<compile_context>
chip_gen: v7x
topology: tpu7x:2x2x1
jax: 0.10.0
libtpu: 0.0.40
codegen_flags: <defaults>
</compile_context>

<pallas_src>
import jax
import jax.numpy as jnp
from jax import lax
from jax.experimental import pallas as pl
from jax.experimental.pallas import tpu as pltpu

F32 = jnp.float32


def _round_up(n, m):
    return ((n + m - 1) // m) * m


# --------------------------------------------------------------------------------------
# Pallas kernel: one batch tile of SO3TensorProductLayer.forward
# --------------------------------------------------------------------------------------

def so3_tp_kernel(x_ref, w1f_ref, b1_ref, w2_ref, b2_ref, o_ref):
    """
    x_ref  : [TB, D]        f32
    w1f_ref: [D, D*K2]      f32   folded W1:  w1f[j, i*K2 + k] = D * W1[i*D + j, k]
    b1_ref : [1, K2]        f32
    w2_ref : [K2, OPAD]     f32   (zero-padded columns O..OPAD-1)
    b2_ref : [1, OPAD]      f32
    o_ref  : [TB, OPAD]     f32
    """
    x = x_ref[...]                                   # [TB, D] f32
    tb, d = x.shape
    k2 = b1_ref.shape[1]

    # ---- Stage 1 (MXU, full f32 precision): y[b, i*K2+k] = sum_j x[b,j] * w1f[j, i*K2+k]
    y = jnp.dot(x, w1f_ref[...],
                precision=lax.Precision.HIGHEST,
                preferred_element_type=jnp.float32)  # [TB, D*K2]

    # ---- Stage 2 (VPU): h1_pre[b, k] = sum_i x[b, i] * y[b, i*K2+k]
    # D is small & static -> fully unrolled, stays 2-D (no reshape / relayout).
    if k2 % 128 == 0:
        # Every [TB, K2] slice of y is already lane-aligned.
        acc = x[:, 0:1] * y[:, 0:k2]
        for i in range(1, d):
            acc = acc + x[:, i:i + 1] * y[:, i * k2:(i + 1) * k2]
        h1_pre = acc
    elif k2 == 64 and d >= 2:
        # K2 = 64: odd-i slices start at lane 64 -> pair i's so every y slice is a
        # 128-lane-aligned [TB, 128] read; build the multiplier with a VPU select
        # (x[:,2p] in lanes 0..63, x[:,2p+1] in lanes 64..127); fold once at the end.
        lane = lax.broadcasted_iota(jnp.int32, (1, 2 * k2), 1)
        lo_half = lane < k2                          # hoisted out of the loop
        acc = jnp.zeros((tb, 2 * k2), jnp.float32)
        for p in range(d // 2):
            xpair = jnp.where(lo_half, x[:, 2 * p:2 * p + 1], x[:, 2 * p + 1:2 * p + 2])
            acc = acc + xpair * y[:, 2 * p * k2:(2 * p + 2) * k2]
        h1_pre = acc[:, :k2] + acc[:, k2:]           # single fold (one relayout per tile)
        if d % 2:                                    # odd-D tail (not hit in the demo)
            h1_pre = h1_pre + x[:, d - 1:d] * y[:, (d - 1) * k2:d * k2]
    else:
        # Generic fallback (correct, possibly with per-iteration relayouts).
        acc = x[:, 0:1] * y[:, 0:k2]
        for i in range(1, d):
            acc = acc + x[:, i:i + 1] * y[:, i * k2:(i + 1) * k2]
        h1_pre = acc

    # D scale already folded into w1f.
    h1 = jnp.maximum(h1_pre + b1_ref[...], 0.0)      # ReLU, f32

    # ---- Stage 3 (MXU): second Linear, lane-dense (OPAD-wide) output.
    out = jnp.dot(h1, w2_ref[...],
                  precision=lax.Precision.HIGHEST,
                  preferred_element_type=jnp.float32)
    o_ref[...] = out + b2_ref[...]


# --------------------------------------------------------------------------------------
# Wrapper: weight folding, output padding, batch tiling, pallas_call
# --------------------------------------------------------------------------------------

def so3_tensor_product(x, params, tile_b=256):
    B, D = x.shape
    w1, b1, w2, b2 = params["w1"], params["b1"], params["w2"], params["b2"]
    K2 = w1.shape[1]            # 2 * output_dim
    O = w2.shape[1]             # output_dim
    OPAD = _round_up(O, 128)    # lane-dense output / second-matmul N dim

    # Fold the outer product AND the D scale into W1 (plain JAX, once, exact in f32):
    #   w1f[j, i*K2 + k] = D * W1[i*D + j, k]
    w1f = (w1.astype(F32) * jnp.asarray(float(D), F32)) \
        .reshape(D, D, K2).transpose(1, 0, 2).reshape(D, D * K2)
    b1r = b1.reshape(1, K2).astype(F32)
    w2p = jnp.zeros((K2, OPAD), F32).at[:, :O].set(w2.astype(F32))
    b2p = jnp.zeros((1, OPAD), F32).at[:, :O].set(b2.astype(F32).reshape(1, O))

    # Batch tiling: sublane-aligned, biggest tile that still leaves >= 2 grid steps so the
    # "parallel" batch axis can shard across both TensorCores on v7x.
    tb = max(8, min(_round_up(tile_b, 8), _round_up(B, 8), _round_up(pl.cdiv(B, 2), 8)))
    bp = _round_up(B, tb)
    xp = x.astype(F32)
    if bp != B:
        xp = jnp.pad(xp, ((0, bp - B), (0, 0)))
    grid = (bp // tb,)

    # VMEM guardrail (matters for large D/O; no-op at demo size): weights + biases are
    # double-buffered by the pipeline even though their block index never changes.
    weight_bytes = 4 * (D * D * K2 + K2 + K2 * OPAD + OPAD)
    per_tile_bytes = 4 * (tb * D + tb * OPAD)            # streamed x / out tiles
    interm_bytes = 4 * (tb * D * K2 + 3 * tb * 2 * K2)   # y + stage-2 temporaries
    est_vmem = 2 * weight_bytes + 2 * per_tile_bytes + interm_bytes
    vmem_limit = None
    if est_vmem > 30 * 1024 * 1024:
        vmem_limit = min(int(est_vmem * 3 // 2), 64 * 1024 * 1024)  # v7x physical VMEM

    cost = pl.CostEstimate(
        flops=2 * bp * D * (D * K2) + 2 * bp * D * K2 + 2 * bp * K2 * OPAD,
        transcendentals=0,
        bytes_accessed=4 * (bp * D + D * D * K2 + K2 + K2 * OPAD + OPAD + bp * OPAD),
    )

    out = pl.pallas_call(
        so3_tp_kernel,
        out_shape=jax.ShapeDtypeStruct((bp, OPAD), F32),
        grid=grid,
        in_specs=[
            pl.BlockSpec((tb, D), lambda i: (i, 0)),        # x (tiled over batch)
            pl.BlockSpec((D, D * K2), lambda i: (0, 0)),    # folded W1 (resident)
            pl.BlockSpec((1, K2), lambda i: (0, 0)),        # b1
            pl.BlockSpec((K2, OPAD), lambda i: (0, 0)),     # W2 (lane-padded)
            pl.BlockSpec((1, OPAD), lambda i: (0, 0)),      # b2 (lane-padded)
        ],
        out_specs=pl.BlockSpec((tb, OPAD), lambda i: (i, 0)),
        compiler_params=pltpu.CompilerParams(
            dimension_semantics=("parallel",),              # shard batch across TCs (v7x)
            vmem_limit_bytes=vmem_limit,
        ),
        cost_estimate=cost,
    )(xp, w1f, b1r, w2p, b2p)
    return out[:B, :O]


# --------------------------------------------------------------------------------------
# Parameter init (mirrors torch.nn.Linear default init) and pure-JAX reference
# --------------------------------------------------------------------------------------

def init_params(key, input_dim, output_dim):
    k2 = 2 * output_dim
    ks = jax.random.split(key, 4)

    fan1 = input_dim * input_dim
    bnd1 = 1.0 / (fan1 ** 0.5)
    w1 = jax.random.uniform(ks[0], (fan1, k2), F32, -bnd1, bnd1)
    b1 = jax.random.uniform(ks[1], (k2,), F32, -bnd1, bnd1)

    fan2 = k2
    bnd2 = 1.0 / (fan2 ** 0.5)
    w2 = jax.random.uniform(ks[2], (k2, output_dim), F32, -bnd2, bnd2)
    b2 = jax.random.uniform(ks[3], (output_dim,), F32, -bnd2, bnd2)
    return dict(w1=w1, b1=b1, w2=w2, b2=b2)


def so3_reference(x, params):
    """Direct mirror of the PyTorch forward, full f32 precision."""
    B, D = x.shape
    tp_flat = (x[:, :, None] * x[:, None, :]).reshape(B, D * D) * D
    h1 = jax.nn.relu(
        jnp.dot(tp_flat, params["w1"], precision=lax.Precision.HIGHEST) + params["b1"])
    return jnp.dot(h1, params["w2"], precision=lax.Precision.HIGHEST) + params["b2"]


# --------------------------------------------------------------------------------------
# Demo / correctness check
# --------------------------------------------------------------------------------------

if __name__ == "__main__":
    B, IN_DIM, OUT_DIM = 256, 32, 32

    key = jax.random.PRNGKey(0)
    kx, kp = jax.random.split(key)
    x = jax.random.normal(kx, (B, IN_DIM), F32)
    params = init_params(kp, IN_DIM, OUT_DIM)

    fwd = jax.jit(so3_tensor_product)

    out = jax.block_until_ready(fwd(x, params))
    assert out.shape == (B, OUT_DIM)

    ref = so3_reference(x, params)
    assert jnp.allclose(out, ref, rtol=1e-2, atol=1e-2), \
        f"mismatch, max abs err = {float(jnp.max(jnp.abs(out - ref)))}"

    # Batch not a multiple of the tile (exercises padding of both batch and output lanes).
    x2 = jax.random.normal(jax.random.PRNGKey(1), (20, IN_DIM), F32)
    out2 = jax.block_until_ready(fwd(x2, params))
    ref2 = so3_reference(x2, params)
    assert out2.shape == (20, OUT_DIM)
    assert jnp.allclose(out2, ref2, rtol=1e-2, atol=1e-2), \
        f"mismatch (padded), max abs err = {float(jnp.max(jnp.abs(out2 - ref2)))}"

    print("KERNEL_OK")
</pallas_src>

<mosaic_0001>
module attributes {stable_mosaic.version = 11 : i64} {
  func.func @so3_tp_kernel(%arg0: i32, %arg1: memref<128x32xf32, #tpu.memory_space<vmem>>, %arg2: memref<32x2048xf32, #tpu.memory_space<vmem>>, %arg3: memref<1x64xf32, #tpu.memory_space<vmem>>, %arg4: memref<64x128xf32, #tpu.memory_space<vmem>>, %arg5: memref<1x128xf32, #tpu.memory_space<vmem>>, %arg6: memref<128x128xf32, #tpu.memory_space<vmem>>) attributes {dimension_semantics = [#tpu.dimension_semantics<parallel>], iteration_bounds = array<i64: 2>, scalar_prefetch = 0 : i64, scratch_operands = 0 : i64, tpu.core_type = #tpu.core_type<tc>, window_params = [{transform_indices = @transform_0, window_bounds = array<i64: 128, 32>}, {pipeline_mode = #tpu.pipeline_mode<synchronous>, transform_indices = @transform_1, window_bounds = array<i64: 32, 2048>}, {pipeline_mode = #tpu.pipeline_mode<synchronous>, transform_indices = @transform_2, window_bounds = array<i64: 1, 64>}, {pipeline_mode = #tpu.pipeline_mode<synchronous>, transform_indices = @transform_3, window_bounds = array<i64: 64, 128>}, {pipeline_mode = #tpu.pipeline_mode<synchronous>, transform_indices = @transform_4, window_bounds = array<i64: 1, 128>}, {transform_indices = @transform_5, window_bounds = array<i64: 128, 128>}]} {
    %c0 = arith.constant 0 : index
    %c0_0 = arith.constant 0 : index
    %0 = vector.load %arg1[%c0, %c0_0] : memref<128x32xf32, #tpu.memory_space<vmem>>, vector<128x32xf32>
    %c0_1 = arith.constant 0 : index
    %c0_2 = arith.constant 0 : index
    %1 = vector.load %arg2[%c0_1, %c0_2] : memref<32x2048xf32, #tpu.memory_space<vmem>>, vector<32x2048xf32>
    %cst = arith.constant dense<0.000000e+00> : vector<128x2048xf32>
    %2 = tpu.matmul %0, %1, %cst {dimension_numbers = #tpu.dot_dimension_numbers<[1], [0], [0], [1], [0, 0, 1, 1], [], []>, precision = #tpu.contract_precision<fp32>} : vector<128x32xf32>, vector<32x2048xf32>, vector<128x2048xf32> -> vector<128x2048xf32>
    %3 = tpu.iota {dimensions = array<i32: 1>} : vector<1x128xi32>
    %c64_i32 = arith.constant 64 : i32
    %4 = vector.broadcast %c64_i32 : i32 to vector<1x128xi32>
    %5 = arith.cmpi slt, %3, %4 : vector<1x128xi32>
    %cst_3 = arith.constant 0.000000e+00 : f32
    %6 = vector.broadcast %cst_3 : f32 to vector<128x128xf32>
    %7 = vector.extract_strided_slice %0 {offsets = [0, 0], sizes = [128, 1], strides = [1, 1]} : vector<128x32xf32> to vector<128x1xf32>
    %8 = vector.extract_strided_slice %0 {offsets = [0, 1], sizes = [128, 1], strides = [1, 1]} : vector<128x32xf32> to vector<128x1xf32>
    %9 = vector.shape_cast %5 : vector<1x128xi1> to vector<1x128xi1>
    %10 = vector.broadcast %9 : vector<1x128xi1> to vector<128x128xi1>
    %11 = vector.shape_cast %7 : vector<128x1xf32> to vector<128x1xf32>
    %12 = vector.broadcast %11 : vector<128x1xf32> to vector<128x128xf32>
    %13 = vector.shape_cast %8 : vector<128x1xf32> to vector<128x1xf32>
    %14 = vector.broadcast %13 : vector<128x1xf32> to vector<128x128xf32>
    %15 = arith.select %10, %12, %14 : vector<128x128xi1>, vector<128x128xf32>
    %16 = vector.extract_strided_slice %2 {offsets = [0, 0], sizes = [128, 128], strides = [1, 1]} : vector<128x2048xf32> to vector<128x128xf32>
    %17 = arith.mulf %15, %16 : vector<128x128xf32>
    %18 = arith.addf %6, %17 : vector<128x128xf32>
    %19 = vector.extract_strided_slice %0 {offsets = [0, 2], sizes = [128, 1], strides = [1, 1]} : vector<128x32xf32> to vector<128x1xf32>
    %20 = vector.extract_strided_slice %0 {offsets = [0, 3], sizes = [128, 1], strides = [1, 1]} : vector<128x32xf32> to vector<128x1xf32>
    %21 = vector.shape_cast %5 : vector<1x128xi1> to vector<1x128xi1>
    %22 = vector.broadcast %21 : vector<1x128xi1> to vector<128x128xi1>
    %23 = vector.shape_cast %19 : vector<128x1xf32> to vector<128x1xf32>
    %24 = vector.broadcast %23 : vector<128x1xf32> to vector<128x128xf32>
    %25 = vector.shape_cast %20 : vector<128x1xf32> to vector<128x1xf32>
    %26 = vector.broadcast %25 : vector<128x1xf32> to vector<128x128xf32>
    %27 = arith.select %22, %24, %26 : vector<128x128xi1>, vector<128x128xf32>
    %28 = vector.extract_strided_slice %2 {offsets = [0, 128], sizes = [128, 128], strides = [1, 1]} : vector<128x2048xf32> to vector<128x128xf32>
    %29 = arith.mulf %27, %28 : vector<128x128xf32>
    %30 = arith.addf %18, %29 : vector<128x128xf32>
    %31 = vector.extract_strided_slice %0 {offsets = [0, 4], sizes = [128, 1], strides = [1, 1]} : vector<128x32xf32> to vector<128x1xf32>
    %32 = vector.extract_strided_slice %0 {offsets = [0, 5], sizes = [128, 1], strides = [1, 1]} : vector<128x32xf32> to vector<128x1xf32>
    %33 = vector.shape_cast %5 : vector<1x128xi1> to vector<1x128xi1>
    %34 = vector.broadcast %33 : vector<1x128xi1> to vector<128x128xi1>
    %35 = vector.shape_cast %31 : vector<128x1xf32> to vector<128x1xf32>
    %36 = vector.broadcast %35 : vector<128x1xf32> to vector<128x128xf32>
    %37 = vector.shape_cast %32 : vector<128x1xf32> to vector<128x1xf32>
    %38 = vector.broadcast %37 : vector<128x1xf32> to vector<128x128xf32>
    %39 = arith.select %34, %36, %38 : vector<128x128xi1>, vector<128x128xf32>
    %40 = vector.extract_strided_slice %2 {offsets = [0, 256], sizes = [128, 128], strides = [1, 1]} : vector<128x2048xf32> to vector<128x128xf32>
    %41 = arith.mulf %39, %40 : vector<128x128xf32>
    %42 = arith.addf %30, %41 : vector<128x128xf32>
    %43 = vector.extract_strided_slice %0 {offsets = [0, 6], sizes = [128, 1], strides = [1, 1]} : vector<128x32xf32> to vector<128x1xf32>
    %44 = vector.extract_strided_slice %0 {offsets = [0, 7], sizes = [128, 1], strides = [1, 1]} : vector<128x32xf32> to vector<128x1xf32>
    %45 = vector.shape_cast %5 : vector<1x128xi1> to vector<1x128xi1>
    %46 = vector.broadcast %45 : vector<1x128xi1> to vector<128x128xi1>
    %47 = vector.shape_cast %43 : vector<128x1xf32> to vector<128x1xf32>
    %48 = vector.broadcast %47 : vector<128x1xf32> to vector<128x128xf32>
    %49 = vector.shape_cast %44 : vector<128x1xf32> to vector<128x1xf32>
    %50 = vector.broadcast %49 : vector<128x1xf32> to vector<128x128xf32>
    %51 = arith.select %46, %48, %50 : vector<128x128xi1>, vector<128x128xf32>
    %52 = vector.extract_strided_slice %2 {offsets = [0, 384], sizes = [128, 128], strides = [1, 1]} : vector<128x2048xf32> to vector<128x128xf32>
    %53 = arith.mulf %51, %52 : vector<128x128xf32>
    %54 = arith.addf %42, %53 : vector<128x128xf32>
    %55 = vector.extract_strided_slice %0 {offsets = [0, 8], sizes = [128, 1], strides = [1, 1]} : vector<128x32xf32> to vector<128x1xf32>
    %56 = vector.extract_strided_slice %0 {offsets = [0, 9], sizes = [128, 1], strides = [1, 1]} : vector<128x32xf32> to vector<128x1xf32>
    %57 = vector.shape_cast %5 : vector<1x128xi1> to vector<1x128xi1>
    %58 = vector.broadcast %57 : vector<1x128xi1> to vector<128x128xi1>
    %59 = vector.shape_cast %55 : vector<128x1xf32> to vector<128x1xf32>
    %60 = vector.broadcast %59 : vector<128x1xf32> to vector<128x128xf32>
    %61 = vector.shape_cast %56 : vector<128x1xf32> to vector<128x1xf32>
    %62 = vector.broadcast %61 : vector<128x1xf32> to vector<128x128xf32>
    %63 = arith.select %58, %60, %62 : vector<128x128xi1>, vector<128x128xf32>
    %64 = vector.extract_strided_slice %2 {offsets = [0, 512], sizes = [128, 128], strides = [1, 1]} : vector<128x2048xf32> to vector<128x128xf32>
    %65 = arith.mulf %63, %64 : vector<128x128xf32>
    %66 = arith.addf %54, %65 : vector<128x128xf32>
    %67 = vector.extract_strided_slice %0 {offsets = [0, 10], sizes = [128, 1], strides = [1, 1]} : vector<128x32xf32> to vector<128x1xf32>
    %68 = vector.extract_strided_slice %0 {offsets = [0, 11], sizes = [128, 1], strides = [1, 1]} : vector<128x32xf32> to vector<128x1xf32>
    %69 = vector.shape_cast %5 : vector<1x128xi1> to vector<1x128xi1>
    %70 = vector.broadcast %69 : vector<1x128xi1> to vector<128x128xi1>
    %71 = vector.shape_cast %67 : vector<128x1xf32> to vector<128x1xf32>
    %72 = vector.broadcast %71 : vector<128x1xf32> to vector<128x128xf32>
    %73 = vector.shape_cast %68 : vector<128x1xf32> to vector<128x1xf32>
    %74 = vector.broadcast %73 : vector<128x1xf32> to vector<128x128xf32>
    %75 = arith.select %70, %72, %74 : vector<128x128xi1>, vector<128x128xf32>
    %76 = vector.extract_strided_slice %2 {offsets = [0, 640], sizes = [128, 128], strides = [1, 1]} : vector<128x2048xf32> to vector<128x128xf32>
    %77 = arith.mulf %75, %76 : vector<128x128xf32>
    %78 = arith.addf %66, %77 : vector<128x128xf32>
    %79 = vector.extract_strided_slice %0 {offsets = [0, 12], sizes = [128, 1], strides = [1, 1]} : vector<128x32xf32> to vector<128x1xf32>
    %80 = vector.extract_strided_slice %0 {offsets = [0, 13], sizes = [128, 1], strides = [1, 1]} : vector<128x32xf32> to vector<128x1xf32>
    %81 = vector.shape_cast %5 : vector<1x128xi1> to vector<1x128xi1>
    %82 = vector.broadcast %81 : vector<1x128xi1> to vector<128x128xi1>
    %83 = vector.shape_cast %79 : vector<128x1xf32> to vector<128x1xf32>
    %84 = vector.broadcast %83 : vector<128x1xf32> to vector<128x128xf32>
    %85 = vector.shape_cast %80 : vector<128x1xf32> to vector<128x1xf32>
    %86 = vector.broadcast %85 : vector<128x1xf32> to vector<128x128xf32>
    %87 = arith.select %82, %84, %86 : vector<128x128xi1>, vector<128x128xf32>
    %88 = vector.extract_strided_slice %2 {offsets = [0, 768], sizes = [128, 128], strides = [1, 1]} : vector<128x2048xf32> to vector<128x128xf32>
    %89 = arith.mulf %87, %88 : vector<128x128xf32>
    %90 = arith.addf %78, %89 : vector<128x128xf32>
    %91 = vector.extract_strided_slice %0 {offsets = [0, 14], sizes = [128, 1], strides = [1, 1]} : vector<128x32xf32> to vector<128x1xf32>
    %92 = vector.extract_strided_slice %0 {offsets = [0, 15], sizes = [128, 1], strides = [1, 1]} : vector<128x32xf32> to vector<128x1xf32>
    %93 = vector.shape_cast %5 : vector<1x128xi1> to vector<1x128xi1>
    %94 = vector.broadcast %93 : vector<1x128xi1> to vector<128x128xi1>
    %95 = vector.shape_cast %91 : vector<128x1xf32> to vector<128x1xf32>
    %96 = vector.broadcast %95 : vector<128x1xf32> to vector<128x128xf32>
    %97 = vector.shape_cast %92 : vector<128x1xf32> to vector<128x1xf32>
    %98 = vector.broadcast %97 : vector<128x1xf32> to vector<128x128xf32>
    %99 = arith.select %94, %96, %98 : vector<128x128xi1>, vector<128x128xf32>
    %100 = vector.extract_strided_slice %2 {offsets = [0, 896], sizes = [128, 128], strides = [1, 1]} : vector<128x2048xf32> to vector<128x128xf32>
    %101 = arith.mulf %99, %100 : vector<128x128xf32>
    %102 = arith.addf %90, %101 : vector<128x128xf32>
    %103 = vector.extract_strided_slice %0 {offsets = [0, 16], sizes = [128, 1], strides = [1, 1]} : vector<128x32xf32> to vector<128x1xf32>
    %104 = vector.extract_strided_slice %0 {offsets = [0, 17], sizes = [128, 1], strides = [1, 1]} : vector<128x32xf32> to vector<128x1xf32>
    %105 = vector.shape_cast %5 : vector<1x128xi1> to vector<1x128xi1>
    %106 = vector.broadcast %105 : vector<1x128xi1> to vector<128x128xi1>
    %107 = vector.shape_cast %103 : vector<128x1xf32> to vector<128x1xf32>
    %108 = vector.broadcast %107 : vector<128x1xf32> to vector<128x128xf32>
    %109 = vector.shape_cast %104 : vector<128x1xf32> to vector<128x1xf32>
    %110 = vector.broadcast %109 : vector<128x1xf32> to vector<128x128xf32>
    %111 = arith.select %106, %108, %110 : vector<128x128xi1>, vector<128x128xf32>
    %112 = vector.extract_strided_slice %2 {offsets = [0, 1024], sizes = [128, 128], strides = [1, 1]} : vector<128x2048xf32> to vector<128x128xf32>
    %113 = arith.mulf %111, %112 : vector<128x128xf32>
    %114 = arith.addf %102, %113 : vector<128x128xf32>
    %115 = vector.extract_strided_slice %0 {offsets = [0, 18], sizes = [128, 1], strides = [1, 1]} : vector<128x32xf32> to vector<128x1xf32>
    %116 = vector.extract_strided_slice %0 {offsets = [0, 19], sizes = [128, 1], strides = [1, 1]} : vector<128x32xf32> to vector<128x1xf32>
    %117 = vector.shape_cast %5 : vector<1x128xi1> to vector<1x128xi1>
    %118 = vector.broadcast %117 : vector<1x128xi1> to vector<128x128xi1>
    %119 = vector.shape_cast %115 : vector<128x1xf32> to vector<128x1xf32>
    %120 = vector.broadcast %119 : vector<128x1xf32> to vector<128x128xf32>
    %121 = vector.shape_cast %116 : vector<128x1xf32> to vector<128x1xf32>
    %122 = vector.broadcast %121 : vector<128x1xf32> to vector<128x128xf32>
    %123 = arith.select %118, %120, %122 : vector<128x128xi1>, vector<128x128xf32>
    %124 = vector.extract_strided_slice %2 {offsets = [0, 1152], sizes = [128, 128], strides = [1, 1]} : vector<128x2048xf32> to vector<128x128xf32>
    %125 = arith.mulf %123, %124 : vector<128x128xf32>
    %126 = arith.addf %114, %125 : vector<128x128xf32>
    %127 = vector.extract_strided_slice %0 {offsets = [0, 20], sizes = [128, 1], strides = [1, 1]} : vector<128x32xf32> to vector<128x1xf32>
    %128 = vector.extract_strided_slice %0 {offsets = [0, 21], sizes = [128, 1], strides = [1, 1]} : vector<128x32xf32> to vector<128x1xf32>
    %129 = vector.shape_cast %5 : vector<1x128xi1> to vector<1x128xi1>
    %130 = vector.broadcast %129 : vector<1x128xi1> to vector<128x128xi1>
    %131 = vector.shape_cast %127 : vector<128x1xf32> to vector<128x1xf32>
    %132 = vector.broadcast %131 : vector<128x1xf32> to vector<128x128xf32>
    %133 = vector.shape_cast %128 : vector<128x1xf32> to vector<128x1xf32>
    %134 = vector.broadcast %133 : vector<128x1xf32> to vector<128x128xf32>
    %135 = arith.select %130, %132, %134 : vector<128x128xi1>, vector<128x128xf32>
    %136 = vector.extract_strided_slice %2 {offsets = [0, 1280], sizes = [128, 128], strides = [1, 1]} : vector<128x2048xf32> to vector<128x128xf32>
    %137 = arith.mulf %135, %136 : vector<128x128xf32>
    %138 = arith.addf %126, %137 : vector<128x128xf32>
    %139 = vector.extract_strided_slice %0 {offsets = [0, 22], sizes = [128, 1], strides = [1, 1]} : vector<128x32xf32> to vector<128x1xf32>
    %140 = vector.extract_strided_slice %0 {offsets = [0, 23], sizes = [128, 1], strides = [1, 1]} : vector<128x32xf32> to vector<128x1xf32>
    %141 = vector.shape_cast %5 : vector<1x128xi1> to vector<1x128xi1>
    %142 = vector.broadcast %141 : vector<1x128xi1> to vector<128x128xi1>
    %143 = vector.shape_cast %139 : vector<128x1xf32> to vector<128x1xf32>
    %144 = vector.broadcast %143 : vector<128x1xf32> to vector<128x128xf32>
    %145 = vector.shape_cast %140 : vector<128x1xf32> to vector<128x1xf32>
    %146 = vector.broadcast %145 : vector<128x1xf32> to vector<128x128xf32>
    %147 = arith.select %142, %144, %146 : vector<128x128xi1>, vector<128x128xf32>
    %148 = vector.extract_strided_slice %2 {offsets = [0, 1408], sizes = [128, 128], strides = [1, 1]} : vector<128x2048xf32> to vector<128x128xf32>
    %149 = arith.mulf %147, %148 : vector<128x128xf32>
    %150 = arith.addf %138, %149 : vector<128x128xf32>
    %151 = vector.extract_strided_slice %0 {offsets = [0, 24], sizes = [128, 1], strides = [1, 1]} : vector<128x32xf32> to vector<128x1xf32>
    %152 = vector.extract_strided_slice %0 {offsets = [0, 25], sizes = [128, 1], strides = [1, 1]} : vector<128x32xf32> to vector<128x1xf32>
    %153 = vector.shape_cast %5 : vector<1x128xi1> to vector<1x128xi1>
    %154 = vector.broadcast %153 : vector<1x128xi1> to vector<128x128xi1>
    %155 = vector.shape_cast %151 : vector<128x1xf32> to vector<128x1xf32>
    %156 = vector.broadcast %155 : vector<128x1xf32> to vector<128x128xf32>
    %157 = vector.shape_cast %152 : vector<128x1xf32> to vector<128x1xf32>
    %158 = vector.broadcast %157 : vector<128x1xf32> to vector<128x128xf32>
    %159 = arith.select %154, %156, %158 : vector<128x128xi1>, vector<128x128xf32>
    %160 = vector.extract_strided_slice %2 {offsets = [0, 1536], sizes = [128, 128], strides = [1, 1]} : vector<128x2048xf32> to vector<128x128xf32>
    %161 = arith.mulf %159, %160 : vector<128x128xf32>
    %162 = arith.addf %150, %161 : vector<128x128xf32>
    %163 = vector.extract_strided_slice %0 {offsets = [0, 26], sizes = [128, 1], strides = [1, 1]} : vector<128x32xf32> to vector<128x1xf32>
    %164 = vector.extract_strided_slice %0 {offsets = [0, 27], sizes = [128, 1], strides = [1, 1]} : vector<128x32xf32> to vector<128x1xf32>
    %165 = vector.shape_cast %5 : vector<1x128xi1> to vector<1x128xi1>
    %166 = vector.broadcast %165 : vector<1x128xi1> to vector<128x128xi1>
    %167 = vector.shape_cast %163 : vector<128x1xf32> to vector<128x1xf32>
    %168 = vector.broadcast %167 : vector<128x1xf32> to vector<128x128xf32>
    %169 = vector.shape_cast %164 : vector<128x1xf32> to vector<128x1xf32>
    %170 = vector.broadcast %169 : vector<128x1xf32> to vector<128x128xf32>
    %171 = arith.select %166, %168, %170 : vector<128x128xi1>, vector<128x128xf32>
    %172 = vector.extract_strided_slice %2 {offsets = [0, 1664], sizes = [128, 128], strides = [1, 1]} : vector<128x2048xf32> to vector<128x128xf32>
    %173 = arith.mulf %171, %172 : vector<128x128xf32>
    %174 = arith.addf %162, %173 : vector<128x128xf32>
    %175 = vector.extract_strided_slice %0 {offsets = [0, 28], sizes = [128, 1], strides = [1, 1]} : vector<128x32xf32> to vector<128x1xf32>
    %176 = vector.extract_strided_slice %0 {offsets = [0, 29], sizes = [128, 1], strides = [1, 1]} : vector<128x32xf32> to vector<128x1xf32>
    %177 = vector.shape_cast %5 : vector<1x128xi1> to vector<1x128xi1>
    %178 = vector.broadcast %177 : vector<1x128xi1> to vector<128x128xi1>
    %179 = vector.shape_cast %175 : vector<128x1xf32> to vector<128x1xf32>
    %180 = vector.broadcast %179 : vector<128x1xf32> to vector<128x128xf32>
    %181 = vector.shape_cast %176 : vector<128x1xf32> to vector<128x1xf32>
    %182 = vector.broadcast %181 : vector<128x1xf32> to vector<128x128xf32>
    %183 = arith.select %178, %180, %182 : vector<128x128xi1>, vector<128x128xf32>
    %184 = vector.extract_strided_slice %2 {offsets = [0, 1792], sizes = [128, 128], strides = [1, 1]} : vector<128x2048xf32> to vector<128x128xf32>
    %185 = arith.mulf %183, %184 : vector<128x128xf32>
    %186 = arith.addf %174, %185 : vector<128x128xf32>
    %187 = vector.extract_strided_slice %0 {offsets = [0, 30], sizes = [128, 1], strides = [1, 1]} : vector<128x32xf32> to vector<128x1xf32>
    %188 = vector.extract_strided_slice %0 {offsets = [0, 31], sizes = [128, 1], strides = [1, 1]} : vector<128x32xf32> to vector<128x1xf32>
    %189 = vector.shape_cast %5 : vector<1x128xi1> to vector<1x128xi1>
    %190 = vector.broadcast %189 : vector<1x128xi1> to vector<128x128xi1>
    %191 = vector.shape_cast %187 : vector<128x1xf32> to vector<128x1xf32>
    %192 = vector.broadcast %191 : vector<128x1xf32> to vector<128x128xf32>
    %193 = vector.shape_cast %188 : vector<128x1xf32> to vector<128x1xf32>
    %194 = vector.broadcast %193 : vector<128x1xf32> to vector<128x128xf32>
    %195 = arith.select %190, %192, %194 : vector<128x128xi1>, vector<128x128xf32>
    %196 = vector.extract_strided_slice %2 {offsets = [0, 1920], sizes = [128, 128], strides = [1, 1]} : vector<128x2048xf32> to vector<128x128xf32>
    %197 = arith.mulf %195, %196 : vector<128x128xf32>
    %198 = arith.addf %186, %197 : vector<128x128xf32>
    %199 = vector.extract_strided_slice %198 {offsets = [0, 0], sizes = [128, 64], strides = [1, 1]} : vector<128x128xf32> to vector<128x64xf32>
    %200 = vector.extract_strided_slice %198 {offsets = [0, 64], sizes = [128, 64], strides = [1, 1]} : vector<128x128xf32> to vector<128x64xf32>
    %201 = arith.addf %199, %200 : vector<128x64xf32>
    %c0_4 = arith.constant 0 : index
    %c0_5 = arith.constant 0 : index
    %202 = vector.load %arg3[%c0_4, %c0_5] : memref<1x64xf32, #tpu.memory_space<vmem>>, vector<1x64xf32>
    %203 = vector.broadcast %202 : vector<1x64xf32> to vector<128x64xf32>
    %204 = arith.addf %201, %203 : vector<128x64xf32>
    %cst_6 = arith.constant 0.000000e+00 : f32
    %205 = vector.broadcast %cst_6 : f32 to vector<128x64xf32>
    %206 = arith.maximumf %204, %205 : vector<128x64xf32>
    %c0_7 = arith.constant 0 : index
    %c0_8 = arith.constant 0 : index
    %207 = vector.load %arg4[%c0_7, %c0_8] : memref<64x128xf32, #tpu.memory_space<vmem>>, vector<64x128xf32>
    %cst_9 = arith.constant dense<0.000000e+00> : vector<128x128xf32>
    %208 = tpu.matmul %206, %207, %cst_9 {dimension_numbers = #tpu.dot_dimension_numbers<[1], [0], [0], [1], [0, 0, 1, 1], [], []>, precision = #tpu.contract_precision<fp32>} : vector<128x64xf32>, vector<64x128xf32>, vector<128x128xf32> -> vector<128x128xf32>
    %c0_10 = arith.constant 0 : index
    %c0_11 = arith.constant 0 : index
    %209 = vector.load %arg5[%c0_10, %c0_11] : memref<1x128xf32, #tpu.memory_space<vmem>>, vector<1x128xf32>
    %210 = vector.broadcast %209 : vector<1x128xf32> to vector<128x128xf32>
    %211 = arith.addf %208, %210 : vector<128x128xf32>
    %c0_12 = arith.constant 0 : index
    %c0_13 = arith.constant 0 : index
    %212 = vector.load %arg6[%c0_12, %c0_13] : memref<128x128xf32, #tpu.memory_space<vmem>>, vector<128x128xf32>
    tpu.vector_store %arg6[%c0_12, %c0_13], %211 {strides = array<i32>} : memref<128x128xf32, #tpu.memory_space<vmem>>, vector<128x128xf32>,
    return
  }
  func.func @transform_0(%arg0: i32) -> (i32, i32) {
    %c0_i32 = arith.constant 0 : i32
    %c0_i32_0 = arith.constant 0 : i32
    return %arg0, %c0_i32 : i32, i32
  }
  func.func @transform_1(%arg0: i32) -> (i32, i32) {
    %c0_i32 = arith.constant 0 : i32
    %c0_i32_0 = arith.constant 0 : i32
    %c0_i32_1 = arith.constant 0 : i32
    return %c0_i32, %c0_i32_0 : i32, i32
  }
  func.func @transform_2(%arg0: i32) -> (i32, i32) {
    %c0_i32 = arith.constant 0 : i32
    %c0_i32_0 = arith.constant 0 : i32
    %c0_i32_1 = arith.constant 0 : i32
    return %c0_i32, %c0_i32_0 : i32, i32
  }
  func.func @transform_3(%arg0: i32) -> (i32, i32) {
    %c0_i32 = arith.constant 0 : i32
    %c0_i32_0 = arith.constant 0 : i32
    %c0_i32_1 = arith.constant 0 : i32
    return %c0_i32, %c0_i32_0 : i32, i32
  }
  func.func @transform_4(%arg0: i32) -> (i32, i32) {
    %c0_i32 = arith.constant 0 : i32
    %c0_i32_0 = arith.constant 0 : i32
    %c0_i32_1 = arith.constant 0 : i32
    return %c0_i32, %c0_i32_0 : i32, i32
  }
  func.func @transform_5(%arg0: i32) -> (i32, i32) {
    %c0_i32 = arith.constant 0 : i32
    %c0_i32_0 = arith.constant 0 : i32
    return %arg0, %c0_i32 : i32, i32
  }
}

</mosaic_0001>

<bundles_post_ra>
// kernel: so3_tensor_product.1
= control target key start
LH: loop header
LB: loop body
LE: loop exit
PB: predicated region body
PF: predicated region fallthrough
CT: control target
= control target key end

     0   :  { %s17440_s18 = smov 0   ;;  %s24519_s0 = inlined_call_operand.vmem [shape: f32[256,32], index: 0, kind: input, shape index: {}]   ;;  %s24520_s1 = inlined_call_operand.vmem [shape: f32[32,2048], index: 1, kind: input, shape index: {}]   ;;  %s24521_s2 = inlined_call_operand.vmem [shape: f32[1,64], index: 2, kind: input, shape index: {}]   ;;  %s24522_s3 = inlined_call_operand.vmem [shape: f32[64,128], index: 3, kind: input, shape index: {}]   ;;  %s24523_s4 = inlined_call_operand.vmem [shape: f32[1,128], index: 4, kind: input, shape index: {}]   ;;  %s24524_s5 = inlined_call_operand.vmem [shape: f32[256,128], index: 5, kind: output, shape index: {}]  }
   0x1 LB: > { %s14839_s19 = sadd.s32 4294967295, %s17374_s18   ;;  %p14843_p0 = scmp.ge.s32.totalorder %s17374_s18, 1  ;;  %s17374_s18 = sphi %s17440_s18, %s15_s18  }
   0x2   : > { %p188_p1 = scmp.lt.s32.totalorder %s17374_s18, 3 }
   0x4   : > { %p189_p2 = pnand %p14843_p0, %p188_p1 }
   0x6   : > { %192 = sbr.rel (%p189_p2) target bundleno = 2392 (0x958), region = 40 }
   0xd   : > { %v245_v0 = vld [vmem:[%s24520_s1 + $0x8] sm:$0xff]  ;;  %v244_v2 = vld [vmem:[%s24520_s1] sm:$0xff]  ;;  %s14844_s26 = sshll.u32 %s14839_s19, 4  ;;  %v24533_v9 = vmov 0.0   ;;  %vm308_vm0 = vcmask 261120   ;;  %s17409_s17 = smov 64  }
   0xe   : > { %v261_v1 = vld [vmem:[%s24520_s1 + $0x88] sm:$0xff]  ;;  %v357_v3 = vand.u32 4294901760, %v245_v0  ;;  %v260_v5 = vld [vmem:[%s24520_s1 + $0x80] sm:$0xff]  ;;  %v359_v6 = vand.u32 4294901760, %v244_v2  ;;  %429 = vmatprep.mubr.f32.mxu1 %v24533_v9  ;;  %710 = vmatprep.mubr.f32.mxu0 %v24533_v9  ;;  %p217_p3 = scmp.lt.s32.totalorder %s14844_s26, 31  ;;  %vm13536_vm2 = vcmask 523264  }
   0xf   : > { %v361_v4 = vand.u32 4294901760, %v261_v1  ;;  %v277_v7 = vld [vmem:[%s24520_s1 + $0x108] sm:$0xff]  ;;  %v363_v10 = vand.u32 4294901760, %v260_v5  ;;  %v276_v17 = vld [vmem:[%s24520_s1 + $0x100] sm:$0xff] }
  0x10   : > { %v293_v8 = vld [vmem:[%s24520_s1 + $0x188] sm:$0xff]  ;;  %v365_v11 = vand.u32 4294901760, %v277_v7  ;;  %v17470_v14 = vsub.f32 %v245_v0, %v357_v3  ;;  %v17474_v16 = vsub.f32 %v244_v2, %v359_v6  ;;  %v292_v18 = vld [vmem:[%s24520_s1 + $0x180] sm:$0xff]  ;;  %s26612_s26 = smov (!%p217_p3, %s14844_s26), 31  ;;  %v367_v28 = vand.u32 4294901760, %v276_v17 }
  0x11   : > { %v369_v12 = vand.u32 4294901760, %v293_v8  ;;  %v17468_v13 = vpack.c.bf16 %v361_v4, %v357_v3  ;;  %v17472_v15 = vsub.f32 %v261_v1, %v361_v4  ;;  %v17482_v19 = vpack.c.bf16 %v363_v10, %v359_v6  ;;  %s14845_s12 = sshll.u32 %s26612_s26, 3 }
  0x12   : > { %v17484_v20 = vsub.f32 %v260_v5, %v363_v10  ;;  %v17488_v22 = vsub.f32 %v277_v7, %v365_v11  ;;  %v24526_v23 = vand.u32 4294901760, %v17470_v14  ;;  %v24532_v26 = vand.u32 4294901760, %v17474_v16  ;;  %s17518_s15 = scalar_lea.vmem %s24519_s0, %s14845_s12  ;;  %s24498_s24 = scalar_lea.vmem %s24524_s5, %s14845_s12 }
  0x13   : > { %24840 = vst [vmem:[#allocation2_spill] sm:$0xff] %v17468_v13  ;;  %24841 = vst [vmem:[#allocation3_spill] sm:$0xff] %v17482_v19  ;;  %v17486_v21 = vpack.c.bf16 %v369_v12, %v365_v11  ;;  %15237 = vmatprep.subr.bf16.mxu1 %v17468_v13  ;;  %v24525_v24 = vand.u32 4294901760, %v17472_v15  ;;  %v17495_v25 = vsub.f32 %v293_v8, %v369_v12  ;;  %v371_v29 = vand.u32 4294901760, %v292_v18  ;;  %v17530_v39 = vld [vmem:[%s17518_s15] sm:$0xff]  ;;  %v17533_v40 = vld [vmem:[%s17518_s15 + $0x8] sm:$0xff] }
  0x14   : > { %15239 = vmatpush1.bf16.msra.mxu1 %v17482_v19  ;;  %v24531_v27 = vand.u32 4294901760, %v17484_v20  ;;  %v24530_v30 = vand.u32 4294901760, %v17488_v22  ;;  %v609_v31 = vsub.f32 %v17470_v14, %v24526_v23  ;;  %v615_v33 = vsub.f32 %v17474_v16, %v24532_v26  ;;  %v17545_v49 = vld [vmem:[%s17518_s15 + $0x10] sm:$0xff]  ;;  %v17548_v50 = vld [vmem:[%s17518_s15 + $0x18] sm:$0xff]  ;;  %v17561_v59 = vld [vmem:[%s17518_s15 + $0x20] sm:$0xff] }
  0x15   : > { %24842 = vst [vmem:[#allocation4_spill] sm:$0xff] %v17486_v21  ;;  %v621_v32 = vsub.f32 %v17472_v15, %v24525_v24  ;;  %15241 = vmatprep.subr.bf16.mxu1 %v17486_v21  ;;  %v24529_v34 = vand.u32 4294901760, %v17495_v25  ;;  %v17523_v36 = vpack.c.bf16 %v371_v29, %v367_v28  ;;  %v17525_v37 = vsub.f32 %v276_v17, %v367_v28  ;;  %v17584_v8 = vld [vmem:[%s17518_s15 + $0x28] sm:$0xff] }
  0x16   : > { %v627_v35 = vsub.f32 %v17484_v20, %v24531_v27  ;;  %v17527_v38 = vsub.f32 %v292_v18, %v371_v29  ;;  %v610_v41 = vand.u32 4294901760, %v609_v31  ;;  %v616_v43 = vand.u32 4294901760, %v615_v33 }
  0x17   : > { %24843 = vst [vmem:[#allocation5_spill] sm:$0xff] %v17523_v36  ;;  %v622_v42 = vand.u32 4294901760, %v621_v32  ;;  %v633_v44 = vsub.f32 %v17488_v22, %v24530_v30  ;;  %v645_v46 = vsub.f32 %v17495_v25, %v24529_v34  ;;  %v24528_v47 = vand.u32 4294901760, %v17525_v37 }
  0x18   : > { %v628_v45 = vand.u32 4294901760, %v627_v35  ;;  %15243 = vmatpush1.bf16.msra.mxu1 %v17523_v36  ;;  %v24527_v48 = vand.u32 4294901760, %v17527_v38  ;;  %v310_v53 = vsel %vm308_vm0, %v17530_v39, 0  ;;  %v313_v54 = vsel %vm308_vm0, %v17533_v40, 0 }
  0x19   : > { %v15244_v51 = vpack.c.bf16 %v622_v42, %v610_v41  ;;  %v634_v52 = vand.u32 4294901760, %v633_v44  ;;  %v646_v56 = vand.u32 4294901760, %v645_v46  ;;  %v639_v57 = vsub.f32 %v17525_v37, %v24528_v47 }
  0x1a   : > { %v15246_v55 = vpack.c.bf16 %v628_v45, %v616_v43  ;;  %v651_v58 = vsub.f32 %v17527_v38, %v24527_v48  ;;  %v17563_v60 = vand.u32 4294901760, %v310_v53  ;;  %v17565_v61 = vand.u32 4294901760, %v313_v54  ;;  %v17617_v43 = vld [vmem:[%s17518_s15 + $0x30] sm:$0xff] }
  0x1b   : > { %15245 = vmatprep.subr.bf16.mxu0 %v15244_v51  ;;  %15716 = vmatprep.subr.bf16.mxu1 %v15244_v51  ;;  %v316_v62 = vsel %vm308_vm0, %v17545_v49, 0  ;;  %v319_v63 = vsel %vm308_vm0, %v17548_v50, 0  ;;  %v15248_v0 = vpack.c.bf16 %v646_v56, %v634_v52  ;;  %v640_v1 = vand.u32 4294901760, %v639_v57  ;;  %v17642_v57 = vld [vmem:[%s17518_s15 + $0x38] sm:$0xff] }
  0x1c   : > { %24844 = vst [vmem:[#allocation6_spill] sm:$0xff] %v17563_v60  ;;  %24845 = vst [vmem:[#allocation7_spill] sm:$0xff] %v17565_v61  ;;  %15247 = vmatpush1.bf16.msra.mxu0 %v15246_v55  ;;  %v652_v2 = vand.u32 4294901760, %v651_v58  ;;  %v17571_v3 = vand.u32 4294901760, %v316_v62  ;;  %v17574_v4 = vsub.f32 %v310_v53, %v17563_v60  ;;  %v17577_v5 = vsub.f32 %v313_v54, %v17565_v61 }
  0x1d   : > { %v17579_v6 = vand.u32 4294901760, %v319_v63  ;;  %v322_v7 = vsel %vm308_vm0, %v17561_v59, 0  ;;  %15249 = vmatprep.subr.bf16.mxu0 %v15248_v0  ;;  %v325_v28 = vsel %vm308_vm0, %v17584_v8, 0  ;;  %v15252_v29 = vpack.c.bf16 %v17472_v15, %v17470_v14 }
  0x1e   : > { %24846 = vst [vmem:[#allocation8_spill] sm:$0xff] %v17571_v3  ;;  %24847 = vst [vmem:[#allocation9_spill] sm:$0xff] %v17574_v4  ;;  %v15250_v10 = vpack.c.bf16 %v652_v2, %v640_v1  ;;  %v17587_v11 = vsub.f32 %v316_v62, %v17571_v3  ;;  %v17590_v12 = vand.u32 4294901760, %v17574_v4  ;;  %v17593_v17 = vand.u32 4294901760, %v17577_v5 }
  0x1f   : > { %24848 = vst [vmem:[#allocation10_spill] sm:$0xff] %v17577_v5  ;;  %24849 = vst [vmem:[#allocation11_spill] sm:$0xff] %v17579_v6  ;;  %v17595_v18 = vand.u32 4294901760, %v322_v7  ;;  %v17609_v35 = vsub.f32 %v319_v63, %v17579_v6  ;;  %v15254_v41 = vpack.c.bf16 %v17484_v20, %v17474_v16  ;;  %v17623_v45 = vand.u32 4294901760, %v325_v28 }
  0x20   : > { %24850 = vst [vmem:[#allocation12_spill] sm:$0xff] %v17587_v11  ;;  %24851 = vst [vmem:[#allocation13_spill] sm:$0xff] %v17590_v12  ;;  %15251 = vmatpush1.bf16.msra.mxu0 %v15250_v10  ;;  %v433_v31 = vsub.f32 %v17574_v4, %v17590_v12  ;;  %v444_v32 = vsub.f32 %v17577_v5, %v17593_v17  ;;  %v17606_v33 = vand.u32 4294901760, %v17587_v11  ;;  %v328_v54 = vsel %vm308_vm0, %v17617_v43, 0 }
  0x21   : > { %24852 = vst [vmem:[#allocation14_spill] sm:$0xff] %v17593_v17  ;;  %24853 = vst [vmem:[#allocation15_spill] sm:$0xff] %v17595_v18  ;;  %15253 = vmatprep.subr.bf16.mxu0 %v15252_v29  ;;  %v17621_v44 = vsub.f32 %v322_v7, %v17595_v18  ;;  %v17631_v52 = vand.u32 4294901760, %v17609_v35  ;;  %v15256_v53 = vpack.c.bf16 %v17495_v25, %v17488_v22  ;;  %v17656_v1 = vand.u32 4294901760, %v328_v54 }
  0x22   : > { %24854 = vst [vmem:[#allocation16_spill] sm:$0xff] %v17606_v33  ;;  %24855 = vst [vmem:[#allocation17_spill] sm:$0xff] %v17609_v35  ;;  %v17613_v42 = vand.u32 4294901760, %v433_v31  ;;  %v17626_v46 = vand.u32 4294901760, %v444_v32  ;;  %v455_v51 = vsub.f32 %v17587_v11, %v17606_v33  ;;  %v15258_v56 = vpack.c.bf16 %v17527_v38, %v17525_v37 }
  0x23   : > { %712 = vmatmul.mubr.f32.vlgmr.msra.gmra.mrb[0].mxu0 %v17563_v60  ;;  %24857 = vst [vmem:[#allocation19_spill] sm:$0xff] %v17621_v44  ;;  %24858 = vst [vmem:[#allocation20_spill] sm:$0xff] %v17623_v45  ;;  %v17646_v58 = vand.u32 4294901760, %v17621_v44  ;;  %v466_v63 = vsub.f32 %v17609_v35, %v17631_v52  ;;  %v331_v2 = vsel %vm308_vm0, %v17642_v57, 0  ;;  %v17377_v32 = vmov 0  }
  0x24   : > { %24856 = vst [vmem:[#allocation18_spill] sm:$0xff] %v17613_v42  ;;  %717 = vmatprep.mubr.f32.mxu0 %v24533_v9  ;;  %15255 = vmatpush1.bf16.msra.mxu0 %v15254_v41  ;;  %24859 = vst [vmem:[#allocation21_spill] sm:$0xff] %v17626_v46  ;;  %v17652_v62 = vand.u32 4294901760, %v455_v51  ;;  %v17678_v31 = vand.u32 4294901760, %v331_v2  ;;  %v17684_v51 = vld [vmem:[%s17518_s15 + $0x48] sm:$0xff] }
  0x25   : > { %435 = vmatmul.mubr.f32.vlgmr.msra.gmra.mrb[0].mxu1 %v17613_v42  ;;  %24860 = vst [vmem:[#allocation22_spill] sm:$0xff] %v17631_v52  ;;  %15257 = vmatprep.subr.bf16.mxu0 %v15256_v53  ;;  %24861 = vst [vmem:[#allocation23_spill] sm:$0xff] %v17646_v58  ;;  %v477_v7 = vsub.f32 %v17621_v44, %v17646_v58  ;;  %v17673_v29 = vand.u32 4294901760, %v466_v63  ;;  %v17691_v53 = vld [vmem:[%s24520_s1 + $0x18] sm:$0xff]  ;;  %v24888_v52 = vand.u32 4294901760, %v17474_v16  ;;  %v24893_v16 = vand.u32 4294901760, %v17525_v37 }
  0x26   : > { %15718 = vmatpush1.bf16.msra.mxu1 %v15246_v55  ;;  %440 = vmatprep.mubr.f32.mxu1 %v24533_v9  ;;  %v17649_v55 = vsub.f32 %v325_v28, %v17623_v45  ;;  %24863 = vst [vmem:[#allocation25_spill] sm:$0xff] %v17652_v62  ;;  %24864 = vst [vmem:[#allocation26_spill] sm:$0xff] %v17656_v1  ;;  %v17709_v23 = vsub.f32 %v331_v2, %v17678_v31  ;;  %v24540_v47 = vand.u32 4294901760, %v17691_v53 }
  0x27   : > { %719 = vmatmul.mubr.f32.gmra.mrb[2].mxu0 %v17565_v61  ;;  %15717 = vmatprep.subr.bf16.mxu1 %v15248_v0  ;;  %v17663_v0 = vld [vmem:[%s17518_s15 + $0x40] sm:$0xff]  ;;  %24866 = vst [vmem:[#allocation28_spill] sm:$0xff] %v17673_v29  ;;  %24868 = vst [vmem:[#allocation30_spill] sm:$0xff] %v17678_v31 }
  0x28   : > { %724 = vmatprep.mubr.f32.mxu0 %v24533_v9  ;;  %24862 = vst [vmem:[#allocation24_spill] sm:$0xff] %v17649_v55  ;;  %15259 = vmatpush1.bf16.msra.mxu0 %v15258_v56  ;;  %v17670_v28 = vand.u32 4294901760, %v17649_v55  ;;  %v334_v41 = vsel %vm308_vm0, %v17663_v0, 0  ;;  %v17698_v56 = vand.u32 4294901760, %v477_v7  ;;  %24871 = vst [vmem:[#allocation33_spill] sm:$0xff] %v17709_v23  ;;  %v337_v7 = vsel %vm308_vm0, %v17684_v51, 0 }
  0x29   : > { %446 = vmatmul.mubr.f32.gmra.mrb[2].mxu1 %v17626_v46  ;;  %15261 = vmatprep.subr.bf16.mxu0 %v17468_v13  ;;  %v17711_v48 = vand.u32 4294901760, %v334_v41  ;;  %v17726_v30 = vand.u32 4294901760, %v337_v7  ;;  %v24892_v46 = vand.u32 4294901760, %v17495_v25 }
  0x2a   : > { %451 = vmatprep.mubr.f32.mxu1 %v24533_v9  ;;  %15719 = vmatpush1.bf16.msra.mxu1 %v15250_v10  ;;  %24865 = vst [vmem:[#allocation27_spill] sm:$0xff] %v17670_v28  ;;  %v17676_v10 = vsub.f32 %v328_v54, %v17656_v1  ;;  %v17696_v54 = vld [vmem:[%s24520_s1 + $0x98] sm:$0xff]  ;;  %24869 = vst [vmem:[#allocation31_spill] sm:$0xff] %v17698_v56  ;;  %v488_v63 = vsub.f32 %v17649_v55, %v17670_v28 }
  0x2b   : > { %726 = vmatmul.mubr.f32.gmra.mrb[4].mxu0 %v17571_v3  ;;  %17139 = vset.pattern.permute.xlu1 %v17377_v32  ;;  %v24539_v34 = vand.u32 4294901760, %v17696_v54 }
  0x2c   : > { %731 = vmatprep.mubr.f32.mxu0 %v24533_v9  ;;  %24867 = vst [vmem:[#allocation29_spill] sm:$0xff] %v17676_v10  ;;  %10595 = vperm.xlu1 %17139, %v17545_v49   ;;  %v17706_v24 = vand.u32 4294901760, %v17676_v10  ;;  %v17723_v2 = vand.u32 4294901760, %v488_v63  ;;  %v17739_v63 = vand.u32 4294901760, %v17709_v23 }
  0x2d   : > { %457 = vmatmul.mubr.f32.gmra.mrb[4].mxu1 %v17652_v62  ;;  %17138 = vset.pattern.permute.xlu0 %v17377_v32  ;;  %v17717_v32 = vld [vmem:[%s17518_s15 + $0x50] sm:$0xff]  ;;  %v17732_v27 = vpack.c.bf16 %v24539_v34, %v24540_v47  ;;  %v24876_v34 = vmov 0.0   ;;  %v17755_v47 = vsub.f32 %v337_v7, %v17726_v30  ;;  %v17772_v7 = vld [vmem:[%s17518_s15 + $0x60] sm:$0xff] }
  0x2e   : > { %462 = vmatprep.mubr.f32.mxu1 %v24533_v9  ;;  %10587 = vperm.xlu0 %17138, %v17530_v39   ;;  %24870 = vst [vmem:[#allocation32_spill] sm:$0xff] %v17706_v24  ;;  %24872 = vst [vmem:[#allocation34_spill] sm:$0xff] %v17723_v2  ;;  %v499_v26 = vsub.f32 %v17676_v10, %v17706_v24  ;;  %v17786_v24 = vld [vmem:[%s17518_s15 + $0x68] sm:$0xff] }
  0x2f   : > { %733 = vmatmul.mubr.f32.gmra.mrb[6].mxu0 %v17579_v6  ;;  %24873 = vst [vmem:[#allocation35_spill] sm:$0xff] %v17732_v27  ;;  %24874 = vst [vmem:[#allocation36_spill] sm:$0xff] %v17739_v63  ;;  %v17747_v6 = vld [vmem:[%s17518_s15 + $0x58] sm:$0xff]  ;;  %15285 = vmatprep.subr.bf16.mxu1 %v17732_v27 }
  0x30   : > { %738 = vmatprep.mubr.f32.mxu0 %v24533_v9  ;;  %10599 = vperm.xlu1 %17139, %v17548_v50   ;;  %24877 = vst [vmem:[#allocation38_spill] sm:$0xff] %v17755_v47  ;;  %v343_v3 = vsel %vm308_vm0, %v17747_v6, 0  ;;  %v17763_v61 = vand.u32 4294901760, %v499_v26  ;;  %v17780_v26 = vand.u32 4294901760, %v17755_v47 }
  0x31   : > { %468 = vmatmul.mubr.f32.gmra.mrb[6].mxu1 %v17673_v29  ;;  %v17776_v60 = vand.u32 4294901760, %v343_v3 }
  0x32   : > { %473 = vmatprep.mubr.f32.mxu1 %v24533_v9  ;;  %10591 = vperm.xlu0 %17138, %v17533_v40   ;;  %24879 = vst [vmem:[#allocation40_spill] sm:$0xff] %v17763_v61  ;;  %24882 = vst [vmem:[#allocation43_spill] sm:$0xff] %v17780_v26 }
  0x33   : > { %740 = vmatmul.mubr.f32.gmra.mrb[8].mxu0 %v17595_v18  ;;  %v340_v18 = vsel %vm308_vm0, %v17717_v32, 0  ;;  %24881 = vst [vmem:[#allocation42_spill] sm:$0xff] %v17776_v60 }
  0x34   : > { %745 = vmatprep.mubr.f32.mxu0 %v24533_v9  ;;  %v17742_v9 = vsub.f32 %v334_v41, %v17711_v48  ;;  %10607 = vperm.xlu1 %17139, %v17584_v8   ;;  %v17757_v41 = vand.u32 4294901760, %v340_v18 }
  0x35   : > { %479 = vmatmul.mubr.f32.gmra.mrb[8].mxu1 %v17698_v56  ;;  %v532_v56 = vsub.f32 %v17755_v47, %v17780_v26  ;;  %v24891_v26 = vand.u32 4294901760, %v17488_v22 }
  0x36   : > { %24875 = vst [vmem:[#allocation37_spill] sm:$0xff] %v17742_v9  ;;  %484 = vmatprep.mubr.f32.mxu1 %v24876_v34  ;;  %24878 = vst [vmem:[#allocation39_spill] sm:$0xff] %v17757_v41  ;;  %10603 = vperm.xlu0 %17138, %v17561_v59   ;;  %v17768_v27 = vand.u32 4294901760, %v17742_v9 }
  0x37   : > { %747 = vmatmul.mubr.f32.gmra.mrb[10].mxu0 %v17623_v45  ;;  %v510_v45 = vsub.f32 %v17709_v23, %v17739_v63  ;;  %v17783_v63 = vsub.f32 %v340_v18, %v17757_v41  ;;  %v17800_v18 = vld [vmem:[%s24520_s1 + $0x10] sm:$0xff]  ;;  %v17837_v17 = vpack.c.bf16 %v24892_v46, %v24891_v26 }
  0x38   : > { %752 = vmatprep.mubr.f32.mxu0 %v24876_v34  ;;  %24880 = vst [vmem:[#allocation41_spill] sm:$0xff] %v17768_v27  ;;  %10615 = vperm.xlu1 %17139, %v17642_v57   ;;  %v521_v28 = vsub.f32 %v17742_v9, %v17768_v27  ;;  %v17810_v27 = vsub.f32 %v343_v3, %v17776_v60  ;;  %v24587_v62 = vand.u32 4294901760, %v17800_v18 }
  0x39   : > { %490 = vmatmul.mubr.f32.gmra.mrb[10].mxu1 %v17723_v2  ;;  %24883 = vst [vmem:[#allocation44_spill] sm:$0xff] %v17783_v63  ;;  %v17789_v2 = vand.u32 4294901760, %v510_v45  ;;  %v17805_v45 = vld [vmem:[%s24520_s1 + $0x90] sm:$0xff]  ;;  %v17818_v58 = vand.u32 4294901760, %v17783_v63 }
  0x3a   : > { %495 = vmatprep.mubr.f32.mxu1 %v24876_v34  ;;  %10611 = vperm.xlu0 %17138, %v17617_v43   ;;  %24885 = vst [vmem:[#allocation46_spill] sm:$0xff] %v17810_v27  ;;  %v17829_v13 = vand.u32 4294901760, %v521_v28  ;;  %v24586_v33 = vand.u32 4294901760, %v17805_v45  ;;  %v17850_v28 = vld [vmem:[%s17518_s15 + $0x70] sm:$0xff]  ;;  %v17855_v22 = vsub.f32 %v17800_v18, %v24587_v62  ;;  %v17864_v37 = vand.u32 4294901760, %v17810_v27 }
  0x3b   : > { %754 = vmatmul.mubr.f32.gmra.mrb[12].mxu0 %v17656_v1  ;;  %24884 = vst [vmem:[#allocation45_spill] sm:$0xff] %v17789_v2  ;;  %v346_v1 = vsel %vm308_vm0, %v17772_v7, 0  ;;  %24886 = vst [vmem:[#allocation47_spill] sm:$0xff] %v17818_v58  ;;  %v543_v26 = vsub.f32 %v17783_v63, %v17818_v58  ;;  %v352_v62 = vsel %vm308_vm0, %v17850_v28, 0 }
  0x3c   : > { %759 = vmatprep.mubr.f32.mxu0 %v24876_v34  ;;  %10623 = vperm.xlu1 %17139, %v17684_v51   ;;  %v17820_v29 = vand.u32 4294901760, %v346_v1  ;;  %24890 = vst [vmem:[#allocation49_spill] sm:$0xff] %v17829_v13  ;;  %v17860_v25 = vsub.f32 %v17805_v45, %v24586_v33  ;;  %24895 = vst [vmem:[#allocation50_spill] sm:$0xff] %v17864_v37 }
  0x3d   : > { %501 = vmatmul.mubr.f32.gmra.mrb[12].mxu1 %v17763_v61  ;;  %v349_v61 = vsel %vm308_vm0, %v17786_v24, 0 }
  0x3e   : > { %506 = vmatprep.mubr.f32.mxu1 %v24876_v34  ;;  %24887 = vst [vmem:[#allocation48_spill] sm:$0xff] %v17820_v29  ;;  %10619 = vperm.xlu0 %17138, %v17663_v0   ;;  %v17869_v46 = vand.u32 4294901760, %v349_v61 }
  0x3f   : > { %761 = vmatmul.mubr.f32.gmra.mrb[14].mxu0 %v17678_v31  ;;  %v24889_v31 = vand.u32 4294901760, %v17484_v20  ;;  %v24894_v20 = vand.u32 4294901760, %v17527_v38  ;;  %v17867_v38 = vsub.f32 %v346_v1, %v17820_v29  ;;  %v17906_v1 = vand.u32 4294901760, %v352_v62 }
  0x40   : > { %903 = vmatprep.mubr.f32.mxu0 %v24876_v34  ;;  %10631 = vperm.xlu1 %17139, %v17747_v6   ;;  %24897 = vst [vmem:[#allocation52_spill] sm:$0xff] %v17869_v46 }
  0x41   : > { %v17826_v3 = vpack.c.bf16 %v24889_v31, %v24888_v52  ;;  %512 = vmatmul.mubr.f32.gmra.mrb[14].mxu1 %v17789_v2  ;;  %v17846_v52 = vpack.c.bf16 %v24894_v20, %v24893_v16  ;;  %24896 = vst [vmem:[#allocation51_spill] sm:$0xff] %v17867_v38  ;;  %v17873_v31 = vand.u32 4294901760, %v532_v56  ;;  %v24899_v16 = vand.u32 4294901760, %v17470_v14  ;;  %v17890_v56 = vld [vmem:[%s17518_s15 + $0x78] sm:$0xff]  ;;  %24904 = vst [vmem:[#allocation57_spill] sm:$0xff] %v17906_v1 }
  0x42   : > { %517 = vmatprep.mubr.f32.mxu1 %v24876_v34  ;;  %v24900_v20 = vand.u32 4294901760, %v17472_v15  ;;  %10627 = vperm.xlu0 %17138, %v17717_v32   ;;  %v17895_v14 = vsub.f32 %v349_v61, %v17869_v46  ;;  %v17899_v15 = vand.u32 4294901760, %v543_v26  ;;  %v355_v61 = vsel %vm308_vm0, %v17890_v56, 0 }
  0x43   : > { %906 = vmatmul.mubr.f32.vlgmr.msra.gmra.mrb[0].mxu0 %v17574_v4  ;;  %24898 = vst [vmem:[#allocation53_spill] sm:$0xff] %v17873_v31  ;;  %v17924_v4 = vsub.f32 %v352_v62, %v17906_v1 }
  0x44   : > { %911 = vmatprep.mubr.f32.mxu0 %v24876_v34  ;;  %15263 = vmatpush1.bf16.msra.mxu0 %v17482_v19  ;;  %v15268_v33 = vpack.c.bf16 %v24900_v20, %v24899_v16  ;;  %24901 = vst [vmem:[#allocation54_spill] sm:$0xff] %v17895_v14  ;;  %24902 = vst [vmem:[#allocation55_spill] sm:$0xff] %v17899_v15  ;;  %v554_v16 = vsub.f32 %v17810_v27, %v17864_v37  ;;  %v17904_v20 = vand.u32 4294901760, %v17867_v38 }
  0x45   : > { %523 = vmatmul.mubr.f32.gmra.mrb[16].mxu1 %v17829_v13  ;;  %15265 = vmatprep.subr.bf16.mxu0 %v17486_v21  ;;  %v17916_v26 = vand.u32 4294901760, %v17895_v14  ;;  %24907 = vst [vmem:[#allocation60_spill] sm:$0xff] %v17924_v4  ;;  %v17939_v21 = vand.u32 4294901760, %v17924_v4 }
  0x46   : > { %528 = vmatprep.mubr.f32.mxu1 %v24876_v34  ;;  %10639 = vperm.xlu1 %17139, %v17786_v24   ;;  %24903 = vst [vmem:[#allocation56_spill] sm:$0xff] %v17904_v20 }
  0x47   : > { %914 = vmatmul.mubr.f32.gmra.mrb[2].mxu0 %v17577_v5  ;;  %10635 = vperm.xlu0 %17138, %v17772_v7   ;;  %24905 = vst [vmem:[#allocation58_spill] sm:$0xff] %v17916_v26  ;;  %v17919_v5 = vand.u32 4294901760, %v554_v16  ;;  %v576_v62 = vsub.f32 %v17895_v14, %v17916_v26  ;;  %24910 = vst [vmem:[#allocation63_spill] sm:$0xff] %v17939_v21 }
  0x48   : > { %919 = vmatprep.mubr.f32.mxu0 %v24876_v34  ;;  %15267 = vmatpush1.bf16.msra.mxu0 %v17523_v36  ;;  %v17926_v36 = vand.u32 4294901760, %v355_v61 }
  0x49   : > { %534 = vmatmul.mubr.f32.gmra.mrb[18].mxu1 %v17873_v31  ;;  %15269 = vmatprep.subr.bf16.mxu0 %v15268_v33  ;;  %24906 = vst [vmem:[#allocation59_spill] sm:$0xff] %v17919_v5  ;;  %v565_v33 = vsub.f32 %v17867_v38, %v17904_v20 }
  0x4a   : > { %539 = vmatprep.mubr.f32.mxu1 %v24876_v34  ;;  %10647 = vperm.xlu1 %17139, %v17890_v56   ;;  %24908 = vst [vmem:[#allocation61_spill] sm:$0xff] %v17926_v36  ;;  %v17942_v19 = vsub.f32 %v355_v61, %v17926_v36  ;;  %v24914_v61 = vand.u32 4294901760, %v17691_v53 }
  0x4b   : > { %922 = vmatmul.mubr.f32.gmra.mrb[4].mxu0 %v17587_v11  ;;  %v17378_v11 = vmov 1   ;;  %10643 = vperm.xlu0 %17138, %v17850_v28   ;;  %v17934_v16 = vand.u32 4294901760, %v565_v33  ;;  %v17949_v33 = vand.u32 4294901760, %v576_v62  ;;  %v24915_v62 = vand.u32 4294901760, %v17696_v54 }
  0x4c   : > { %927 = vmatprep.mubr.f32.mxu0 %v24876_v34  ;;  %24911 = vst [vmem:[#allocation64_spill] sm:$0xff] %v17942_v19  ;;  %v17954_v26 = vand.u32 4294901760, %v17942_v19 }
  0x4d   : > { %545 = vmatmul.mubr.f32.gmra.mrb[20].mxu1 %v17899_v15  ;;  %24909 = vst [vmem:[#allocation62_spill] sm:$0xff] %v17934_v16  ;;  %24912 = vst [vmem:[#allocation65_spill] sm:$0xff] %v17949_v33 }
  0x4e   : > { %550 = vmatprep.mubr.f32.mxu1 %v24876_v34  ;;  %17141 = vset.pattern.permute.xlu1 %v17378_v11  ;;  %24913 = vst [vmem:[#allocation66_spill] sm:$0xff] %v17954_v26 }
  0x4f   : > { %930 = vmatmul.mubr.f32.gmra.mrb[6].mxu0 %v17609_v35  ;;  %10655 = vperm.xlu1 %17141, %v17533_v40   ;;  %v587_v35 = vsub.f32 %v17924_v4, %v17939_v21 }
  0x50   : > { %935 = vmatprep.mubr.f32.mxu0 %v24876_v34  ;;  %17140 = vset.pattern.permute.xlu0 %v17378_v11  ;;  %v17962_v11 = vsub.f32 %v17691_v53, %v24914_v61  ;;  %v279_v53 = vld [vmem:[%s24520_s1 + $0x118] sm:$0xff]  ;;  %v294_v61 = vld [vmem:[%s24520_s1 + $0x190] sm:$0xff] }
  0x51   : > { %556 = vmatmul.mubr.f32.gmra.mrb[22].mxu1 %v17919_v5  ;;  %10651 = vperm.xlu0 %17140, %v17530_v39   ;;  %v17972_v21 = vand.u32 4294901760, %v587_v35  ;;  %v278_v35 = vld [vmem:[%s24520_s1 + $0x110] sm:$0xff] }
  0x52   : > { %561 = vmatprep.mubr.f32.mxu1 %v24876_v34  ;;  %v1645_v37 = vand.u32 4294901760, %v278_v35 }
  0x53   : > { %938 = vmatmul.mubr.f32.gmra.mrb[8].mxu0 %v17621_v44  ;;  %10659 = vperm.xlu1 %17141, %v17545_v49   ;;  %v17967_v44 = vsub.f32 %v17696_v54, %v24915_v62  ;;  %24916 = vst [vmem:[#allocation67_spill] sm:$0xff] %v17972_v21  ;;  %v295_v54 = vld [vmem:[%s24520_s1 + $0x198] sm:$0xff] }
  0x54   : > { %943 = vmatprep.mubr.f32.mxu0 %v24876_v34 }
  0x55   : > { %567 = vmatmul.mubr.f32.gmra.mrb[24].mxu1 %v17934_v16  ;;  %10663 = vperm.xlu0 %17140, %v17548_v50  }
  0x56   : > { %572 = vmatprep.mubr.f32.mxu1 %v24876_v34 }
  0x57   : > { %946 = vmatmul.mubr.f32.gmra.mrb[10].mxu0 %v17649_v55  ;;  %10667 = vperm.xlu1 %17141, %v17561_v59   ;;  %v598_v55 = vsub.f32 %v17942_v19, %v17954_v26  ;;  %v1647_v26 = vand.u32 4294901760, %v295_v54 }
  0x58   : > { %951 = vmatprep.mubr.f32.mxu0 %v24876_v34 }
  0x59   : > { %578 = vmatmul.mubr.f32.gmra.mrb[26].mxu1 %v17949_v33  ;;  %v17990_v62 = vand.u32 4294901760, %v598_v55  ;;  %10671 = vperm.xlu0 %17140, %v17584_v8   ;;  %v24919_v33 = vand.u32 4294901760, %v17967_v44  ;;  %v18011_v5 = vsub.f32 %v295_v54, %v1647_v26  ;;  %v18027_v54 = vsub.f32 %v278_v35, %v1645_v37 }
  0x5a   : > { %583 = vmatprep.mubr.f32.mxu1 %v24876_v34 }
  0x5b   : > { %954 = vmatmul.mubr.f32.gmra.mrb[12].mxu0 %v17676_v10  ;;  %10675 = vperm.xlu1 %17141, %v17617_v43   ;;  %24917 = vst [vmem:[#allocation68_spill] sm:$0xff] %v17990_v62  ;;  %v1643_v10 = vand.u32 4294901760, %v279_v53  ;;  %v1899_v16 = vsub.f32 %v17967_v44, %v24919_v33  ;;  %v24921_v33 = vand.u32 4294901760, %v17805_v45 }
  0x5c   : > { %959 = vmatprep.mubr.f32.mxu0 %v24876_v34 }
  0x5d   : > { %589 = vmatmul.mubr.f32.gmra.mrb[28].mxu1 %v17972_v21  ;;  %v24918_v21 = vand.u32 4294901760, %v17962_v11  ;;  %v18009_v20 = vsub.f32 %v279_v53, %v1643_v10  ;;  %10679 = vperm.xlu0 %17140, %v17642_v57   ;;  %v18022_v58 = vpack.c.bf16 %v1647_v26, %v1643_v10  ;;  %v1900_v13 = vand.u32 4294901760, %v1899_v16  ;;  %v24939_v10 = vld [vmem:[#allocation43_spill] sm:$0xff]  ;;  %v24940_v53 = vld [vmem:[#allocation53_spill] sm:$0xff] }
  0x5e   : > { %594 = vmatprep.mubr.f32.mxu1 %v24876_v34  ;;  %v24636_v26 = vand.u32 4294901760, %v18011_v5 }
  0x5f   : > { %962 = vmatmul.mubr.f32.gmra.mrb[14].mxu0 %v17709_v23  ;;  %v1887_v55 = vsub.f32 %v17962_v11, %v24918_v21  ;;  %10683 = vperm.xlu1 %17141, %v17663_v0   ;;  %v1649_v23 = vand.u32 4294901760, %v294_v61  ;;  %v24920_v21 = vand.u32 4294901760, %v17800_v18 }
  0x60   : > { %967 = vmatprep.mubr.f32.mxu0 %v24876_v34 }
  0x61   : > { %600 = vmatmul.mubr.f32.gmra.mrb[30].mxu1 %v17990_v62  ;;  %v18020_v15 = vpack.c.bf16 %v24921_v33, %v24920_v21  ;;  %v18029_v62 = vsub.f32 %v294_v61, %v1649_v23  ;;  %v1888_v31 = vand.u32 4294901760, %v1887_v55  ;;  %10687 = vperm.xlu0 %17140, %v17684_v51   ;;  %v18039_v18 = vpack.c.bf16 %v1649_v23, %v1645_v37 }
  0x62   : > { %766 = vmatprep.mubr.f32.mxu1 %v24876_v34  ;;  %v24638_v23 = vand.u32 4294901760, %v17855_v22  ;;  %v24637_v37 = vand.u32 4294901760, %v17860_v25  ;;  %v24639_v61 = vand.u32 4294901760, %v18027_v54  ;;  %v1923_v33 = vsub.f32 %v18011_v5, %v24636_v26 }
  0x63   : > { %970 = vmatmul.mubr.f32.gmra.mrb[16].mxu0 %v17742_v9  ;;  %24922 = vst [vmem:[#allocation69_spill] sm:$0xff] %v18029_v62  ;;  %10691 = vperm.xlu1 %17141, %v17717_v32   ;;  %v15292_v45 = vpack.c.bf16 %v1900_v13, %v1888_v31  ;;  %v17379_v13 = vmov 2   ;;  %v24635_v31 = vand.u32 4294901760, %v18009_v20  ;;  %v24640_v55 = vand.u32 4294901760, %v18029_v62 }
  0x64   : > { %975 = vmatprep.mubr.f32.mxu0 %v24876_v34  ;;  %v1893_v16 = vsub.f32 %v17855_v22, %v24638_v23  ;;  %v1905_v35 = vsub.f32 %v17860_v25, %v24637_v37  ;;  %v1924_v23 = vand.u32 4294901760, %v1923_v33  ;;  %v24923_v33 = vld [vmem:[#allocation14_spill] sm:$0xff] }
  0x65   : > { %768 = vmatmul.mubr.f32.vlgmr.msra.gmra.mrb[16].mxu1 %v17711_v48  ;;  %10695 = vperm.xlu0 %17140, %v17747_v6   ;;  %v1911_v21 = vsub.f32 %v18009_v20, %v24635_v31  ;;  %v1917_v31 = vsub.f32 %v18027_v54, %v24639_v61  ;;  %v1929_v26 = vsub.f32 %v18029_v62, %v24640_v55 }
  0x66   : > { %15287 = vmatpush1.bf16.msra.mxu1 %v18020_v15  ;;  %773 = vmatprep.mubr.f32.mxu1 %v24876_v34 }
  0x67   : > { %978 = vmatmul.mubr.f32.gmra.mrb[18].mxu0 %v17755_v47  ;;  %15289 = vmatprep.subr.bf16.mxu1 %v18022_v58  ;;  %v1912_v37 = vand.u32 4294901760, %v1911_v21  ;;  %v1930_v61 = vand.u32 4294901760, %v1929_v26  ;;  %v24928_v26 = vld [vmem:[#allocation22_spill] sm:$0xff] }
  0x68   : > { %983 = vmatprep.mubr.f32.mxu0 %v24876_v34  ;;  %10699 = vperm.xlu1 %17141, %v17772_v7  }
  0x69   : > { %775 = vmatmul.mubr.f32.gmra.mrb[18].mxu1 %v17726_v30  ;;  %10703 = vperm.xlu0 %17140, %v17786_v24   ;;  %v15296_v55 = vpack.c.bf16 %v1924_v23, %v1912_v37  ;;  %v15300_v23 = vpack.c.bf16 %v17967_v44, %v17962_v11  ;;  %v24924_v37 = vld [vmem:[#allocation21_spill] sm:$0xff] }
  0x6a   : > { %780 = vmatprep.mubr.f32.mxu1 %v24876_v34  ;;  %15291 = vmatpush1.bf16.msra.mxu1 %v18039_v18 }
  0x6b   : > { %986 = vmatmul.mubr.f32.gmra.mrb[20].mxu0 %v17783_v63  ;;  %15293 = vmatprep.subr.bf16.mxu1 %v15292_v45  ;;  %v1894_v45 = vand.u32 4294901760, %v1893_v16 }
  0x6c   : > { %991 = vmatprep.mubr.f32.mxu0 %v24876_v34  ;;  %10707 = vperm.xlu1 %17141, %v17850_v28  }
  0x6d   : > { %782 = vmatmul.mubr.f32.gmra.mrb[20].mxu1 %v17757_v41  ;;  %10711 = vperm.xlu0 %17140, %v17890_v56  }
  0x6e   : > { %787 = vmatprep.mubr.f32.mxu1 %v24876_v34 }
  0x6f   : > { %994 = vmatmul.mubr.f32.gmra.mrb[22].mxu0 %v17810_v27 }
  0x70   : > { %999 = vmatprep.mubr.f32.mxu0 %v24876_v34  ;;  %17142 = vset.pattern.permute.xlu1 %v17379_v13 }
  0x71   : > { %789 = vmatmul.mubr.f32.gmra.mrb[22].mxu1 %v17776_v60  ;;  %10763 = vperm.xlu1 %17142, %v17530_v39  }
  0x72   : > { %794 = vmatprep.mubr.f32.mxu1 %v24876_v34  ;;  %17143 = vset.pattern.permute.xlu0 %v17379_v13  ;;  %v1906_v13 = vand.u32 4294901760, %v1905_v35  ;;  %v1918_v35 = vand.u32 4294901760, %v1917_v31  ;;  %v24926_v31 = vld [vmem:[#allocation25_spill] sm:$0xff] }
  0x73   : > { %1002 = vmatmul.mubr.f32.gmra.mrb[24].mxu0 %v17867_v38  ;;  %10767 = vperm.xlu0 %17143, %v17533_v40  }
  0x74   : > { %1007 = vmatprep.mubr.f32.mxu0 %v24876_v34  ;;  %v15294_v16 = vpack.c.bf16 %v1906_v13, %v1894_v45  ;;  %v15298_v21 = vpack.c.bf16 %v1930_v61, %v1918_v35  ;;  %v24929_v61 = vld [vmem:[#allocation28_spill] sm:$0xff]  ;;  %v17380_v45 = vmov 3   ;;  %v24932_v13 = vld [vmem:[#allocation27_spill] sm:$0xff] }
  0x75   : > { %796 = vmatmul.mubr.f32.gmra.mrb[24].mxu1 %v17820_v29  ;;  %10771 = vperm.xlu1 %17142, %v17545_v49   ;;  %v24934_v35 = vld [vmem:[#allocation32_spill] sm:$0xff] }
  0x76   : > { %801 = vmatprep.mubr.f32.mxu1 %v24876_v34 }
  0x77   : > { %1010 = vmatmul.mubr.f32.gmra.mrb[26].mxu0 %v17895_v14  ;;  %10779 = vperm.xlu0 %17143, %v17561_v59  }
  0x78   : > { %1015 = vmatprep.mubr.f32.mxu0 %v24876_v34 }
  0x79   : > { %803 = vmatmul.mubr.f32.gmra.mrb[26].mxu1 %v17869_v46  ;;  %10775 = vperm.xlu1 %17142, %v17548_v50  }
  0x7a   : > { %808 = vmatprep.mubr.f32.mxu1 %v24876_v34 }
  0x7b   : > { %1018 = vmatmul.mubr.f32.gmra.mrb[28].mxu0 %v17924_v4  ;;  %10787 = vperm.xlu0 %17143, %v17617_v43  }
  0x7c   : > { %1023 = vmatprep.mubr.f32.mxu0 %v24876_v34 }
  0x7d   : > { %810 = vmatmul.mubr.f32.gmra.mrb[28].mxu1 %v17906_v1  ;;  %10783 = vperm.xlu1 %17142, %v17584_v8  }
  0x7e   : > { %815 = vmatprep.mubr.f32.mxu1 %v24876_v34 }
  0x7f   : > { %1026 = vmatmul.mubr.f32.gmra.mrb[30].mxu0 %v17942_v19  ;;  %10795 = vperm.xlu0 %17143, %v17663_v0  }
  0x80   : > { %1104 = vmatprep.mubr.f32.mxu0 %v24876_v34 }
  0x81   : > { %817 = vmatmul.mubr.f32.gmra.mrb[30].mxu1 %v17926_v36  ;;  %10791 = vperm.xlu1 %17142, %v17642_v57  }
  0x82   : > { %1707 = vmatprep.mubr.f32.mxu1 %v24876_v34 }
  0x83   : > { %1108 = vmatmul.mubr.f32.vlgmr.msra.gmra.mrb[0].mxu0 %v17590_v12  ;;  %10803 = vperm.xlu0 %17143, %v17717_v32  }
  0x84   : > { %1113 = vmatprep.mubr.f32.mxu0 %v24876_v34  ;;  %15271 = vmatpush1.bf16.msra.mxu0 %v17826_v3  ;;  %v24925_v3 = vld [vmem:[#allocation16_spill] sm:$0xff] }
  0x85   : > { %1713 = vmatmul.mubr.f32.vlgmr.msra.gmra.mrb[32].mxu1 %v17613_v42  ;;  %10799 = vperm.xlu1 %17142, %v17684_v51  }
  0x86   : > { %15295 = vmatpush1.bf16.msra.mxu1 %v15294_v16  ;;  %1718 = vmatprep.mubr.f32.mxu1 %v24876_v34  ;;  %v24933_v16 = vld [vmem:[#allocation34_spill] sm:$0xff] }
  0x87   : > { %1117 = vmatmul.mubr.f32.gmra.mrb[2].mxu0 %v24923_v33  ;;  %15297 = vmatprep.subr.bf16.mxu1 %v15296_v55  ;;  %v24931_v55 = vld [vmem:[#allocation31_spill] sm:$0xff] }
  0x88   : > { %1122 = vmatprep.mubr.f32.mxu0 %v24876_v34  ;;  %15273 = vmatprep.subr.bf16.mxu0 %v17837_v17  ;;  %v24927_v17 = vld [vmem:[#allocation2_spill] sm:$0xff] }
  0x89   : > { %1724 = vmatmul.mubr.f32.gmra.mrb[34].mxu1 %v24924_v37  ;;  %10807 = vperm.xlu1 %17142, %v17747_v6  }
  0x8a   : > { %1729 = vmatprep.mubr.f32.mxu1 %v24876_v34  ;;  %15299 = vmatpush1.bf16.msra.mxu1 %v15298_v21  ;;  %v24935_v21 = vld [vmem:[#allocation40_spill] sm:$0xff] }
  0x8b   : > { %1126 = vmatmul.mubr.f32.gmra.mrb[4].mxu0 %v24925_v3  ;;  %15301 = vmatprep.subr.bf16.mxu1 %v15300_v23  ;;  %v24936_v23 = vld [vmem:[#allocation36_spill] sm:$0xff] }
  0x8c   : > { %1131 = vmatprep.mubr.f32.mxu0 %v24876_v34  ;;  %15275 = vmatpush1.bf16.msra.mxu0 %v17846_v52  ;;  %v24930_v52 = vld [vmem:[#allocation23_spill] sm:$0xff] }
  0x8d   : > { %1735 = vmatmul.mubr.f32.gmra.mrb[36].mxu1 %v24926_v31  ;;  %10815 = vperm.xlu1 %17142, %v17786_v24  }
  0x8e   : > { %1740 = vmatprep.mubr.f32.mxu1 %v24876_v34  ;;  %15277 = vmatprep.subr.bf16.mxu0 %v24927_v17  ;;  %v24937_v17 = vld [vmem:[#allocation41_spill] sm:$0xff] }
  0x8f   : > { %1135 = vmatmul.mubr.f32.gmra.mrb[6].mxu0 %v24928_v26  ;;  %10811 = vperm.xlu0 %17143, %v17772_v7   ;;  %v18345_v26 = vld [vmem:[%s17518_s15 + $0x28] sm:$0xff] }
  0x90   : > { %1140 = vmatprep.mubr.f32.mxu0 %v24876_v34 }
  0x91   : > { %1746 = vmatmul.mubr.f32.gmra.mrb[38].mxu1 %v24929_v61  ;;  %10823 = vperm.xlu1 %17142, %v17890_v56   ;;  %v18438_v61 = vld [vmem:[%s24520_s1 + $0x1a0] sm:$0xff] }
  0x92   : > { %1751 = vmatprep.mubr.f32.mxu1 %v24876_v34 }
  0x93   : > { %1144 = vmatmul.mubr.f32.gmra.mrb[8].mxu0 %v24930_v52  ;;  %10819 = vperm.xlu0 %17143, %v17850_v28   ;;  %v18326_v52 = vld [vmem:[%s17518_s15 + $0x20] sm:$0xff] }
  0x94   : > { %1149 = vmatprep.mubr.f32.mxu0 %v24876_v34 }
  0x95   : > { %1757 = vmatmul.mubr.f32.gmra.mrb[40].mxu1 %v24931_v55  ;;  %17145 = vset.pattern.permute.xlu1 %v17380_v45 }
  0x96   : > { %1762 = vmatprep.mubr.f32.mxu1 %v24876_v34  ;;  %10831 = vperm.xlu1 %17145, %v17533_v40  }
  0x97   : > { %1153 = vmatmul.mubr.f32.gmra.mrb[10].mxu0 %v24932_v13  ;;  %17144 = vset.pattern.permute.xlu0 %v17380_v45  ;;  %v24938_v45 = vld [vmem:[#allocation49_spill] sm:$0xff]  ;;  %v18312_v13 = vld [vmem:[%s17518_s15 + $0x10] sm:$0xff] }
  0x98   : > { %1158 = vmatprep.mubr.f32.mxu0 %v24876_v34  ;;  %10827 = vperm.xlu0 %17144, %v17530_v39  }
  0x99   : > { %1768 = vmatmul.mubr.f32.gmra.mrb[42].mxu1 %v24933_v16 }
  0x9a   : > { %1773 = vmatprep.mubr.f32.mxu1 %v24876_v34  ;;  %10835 = vperm.xlu1 %17145, %v17545_v49  }
  0x9b   : > { %1162 = vmatmul.mubr.f32.gmra.mrb[12].mxu0 %v24934_v35  ;;  %v18301_v35 = vld [vmem:[%s17518_s15 + $0x8] sm:$0xff] }
  0x9c   : > { %1167 = vmatprep.mubr.f32.mxu0 %v24876_v34  ;;  %10839 = vperm.xlu0 %17144, %v17548_v50  }
  0x9d   : > { %1779 = vmatmul.mubr.f32.gmra.mrb[44].mxu1 %v24935_v21 }
  0x9e   : > { %1784 = vmatprep.mubr.f32.mxu1 %v24876_v34  ;;  %10843 = vperm.xlu1 %17145, %v17561_v59  }
  0x9f   : > { %1171 = vmatmul.mubr.f32.gmra.mrb[14].mxu0 %v24936_v23 }
  0xa0   : > { %1176 = vmatprep.mubr.f32.mxu0 %v24876_v34  ;;  %10847 = vperm.xlu0 %17144, %v17584_v8  }
  0xa1   : > { %1790 = vmatmul.mubr.f32.gmra.mrb[46].mxu1 %v17789_v2  ;;  %v17381_v2 = vmov 4  }
  0xa2   : > { %1795 = vmatprep.mubr.f32.mxu1 %v24876_v34  ;;  %10851 = vperm.xlu1 %17145, %v17617_v43  }
  0xa3   : > { %1180 = vmatmul.mubr.f32.gmra.mrb[16].mxu0 %v24937_v17  ;;  %v24941_v17 = vld [vmem:[#allocation47_spill] sm:$0xff] }
  0xa4   : > { %1185 = vmatprep.mubr.f32.mxu0 %v24876_v34  ;;  %10855 = vperm.xlu0 %17144, %v17642_v57  }
  0xa5   : > { %1801 = vmatmul.mubr.f32.gmra.mrb[48].mxu1 %v24938_v45  ;;  %v24942_v45 = vld [vmem:[#allocation55_spill] sm:$0xff] }
  0xa6   : > { %1806 = vmatprep.mubr.f32.mxu1 %v24876_v34  ;;  %10859 = vperm.xlu1 %17145, %v17663_v0  }
  0xa7   : > { %1189 = vmatmul.mubr.f32.gmra.mrb[18].mxu0 %v24939_v10  ;;  %v24944_v10 = vld [vmem:[#allocation50_spill] sm:$0xff] }
  0xa8   : > { %1194 = vmatprep.mubr.f32.mxu0 %v24876_v34  ;;  %10863 = vperm.xlu0 %17144, %v17684_v51  }
  0xa9   : > { %1812 = vmatmul.mubr.f32.gmra.mrb[50].mxu1 %v24940_v53  ;;  %v24945_v53 = vld [vmem:[#allocation59_spill] sm:$0xff] }
  0xaa   : > { %1817 = vmatprep.mubr.f32.mxu1 %v24876_v34  ;;  %10867 = vperm.xlu1 %17145, %v17717_v32  }
  0xab   : > { %1198 = vmatmul.mubr.f32.gmra.mrb[20].mxu0 %v24941_v17  ;;  %v18176_v23 = vpop.permute.xlu1 %10595 }
  0xac   : > { %1203 = vmatprep.mubr.f32.mxu0 %v24876_v34  ;;  %24943 = vst [vmem:[#allocation2_spill] sm:$0xff] %v18176_v23  ;;  %10871 = vperm.xlu0 %17144, %v17747_v6   ;;  %v24948_v23 = vld [vmem:[#allocation62_spill] sm:$0xff] }
  0xad   : > { %1823 = vmatmul.mubr.f32.gmra.mrb[52].mxu1 %v24942_v45  ;;  %v24947_v45 = vld [vmem:[#allocation56_spill] sm:$0xff] }
  0xae   : > { %1828 = vmatprep.mubr.f32.mxu1 %v24876_v34  ;;  %10875 = vperm.xlu1 %17145, %v17772_v7  }
  0xaf   : > { %1207 = vmatmul.mubr.f32.gmra.mrb[22].mxu0 %v24944_v10  ;;  %v18184_v17 = vpop.permute.xlu1 %10599 }
  0xb0   : > { %1212 = vmatprep.mubr.f32.mxu0 %v24876_v34  ;;  %24946 = vst [vmem:[#allocation70_spill] sm:$0xff] %v18184_v17  ;;  %10879 = vperm.xlu0 %17144, %v17786_v24   ;;  %v24951_v17 = vld [vmem:[#allocation65_spill] sm:$0xff] }
  0xb1   : > { %1834 = vmatmul.mubr.f32.gmra.mrb[54].mxu1 %v24945_v53  ;;  %v24950_v53 = vld [vmem:[#allocation58_spill] sm:$0xff] }
  0xb2   : > { %1839 = vmatprep.mubr.f32.mxu1 %v24876_v34  ;;  %10883 = vperm.xlu1 %17145, %v17850_v28  }
  0xb3   : > { %1216 = vmatmul.mubr.f32.gmra.mrb[24].mxu0 %v24947_v45  ;;  %v18192_v10 = vpop.permute.xlu1 %10607 }
  0xb4   : > { %1221 = vmatprep.mubr.f32.mxu0 %v24876_v34  ;;  %24949 = vst [vmem:[#allocation71_spill] sm:$0xff] %v18192_v10  ;;  %10887 = vperm.xlu0 %17144, %v17890_v56   ;;  %v24954_v10 = vld [vmem:[#allocation67_spill] sm:$0xff] }
  0xb5   : > { %1845 = vmatmul.mubr.f32.gmra.mrb[56].mxu1 %v24948_v23  ;;  %v24953_v23 = vld [vmem:[#allocation63_spill] sm:$0xff] }
  0xb6   : > { %1850 = vmatprep.mubr.f32.mxu1 %v24876_v34  ;;  %17146 = vset.pattern.permute.xlu1 %v17381_v2 }
  0xb7   : > { %1225 = vmatmul.mubr.f32.gmra.mrb[26].mxu0 %v24950_v53  ;;  %10939 = vperm.xlu1 %17146, %v17530_v39   ;;  %v18200_v45 = vpop.permute.xlu1 %10615  ;;  %v24956_v53 = vld [vmem:[#allocation66_spill] sm:$0xff] }
  0xb8   : > { %1230 = vmatprep.mubr.f32.mxu0 %v24876_v34  ;;  %24952 = vst [vmem:[#allocation72_spill] sm:$0xff] %v18200_v45  ;;  %17147 = vset.pattern.permute.xlu0 %v17381_v2  ;;  %v24957_v45 = vld [vmem:[#allocation68_spill] sm:$0xff]  ;;  %v18227_v2 = vld [vmem:[%s24520_s1 + $0xa8] sm:$0xff] }
  0xb9   : > { %1856 = vmatmul.mubr.f32.gmra.mrb[58].mxu1 %v24951_v17  ;;  %10943 = vperm.xlu0 %17147, %v17533_v40   ;;  %v18222_v40 = vld [vmem:[%s24520_s1 + $0x28] sm:$0xff] }
  0xba   : > { %1861 = vmatprep.mubr.f32.mxu1 %v24876_v34  ;;  %v24971_v17 = vld [vmem:[#allocation35_spill] sm:$0xff] }
  0xbb   : > { %1234 = vmatmul.mubr.f32.gmra.mrb[28].mxu0 %v24953_v23  ;;  %10947 = vperm.xlu1 %17146, %v17545_v49   ;;  %v18207_v39 = vpop.permute.xlu1 %10623  ;;  %v24963_v23 = vpack.c.bf16 %v17860_v25, %v17855_v22 }
  0xbc   : > { %1239 = vmatprep.mubr.f32.mxu0 %v24876_v34  ;;  %24955 = vst [vmem:[#allocation73_spill] sm:$0xff] %v18207_v39 }
  0xbd   : > { %1867 = vmatmul.mubr.f32.gmra.mrb[60].mxu1 %v24954_v10  ;;  %10955 = vperm.xlu0 %17147, %v17561_v59   ;;  %v24961_v59 = vld [vmem:[#allocation4_spill] sm:$0xff] }
  0xbe   : > { %1872 = vmatprep.mubr.f32.mxu1 %v24876_v34  ;;  %v24970_v10 = vld [vmem:[#allocation8_spill] sm:$0xff] }
  0xbf   : > { %1243 = vmatmul.mubr.f32.gmra.mrb[30].mxu0 %v24956_v53  ;;  %10951 = vperm.xlu1 %17146, %v17548_v50   ;;  %v18215_v49 = vpop.permute.xlu1 %10631  ;;  %v24959_v50 = vld [vmem:[#allocation6_spill] sm:$0xff]  ;;  %v24644_v53 = vand.u32 4294901760, %v18222_v40 }
  0xc0   : > { %1337 = vmatprep.mubr.f32.mxu0 %v24876_v34  ;;  %24958 = vst [vmem:[#allocation74_spill] sm:$0xff] %v18215_v49  ;;  %v24960_v49 = vld [vmem:[#allocation3_spill] sm:$0xff] }
  0xc1   : > { %1878 = vmatmul.mubr.f32.gmra.mrb[62].mxu1 %v24957_v45  ;;  %v24643_v45 = vand.u32 4294901760, %v18227_v2  ;;  %10963 = vperm.xlu0 %17147, %v17617_v43  }
  0xc2   : > { %1988 = vmatprep.mubr.f32.mxu1 %v24876_v34 }
  0xc3   : > { %1339 = vmatmul.mubr.f32.vlgmr.msra.gmra.mrb[0].mxu0 %v24959_v50  ;;  %10959 = vperm.xlu1 %17146, %v17584_v8   ;;  %v24964_v8 = vld [vmem:[#allocation7_spill] sm:$0xff] }
  0xc4   : > { %1344 = vmatprep.mubr.f32.mxu0 %v24876_v34  ;;  %15279 = vmatpush1.bf16.msra.mxu0 %v24960_v49  ;;  %v24965_v49 = vpack.c.bf16 %v18011_v5, %v18009_v20 }
  0xc5   : > { %1990 = vmatmul.mubr.f32.vlgmr.msra.gmra.mrb[32].mxu1 %v24959_v50  ;;  %15281 = vmatprep.subr.bf16.mxu0 %v24961_v59  ;;  %v18235_v39 = vpop.permute.xlu1 %10639  ;;  %v24966_v59 = vld [vmem:[#allocation5_spill] sm:$0xff] }
  0xc6   : > { %24962 = vst [vmem:[#allocation3_spill] sm:$0xff] %v18235_v39  ;;  %15303 = vmatpush1.bf16.msra.mxu1 %v24963_v23  ;;  %1995 = vmatprep.mubr.f32.mxu1 %v24876_v34  ;;  %v18255_v23 = vpack.c.bf16 %v24643_v45, %v24644_v53  ;;  %v24973_v45 = vld [vmem:[#allocation11_spill] sm:$0xff] }
  0xc7   : > { %1346 = vmatmul.mubr.f32.gmra.mrb[2].mxu0 %v24964_v8  ;;  %15305 = vmatprep.subr.bf16.mxu1 %v24965_v49  ;;  %v24969_v49 = vpack.c.bf16 %v18029_v62, %v18027_v54  ;;  %v24975_v53 = vld [vmem:[#allocation15_spill] sm:$0xff] }
  0xc8   : > { %1351 = vmatprep.mubr.f32.mxu0 %v24876_v34  ;;  %10967 = vperm.xlu1 %17146, %v17642_v57   ;;  %24967 = vst [vmem:[#allocation4_spill] sm:$0xff] %v18255_v23 }
  0xc9   : > { %1997 = vmatmul.mubr.f32.gmra.mrb[34].mxu1 %v24964_v8  ;;  %15283 = vmatpush1.bf16.msra.mxu0 %v24966_v59  ;;  %v18257_v39 = vpop.permute.xlu1 %10647 }
  0xca   : > { %24968 = vst [vmem:[#allocation5_spill] sm:$0xff] %v18257_v39  ;;  %2002 = vmatprep.mubr.f32.mxu1 %v24876_v34  ;;  %15307 = vmatpush1.bf16.msra.mxu1 %v24969_v49 }
  0xcb   : > { %1353 = vmatmul.mubr.f32.gmra.mrb[4].mxu0 %v24970_v10  ;;  %15309 = vmatprep.subr.bf16.mxu1 %v24971_v17 }
  0xcc   : > { %1358 = vmatprep.mubr.f32.mxu0 %v24876_v34  ;;  %10975 = vperm.xlu1 %17146, %v17684_v51  }
  0xcd   : > { %2004 = vmatmul.mubr.f32.gmra.mrb[36].mxu1 %v24970_v10  ;;  %15333 = vmatprep.subr.bf16.mxu0 %v18255_v23  ;;  %v24979_v23 = vld [vmem:[#allocation26_spill] sm:$0xff] }
  0xce   : > { %2009 = vmatprep.mubr.f32.mxu1 %v24876_v34  ;;  %v18270_v59 = vpop.permute.xlu1 %10655  ;;  %10971 = vperm.xlu0 %17147, %v17663_v0  }
  0xcf   : > { %24972 = vst [vmem:[#allocation75_spill] sm:$0xff] %v18270_v59  ;;  %1360 = vmatmul.mubr.f32.gmra.mrb[6].mxu0 %v24973_v45  ;;  %v24977_v59 = vld [vmem:[#allocation20_spill] sm:$0xff] }
  0xd0   : > { %1365 = vmatprep.mubr.f32.mxu0 %v24876_v34  ;;  %10983 = vperm.xlu1 %17146, %v17747_v6  }
  0xd1   : > { %2011 = vmatmul.mubr.f32.gmra.mrb[38].mxu1 %v24973_v45 }
  0xd2   : > { %2016 = vmatprep.mubr.f32.mxu1 %v24876_v34  ;;  %v18278_v49 = vpop.permute.xlu1 %10659  ;;  %10979 = vperm.xlu0 %17147, %v17717_v32  }
  0xd3   : > { %24974 = vst [vmem:[#allocation76_spill] sm:$0xff] %v18278_v49  ;;  %1367 = vmatmul.mubr.f32.gmra.mrb[8].mxu0 %v24975_v53 }
  0xd4   : > { %1372 = vmatprep.mubr.f32.mxu0 %v24876_v34  ;;  %10991 = vperm.xlu1 %17146, %v17786_v24  }
  0xd5   : > { %2018 = vmatmul.mubr.f32.gmra.mrb[40].mxu1 %v24975_v53 }
  0xd6   : > { %2023 = vmatprep.mubr.f32.mxu1 %v24876_v34  ;;  %v18286_v39 = vpop.permute.xlu1 %10667  ;;  %10987 = vperm.xlu0 %17147, %v17772_v7  }
  0xd7   : > { %24976 = vst [vmem:[#allocation77_spill] sm:$0xff] %v18286_v39  ;;  %1374 = vmatmul.mubr.f32.gmra.mrb[10].mxu0 %v24977_v59  ;;  %v17382_v39 = vmov 5  }
  0xd8   : > { %1379 = vmatprep.mubr.f32.mxu0 %v24876_v34  ;;  %10999 = vperm.xlu1 %17146, %v17890_v56  }
  0xd9   : > { %2025 = vmatmul.mubr.f32.gmra.mrb[42].mxu1 %v24977_v59 }
  0xda   : > { %2030 = vmatprep.mubr.f32.mxu1 %v24876_v34  ;;  %v18294_v49 = vpop.permute.xlu1 %10675  ;;  %10995 = vperm.xlu0 %17147, %v17850_v28  }
  0xdb   : > { %24978 = vst [vmem:[#allocation78_spill] sm:$0xff] %v18294_v49  ;;  %1381 = vmatmul.mubr.f32.gmra.mrb[12].mxu0 %v24979_v23  ;;  %v24981_v49 = vld [vmem:[#allocation30_spill] sm:$0xff] }
  0xdc   : > { %1386 = vmatprep.mubr.f32.mxu0 %v24876_v34  ;;  %17149 = vset.pattern.permute.xlu1 %v17382_v39 }
  0xdd   : > { %2032 = vmatmul.mubr.f32.gmra.mrb[44].mxu1 %v24979_v23  ;;  %11007 = vperm.xlu1 %17149, %v18301_v35  }
  0xde   : > { %2037 = vmatprep.mubr.f32.mxu1 %v24876_v34  ;;  %v18305_v21 = vpop.permute.xlu1 %10683  ;;  %17148 = vset.pattern.permute.xlu0 %v17382_v39 }
  0xdf   : > { %24980 = vst [vmem:[#allocation79_spill] sm:$0xff] %v18305_v21  ;;  %1388 = vmatmul.mubr.f32.gmra.mrb[14].mxu0 %v24981_v49  ;;  %v18320_v21 = vld [vmem:[%s17518_s15] sm:$0xff] }
  0xe0   : > { %1393 = vmatprep.mubr.f32.mxu0 %v24876_v34  ;;  %11003 = vperm.xlu0 %17148, %v18320_v21  }
  0xe1   : > { %2039 = vmatmul.mubr.f32.gmra.mrb[46].mxu1 %v24981_v49  ;;  %11011 = vperm.xlu1 %17149, %v18312_v13  }
  0xe2   : > { %2044 = vmatprep.mubr.f32.mxu1 %v24876_v34  ;;  %v18316_v16 = vpop.permute.xlu1 %10691 }
  0xe3   : > { %24982 = vst [vmem:[#allocation30_spill] sm:$0xff] %v18316_v16  ;;  %1395 = vmatmul.mubr.f32.gmra.mrb[16].mxu0 %v17711_v48  ;;  %v18334_v16 = vld [vmem:[%s17518_s15 + $0x18] sm:$0xff] }
  0xe4   : > { %1400 = vmatprep.mubr.f32.mxu0 %v24876_v34  ;;  %11015 = vperm.xlu0 %17148, %v18334_v16  }
  0xe5   : > { %2046 = vmatmul.mubr.f32.gmra.mrb[48].mxu1 %v17711_v48  ;;  %11019 = vperm.xlu1 %17149, %v18326_v52  }
  0xe6   : > { %2051 = vmatprep.mubr.f32.mxu1 %v24876_v34 }
  0xe7   : > { %1402 = vmatmul.mubr.f32.gmra.mrb[18].mxu0 %v17726_v30  ;;  %v18331_v39 = vpop.permute.xlu1 %10699 }
  0xe8   : > { %24983 = vst [vmem:[#allocation80_spill] sm:$0xff] %v18331_v39  ;;  %1407 = vmatprep.mubr.f32.mxu0 %v24876_v34  ;;  %11023 = vperm.xlu0 %17148, %v18345_v26   ;;  %v24991_v39 = vand.u32 4294901760, %v18227_v2 }
  0xe9   : > { %2053 = vmatmul.mubr.f32.gmra.mrb[50].mxu1 %v17726_v30  ;;  %11027 = vperm.xlu1 %17149, %v17617_v43  }
  0xea   : > { %2058 = vmatprep.mubr.f32.mxu1 %v24876_v34 }
  0xeb   : > { %1409 = vmatmul.mubr.f32.gmra.mrb[20].mxu0 %v17757_v41  ;;  %v18342_v55 = vpop.permute.xlu1 %10707 }
  0xec   : > { %24984 = vst [vmem:[#allocation81_spill] sm:$0xff] %v18342_v55  ;;  %1414 = vmatprep.mubr.f32.mxu0 %v24876_v34  ;;  %11031 = vperm.xlu0 %17148, %v17642_v57  }
  0xed   : > { %2060 = vmatmul.mubr.f32.gmra.mrb[52].mxu1 %v17757_v41  ;;  %11035 = vperm.xlu1 %17149, %v17663_v0  }
  0xee   : > { %2065 = vmatprep.mubr.f32.mxu1 %v24876_v34 }
  0xef   : > { %1416 = vmatmul.mubr.f32.gmra.mrb[22].mxu0 %v17776_v60 }
  0xf0   : > { %1421 = vmatprep.mubr.f32.mxu0 %v24876_v34  ;;  %v18355_v43 = vpop.permute.xlu1 %10763  ;;  %11039 = vperm.xlu0 %17148, %v17684_v51  }
  0xf1   : > { %24985 = vst [vmem:[#allocation82_spill] sm:$0xff] %v18355_v43  ;;  %2067 = vmatmul.mubr.f32.gmra.mrb[54].mxu1 %v17776_v60  ;;  %11043 = vperm.xlu1 %17149, %v17717_v32  }
  0xf2   : > { %2072 = vmatprep.mubr.f32.mxu1 %v24876_v34 }
  0xf3   : > { %1423 = vmatmul.mubr.f32.gmra.mrb[24].mxu0 %v17820_v29 }
  0xf4   : > { %1428 = vmatprep.mubr.f32.mxu0 %v24876_v34  ;;  %v18363_v0 = vpop.permute.xlu1 %10771  ;;  %11047 = vperm.xlu0 %17148, %v17747_v6   ;;  %v18387_v6 = vsub.f32 %v18227_v2, %v24991_v39 }
  0xf5   : > { %24986 = vst [vmem:[#allocation83_spill] sm:$0xff] %v18363_v0  ;;  %2074 = vmatmul.mubr.f32.gmra.mrb[56].mxu1 %v17820_v29  ;;  %11051 = vperm.xlu1 %17149, %v17772_v7   ;;  %v24990_v7 = vand.u32 4294901760, %v18222_v40  ;;  %v18397_v0 = vld [vmem:[%s24520_s1 + $0xa0] sm:$0xff] }
  0xf6   : > { %2079 = vmatprep.mubr.f32.mxu1 %v24876_v34  ;;  %v24997_v39 = vand.u32 4294901760, %v18397_v0 }
  0xf7   : > { %1430 = vmatmul.mubr.f32.gmra.mrb[26].mxu0 %v17869_v46  ;;  %v18382_v55 = vsub.f32 %v18222_v40, %v24990_v7  ;;  %v18408_v40 = vld [vmem:[%s24520_s1 + $0x1a8] sm:$0xff] }
  0xf8   : > { %v18370_v57 = vpop.f32.mrb[0].mxu1  ;;  %1435 = vmatprep.mubr.f32.mxu0 %v24876_v34  ;;  %v18373_v32 = vpop.permute.xlu1 %10775  ;;  %11055 = vperm.xlu0 %17148, %v17786_v24  }
  0xf9   : > { %24987 = vst [vmem:[#allocation84_spill] sm:$0xff] %v18370_v57  ;;  %24988 = vst [vmem:[#allocation85_spill] sm:$0xff] %v18373_v32  ;;  %v18375_v51 = vpop.f32.mrb[1].mxu1  ;;  %2081 = vmatmul.mubr.f32.gmra.mrb[58].mxu1 %v17869_v46  ;;  %11059 = vperm.xlu1 %17149, %v17850_v28   ;;  %v18392_v32 = vld [vmem:[%s24520_s1 + $0x20] sm:$0xff]  ;;  %v18403_v28 = vld [vmem:[%s24520_s1 + $0x128] sm:$0xff]  ;;  %v17383_v57 = vmov 6  }
  0xfa   : > { %24989 = vst [vmem:[#allocation86_spill] sm:$0xff] %v18375_v51  ;;  %2086 = vmatprep.mubr.f32.mxu1 %v24876_v34  ;;  %v24996_v7 = vand.u32 4294901760, %v18392_v32  ;;  %v25004_v62 = vand.u32 4294901760, %v18382_v55 }
  0xfb   : > { %1437 = vmatmul.mubr.f32.gmra.mrb[28].mxu0 %v17906_v1 }
  0xfc   : > { %v18412_v2 = vpop.f32.mrb[2].mxu1  ;;  %1442 = vmatprep.mubr.f32.mxu0 %v24876_v34  ;;  %v18417_v51 = vpop.permute.xlu1 %10783  ;;  %11063 = vperm.xlu0 %17148, %v17890_v56   ;;  %v25001_v56 = vand.u32 4294901760, %v18403_v28 }
  0xfd   : > { %24992 = vst [vmem:[#allocation87_spill] sm:$0xff] %v18412_v2  ;;  %24993 = vst [vmem:[#allocation88_spill] sm:$0xff] %v18417_v51  ;;  %v18419_v43 = vpop.f32.mrb[3].mxu1  ;;  %2088 = vmatmul.mubr.f32.gmra.mrb[60].mxu1 %v17906_v1  ;;  %17150 = vset.pattern.permute.xlu1 %v17383_v57  ;;  %v18427_v2 = vld [vmem:[%s24520_s1 + $0x120] sm:$0xff]  ;;  %v18431_v51 = vpop.permute.xlu0 %10587 }
  0xfe   : > { %24994 = vst [vmem:[#allocation89_spill] sm:$0xff] %v18419_v43  ;;  %2093 = vmatprep.mubr.f32.mxu1 %v24876_v34  ;;  %11115 = vperm.xlu1 %17150, %v18320_v21   ;;  %v18449_v43 = vpack.c.bf16 %v24997_v39, %v24996_v7  ;;  %v3165_v39 = vsub.f32 %v18382_v55, %v25004_v62  ;;  %v25005_v7 = vand.u32 4294901760, %v18387_v6  ;;  %v25011_v37 = vand.u32 4294901760, %v18427_v2 }
  0xff   : > { %1444 = vmatmul.mubr.f32.gmra.mrb[30].mxu0 %v17926_v36 }
 0x100   : > { %v18442_v24 = vpop.f32.mrb[4].mxu1  ;;  %1522 = vmatprep.mubr.f32.mxu0 %v24876_v34  ;;  %24998 = vst [vmem:[#allocation91_spill] sm:$0xff] %v18449_v43  ;;  %v18452_v17 = vpop.permute.xlu1 %10791  ;;  %v3177_v3 = vsub.f32 %v18387_v6, %v25005_v7  ;;  %17151 = vset.pattern.permute.xlu0 %v17383_v57  ;;  %v25010_v7 = vld [vmem:[#allocation9_spill] sm:$0xff]  ;;  %v3166_v57 = vand.u32 4294901760, %v3165_v39 }
 0x101   : > { %24995 = vst [vmem:[#allocation90_spill] sm:$0xff] %v18442_v24  ;;  %24999 = vst [vmem:[#allocation92_spill] sm:$0xff] %v18452_v17  ;;  %v18454_v31 = vpop.f32.mrb[5].mxu1  ;;  %2095 = vmatmul.mubr.f32.gmra.mrb[62].mxu1 %v17926_v36  ;;  %v25002_v24 = vand.u32 4294901760, %v18408_v40  ;;  %v18470_v17 = vpop.permute.xlu0 %10591  ;;  %11119 = vperm.xlu0 %17151, %v18301_v35  }
 0x102   : > { %25000 = vst [vmem:[#allocation93_spill] sm:$0xff] %v18454_v31  ;;  %25006 = vst [vmem:[#allocation95_spill] sm:$0xff] %v18470_v17  ;;  %2181 = vmatprep.mubr.f32.mxu1 %v24876_v34  ;;  %11123 = vperm.xlu1 %17150, %v18312_v13   ;;  %v25012_v31 = vand.u32 4294901760, %v18438_v61 }
 0x103   : > { %v18461_v33 = vpack.c.bf16 %v25002_v24, %v25001_v56  ;;  %1524 = vmatmul.mubr.f32.vlgmr.msra.gmra.mrb[0].mxu0 %v24959_v50 }
 0x104   : > { %v18475_v24 = vpop.f32.mrb[6].mxu1  ;;  %1529 = vmatprep.mubr.f32.mxu0 %v24876_v34  ;;  %15335 = vmatpush1.bf16.msra.mxu0 %v18449_v43  ;;  %v18479_v62 = vpop.permute.xlu1 %10799  ;;  %v18489_v17 = vpack.c.bf16 %v25012_v31, %v25011_v37  ;;  %v25020_v31 = vld [vmem:[#allocation10_spill] sm:$0xff] }
 0x105   : > { %25003 = vst [vmem:[#allocation94_spill] sm:$0xff] %v18461_v33  ;;  %25007 = vst [vmem:[#allocation96_spill] sm:$0xff] %v18475_v24  ;;  %v18481_v56 = vpop.f32.mrb[7].mxu1  ;;  %2184 = vmatmul.mubr.f32.vlgmr.msra.gmra.mrb[32].mxu1 %v25010_v7  ;;  %15337 = vmatprep.subr.bf16.mxu0 %v18461_v33  ;;  %v3178_v24 = vand.u32 4294901760, %v3177_v3  ;;  %v18493_v43 = vpop.permute.xlu0 %10603 }
 0x106   : > { %25008 = vst [vmem:[#allocation97_spill] sm:$0xff] %v18479_v62  ;;  %25009 = vst [vmem:[#allocation98_spill] sm:$0xff] %v18481_v56  ;;  %15311 = vmatpush1.bf16.msra.mxu1 %v18020_v15  ;;  %2189 = vmatprep.mubr.f32.mxu1 %v24876_v34  ;;  %v25015_v62 = vand.u32 4294901760, %v17962_v11  ;;  %v25016_v56 = vand.u32 4294901760, %v17967_v44 }
 0x107   : > { %25013 = vst [vmem:[#allocation99_spill] sm:$0xff] %v18489_v17  ;;  %25014 = vst [vmem:[#allocation100_spill] sm:$0xff] %v18493_v43  ;;  %1531 = vmatmul.mubr.f32.gmra.mrb[2].mxu0 %v24964_v8  ;;  %15313 = vmatprep.subr.bf16.mxu1 %v18022_v58  ;;  %v15340_v39 = vpack.c.bf16 %v3178_v24, %v3166_v57  ;;  %v25025_v24 = vld [vmem:[#allocation12_spill] sm:$0xff] }
 0x108   : > { %v15316_v33 = vpack.c.bf16 %v25016_v56, %v25015_v62  ;;  %v18501_v7 = vpop.f32.mrb[8].mxu1  ;;  %1536 = vmatprep.mubr.f32.mxu0 %v24876_v34  ;;  %11127 = vperm.xlu1 %17150, %v18334_v16   ;;  %v18505_v37 = vpop.permute.xlu1 %10807  ;;  %v25038_v43 = vld [vmem:[#allocation24_spill] sm:$0xff] }
 0x109   : > { %25017 = vst [vmem:[#allocation101_spill] sm:$0xff] %v18501_v7  ;;  %25018 = vst [vmem:[#allocation102_spill] sm:$0xff] %v18505_v37  ;;  %v18507_v3 = vpop.f32.mrb[9].mxu1  ;;  %2192 = vmatmul.mubr.f32.gmra.mrb[34].mxu1 %v25020_v31  ;;  %15339 = vmatpush1.bf16.msra.mxu0 %v18489_v17  ;;  %v18513_v44 = vpop.permute.xlu0 %10611  ;;  %v18534_v37 = vld [vmem:[%s17518_s15 + $0x38] sm:$0xff]  ;;  %v18615_v31 = vld [vmem:[%s17518_s15 + $0x60] sm:$0xff] }
 0x10a   : > { %25019 = vst [vmem:[#allocation103_spill] sm:$0xff] %v18507_v3  ;;  %2197 = vmatprep.mubr.f32.mxu1 %v24876_v34  ;;  %15315 = vmatpush1.bf16.msra.mxu1 %v18039_v18  ;;  %25021 = vst [vmem:[#allocation104_spill] sm:$0xff] %v18513_v44  ;;  %v25030_v44 = vld [vmem:[#allocation17_spill] sm:$0xff] }
 0x10b   : > { %1538 = vmatmul.mubr.f32.gmra.mrb[4].mxu0 %v24970_v10  ;;  %15317 = vmatprep.subr.bf16.mxu1 %v15316_v33  ;;  %v18569_v7 = vld [vmem:[%s17518_s15 + $0x58] sm:$0xff] }
 0x10c   : > { %v18516_v11 = vpop.f32.mrb[10].mxu1  ;;  %1543 = vmatprep.mubr.f32.mxu0 %v24876_v34  ;;  %11135 = vperm.xlu1 %17150, %v18345_v26   ;;  %v18520_v62 = vpop.permute.xlu1 %10815 }
 0x10d   : > { %25022 = vst [vmem:[#allocation105_spill] sm:$0xff] %v18516_v11  ;;  %25023 = vst [vmem:[#allocation106_spill] sm:$0xff] %v18520_v62  ;;  %v18522_v56 = vpop.f32.mrb[11].mxu1  ;;  %2200 = vmatmul.mubr.f32.gmra.mrb[36].mxu1 %v25025_v24  ;;  %15341 = vmatprep.subr.bf16.mxu0 %v15340_v39  ;;  %v18526_v57 = vpop.permute.xlu0 %10619  ;;  %v25034_v11 = vld [vmem:[#allocation19_spill] sm:$0xff] }
 0x10e   : > { %25024 = vst [vmem:[#allocation107_spill] sm:$0xff] %v18522_v56  ;;  %2205 = vmatprep.mubr.f32.mxu1 %v24876_v34  ;;  %25026 = vst [vmem:[#allocation108_spill] sm:$0xff] %v18526_v57  ;;  %11131 = vperm.xlu0 %17151, %v18326_v52   ;;  %v18551_v56 = vld [vmem:[%s17518_s15 + $0x48] sm:$0xff] }
 0x10f   : > { %1545 = vmatmul.mubr.f32.gmra.mrb[6].mxu0 %v24973_v45 }
 0x110   : > { %v18530_v33 = vpop.f32.mrb[12].mxu1  ;;  %1550 = vmatprep.mubr.f32.mxu0 %v24876_v34  ;;  %11143 = vperm.xlu1 %17150, %v18534_v37   ;;  %v18537_v62 = vpop.permute.xlu1 %10823 }
 0x111   : > { %25027 = vst [vmem:[#allocation109_spill] sm:$0xff] %v18530_v33  ;;  %25028 = vst [vmem:[#allocation110_spill] sm:$0xff] %v18537_v62  ;;  %v18539_v39 = vpop.f32.mrb[13].mxu1  ;;  %2208 = vmatmul.mubr.f32.gmra.mrb[38].mxu1 %v25030_v44  ;;  %v18543_v57 = vpop.permute.xlu0 %10627  ;;  %v10581_v62 = vlaneseq  ;;  %v18596_v44 = vld [vmem:[%s17518_s15 + $0x50] sm:$0xff] }
 0x112   : > { %25029 = vst [vmem:[#allocation111_spill] sm:$0xff] %v18539_v39  ;;  %2213 = vmatprep.mubr.f32.mxu1 %v24876_v34  ;;  %25031 = vst [vmem:[#allocation112_spill] sm:$0xff] %v18543_v57 }
 0x113   : > { %1552 = vmatmul.mubr.f32.gmra.mrb[8].mxu0 %v24975_v53 }
 0x114   : > { %v18547_v33 = vpop.f32.mrb[14].mxu1  ;;  %1557 = vmatprep.mubr.f32.mxu0 %v24876_v34  ;;  %11151 = vperm.xlu1 %17150, %v18551_v56  }
 0x115   : > { %25032 = vst [vmem:[#allocation113_spill] sm:$0xff] %v18547_v33  ;;  %v18554_v39 = vpop.f32.mrb[15].mxu1  ;;  %2216 = vmatmul.mubr.f32.gmra.mrb[40].mxu1 %v25034_v11  ;;  %v18557_v57 = vpop.permute.xlu1 %10831  ;;  %v18563_v33 = vld [vmem:[%s17518_s15 + $0x30] sm:$0xff]  ;;  %v18581_v11 = vld [vmem:[%s17518_s15 + $0x40] sm:$0xff] }
 0x116   : > { %25033 = vst [vmem:[#allocation114_spill] sm:$0xff] %v18554_v39  ;;  %25035 = vst [vmem:[#allocation115_spill] sm:$0xff] %v18557_v57  ;;  %2221 = vmatprep.mubr.f32.mxu1 %v24876_v34  ;;  %v18560_v3 = vpop.permute.xlu0 %10635  ;;  %11139 = vperm.xlu0 %17151, %v18563_v33   ;;  %v18572_v39 = vand.u32 127, %v10581_v62  ;;  %v18587_v62 = vld [vmem:[%s17518_s15 + $0x68] sm:$0xff] }
 0x117   : > { %25036 = vst [vmem:[#allocation116_spill] sm:$0xff] %v18560_v3  ;;  %1559 = vmatmul.mubr.f32.gmra.mrb[10].mxu0 %v24977_v59 }
 0x118   : > { %1564 = vmatprep.mubr.f32.mxu0 %v24876_v34  ;;  %11159 = vperm.xlu1 %17150, %v18569_v7   ;;  %25037 = vst [vmem:[#allocation117_spill] sm:$0xff] %v18572_v39  ;;  %vm10583_vm1 = vcmp.lt.s32.totalorder %v18572_v39, 64 }
 0x119   : > { %2224 = vmatmul.mubr.f32.gmra.mrb[42].mxu1 %v25038_v43  ;;  %v18575_v57 = vpop.permute.xlu1 %10835 }
 0x11a   : > { %25039 = vst [vmem:[#allocation118_spill] sm:$0xff] %v18575_v57  ;;  %2229 = vmatprep.mubr.f32.mxu1 %v24876_v34  ;;  %v18578_v3 = vpop.permute.xlu0 %10643  ;;  %11147 = vperm.xlu0 %17151, %v18581_v11   ;;  %v25041_v57 = vld [vmem:[#allocation29_spill] sm:$0xff] }
 0x11b   : > { %25040 = vst [vmem:[#allocation119_spill] sm:$0xff] %v18578_v3  ;;  %1566 = vmatmul.mubr.f32.gmra.mrb[12].mxu0 %v24979_v23 }
 0x11c   : > { %1571 = vmatprep.mubr.f32.mxu0 %v24876_v34  ;;  %11167 = vperm.xlu1 %17150, %v18587_v62  }
 0x11d   : > { %2232 = vmatmul.mubr.f32.gmra.mrb[44].mxu1 %v25041_v57  ;;  %v18592_v43 = vpop.permute.xlu1 %10843  ;;  %v18607_v57 = vld [vmem:[%s17518_s15 + $0x78] sm:$0xff] }
 0x11e   : > { %25042 = vst [vmem:[#allocation120_spill] sm:$0xff] %v18592_v43  ;;  %2237 = vmatprep.mubr.f32.mxu1 %v24876_v34  ;;  %v10652_v3 = vpop.permute.xlu0 %10651  ;;  %11155 = vperm.xlu0 %17151, %v18596_v44   ;;  %v25044_v43 = vld [vmem:[#allocation33_spill] sm:$0xff] }
 0x11f   : > { %1573 = vmatmul.mubr.f32.gmra.mrb[14].mxu0 %v24981_v49  ;;  %v18603_v24 = vsel %vm10583_vm1, %v18431_v51, %v10652_v3  ;;  %v17384_v51 = vmov 7  }
 0x120   : > { %25043 = vst [vmem:[#allocation121_spill] sm:$0xff] %v18603_v24  ;;  %1578 = vmatprep.mubr.f32.mxu0 %v24876_v34  ;;  %11175 = vperm.xlu1 %17150, %v18607_v57  }
 0x121   : > { %2240 = vmatmul.mubr.f32.gmra.mrb[46].mxu1 %v25044_v43  ;;  %v18611_v17 = vpop.permute.xlu1 %10851 }
 0x122   : > { %25045 = vst [vmem:[#allocation122_spill] sm:$0xff] %v18611_v17  ;;  %2245 = vmatprep.mubr.f32.mxu1 %v24876_v34  ;;  %11163 = vperm.xlu0 %17151, %v18615_v31   ;;  %v18626_v17 = vld [vmem:[%s17518_s15 + $0x70] sm:$0xff] }
 0x123   : > { %1580 = vmatmul.mubr.f32.gmra.mrb[16].mxu0 %v17711_v48 }
 0x124   : > { %1585 = vmatprep.mubr.f32.mxu0 %v24876_v34  ;;  %17153 = vset.pattern.permute.xlu1 %v17384_v51 }
 0x125   : > { %2248 = vmatmul.mubr.f32.gmra.mrb[48].mxu1 %v17742_v9  ;;  %11183 = vperm.xlu1 %17153, %v18301_v35   ;;  %v18622_v3 = vpop.permute.xlu1 %10859 }
 0x126   : > { %25046 = vst [vmem:[#allocation123_spill] sm:$0xff] %v18622_v3  ;;  %2253 = vmatprep.mubr.f32.mxu1 %v24876_v34  ;;  %11171 = vperm.xlu0 %17151, %v18626_v17  }
 0x127   : > { %1587 = vmatmul.mubr.f32.gmra.mrb[18].mxu0 %v17726_v30 }
 0x128   : > { %1592 = vmatprep.mubr.f32.mxu0 %v24876_v34 }
 0x129   : > { %2256 = vmatmul.mubr.f32.gmra.mrb[50].mxu1 %v17755_v47  ;;  %11187 = vperm.xlu1 %17153, %v18312_v13   ;;  %v18633_v43 = vpop.permute.xlu1 %10867 }
 0x12a   : > { %25047 = vst [vmem:[#allocation124_spill] sm:$0xff] %v18633_v43  ;;  %2261 = vmatprep.mubr.f32.mxu1 %v24876_v34  ;;  %17152 = vset.pattern.permute.xlu0 %v17384_v51  ;;  %v18645_v43 = vpop.permute.xlu0 %10663  ;;  %v25050_v51 = vand.u32 4294901760, %v18392_v32 }
 0x12b   : > { %1594 = vmatmul.mubr.f32.gmra.mrb[20].mxu0 %v17757_v41  ;;  %11179 = vperm.xlu0 %17152, %v18320_v21   ;;  %25049 = vst [vmem:[#allocation126_spill] sm:$0xff] %v18645_v43 }
 0x12c   : > { %1599 = vmatprep.mubr.f32.mxu0 %v24876_v34  ;;  %v18652_v47 = vsub.f32 %v18392_v32, %v25050_v51 }
 0x12d   : > { %2264 = vmatmul.mubr.f32.gmra.mrb[52].mxu1 %v17783_v63  ;;  %11195 = vperm.xlu1 %17153, %v18326_v52   ;;  %v18641_v3 = vpop.permute.xlu1 %10875  ;;  %v25051_v63 = vand.u32 4294901760, %v18397_v0 }
 0x12e   : > { %25048 = vst [vmem:[#allocation125_spill] sm:$0xff] %v18641_v3  ;;  %2269 = vmatprep.mubr.f32.mxu1 %v24876_v34  ;;  %v18681_v43 = vpop.permute.xlu0 %10671 }
 0x12f   : > { %1601 = vmatmul.mubr.f32.gmra.mrb[22].mxu0 %v17776_v60  ;;  %11191 = vperm.xlu0 %17152, %v18334_v16   ;;  %v18657_v9 = vsub.f32 %v18397_v0, %v25051_v63  ;;  %v25053_v63 = vand.u32 4294901760, %v18403_v28  ;;  %25055 = vst [vmem:[#allocation128_spill] sm:$0xff] %v18681_v43 }
 0x130   : > { %1606 = vmatprep.mubr.f32.mxu0 %v24876_v34 }
 0x131   : > { %2272 = vmatmul.mubr.f32.gmra.mrb[54].mxu1 %v17810_v27  ;;  %11203 = vperm.xlu1 %17153, %v18563_v33   ;;  %v18661_v3 = vpop.permute.xlu1 %10883  ;;  %v18673_v0 = vsub.f32 %v18403_v28, %v25053_v63  ;;  %v25058_v28 = vand.u32 4294901760, %v18652_v47 }
 0x132   : > { %25052 = vst [vmem:[#allocation127_spill] sm:$0xff] %v18661_v3  ;;  %2277 = vmatprep.mubr.f32.mxu1 %v24876_v34  ;;  %v25054_v3 = vand.u32 4294901760, %v18408_v40 }
 0x133   : > { %1608 = vmatmul.mubr.f32.gmra.mrb[24].mxu0 %v17820_v29  ;;  %11199 = vperm.xlu0 %17152, %v18345_v26  }
 0x134   : > { %1613 = vmatprep.mubr.f32.mxu0 %v24876_v34  ;;  %v18678_v27 = vsub.f32 %v18408_v40, %v25054_v3  ;;  %v3171_v40 = vsub.f32 %v18652_v47, %v25058_v28  ;;  %v25059_v3 = vand.u32 4294901760, %v18657_v9  ;;  %v24668_v28 = vand.u32 4294901760, %v18673_v0 }
 0x135   : > { %2280 = vmatmul.mubr.f32.gmra.mrb[56].mxu1 %v17867_v38  ;;  %11211 = vperm.xlu1 %17153, %v18581_v11  }
 0x136   : > { %2285 = vmatprep.mubr.f32.mxu1 %v24876_v34  ;;  %v18684_v32 = vpop.permute.xlu1 %10939  ;;  %v3183_v63 = vsub.f32 %v18657_v9, %v25059_v3  ;;  %v3189_v3 = vsub.f32 %v18673_v0, %v24668_v28 }
 0x137   : > { %25056 = vst [vmem:[#allocation129_spill] sm:$0xff] %v18684_v32  ;;  %1615 = vmatmul.mubr.f32.gmra.mrb[26].mxu0 %v17869_v46  ;;  %11207 = vperm.xlu0 %17152, %v18534_v37   ;;  %v25061_v32 = vand.u32 4294901760, %v18427_v2 }
 0x138   : > { %v18688_v51 = vpop.f32.mrb[16].mxu1  ;;  %1620 = vmatprep.mubr.f32.mxu0 %v24876_v34 }
 0x139   : > { %25057 = vst [vmem:[#allocation130_spill] sm:$0xff] %v18688_v51  ;;  %v18697_v38 = vpop.f32.mrb[17].mxu1  ;;  %2288 = vmatmul.mubr.f32.gmra.mrb[58].mxu1 %v17895_v14  ;;  %v18703_v43 = vsub.f32 %v18427_v2, %v25061_v32  ;;  %v25063_v51 = vand.u32 4294901760, %v18438_v61  ;;  %11219 = vperm.xlu1 %17153, %v18596_v44   ;;  %v18717_v14 = vpop.permute.xlu0 %10679  ;;  %v3184_v32 = vand.u32 4294901760, %v3183_v63 }
 0x13a   : > { %25060 = vst [vmem:[#allocation131_spill] sm:$0xff] %v18697_v38  ;;  %2293 = vmatprep.mubr.f32.mxu1 %v24876_v34  ;;  %v18714_v38 = vpop.permute.xlu1 %10947  ;;  %25066 = vst [vmem:[#allocation135_spill] sm:$0xff] %v18717_v14 }
 0x13b   : > { %25062 = vst [vmem:[#allocation132_spill] sm:$0xff] %v18703_v43  ;;  %v18708_v24 = vsub.f32 %v18438_v61, %v25063_v51  ;;  %25065 = vst [vmem:[#allocation134_spill] sm:$0xff] %v18714_v38  ;;  %1622 = vmatmul.mubr.f32.gmra.mrb[28].mxu0 %v17906_v1  ;;  %11215 = vperm.xlu0 %17152, %v18551_v56   ;;  %v3172_v61 = vand.u32 4294901760, %v3171_v40  ;;  %v25069_v38 = vand.u32 4294901760, %v18678_v27 }
 0x13c   : > { %v18720_v2 = vpop.f32.mrb[18].mxu1  ;;  %1627 = vmatprep.mubr.f32.mxu0 %v24876_v34 }
 0x13d   : > { %25064 = vst [vmem:[#allocation133_spill] sm:$0xff] %v18708_v24  ;;  %25067 = vst [vmem:[#allocation136_spill] sm:$0xff] %v18720_v2  ;;  %v18723_v51 = vpop.f32.mrb[19].mxu1  ;;  %2296 = vmatmul.mubr.f32.gmra.mrb[60].mxu1 %v17924_v4  ;;  %11227 = vperm.xlu1 %17153, %v18615_v31   ;;  %v3201_v14 = vsub.f32 %v18678_v27, %v25069_v38  ;;  %v24675_v2 = vand.u32 4294901760, %v18703_v43  ;;  %v15342_v28 = vpack.c.bf16 %v3184_v32, %v3172_v61 }
 0x13e   : > { %25068 = vst [vmem:[#allocation137_spill] sm:$0xff] %v18723_v51  ;;  %2301 = vmatprep.mubr.f32.mxu1 %v24876_v34  ;;  %v18736_v40 = vpop.permute.xlu1 %10951  ;;  %v3190_v38 = vand.u32 4294901760, %v3189_v3  ;;  %v25073_v4 = vand.u32 4294901760, %v18708_v24  ;;  %v25074_v61 = vand.u32 4294901760, %v17855_v22  ;;  %v25075_v32 = vand.u32 4294901760, %v17860_v25 }
 0x13f   : > { %25070 = vst [vmem:[#allocation138_spill] sm:$0xff] %v18736_v40  ;;  %1629 = vmatmul.mubr.f32.gmra.mrb[30].mxu0 %v17926_v36  ;;  %11223 = vperm.xlu0 %17152, %v18569_v7   ;;  %v3202_v39 = vand.u32 4294901760, %v3201_v14  ;;  %v3195_v40 = vsub.f32 %v18703_v43, %v24675_v2  ;;  %v25077_v14 = vand.u32 4294901760, %v18009_v20  ;;  %v25078_v3 = vand.u32 4294901760, %v18011_v5  ;;  %v25082_v20 = vld [vmem:[#allocation69_spill] sm:$0xff] }
 0x140   : > { %v18740_v63 = vpop.f32.mrb[20].mxu1  ;;  %2985 = vmatprep.mubr.f32.mxu0 %v24876_v34  ;;  %v3207_v36 = vsub.f32 %v18708_v24, %v25073_v4  ;;  %v17385_v25 = vmov 8   ;;  %v25081_v5 = vand.u32 4294901760, %v18027_v54 }
 0x141   : > { %25071 = vst [vmem:[#allocation139_spill] sm:$0xff] %v18740_v63  ;;  %v18743_v51 = vpop.f32.mrb[21].mxu1  ;;  %2304 = vmatmul.mubr.f32.gmra.mrb[62].mxu1 %v17942_v19  ;;  %11235 = vperm.xlu1 %17153, %v18626_v17   ;;  %v18753_v63 = vpop.permute.xlu0 %10687  ;;  %v15320_v2 = vpack.c.bf16 %v25078_v3, %v25077_v14  ;;  %v25083_v14 = vand.u32 4294901760, %v25082_v20  ;;  %v25096_v20 = vld [vmem:[#allocation28_spill] sm:$0xff] }
 0x142   : > { %25072 = vst [vmem:[#allocation140_spill] sm:$0xff] %v18743_v51  ;;  %2382 = vmatprep.mubr.f32.mxu1 %v24876_v34  ;;  %v15318_v51 = vpack.c.bf16 %v25075_v32, %v25074_v61  ;;  %v18760_v19 = vpop.permute.xlu1 %10959  ;;  %v15344_v61 = vpack.c.bf16 %v3202_v39, %v3190_v38  ;;  %v3196_v32 = vand.u32 4294901760, %v3195_v40  ;;  %v25088_v39 = vld [vmem:[#allocation14_spill] sm:$0xff]  ;;  %v25090_v40 = vld [vmem:[#allocation35_spill] sm:$0xff] }
 0x143   : > { %25076 = vst [vmem:[#allocation141_spill] sm:$0xff] %v18760_v19  ;;  %2991 = vmatmul.mubr.f32.vlgmr.msra.gmra.mrb[32].mxu0 %v17613_v42  ;;  %11231 = vperm.xlu0 %17152, %v18587_v62   ;;  %v3208_v19 = vand.u32 4294901760, %v3207_v36  ;;  %v15322_v3 = vpack.c.bf16 %v25083_v14, %v25081_v5  ;;  %v25084_v42 = vld [vmem:[#allocation21_spill] sm:$0xff] }
 0x144   : > { %v18768_v4 = vpop.f32.mrb[22].mxu1  ;;  %2996 = vmatprep.mubr.f32.mxu0 %v24876_v34  ;;  %15343 = vmatpush1.bf16.msra.mxu0 %v15342_v28 }
 0x145   : > { %25079 = vst [vmem:[#allocation142_spill] sm:$0xff] %v18768_v4  ;;  %v18771_v22 = vpop.f32.mrb[23].mxu1  ;;  %2386 = vmatmul.mubr.f32.vlgmr.msra.gmra.mrb[32].mxu1 %v17590_v12  ;;  %17154 = vset.pattern.permute.xlu1 %v17385_v25  ;;  %v18780_v28 = vpop.permute.xlu0 %10695  ;;  %v15346_v54 = vpack.c.bf16 %v3208_v19, %v3196_v32  ;;  %v25094_v19 = vld [vmem:[#allocation16_spill] sm:$0xff] }
 0x146   : > { %25080 = vst [vmem:[#allocation143_spill] sm:$0xff] %v18771_v22  ;;  %15319 = vmatpush1.bf16.msra.mxu1 %v15318_v51  ;;  %2391 = vmatprep.mubr.f32.mxu1 %v24876_v34  ;;  %v25089_v51 = vld [vmem:[#allocation25_spill] sm:$0xff] }
 0x147   : > { %3002 = vmatmul.mubr.f32.gmra.mrb[34].mxu0 %v25084_v42  ;;  %15321 = vmatprep.subr.bf16.mxu1 %v15320_v2  ;;  %v18782_v22 = vpop.permute.xlu1 %10967  ;;  %v15348_v2 = vpack.c.bf16 %v18387_v6, %v18382_v55  ;;  %v19142_v42 = vld [vmem:[%s24520_s1 + $0x1b0] sm:$0xff] }
 0x148   : > { %25085 = vst [vmem:[#allocation69_spill] sm:$0xff] %v18782_v22  ;;  %v18784_v12 = vpop.f32.mrb[24].mxu1  ;;  %3007 = vmatprep.mubr.f32.mxu0 %v24876_v34  ;;  %11291 = vperm.xlu1 %17154, %v18320_v21  }
 0x149   : > { %25086 = vst [vmem:[#allocation144_spill] sm:$0xff] %v18784_v12  ;;  %v18788_v36 = vpop.f32.mrb[25].mxu1  ;;  %2395 = vmatmul.mubr.f32.gmra.mrb[34].mxu1 %v25088_v39  ;;  %15345 = vmatprep.subr.bf16.mxu0 %v15344_v61  ;;  %v18805_v32 = vpop.permute.xlu0 %10703 }
 0x14a   : > { %25087 = vst [vmem:[#allocation145_spill] sm:$0xff] %v18788_v36  ;;  %2400 = vmatprep.mubr.f32.mxu1 %v24876_v34  ;;  %15323 = vmatpush1.bf16.msra.mxu1 %v15322_v3  ;;  %25095 = vst [vmem:[#allocation148_spill] sm:$0xff] %v18805_v32 }
 0x14b   : > { %3013 = vmatmul.mubr.f32.gmra.mrb[36].mxu0 %v25089_v51  ;;  %15325 = vmatprep.subr.bf16.mxu1 %v25090_v40  ;;  %v18796_v38 = vpop.permute.xlu1 %10975  ;;  %v25124_v51 = vld [vmem:[#allocation47_spill] sm:$0xff] }
 0x14c   : > { %25091 = vst [vmem:[#allocation35_spill] sm:$0xff] %v18796_v38  ;;  %v18798_v5 = vpop.f32.mrb[26].mxu1  ;;  %3018 = vmatprep.mubr.f32.mxu0 %v24876_v34  ;;  %11299 = vperm.xlu1 %17154, %v18312_v13   ;;  %v25101_v38 = vld [vmem:[#allocation31_spill] sm:$0xff] }
 0x14d   : > { %25092 = vst [vmem:[#allocation146_spill] sm:$0xff] %v18798_v5  ;;  %v18802_v61 = vpop.f32.mrb[27].mxu1  ;;  %2404 = vmatmul.mubr.f32.gmra.mrb[36].mxu1 %v25094_v19  ;;  %15347 = vmatpush1.bf16.msra.mxu0 %v15346_v54  ;;  %v25100_v54 = vld [vmem:[#allocation22_spill] sm:$0xff] }
 0x14e   : > { %25093 = vst [vmem:[#allocation147_spill] sm:$0xff] %v18802_v61  ;;  %2409 = vmatprep.mubr.f32.mxu1 %v24876_v34  ;;  %15349 = vmatprep.subr.bf16.mxu0 %v15348_v2  ;;  %v18821_v2 = vpop.permute.xlu0 %10711 }
 0x14f   : > { %3024 = vmatmul.mubr.f32.gmra.mrb[38].mxu0 %v25096_v20  ;;  %v18809_v14 = vpop.permute.xlu1 %10983  ;;  %11239 = vperm.xlu0 %17152, %v18607_v57   ;;  %25102 = vst [vmem:[#allocation152_spill] sm:$0xff] %v18821_v2 }
 0x150   : > { %25097 = vst [vmem:[#allocation149_spill] sm:$0xff] %v18809_v14  ;;  %v18812_v3 = vpop.f32.mrb[28].mxu1  ;;  %3029 = vmatprep.mubr.f32.mxu0 %v24876_v34  ;;  %11303 = vperm.xlu1 %17154, %v18334_v16  }
 0x151   : > { %25098 = vst [vmem:[#allocation150_spill] sm:$0xff] %v18812_v3  ;;  %v18816_v40 = vpop.f32.mrb[29].mxu1  ;;  %2413 = vmatmul.mubr.f32.gmra.mrb[38].mxu1 %v25100_v54  ;;  %v17386_v3 = vmov 9  }
 0x152   : > { %25099 = vst [vmem:[#allocation151_spill] sm:$0xff] %v18816_v40  ;;  %2418 = vmatprep.mubr.f32.mxu1 %v24876_v34  ;;  %v25106_v40 = vld [vmem:[#allocation23_spill] sm:$0xff] }
 0x153   : > { %3035 = vmatmul.mubr.f32.gmra.mrb[40].mxu0 %v25101_v38  ;;  %v18823_v22 = vpop.permute.xlu1 %10991  ;;  %17155 = vset.pattern.permute.xlu0 %v17385_v25  ;;  %v25107_v38 = vld [vmem:[#allocation34_spill] sm:$0xff]  ;;  %v25109_v25 = vld [vmem:[#allocation27_spill] sm:$0xff] }
 0x154   : > { %25103 = vst [vmem:[#allocation153_spill] sm:$0xff] %v18823_v22  ;;  %v18825_v14 = vpop.f32.mrb[30].mxu1  ;;  %3040 = vmatprep.mubr.f32.mxu0 %v24876_v34  ;;  %11311 = vperm.xlu1 %17154, %v18345_v26   ;;  %v18840_v22 = vpop.permute.xlu0 %10767 }
 0x155   : > { %25104 = vst [vmem:[#allocation154_spill] sm:$0xff] %v18825_v14  ;;  %v18829_v20 = vpop.f32.mrb[31].mxu1  ;;  %2422 = vmatmul.mubr.f32.gmra.mrb[40].mxu1 %v25106_v40  ;;  %11295 = vperm.xlu0 %17155, %v18301_v35   ;;  %v25115_v14 = vld [vmem:[#allocation36_spill] sm:$0xff] }
 0x156   : > { %25105 = vst [vmem:[#allocation155_spill] sm:$0xff] %v18829_v20  ;;  %2427 = vmatprep.mubr.f32.mxu1 %v24876_v34  ;;  %v25110_v20 = vld [vmem:[#allocation40_spill] sm:$0xff] }
 0x157   : > { %3046 = vmatmul.mubr.f32.gmra.mrb[42].mxu0 %v25107_v38  ;;  %v18835_v2 = vpop.permute.xlu1 %10999 }
 0x158   : > { %25108 = vst [vmem:[#allocation156_spill] sm:$0xff] %v18835_v2  ;;  %3051 = vmatprep.mubr.f32.mxu0 %v24876_v34  ;;  %11319 = vperm.xlu1 %17154, %v18534_v37   ;;  %v25112_v2 = vld [vmem:[#allocation32_spill] sm:$0xff]  ;;  %v18853_v40 = vpop.permute.xlu0 %10779 }
 0x159   : > { %2431 = vmatmul.mubr.f32.gmra.mrb[42].mxu1 %v25109_v25  ;;  %11307 = vperm.xlu0 %17155, %v18326_v52   ;;  %v25113_v25 = vld [vmem:[#allocation45_spill] sm:$0xff] }
 0x15a   : > { %2436 = vmatprep.mubr.f32.mxu1 %v24876_v34 }
 0x15b   : > { %3057 = vmatmul.mubr.f32.gmra.mrb[44].mxu0 %v25110_v20 }
 0x15c   : > { %3062 = vmatprep.mubr.f32.mxu0 %v24876_v34  ;;  %11327 = vperm.xlu1 %17154, %v18551_v56   ;;  %v18847_v38 = vpop.permute.xlu1 %11007  ;;  %v18868_v54 = vpop.permute.xlu0 %10787 }
 0x15d   : > { %25111 = vst [vmem:[#allocation157_spill] sm:$0xff] %v18847_v38  ;;  %2440 = vmatmul.mubr.f32.gmra.mrb[44].mxu1 %v25112_v2  ;;  %11315 = vperm.xlu0 %17155, %v18563_v33   ;;  %v25116_v38 = vld [vmem:[#allocation49_spill] sm:$0xff] }
 0x15e   : > { %2445 = vmatprep.mubr.f32.mxu1 %v24876_v34  ;;  %v25118_v2 = vld [vmem:[#allocation41_spill] sm:$0xff] }
 0x15f   : > { %3068 = vmatmul.mubr.f32.gmra.mrb[46].mxu0 %v25113_v25 }
 0x160   : > { %3073 = vmatprep.mubr.f32.mxu0 %v24876_v34  ;;  %11335 = vperm.xlu1 %17154, %v18569_v7   ;;  %v18857_v20 = vpop.permute.xlu1 %11011 }
 0x161   : > { %25114 = vst [vmem:[#allocation158_spill] sm:$0xff] %v18857_v20  ;;  %2449 = vmatmul.mubr.f32.gmra.mrb[46].mxu1 %v25115_v14  ;;  %11323 = vperm.xlu0 %17155, %v18581_v11   ;;  %v25119_v20 = vld [vmem:[#allocation53_spill] sm:$0xff]  ;;  %v25121_v14 = vld [vmem:[#allocation43_spill] sm:$0xff] }
 0x162   : > { %2454 = vmatprep.mubr.f32.mxu1 %v24876_v34 }
 0x163   : > { %3079 = vmatmul.mubr.f32.gmra.mrb[48].mxu0 %v25116_v38 }
 0x164   : > { %3084 = vmatprep.mubr.f32.mxu0 %v24876_v34  ;;  %11343 = vperm.xlu1 %17154, %v18587_v62   ;;  %v18865_v25 = vpop.permute.xlu1 %11019 }
 0x165   : > { %25117 = vst [vmem:[#allocation159_spill] sm:$0xff] %v18865_v25  ;;  %2458 = vmatmul.mubr.f32.gmra.mrb[48].mxu1 %v25118_v2  ;;  %11331 = vperm.xlu0 %17155, %v18596_v44   ;;  %v25122_v25 = vld [vmem:[#allocation55_spill] sm:$0xff]  ;;  %v18881_v2 = vpop.permute.xlu0 %10795 }
 0x166   : > { %2463 = vmatprep.mubr.f32.mxu1 %v24876_v34 }
 0x167   : > { %3090 = vmatmul.mubr.f32.gmra.mrb[50].mxu0 %v25119_v20 }
 0x168   : > { %3095 = vmatprep.mubr.f32.mxu0 %v24876_v34  ;;  %11351 = vperm.xlu1 %17154, %v18607_v57   ;;  %v18875_v38 = vpop.permute.xlu1 %11027 }
 0x169   : > { %25120 = vst [vmem:[#allocation160_spill] sm:$0xff] %v18875_v38  ;;  %2467 = vmatmul.mubr.f32.gmra.mrb[50].mxu1 %v25121_v14  ;;  %11339 = vperm.xlu0 %17155, %v18615_v31   ;;  %v25125_v38 = vld [vmem:[#allocation59_spill] sm:$0xff]  ;;  %v25127_v14 = vld [vmem:[#allocation50_spill] sm:$0xff]  ;;  %v18896_v61 = vpop.permute.xlu0 %10803 }
 0x16a   : > { %2472 = vmatprep.mubr.f32.mxu1 %v24876_v34 }
 0x16b   : > { %3101 = vmatmul.mubr.f32.gmra.mrb[52].mxu0 %v25122_v25 }
 0x16c   : > { %3106 = vmatprep.mubr.f32.mxu0 %v24876_v34  ;;  %17157 = vset.pattern.permute.xlu1 %v17386_v3  ;;  %v18884_v20 = vpop.permute.xlu1 %11035 }
 0x16d   : > { %25123 = vst [vmem:[#allocation161_spill] sm:$0xff] %v18884_v20  ;;  %2476 = vmatmul.mubr.f32.gmra.mrb[52].mxu1 %v25124_v51  ;;  %11359 = vperm.xlu1 %17157, %v18301_v35   ;;  %v25128_v20 = vld [vmem:[#allocation62_spill] sm:$0xff]  ;;  %v25130_v51 = vld [vmem:[#allocation56_spill] sm:$0xff] }
 0x16e   : > { %2481 = vmatprep.mubr.f32.mxu1 %v24876_v34  ;;  %11347 = vperm.xlu0 %17155, %v18626_v17  }
 0x16f   : > { %3112 = vmatmul.mubr.f32.gmra.mrb[54].mxu0 %v25125_v38 }
 0x170   : > { %3117 = vmatprep.mubr.f32.mxu0 %v24876_v34  ;;  %v18892_v25 = vpop.permute.xlu1 %11043 }
 0x171   : > { %25126 = vst [vmem:[#allocation162_spill] sm:$0xff] %v18892_v25  ;;  %2485 = vmatmul.mubr.f32.gmra.mrb[54].mxu1 %v25127_v14  ;;  %11363 = vperm.xlu1 %17157, %v18312_v13   ;;  %v25131_v25 = vld [vmem:[#allocation65_spill] sm:$0xff]  ;;  %v18908_v14 = vpop.permute.xlu0 %10811 }
 0x172   : > { %2490 = vmatprep.mubr.f32.mxu1 %v24876_v34  ;;  %17156 = vset.pattern.permute.xlu0 %v17386_v3  ;;  %25132 = vst [vmem:[#allocation164_spill] sm:$0xff] %v18908_v14 }
 0x173   : > { %3123 = vmatmul.mubr.f32.gmra.mrb[56].mxu0 %v25128_v20  ;;  %11355 = vperm.xlu0 %17156, %v18320_v21   ;;  %v25134_v20 = vld [vmem:[#allocation58_spill] sm:$0xff] }
 0x174   : > { %3128 = vmatprep.mubr.f32.mxu0 %v24876_v34  ;;  %v18902_v38 = vpop.permute.xlu1 %11051 }
 0x175   : > { %25129 = vst [vmem:[#allocation163_spill] sm:$0xff] %v18902_v38  ;;  %2494 = vmatmul.mubr.f32.gmra.mrb[56].mxu1 %v25130_v51  ;;  %11371 = vperm.xlu1 %17157, %v18326_v52   ;;  %v25135_v38 = vld [vmem:[#allocation67_spill] sm:$0xff]  ;;  %v18922_v51 = vpop.permute.xlu0 %10819 }
 0x176   : > { %2499 = vmatprep.mubr.f32.mxu1 %v24876_v34  ;;  %25137 = vst [vmem:[#allocation166_spill] sm:$0xff] %v18922_v51 }
 0x177   : > { %3134 = vmatmul.mubr.f32.gmra.mrb[58].mxu0 %v25131_v25  ;;  %11367 = vperm.xlu0 %17156, %v18334_v16   ;;  %v25136_v25 = vld [vmem:[#allocation63_spill] sm:$0xff] }
 0x178   : > { %3139 = vmatprep.mubr.f32.mxu0 %v24876_v34  ;;  %v18912_v3 = vpop.permute.xlu1 %11059 }
 0x179   : > { %25133 = vst [vmem:[#allocation165_spill] sm:$0xff] %v18912_v3  ;;  %2503 = vmatmul.mubr.f32.gmra.mrb[58].mxu1 %v25134_v20  ;;  %11379 = vperm.xlu1 %17157, %v18563_v33   ;;  %v25139_v3 = vld [vmem:[#allocation68_spill] sm:$0xff]  ;;  %v25140_v20 = vld [vmem:[#allocation66_spill] sm:$0xff]  ;;  %v18950_v32 = vpop.permute.xlu0 %10827 }
 0x17a   : > { %2508 = vmatprep.mubr.f32.mxu1 %v24876_v34 }
 0x17b   : > { %3145 = vmatmul.mubr.f32.gmra.mrb[60].mxu0 %v25135_v38  ;;  %11375 = vperm.xlu0 %17156, %v18345_v26   ;;  %v15350_v38 = vpack.c.bf16 %v18657_v9, %v18652_v47 }
 0x17c   : > { %3150 = vmatprep.mubr.f32.mxu0 %v24876_v34 }
 0x17d   : > { %2512 = vmatmul.mubr.f32.gmra.mrb[60].mxu1 %v25136_v25  ;;  %11387 = vperm.xlu1 %17157, %v18581_v11   ;;  %v18924_v19 = vpop.permute.xlu1 %11115  ;;  %v18935_v25 = vld [vmem:[%s24520_s1 + $0x38] sm:$0xff] }
 0x17e   : > { %25138 = vst [vmem:[#allocation167_spill] sm:$0xff] %v18924_v19  ;;  %2517 = vmatprep.mubr.f32.mxu1 %v24876_v34  ;;  %v18940_v19 = vld [vmem:[%s24520_s1 + $0xb8] sm:$0xff]  ;;  %v24681_v51 = vand.u32 4294901760, %v18935_v25 }
 0x17f   : > { %3156 = vmatmul.mubr.f32.gmra.mrb[62].mxu0 %v25139_v3  ;;  %11383 = vperm.xlu0 %17156, %v18534_v37   ;;  %v24680_v5 = vand.u32 4294901760, %v18940_v19 }
 0x180   : > { %3266 = vmatprep.mubr.f32.mxu0 %v24876_v34 }
 0x181   : > { %2521 = vmatmul.mubr.f32.gmra.mrb[62].mxu1 %v25140_v20  ;;  %11395 = vperm.xlu1 %17157, %v18596_v44   ;;  %v18944_v3 = vpop.permute.xlu1 %11123  ;;  %v15352_v20 = vpack.c.bf16 %v18678_v27, %v18673_v0 }
 0x182   : > { %25141 = vst [vmem:[#allocation168_spill] sm:$0xff] %v18944_v3  ;;  %2615 = vmatprep.mubr.f32.mxu1 %v24876_v34 }
 0x183   : > { %3268 = vmatmul.mubr.f32.vlgmr.msra.gmra.mrb[32].mxu0 %v24959_v50  ;;  %11391 = vperm.xlu0 %17156, %v18551_v56  }
 0x184   : > { %3273 = vmatprep.mubr.f32.mxu0 %v24876_v34  ;;  %15351 = vmatpush1.bf16.msra.mxu0 %v15350_v38  ;;  %v18966_v38 = vpack.c.bf16 %v24680_v5, %v24681_v51  ;;  %v18990_v51 = vpop.permute.xlu0 %10839 }
 0x185   : > { %2617 = vmatmul.mubr.f32.vlgmr.msra.gmra.mrb[32].mxu1 %v24959_v50  ;;  %11403 = vperm.xlu1 %17157, %v18615_v31  }
 0x186   : > { %15327 = vmatpush1.bf16.msra.mxu1 %v18020_v15  ;;  %2622 = vmatprep.mubr.f32.mxu1 %v24876_v34  ;;  %25142 = vst [vmem:[#allocation169_spill] sm:$0xff] %v18966_v38  ;;  %v15354_v15 = vpack.c.bf16 %v18708_v24, %v18703_v43 }
 0x187   : > { %3275 = vmatmul.mubr.f32.gmra.mrb[34].mxu0 %v24964_v8  ;;  %15329 = vmatprep.subr.bf16.mxu1 %v18022_v58  ;;  %v18968_v3 = vpop.permute.xlu1 %11127 }
 0x188   : > { %25143 = vst [vmem:[#allocation170_spill] sm:$0xff] %v18968_v3  ;;  %3280 = vmatprep.mubr.f32.mxu0 %v24876_v34  ;;  %15353 = vmatprep.subr.bf16.mxu0 %v15352_v20  ;;  %v17387_v20 = vmov 10   ;;  %v19117_v3 = vld [vmem:[%s24520_s1 + $0x138] sm:$0xff] }
 0x189   : > { %2624 = vmatmul.mubr.f32.gmra.mrb[34].mxu1 %v24964_v8  ;;  %11411 = vperm.xlu1 %17157, %v18626_v17  }
 0x18a   : > { %2629 = vmatprep.mubr.f32.mxu1 %v24876_v34  ;;  %15331 = vmatpush1.bf16.msra.mxu1 %v18039_v18  ;;  %v25145_v18 = vld [vmem:[#allocation4_spill] sm:$0xff] }
 0x18b   : > { %3282 = vmatmul.mubr.f32.gmra.mrb[36].mxu0 %v24970_v10  ;;  %15381 = vmatprep.subr.bf16.mxu1 %v18966_v38  ;;  %v18979_v58 = vpop.permute.xlu1 %11135 }
 0x18c   : > { %25144 = vst [vmem:[#allocation171_spill] sm:$0xff] %v18979_v58  ;;  %3287 = vmatprep.mubr.f32.mxu0 %v24876_v34  ;;  %15355 = vmatpush1.bf16.msra.mxu0 %v15354_v15  ;;  %v19000_v15 = vpop.permute.xlu0 %10847 }
 0x18d   : > { %2631 = vmatmul.mubr.f32.gmra.mrb[36].mxu1 %v24970_v10  ;;  %17158 = vset.pattern.permute.xlu1 %v17387_v20 }
 0x18e   : > { %2636 = vmatprep.mubr.f32.mxu1 %v24876_v34  ;;  %11467 = vperm.xlu1 %17158, %v18320_v21  }
 0x18f   : > { %3289 = vmatmul.mubr.f32.gmra.mrb[38].mxu0 %v24973_v45  ;;  %15357 = vmatprep.subr.bf16.mxu0 %v25145_v18  ;;  %v18987_v5 = vpop.permute.xlu1 %11143 }
 0x190   : > { %25146 = vst [vmem:[#allocation172_spill] sm:$0xff] %v18987_v5  ;;  %3294 = vmatprep.mubr.f32.mxu0 %v24876_v34  ;;  %11399 = vperm.xlu0 %17156, %v18569_v7  }
 0x191   : > { %2638 = vmatmul.mubr.f32.gmra.mrb[38].mxu1 %v24973_v45 }
 0x192   : > { %2643 = vmatprep.mubr.f32.mxu1 %v24876_v34  ;;  %11475 = vperm.xlu1 %17158, %v18312_v13   ;;  %v19010_v13 = vpop.permute.xlu0 %10855 }
 0x193   : > { %3296 = vmatmul.mubr.f32.gmra.mrb[40].mxu0 %v24975_v53  ;;  %v18997_v21 = vpop.permute.xlu1 %11151 }
 0x194   : > { %25147 = vst [vmem:[#allocation173_spill] sm:$0xff] %v18997_v21  ;;  %3301 = vmatprep.mubr.f32.mxu0 %v24876_v34  ;;  %11407 = vperm.xlu0 %17156, %v18587_v62  }
 0x195   : > { %2645 = vmatmul.mubr.f32.gmra.mrb[40].mxu1 %v24975_v53 }
 0x196   : > { %2650 = vmatprep.mubr.f32.mxu1 %v24876_v34  ;;  %11479 = vperm.xlu1 %17158, %v18334_v16   ;;  %v19021_v16 = vpop.permute.xlu0 %10863 }
 0x197   : > { %3303 = vmatmul.mubr.f32.gmra.mrb[42].mxu0 %v24977_v59  ;;  %v19007_v5 = vpop.permute.xlu1 %11159 }
 0x198   : > { %25148 = vst [vmem:[#allocation174_spill] sm:$0xff] %v19007_v5  ;;  %3308 = vmatprep.mubr.f32.mxu0 %v24876_v34  ;;  %11415 = vperm.xlu0 %17156, %v18607_v57   ;;  %v25159_v5 = vand.u32 4294901760, %v18935_v25 }
 0x199   : > { %2652 = vmatmul.mubr.f32.gmra.mrb[42].mxu1 %v24977_v59 }
 0x19a   : > { %2657 = vmatprep.mubr.f32.mxu1 %v24876_v34  ;;  %11487 = vperm.xlu1 %17158, %v18345_v26  }
 0x19b   : > { %3310 = vmatmul.mubr.f32.gmra.mrb[44].mxu0 %v24979_v23  ;;  %v19017_v21 = vpop.permute.xlu1 %11167 }
 0x19c   : > { %25149 = vst [vmem:[#allocation175_spill] sm:$0xff] %v19017_v21  ;;  %3315 = vmatprep.mubr.f32.mxu0 %v24876_v34  ;;  %17159 = vset.pattern.permute.xlu0 %v17387_v20  ;;  %v19031_v21 = vpop.permute.xlu0 %10871 }
 0x19d   : > { %2659 = vmatmul.mubr.f32.gmra.mrb[44].mxu1 %v24979_v23  ;;  %11471 = vperm.xlu0 %17159, %v18301_v35   ;;  %25151 = vst [vmem:[#allocation177_spill] sm:$0xff] %v19031_v21  ;;  %v25170_v21 = vld [vmem:[#allocation9_spill] sm:$0xff] }
 0x19e   : > { %2664 = vmatprep.mubr.f32.mxu1 %v24876_v34  ;;  %11495 = vperm.xlu1 %17158, %v18534_v37  }
 0x19f   : > { %3317 = vmatmul.mubr.f32.gmra.mrb[46].mxu0 %v24981_v49  ;;  %v19027_v26 = vpop.permute.xlu1 %11175 }
 0x1a0   : > { %25150 = vst [vmem:[#allocation176_spill] sm:$0xff] %v19027_v26  ;;  %3322 = vmatprep.mubr.f32.mxu0 %v24876_v34  ;;  %v19041_v37 = vpop.permute.xlu0 %10879  ;;  %v19072_v26 = vld [vmem:[%s17518_s15 + $0x8] sm:$0xff] }
 0x1a1   : > { %2666 = vmatmul.mubr.f32.gmra.mrb[46].mxu1 %v24981_v49  ;;  %11483 = vperm.xlu0 %17159, %v18326_v52   ;;  %25153 = vst [vmem:[#allocation179_spill] sm:$0xff] %v19041_v37 }
 0x1a2   : > { %2671 = vmatprep.mubr.f32.mxu1 %v24876_v34  ;;  %11503 = vperm.xlu1 %17158, %v18551_v56  }
 0x1a3   : > { %3324 = vmatmul.mubr.f32.gmra.mrb[48].mxu0 %v17711_v48 }
 0x1a4   : > { %3329 = vmatprep.mubr.f32.mxu0 %v24876_v34  ;;  %v19038_v35 = vpop.permute.xlu1 %11183  ;;  %v19051_v56 = vpop.permute.xlu0 %10887 }
 0x1a5   : > { %25152 = vst [vmem:[#allocation178_spill] sm:$0xff] %v19038_v35  ;;  %2673 = vmatmul.mubr.f32.gmra.mrb[48].mxu1 %v17711_v48  ;;  %11491 = vperm.xlu0 %17159, %v18563_v33   ;;  %25155 = vst [vmem:[#allocation181_spill] sm:$0xff] %v19051_v56 }
 0x1a6   : > { %2678 = vmatprep.mubr.f32.mxu1 %v24876_v34  ;;  %11511 = vperm.xlu1 %17158, %v18569_v7  }
 0x1a7   : > { %3331 = vmatmul.mubr.f32.gmra.mrb[50].mxu0 %v17726_v30 }
 0x1a8   : > { %3336 = vmatprep.mubr.f32.mxu0 %v24876_v34  ;;  %v19048_v52 = vpop.permute.xlu1 %11187  ;;  %v19127_v56 = vpop.permute.xlu0 %10943 }
 0x1a9   : > { %25154 = vst [vmem:[#allocation180_spill] sm:$0xff] %v19048_v52  ;;  %2680 = vmatmul.mubr.f32.gmra.mrb[50].mxu1 %v17726_v30  ;;  %11499 = vperm.xlu0 %17159, %v18581_v11   ;;  %v19122_v52 = vld [vmem:[%s24520_s1 + $0x1b8] sm:$0xff]  ;;  %25163 = vst [vmem:[#allocation187_spill] sm:$0xff] %v19127_v56 }
 0x1aa   : > { %2685 = vmatprep.mubr.f32.mxu1 %v24876_v34  ;;  %11519 = vperm.xlu1 %17158, %v18587_v62   ;;  %v24682_v62 = vmov 11  }
 0x1ab   : > { %3338 = vmatmul.mubr.f32.gmra.mrb[52].mxu0 %v17757_v41 }
 0x1ac   : > { %3343 = vmatprep.mubr.f32.mxu0 %v24876_v34  ;;  %v19058_v7 = vpop.permute.xlu1 %11195  ;;  %v19157_v14 = vpop.permute.xlu0 %10955 }
 0x1ad   : > { %25156 = vst [vmem:[#allocation182_spill] sm:$0xff] %v19058_v7  ;;  %2687 = vmatmul.mubr.f32.gmra.mrb[52].mxu1 %v17757_v41  ;;  %v19092_v7 = vld [vmem:[%s17518_s15 + $0x10] sm:$0xff]  ;;  %11507 = vperm.xlu0 %17159, %v18596_v44   ;;  %25169 = vst [vmem:[#allocation190_spill] sm:$0xff] %v19157_v14  ;;  %v25172_v14 = vand.u32 4294901760, %v19122_v52 }
 0x1ae   : > { %2692 = vmatprep.mubr.f32.mxu1 %v24876_v34  ;;  %11527 = vperm.xlu1 %17158, %v18607_v57  }
 0x1af   : > { %3345 = vmatmul.mubr.f32.gmra.mrb[54].mxu0 %v17776_v60 }
 0x1b0   : > { %3350 = vmatprep.mubr.f32.mxu0 %v24876_v34  ;;  %v19065_v20 = vpop.permute.xlu1 %11203 }
 0x1b1   : > { %25157 = vst [vmem:[#allocation183_spill] sm:$0xff] %v19065_v20  ;;  %2694 = vmatmul.mubr.f32.gmra.mrb[54].mxu1 %v17776_v60  ;;  %v25160_v20 = vand.u32 4294901760, %v18940_v19  ;;  %11515 = vperm.xlu0 %17159, %v18615_v31  }
 0x1b2   : > { %2699 = vmatprep.mubr.f32.mxu1 %v24876_v34  ;;  %17161 = vset.pattern.permute.xlu1 %v24682_v62  ;;  %v19084_v62 = vsub.f32 %v18935_v25, %v25159_v5  ;;  %v250_v5 = vld [vmem:[%s24520_s1 + $0x30] sm:$0xff]  ;;  %v19108_v25 = vld [vmem:[%s17518_s15 + $0x20] sm:$0xff] }
 0x1b3   : > { %3352 = vmatmul.mubr.f32.gmra.mrb[56].mxu0 %v17820_v29  ;;  %11535 = vperm.xlu1 %17161, %v19072_v26   ;;  %v19089_v58 = vsub.f32 %v18940_v19, %v25160_v20  ;;  %v266_v19 = vld [vmem:[%s24520_s1 + $0xb0] sm:$0xff]  ;;  %v4193_v38 = vand.u32 4294901760, %v250_v5 }
 0x1b4   : > { %3357 = vmatprep.mubr.f32.mxu0 %v24876_v34  ;;  %v19076_v57 = vpop.permute.xlu1 %11211  ;;  %v4197_v20 = vand.u32 4294901760, %v266_v19  ;;  %v25165_v56 = vand.u32 4294901760, %v19084_v62 }
 0x1b5   : > { %25158 = vst [vmem:[#allocation184_spill] sm:$0xff] %v19076_v57  ;;  %2701 = vmatmul.mubr.f32.gmra.mrb[56].mxu1 %v17820_v29  ;;  %v25166_v18 = vand.u32 4294901760, %v19089_v58 }
 0x1b6   : > { %2706 = vmatprep.mubr.f32.mxu1 %v24876_v34  ;;  %v4443_v36 = vsub.f32 %v19084_v62, %v25165_v56  ;;  %v19153_v39 = vpack.c.bf16 %v4197_v20, %v4193_v38  ;;  %v19167_v43 = vsub.f32 %v266_v19, %v4197_v20  ;;  %v25175_v19 = vld [vmem:[#allocation94_spill] sm:$0xff]  ;;  %v25181_v20 = vld [vmem:[#allocation99_spill] sm:$0xff] }
 0x1b7   : > { %3359 = vmatmul.mubr.f32.gmra.mrb[58].mxu0 %v17869_v46  ;;  %11539 = vperm.xlu1 %17161, %v19092_v7   ;;  %v4455_v37 = vsub.f32 %v19089_v58, %v25166_v18  ;;  %v25174_v18 = vld [vmem:[#allocation91_spill] sm:$0xff] }
 0x1b8   : > { %3364 = vmatprep.mubr.f32.mxu0 %v24876_v34  ;;  %v19096_v57 = vpop.permute.xlu1 %11219  ;;  %25167 = vst [vmem:[#allocation188_spill] sm:$0xff] %v19153_v39 }
 0x1b9   : > { %25161 = vst [vmem:[#allocation185_spill] sm:$0xff] %v19096_v57  ;;  %2708 = vmatmul.mubr.f32.gmra.mrb[58].mxu1 %v17869_v46  ;;  %v25164_v57 = vld [vmem:[#allocation61_spill] sm:$0xff] }
 0x1ba   : > { %2713 = vmatprep.mubr.f32.mxu1 %v24876_v34 }
 0x1bb   : > { %3366 = vmatmul.mubr.f32.gmra.mrb[60].mxu0 %v17906_v1  ;;  %11547 = vperm.xlu1 %17161, %v19108_v25  }
 0x1bc   : > { %3371 = vmatprep.mubr.f32.mxu0 %v24876_v34  ;;  %v19124_v35 = vpop.permute.xlu1 %11227 }
 0x1bd   : > { %25162 = vst [vmem:[#allocation186_spill] sm:$0xff] %v19124_v35  ;;  %2715 = vmatmul.mubr.f32.gmra.mrb[60].mxu1 %v17906_v1  ;;  %v19137_v35 = vld [vmem:[%s24520_s1 + $0x130] sm:$0xff] }
 0x1be   : > { %2720 = vmatprep.mubr.f32.mxu1 %v24876_v34  ;;  %v24687_v56 = vand.u32 4294901760, %v19137_v35 }
 0x1bf   : > { %3373 = vmatmul.mubr.f32.gmra.mrb[62].mxu0 %v25164_v57  ;;  %11555 = vperm.xlu1 %17161, %v18563_v33   ;;  %v19161_v33 = vsub.f32 %v250_v5, %v4193_v38  ;;  %v4444_v38 = vand.u32 4294901760, %v4443_v36  ;;  %v4456_v5 = vand.u32 4294901760, %v4455_v37  ;;  %v19191_v36 = vpop.permute.xlu0 %10963 }
 0x1c0   : > { %3459 = vmatprep.mubr.f32.mxu0 %v24876_v34  ;;  %v19155_v12 = vpop.permute.xlu1 %11235  ;;  %25178 = vst [vmem:[#allocation94_spill] sm:$0xff] %v19191_v36  ;;  %11523 = vperm.xlu0 %17159, %v18626_v17  }
 0x1c1   : > { %2722 = vmatmul.mubr.f32.gmra.mrb[62].mxu1 %v25164_v57  ;;  %25168 = vst [vmem:[#allocation189_spill] sm:$0xff] %v19155_v12  ;;  %v25171_v12 = vand.u32 4294901760, %v19117_v3  ;;  %v15388_v37 = vpack.c.bf16 %v4456_v5, %v4444_v38  ;;  %v25185_v5 = vld [vmem:[#allocation12_spill] sm:$0xff] }
 0x1c2   : > { %2800 = vmatprep.mubr.f32.mxu1 %v24876_v34 }
 0x1c3   : > { %3462 = vmatmul.mubr.f32.vlgmr.msra.gmra.mrb[32].mxu0 %v25170_v21  ;;  %v19174_v4 = vpack.c.bf16 %v25172_v14, %v25171_v12  ;;  %11563 = vperm.xlu1 %17161, %v18581_v11   ;;  %v25176_v12 = vand.u32 4294901760, %v19142_v42  ;;  %v25179_v14 = vld [vmem:[#allocation10_spill] sm:$0xff]  ;;  %v19207_v38 = vpop.permute.xlu0 %10971  ;;  %v25207_v21 = vld [vmem:[#allocation29_spill] sm:$0xff] }
 0x1c4   : > { %3467 = vmatprep.mubr.f32.mxu0 %v24876_v34  ;;  %15359 = vmatpush1.bf16.msra.mxu0 %v25174_v18  ;;  %25184 = vst [vmem:[#allocation99_spill] sm:$0xff] %v19207_v38  ;;  %v25197_v38 = vld [vmem:[#allocation82_spill] sm:$0xff] }
 0x1c5   : > { %25173 = vst [vmem:[#allocation191_spill] sm:$0xff] %v19174_v4  ;;  %2802 = vmatmul.mubr.f32.vlgmr.msra.gmra.mrb[32].mxu1 %v24959_v50  ;;  %15361 = vmatprep.subr.bf16.mxu0 %v25175_v19  ;;  %v19189_v11 = vpack.c.bf16 %v25176_v12, %v24687_v56  ;;  %v25182_v12 = vand.u32 4294901760, %v18382_v55  ;;  %v25183_v56 = vand.u32 4294901760, %v18387_v6  ;;  %v25188_v6 = vld [vmem:[#allocation17_spill] sm:$0xff] }
 0x1c6   : > { %15383 = vmatpush1.bf16.msra.mxu1 %v19153_v39  ;;  %2807 = vmatprep.mubr.f32.mxu1 %v24876_v34  ;;  %v25206_v39 = vld [vmem:[#allocation87_spill] sm:$0xff] }
 0x1c7   : > { %25177 = vst [vmem:[#allocation91_spill] sm:$0xff] %v19189_v11  ;;  %3470 = vmatmul.mubr.f32.gmra.mrb[34].mxu0 %v25179_v14  ;;  %15385 = vmatprep.subr.bf16.mxu1 %v19174_v4  ;;  %v19195_v24 = vpop.permute.xlu1 %11291  ;;  %v15364_v36 = vpack.c.bf16 %v25183_v56, %v25182_v12  ;;  %v19216_v55 = vpop.permute.xlu0 %10979  ;;  %v25191_v56 = vmov 11   ;;  %v19233_v12 = vld [vmem:[%s17518_s15] sm:$0xff] }
 0x1c8   : > { %25180 = vst [vmem:[#allocation192_spill] sm:$0xff] %v19195_v24  ;;  %3475 = vmatprep.mubr.f32.mxu0 %v24876_v34  ;;  %11571 = vperm.xlu1 %17161, %v18596_v44   ;;  %25187 = vst [vmem:[#allocation194_spill] sm:$0xff] %v19216_v55  ;;  %v25196_v55 = vld [vmem:[#allocation24_spill] sm:$0xff] }
 0x1c9   : > { %2809 = vmatmul.mubr.f32.gmra.mrb[34].mxu1 %v24964_v8  ;;  %15363 = vmatpush1.bf16.msra.mxu0 %v25181_v20 }
 0x1ca   : > { %2814 = vmatprep.mubr.f32.mxu1 %v24876_v34  ;;  %15387 = vmatpush1.bf16.msra.mxu1 %v19189_v11  ;;  %v25200_v11 = vld [vmem:[#allocation86_spill] sm:$0xff] }
 0x1cb   : > { %3478 = vmatmul.mubr.f32.gmra.mrb[36].mxu0 %v25185_v5  ;;  %15389 = vmatprep.subr.bf16.mxu1 %v15388_v37  ;;  %v19210_v24 = vpop.permute.xlu1 %11299  ;;  %v19252_v5 = vld [vmem:[%s17518_s15 + $0x18] sm:$0xff] }
 0x1cc   : > { %25186 = vst [vmem:[#allocation193_spill] sm:$0xff] %v19210_v24  ;;  %3483 = vmatprep.mubr.f32.mxu0 %v24876_v34  ;;  %11579 = vperm.xlu1 %17161, %v18615_v31   ;;  %v19226_v31 = vpop.permute.xlu0 %10987 }
 0x1cd   : > { %2816 = vmatmul.mubr.f32.gmra.mrb[36].mxu1 %v24970_v10  ;;  %15365 = vmatprep.subr.bf16.mxu0 %v15364_v36  ;;  %25190 = vst [vmem:[#allocation196_spill] sm:$0xff] %v19226_v31  ;;  %v25192_v36 = vld [vmem:[#allocation19_spill] sm:$0xff] }
 0x1ce   : > { %2821 = vmatprep.mubr.f32.mxu1 %v24876_v34  ;;  %17160 = vset.pattern.permute.xlu0 %v25191_v56 }
 0x1cf   : > { %3486 = vmatmul.mubr.f32.gmra.mrb[38].mxu0 %v25188_v6  ;;  %v19220_v44 = vpop.permute.xlu1 %11303  ;;  %11531 = vperm.xlu0 %17160, %v19233_v12   ;;  %v10890_v6 = vsel %vm10583_vm1, %v25197_v38, %v18950_v32 }
 0x1d0   : > { %25189 = vst [vmem:[#allocation195_spill] sm:$0xff] %v19220_v44  ;;  %3491 = vmatprep.mubr.f32.mxu0 %v24876_v34  ;;  %11587 = vperm.xlu1 %17161, %v18626_v17   ;;  %v24688_v17 = vmov 12   ;;  %v19241_v44 = vpop.permute.xlu0 %10995 }
 0x1d1   : > { %2823 = vmatmul.mubr.f32.gmra.mrb[38].mxu1 %v24973_v45  ;;  %25194 = vst [vmem:[#allocation198_spill] sm:$0xff] %v19241_v44  ;;  %v25202_v44 = vld [vmem:[#allocation75_spill] sm:$0xff] }
 0x1d2   : > { %2828 = vmatprep.mubr.f32.mxu1 %v24876_v34 }
 0x1d3   : > { %3494 = vmatmul.mubr.f32.gmra.mrb[40].mxu0 %v25192_v36  ;;  %v19230_v37 = vpop.permute.xlu1 %11311  ;;  %11543 = vperm.xlu0 %17160, %v19252_v5  }
 0x1d4   : > { %25193 = vst [vmem:[#allocation197_spill] sm:$0xff] %v19230_v37  ;;  %3499 = vmatprep.mubr.f32.mxu0 %v24876_v34  ;;  %17162 = vset.pattern.permute.xlu1 %v24688_v17  ;;  %v25195_v37 = vld [vmem:[#allocation84_spill] sm:$0xff]  ;;  %v19265_v4 = vpop.permute.xlu0 %11003 }
 0x1d5   : > { %2830 = vmatmul.mubr.f32.gmra.mrb[40].mxu1 %v24975_v53  ;;  %11643 = vperm.xlu1 %17162, %v19233_v12   ;;  %25204 = vst [vmem:[#allocation82_spill] sm:$0xff] %v19265_v4  ;;  %v19276_v53 = vld [vmem:[%s17518_s15 + $0x28] sm:$0xff] }
 0x1d6   : > { %2835 = vmatprep.mubr.f32.mxu1 %v24876_v34  ;;  %v1525_v56 = vpop.f32.mrb[0].mxu0 }
 0x1d7   : > { %v15720_v24 = vadd.f32 %v1525_v56, %v25195_v37  ;;  %v1527_v31 = vpop.f32.mrb[1].mxu0  ;;  %3502 = vmatmul.mubr.f32.gmra.mrb[42].mxu0 %v25196_v55  ;;  %v19249_v17 = vpop.permute.xlu1 %11319  ;;  %v25201_v37 = vld [vmem:[#allocation121_spill] sm:$0xff]  ;;  %v25203_v55 = vld [vmem:[#allocation95_spill] sm:$0xff]  ;;  %11551 = vperm.xlu0 %17160, %v19276_v53  }
 0x1d8   : > { %25199 = vst [vmem:[#allocation84_spill] sm:$0xff] %v19249_v17  ;;  %v15721_v14 = vadd.f32 %v1527_v31, %v25200_v11  ;;  %3507 = vmatprep.mubr.f32.mxu0 %v24876_v34  ;;  %v10715_v32 = vsel %vm10583_vm1, %v25203_v55, %v25202_v44  ;;  %v25205_v11 = vld [vmem:[#allocation115_spill] sm:$0xff]  ;;  %v25212_v44 = vld [vmem:[#allocation2_spill] sm:$0xff] }
 0x1d9   : > { %2837 = vmatmul.mubr.f32.gmra.mrb[42].mxu1 %v24977_v59  ;;  %v10730_v56 = vmul.f32 %v15720_v24, %v25201_v37  ;;  %11651 = vperm.xlu1 %17162, %v19092_v7   ;;  %v10891_v31 = vsel %vm10583_vm1, %v18840_v22, %v25205_v11 }
 0x1da   : > { %v10906_v38 = vmul.f32 %v15721_v14, %v10890_v6  ;;  %2842 = vmatprep.mubr.f32.mxu1 %v24876_v34  ;;  %v1532_v17 = vpop.f32.mrb[2].mxu0  ;;  %v25209_v14 = vld [vmem:[#allocation89_spill] sm:$0xff] }
 0x1db   : > { %v15722_v24 = vadd.f32 %v1532_v17, %v25206_v39  ;;  %v1534_v37 = vpop.f32.mrb[3].mxu0  ;;  %3510 = vmatmul.mubr.f32.gmra.mrb[44].mxu0 %v25207_v21  ;;  %v19273_v59 = vpop.permute.xlu1 %11327  ;;  %v25211_v39 = vld [vmem:[#allocation76_spill] sm:$0xff]  ;;  %v25215_v21 = vld [vmem:[#allocation83_spill] sm:$0xff] }
 0x1dc   : > { %25208 = vst [vmem:[#allocation117_spill] sm:$0xff] %v19273_v59  ;;  %v15723_v55 = vadd.f32 %v1534_v37, %v25209_v14  ;;  %3515 = vmatprep.mubr.f32.mxu0 %v24876_v34  ;;  %v19281_v6 = vadd.f32 %v10906_v38, %v10730_v56  ;;  %v10716_v17 = vsel %vm10583_vm1, %v25212_v44, %v25211_v39  ;;  %v19290_v37 = vpop.permute.xlu0 %11015  ;;  %v25214_v14 = vld [vmem:[#allocation118_spill] sm:$0xff]  ;;  %v25220_v39 = vand.u32 4294901760, %v19117_v3 }
 0x1dd   : > { %2844 = vmatmul.mubr.f32.gmra.mrb[44].mxu1 %v24979_v23  ;;  %v10731_v22 = vmul.f32 %v15722_v24, %v10715_v32  ;;  %11655 = vperm.xlu1 %17162, %v19252_v5   ;;  %25213 = vst [vmem:[#allocation121_spill] sm:$0xff] %v19290_v37  ;;  %v10892_v56 = vsel %vm10583_vm1, %v25215_v21, %v25214_v14  ;;  %v25216_v38 = vld [vmem:[#allocation90_spill] sm:$0xff]  ;;  %v19301_v23 = vld [vmem:[%s17518_s15 + $0x38] sm:$0xff]  ;;  %v25221_v21 = vand.u32 4294901760, %v19122_v52 }
 0x1de   : > { %25210 = vst [vmem:[#allocation86_spill] sm:$0xff] %v19281_v6  ;;  %v10907_v11 = vmul.f32 %v15723_v55, %v10891_v31  ;;  %2849 = vmatprep.mubr.f32.mxu1 %v24876_v34  ;;  %v1539_v59 = vpop.f32.mrb[4].mxu0  ;;  %v25217_v6 = vld [vmem:[#allocation33_spill] sm:$0xff]  ;;  %11559 = vperm.xlu0 %17160, %v19301_v23   ;;  %v19308_v44 = vsub.f32 %v19117_v3, %v25220_v39 }
 0x1df   : > { %v15724_v32 = vadd.f32 %v1539_v59, %v25216_v38  ;;  %v1541_v24 = vpop.f32.mrb[5].mxu0  ;;  %3518 = vmatmul.mubr.f32.gmra.mrb[46].mxu0 %v25217_v6  ;;  %v19298_v4 = vpop.permute.xlu1 %11335  ;;  %v25219_v31 = vld [vmem:[#allocation93_spill] sm:$0xff]  ;;  %v19313_v59 = vsub.f32 %v19122_v52, %v25221_v21 }
 0x1e0   : > { %25218 = vst [vmem:[#allocation75_spill] sm:$0xff] %v19298_v4  ;;  %v15725_v55 = vadd.f32 %v1541_v24, %v25219_v31  ;;  %3523 = vmatprep.mubr.f32.mxu0 %v24876_v34  ;;  %v19316_v14 = vadd.f32 %v10907_v11, %v10731_v22  ;;  %v25223_v24 = vld [vmem:[#allocation126_spill] sm:$0xff]  ;;  %v25225_v21 = vld [vmem:[#allocation85_spill] sm:$0xff]  ;;  %v19329_v11 = vpop.permute.xlu0 %11023 }
 0x1e1   : > { %2851 = vmatmul.mubr.f32.gmra.mrb[46].mxu1 %v24981_v49  ;;  %v10732_v38 = vmul.f32 %v15724_v32, %v10716_v17  ;;  %11663 = vperm.xlu1 %17162, %v19276_v53   ;;  %v25224_v31 = vld [vmem:[#allocation70_spill] sm:$0xff]  ;;  %v10893_v22 = vsel %vm10583_vm1, %v25225_v21, %v18990_v51  ;;  %25226 = vst [vmem:[#allocation115_spill] sm:$0xff] %v19329_v11  ;;  %v25227_v32 = vand.u32 4294901760, %v19137_v35  ;;  %v25231_v6 = vld [vmem:[#allocation37_spill] sm:$0xff]  ;;  %v19348_v21 = vld [vmem:[%s17518_s15 + $0x48] sm:$0xff] }
 0x1e2   : > { %25222 = vst [vmem:[#allocation95_spill] sm:$0xff] %v19316_v14  ;;  %v10717_v3 = vsel %vm10583_vm1, %v25224_v31, %v25223_v24  ;;  %v10908_v39 = vmul.f32 %v15725_v55, %v10892_v56  ;;  %2856 = vmatprep.mubr.f32.mxu1 %v24876_v34  ;;  %v1546_v52 = vpop.f32.mrb[6].mxu0  ;;  %v25228_v56 = vand.u32 4294901760, %v19142_v42  ;;  %v25230_v24 = vld [vmem:[#allocation96_spill] sm:$0xff]  ;;  %11567 = vperm.xlu0 %17160, %v19348_v21   ;;  %v25233_v17 = vld [vmem:[#allocation98_spill] sm:$0xff]  ;;  %v19375_v14 = vld [vmem:[%s17518_s15 + $0x58] sm:$0xff] }
 0x1e3   : > { %v19336_v4 = vsub.f32 %v19137_v35, %v25227_v32  ;;  %v15726_v31 = vadd.f32 %v1546_v52, %v25230_v24  ;;  %v1548_v37 = vpop.f32.mrb[7].mxu0  ;;  %3526 = vmatmul.mubr.f32.gmra.mrb[48].mxu0 %v25231_v6  ;;  %v19345_v51 = vpop.permute.xlu1 %11343  ;;  %v25235_v32 = vld [vmem:[#allocation77_spill] sm:$0xff]  ;;  %v25240_v52 = vld [vmem:[#allocation38_spill] sm:$0xff] }
 0x1e4   : > { %v19341_v55 = vsub.f32 %v19142_v42, %v25228_v56  ;;  %25232 = vst [vmem:[#allocation89_spill] sm:$0xff] %v19345_v51  ;;  %v15727_v11 = vadd.f32 %v1548_v37, %v25233_v17  ;;  %3531 = vmatprep.mubr.f32.mxu0 %v24876_v34  ;;  %v19353_v35 = vadd.f32 %v10908_v39, %v10732_v38  ;;  %v25236_v56 = vld [vmem:[#allocation100_spill] sm:$0xff]  ;;  %v19364_v17 = vpop.permute.xlu0 %11031  ;;  %v25239_v39 = vld [vmem:[#allocation101_spill] sm:$0xff] }
 0x1e5   : > { %2858 = vmatmul.mubr.f32.gmra.mrb[48].mxu1 %v17711_v48  ;;  %v10733_v42 = vmul.f32 %v15726_v31, %v10717_v3  ;;  %11671 = vperm.xlu1 %17162, %v19301_v23   ;;  %v10718_v24 = vsel %vm10583_vm1, %v25236_v56, %v25235_v32  ;;  %25237 = vst [vmem:[#allocation2_spill] sm:$0xff] %v19364_v17  ;;  %v25238_v38 = vld [vmem:[#allocation120_spill] sm:$0xff] }
 0x1e6   : > { %25229 = vst [vmem:[#allocation87_spill] sm:$0xff] %v19341_v55  ;;  %25234 = vst [vmem:[#allocation76_spill] sm:$0xff] %v19353_v35  ;;  %v10909_v51 = vmul.f32 %v15727_v11, %v10893_v22  ;;  %2863 = vmatprep.mubr.f32.mxu1 %v24876_v34  ;;  %v1553_v37 = vpop.f32.mrb[8].mxu0  ;;  %v10894_v3 = vsel %vm10583_vm1, %v18853_v40, %v25238_v38  ;;  %11575 = vperm.xlu0 %17160, %v19375_v14   ;;  %v25242_v22 = vld [vmem:[#allocation103_spill] sm:$0xff]  ;;  %v25244_v56 = vld [vmem:[#allocation128_spill] sm:$0xff] }
 0x1e7   : > { %v15728_v31 = vadd.f32 %v1553_v37, %v25239_v39  ;;  %v1555_v6 = vpop.f32.mrb[9].mxu0  ;;  %3534 = vmatmul.mubr.f32.gmra.mrb[50].mxu0 %v25240_v52  ;;  %v19372_v35 = vpop.permute.xlu1 %11351  ;;  %v25245_v37 = vld [vmem:[#allocation71_spill] sm:$0xff] }
 0x1e8   : > { %25241 = vst [vmem:[#allocation118_spill] sm:$0xff] %v19372_v35  ;;  %v15729_v11 = vadd.f32 %v1555_v6, %v25242_v22  ;;  %3539 = vmatprep.mubr.f32.mxu0 %v24876_v34  ;;  %v19380_v32 = vadd.f32 %v10909_v51, %v10733_v42  ;;  %v10719_v38 = vsel %vm10583_vm1, %v25245_v37, %v25244_v56  ;;  %v19389_v17 = vpop.permute.xlu0 %11039  ;;  %v25247_v6 = vld [vmem:[#allocation105_spill] sm:$0xff]  ;;  %v25248_v42 = vld [vmem:[#allocation44_spill] sm:$0xff]  ;;  %v19398_v52 = vld [vmem:[%s17518_s15 + $0x68] sm:$0xff] }
 0x1e9   : > { %2865 = vmatmul.mubr.f32.gmra.mrb[50].mxu1 %v17726_v30  ;;  %v10734_v40 = vmul.f32 %v15728_v31, %v10718_v24  ;;  %11679 = vperm.xlu1 %17162, %v19348_v21   ;;  %25246 = vst [vmem:[#allocation90_spill] sm:$0xff] %v19389_v17  ;;  %v25249_v24 = vld [vmem:[#allocation88_spill] sm:$0xff] }
 0x1ea   : > { %25243 = vst [vmem:[#allocation83_spill] sm:$0xff] %v19380_v32  ;;  %v10910_v39 = vmul.f32 %v15729_v11, %v10894_v3  ;;  %2870 = vmatprep.mubr.f32.mxu1 %v24876_v34  ;;  %v1560_v35 = vpop.f32.mrb[10].mxu0  ;;  %v10895_v31 = vsel %vm10583_vm1, %v25249_v24, %v19000_v15  ;;  %11583 = vperm.xlu0 %17160, %v19398_v52   ;;  %v25250_v3 = vld [vmem:[#allocation107_spill] sm:$0xff]  ;;  %v25254_v15 = vld [vmem:[#allocation104_spill] sm:$0xff] }
 0x1eb   : > { %v15730_v22 = vadd.f32 %v1560_v35, %v25247_v6  ;;  %v1562_v51 = vpop.f32.mrb[11].mxu0  ;;  %3542 = vmatmul.mubr.f32.gmra.mrb[52].mxu0 %v25248_v42  ;;  %v25253_v6 = vld [vmem:[#allocation78_spill] sm:$0xff] }
 0x1ec   : > { %v15731_v11 = vadd.f32 %v1562_v51, %v25250_v3  ;;  %3547 = vmatprep.mubr.f32.mxu0 %v24876_v34  ;;  %v19403_v56 = vpop.permute.xlu1 %11359  ;;  %v19405_v35 = vadd.f32 %v10910_v39, %v10734_v40  ;;  %v10720_v24 = vsel %vm10583_vm1, %v25254_v15, %v25253_v6  ;;  %v25255_v3 = vld [vmem:[#allocation122_spill] sm:$0xff]  ;;  %v25256_v39 = vld [vmem:[#allocation109_spill] sm:$0xff] }
 0x1ed   : > { %25251 = vst [vmem:[#allocation93_spill] sm:$0xff] %v19403_v56  ;;  %2872 = vmatmul.mubr.f32.gmra.mrb[52].mxu1 %v17757_v41  ;;  %v10735_v37 = vmul.f32 %v15730_v22, %v10719_v38  ;;  %11687 = vperm.xlu1 %17162, %v19375_v14   ;;  %v10896_v40 = vsel %vm10583_vm1, %v18868_v54, %v25255_v3  ;;  %v25257_v38 = vld [vmem:[#allocation46_spill] sm:$0xff]  ;;  %v19420_v22 = vpop.permute.xlu0 %11047  ;;  %v25263_v3 = vld [vmem:[#allocation72_spill] sm:$0xff] }
 0x1ee   : > { %25252 = vst [vmem:[#allocation126_spill] sm:$0xff] %v19405_v35  ;;  %v10911_v17 = vmul.f32 %v15731_v11, %v10895_v31  ;;  %2877 = vmatprep.mubr.f32.mxu1 %v24876_v34  ;;  %v1567_v51 = vpop.f32.mrb[12].mxu0  ;;  %25258 = vst [vmem:[#allocation70_spill] sm:$0xff] %v19420_v22  ;;  %v19423_v35 = vld [vmem:[%s17518_s15 + $0x78] sm:$0xff]  ;;  %v25259_v31 = vld [vmem:[#allocation111_spill] sm:$0xff] }
 0x1ef   : > { %v15732_v56 = vadd.f32 %v1567_v51, %v25256_v39  ;;  %v1569_v42 = vpop.f32.mrb[13].mxu0  ;;  %3550 = vmatmul.mubr.f32.gmra.mrb[54].mxu0 %v25257_v38  ;;  %11591 = vperm.xlu0 %17160, %v19423_v35   ;;  %v25262_v51 = vld [vmem:[#allocation135_spill] sm:$0xff] }
 0x1f0   : > { %v15733_v11 = vadd.f32 %v1569_v42, %v25259_v31  ;;  %3555 = vmatprep.mubr.f32.mxu0 %v24876_v34  ;;  %v19428_v6 = vpop.permute.xlu1 %11363  ;;  %v19430_v15 = vadd.f32 %v10911_v17, %v10735_v37  ;;  %v10721_v39 = vsel %vm10583_vm1, %v25263_v3, %v25262_v51  ;;  %v25264_v31 = vld [vmem:[#allocation113_spill] sm:$0xff]  ;;  %v25266_v17 = vld [vmem:[#allocation92_spill] sm:$0xff]  ;;  %v25267_v37 = vmov 12  }
 0x1f1   : > { %25260 = vst [vmem:[#allocation85_spill] sm:$0xff] %v19428_v6  ;;  %2879 = vmatmul.mubr.f32.gmra.mrb[54].mxu1 %v17776_v60  ;;  %v10736_v54 = vmul.f32 %v15732_v56, %v10720_v24  ;;  %11695 = vperm.xlu1 %17162, %v19398_v52   ;;  %v25265_v6 = vld [vmem:[#allocation51_spill] sm:$0xff]  ;;  %v10897_v56 = vsel %vm10583_vm1, %v25266_v17, %v19010_v13  ;;  %v25268_v24 = vld [vmem:[#allocation114_spill] sm:$0xff]  ;;  %v19456_v13 = vpop.permute.xlu0 %11055 }
 0x1f2   : > { %25261 = vst [vmem:[#allocation96_spill] sm:$0xff] %v19430_v15  ;;  %v10912_v22 = vmul.f32 %v15733_v11, %v10896_v40  ;;  %2884 = vmatprep.mubr.f32.mxu1 %v24876_v34  ;;  %v1574_v42 = vpop.f32.mrb[14].mxu0  ;;  %25271 = vst [vmem:[#allocation100_spill] sm:$0xff] %v19456_v13 }
 0x1f3   : > { %v15734_v38 = vadd.f32 %v1574_v42, %v25264_v31  ;;  %v1576_v32 = vpop.f32.mrb[15].mxu0  ;;  %3558 = vmatmul.mubr.f32.gmra.mrb[56].mxu0 %v25265_v6  ;;  %17163 = vset.pattern.permute.xlu0 %v25267_v37  ;;  %v25272_v42 = vld [vmem:[#allocation79_spill] sm:$0xff]  ;;  %v25273_v31 = vld [vmem:[#allocation108_spill] sm:$0xff] }
 0x1f4   : > { %v15735_v15 = vadd.f32 %v1576_v32, %v25268_v24  ;;  %3563 = vmatprep.mubr.f32.mxu0 %v24876_v34  ;;  %v19448_v40 = vpop.permute.xlu1 %11371  ;;  %v19450_v11 = vadd.f32 %v10912_v22, %v10736_v54  ;;  %11647 = vperm.xlu0 %17163, %v19072_v26   ;;  %v10722_v32 = vsel %vm10583_vm1, %v25273_v31, %v25272_v42  ;;  %v25274_v37 = vld [vmem:[#allocation123_spill] sm:$0xff]  ;;  %v19516_v6 = vld [vmem:[%s17518_s15 + $0x30] sm:$0xff] }
 0x1f5   : > { %25269 = vst [vmem:[#allocation98_spill] sm:$0xff] %v19448_v40  ;;  %2886 = vmatmul.mubr.f32.gmra.mrb[56].mxu1 %v17820_v29  ;;  %v10737_v51 = vmul.f32 %v15734_v38, %v10721_v39  ;;  %11703 = vperm.xlu1 %17162, %v19423_v35   ;;  %v10898_v38 = vsel %vm10583_vm1, %v18881_v2, %v25274_v37  ;;  %v25275_v39 = vld [vmem:[#allocation130_spill] sm:$0xff]  ;;  %v25280_v2 = vld [vmem:[#allocation73_spill] sm:$0xff] }
 0x1f6   : > { %25270 = vst [vmem:[#allocation77_spill] sm:$0xff] %v19450_v11  ;;  %v10913_v17 = vmul.f32 %v15735_v15, %v10897_v56  ;;  %2891 = vmatprep.mubr.f32.mxu1 %v24876_v34  ;;  %v1581_v22 = vpop.f32.mrb[16].mxu0  ;;  %v25276_v40 = vld [vmem:[#allocation54_spill] sm:$0xff]  ;;  %v25277_v15 = vld [vmem:[#allocation131_spill] sm:$0xff] }
 0x1f7   : > { %v15736_v24 = vadd.f32 %v1581_v22, %v25275_v39  ;;  %v1583_v3 = vpop.f32.mrb[17].mxu0  ;;  %3566 = vmatmul.mubr.f32.gmra.mrb[58].mxu0 %v25276_v40  ;;  %v10723_v22 = vsel %vm10583_vm1, %v25280_v2, %v18753_v63  ;;  %v25281_v39 = vand.u32 4294901760, %v19161_v33  ;;  %v25287_v40 = vand.u32 4294901760, %v19313_v59 }
 0x1f8   : > { %v15737_v56 = vadd.f32 %v1583_v3, %v25277_v15  ;;  %3571 = vmatprep.mubr.f32.mxu0 %v24876_v34  ;;  %v19474_v31 = vpop.permute.xlu1 %11379  ;;  %v19476_v54 = vadd.f32 %v10913_v17, %v10737_v51  ;;  %11659 = vperm.xlu0 %17163, %v19108_v25   ;;  %v24698_v15 = vmov 13   ;;  %v25282_v17 = vand.u32 4294901760, %v19167_v43 }
 0x1f9   : > { %25278 = vst [vmem:[#allocation120_spill] sm:$0xff] %v19474_v31  ;;  %2893 = vmatmul.mubr.f32.gmra.mrb[58].mxu1 %v17869_v46  ;;  %v10738_v37 = vmul.f32 %v15736_v24, %v10722_v32  ;;  %v4449_v3 = vsub.f32 %v19161_v33, %v25281_v39  ;;  %17165 = vset.pattern.permute.xlu1 %v24698_v15  ;;  %v25283_v24 = vld [vmem:[#allocation136_spill] sm:$0xff]  ;;  %v25286_v15 = vand.u32 4294901760, %v19308_v44  ;;  %v25289_v32 = vld [vmem:[#allocation137_spill] sm:$0xff] }
 0x1fa   : > { %25279 = vst [vmem:[#allocation101_spill] sm:$0xff] %v19476_v54  ;;  %v10914_v42 = vmul.f32 %v15737_v56, %v10898_v38  ;;  %2898 = vmatprep.mubr.f32.mxu1 %v24876_v34  ;;  %v1588_v51 = vpop.f32.mrb[18].mxu0  ;;  %v4461_v13 = vsub.f32 %v19167_v43, %v25282_v17  ;;  %11711 = vperm.xlu1 %17165, %v19072_v26   ;;  %v25284_v31 = vld [vmem:[#allocation60_spill] sm:$0xff]  ;;  %v25285_v38 = vld [vmem:[#allocation97_spill] sm:$0xff]  ;;  %v19507_v54 = vpop.permute.xlu0 %11063 }
 0x1fb   : > { %v15738_v2 = vadd.f32 %v1588_v51, %v25283_v24  ;;  %v1590_v39 = vpop.f32.mrb[19].mxu0  ;;  %3574 = vmatmul.mubr.f32.gmra.mrb[60].mxu0 %v25284_v31  ;;  %v10899_v56 = vsel %vm10583_vm1, %v25285_v38, %v19021_v16  ;;  %v4467_v17 = vsub.f32 %v19308_v44, %v25286_v15  ;;  %v4479_v63 = vsub.f32 %v19313_v59, %v25287_v40  ;;  %v25292_v16 = vld [vmem:[#allocation30_spill] sm:$0xff]  ;;  %v25293_v15 = vld [vmem:[#allocation112_spill] sm:$0xff] }
 0x1fc   : > { %25288 = vst [vmem:[#allocation103_spill] sm:$0xff] %v19507_v54  ;;  %v15739_v51 = vadd.f32 %v1590_v39, %v25289_v32  ;;  %3579 = vmatprep.mubr.f32.mxu0 %v24876_v34  ;;  %v19511_v24 = vpop.permute.xlu1 %11387  ;;  %v19513_v31 = vadd.f32 %v10914_v42, %v10738_v37  ;;  %11667 = vperm.xlu0 %17163, %v19516_v6   ;;  %v4450_v54 = vand.u32 4294901760, %v4449_v3  ;;  %v4462_v42 = vand.u32 4294901760, %v4461_v13  ;;  %v25297_v3 = vld [vmem:[#allocation139_spill] sm:$0xff] }
 0x1fd   : > { %25290 = vst [vmem:[#allocation128_spill] sm:$0xff] %v19511_v24  ;;  %v10724_v38 = vsel %vm10583_vm1, %v25293_v15, %v25292_v16  ;;  %2900 = vmatmul.mubr.f32.gmra.mrb[60].mxu1 %v17906_v1  ;;  %v10739_v40 = vmul.f32 %v15738_v2, %v10723_v22  ;;  %v25294_v37 = vand.u32 4294901760, %v19336_v4  ;;  %v25296_v15 = vld [vmem:[#allocation124_spill] sm:$0xff]  ;;  %v4468_v13 = vand.u32 4294901760, %v4467_v17  ;;  %v25303_v17 = vld [vmem:[#allocation74_spill] sm:$0xff] }
 0x1fe   : > { %25291 = vst [vmem:[#allocation71_spill] sm:$0xff] %v19513_v31  ;;  %v10915_v32 = vmul.f32 %v15739_v51, %v10899_v56  ;;  %2905 = vmatprep.mubr.f32.mxu1 %v24876_v34  ;;  %v1595_v39 = vpop.f32.mrb[20].mxu0  ;;  %11715 = vperm.xlu1 %17165, %v19092_v7   ;;  %v25295_v31 = vand.u32 4294901760, %v19341_v55  ;;  %v10900_v22 = vsel %vm10583_vm1, %v18896_v61, %v25296_v15  ;;  %v25298_v51 = vld [vmem:[#allocation64_spill] sm:$0xff]  ;;  %v4480_v11 = vand.u32 4294901760, %v4479_v63  ;;  %v19549_v61 = vld [vmem:[%s17518_s15 + $0x40] sm:$0xff]  ;;  %v19561_v15 = vpop.permute.xlu0 %11119 }
 0x1ff   : > { %v4473_v24 = vsub.f32 %v19336_v4, %v25294_v37  ;;  %v15740_v2 = vadd.f32 %v1595_v39, %v25297_v3  ;;  %v1597_v56 = vpop.f32.mrb[21].mxu0  ;;  %3582 = vmatmul.mubr.f32.gmra.mrb[62].mxu0 %v25298_v51  ;;  %v25299_v1 = vld [vmem:[#allocation140_spill] sm:$0xff]  ;;  %v25300_v37 = vand.u32 4294901760, %v18652_v47  ;;  %v25304_v47 = vand.u32 4294901760, %v18673_v0  ;;  %v25308_v0 = vld [vmem:[#allocation177_spill] sm:$0xff] }
 0x200   : > { %v4485_v16 = vsub.f32 %v19341_v55, %v25295_v31  ;;  %v15741_v46 = vadd.f32 %v1597_v56, %v25299_v1  ;;  %3660 = vmatprep.mubr.f32.mxu0 %v24876_v34  ;;  %v25301_v31 = vand.u32 4294901760, %v18657_v9  ;;  %v19544_v60 = vpop.permute.xlu1 %11395  ;;  %v19546_v41 = vadd.f32 %v10915_v32, %v10739_v40  ;;  %11675 = vperm.xlu0 %17163, %v19549_v61  }
 0x201   : > { %25302 = vst [vmem:[#allocation105_spill] sm:$0xff] %v19544_v60  ;;  %v10725_v1 = vsel %vm10583_vm1, %v25303_v17, %v18780_v28  ;;  %2907 = vmatmul.mubr.f32.gmra.mrb[62].mxu1 %v25164_v57  ;;  %v10740_v63 = vmul.f32 %v15740_v2, %v10724_v38  ;;  %v25305_v9 = vand.u32 4294901760, %v18678_v27  ;;  %v15390_v32 = vpack.c.bf16 %v4462_v42, %v4450_v54  ;;  %v25306_v28 = vld [vmem:[#allocation142_spill] sm:$0xff]  ;;  %v25307_v38 = vld [vmem:[#allocation13_spill] sm:$0xff] }
 0x202   : > { %v15366_v29 = vpack.c.bf16 %v25301_v31, %v25300_v37  ;;  %v10916_v40 = vmul.f32 %v15741_v46, %v10900_v22  ;;  %4263 = vmatprep.mubr.f32.mxu1 %v24876_v34  ;;  %v1602_v3 = vpop.f32.mrb[22].mxu0  ;;  %v4474_v56 = vand.u32 4294901760, %v4473_v24  ;;  %v4486_v37 = vand.u32 4294901760, %v4485_v16  ;;  %11723 = vperm.xlu1 %17165, %v19108_v25   ;;  %v25309_v2 = vld [vmem:[#allocation102_spill] sm:$0xff]  ;;  %v25310_v46 = vld [vmem:[#allocation143_spill] sm:$0xff] }
 0x203   : > { %v15368_v39 = vpack.c.bf16 %v25305_v9, %v25304_v47  ;;  %v15742_v31 = vadd.f32 %v1602_v3, %v25306_v28  ;;  %v1604_v17 = vpop.f32.mrb[23].mxu0  ;;  %3664 = vmatmul.mubr.f32.vlgmr.msra.gmra.mrb[32].mxu0 %v25307_v38  ;;  %v10901_v27 = vsel %vm10583_vm1, %v25309_v2, %v25308_v0  ;;  %v15392_v47 = vpack.c.bf16 %v4480_v11, %v4468_v13  ;;  %v25312_v42 = vld [vmem:[#allocation18_spill] sm:$0xff]  ;;  %v25313_v9 = vld [vmem:[#allocation132_spill] sm:$0xff]  ;;  %v25315_v28 = vld [vmem:[#allocation133_spill] sm:$0xff] }
 0x204   : > { %v15743_v22 = vadd.f32 %v1604_v17, %v25310_v46  ;;  %3669 = vmatprep.mubr.f32.mxu0 %v24876_v34  ;;  %15367 = vmatpush1.bf16.msra.mxu0 %v15366_v29  ;;  %v19573_v54 = vpop.permute.xlu1 %11403  ;;  %v19575_v24 = vadd.f32 %v10916_v40, %v10740_v63  ;;  %v25314_v3 = vand.u32 4294901760, %v25313_v9  ;;  %v25316_v60 = vand.u32 4294901760, %v25315_v28  ;;  %v25317_v0 = vld [vmem:[#allocation80_spill] sm:$0xff]  ;;  %v25319_v17 = vld [vmem:[#allocation125_spill] sm:$0xff]  ;;  %v19593_v9 = vpop.permute.xlu0 %11131 }
 0x205   : > { %25311 = vst [vmem:[#allocation88_spill] sm:$0xff] %v19573_v54  ;;  %4269 = vmatmul.mubr.f32.vlgmr.msra.gmra.mrb[64].mxu1 %v25312_v42  ;;  %v10741_v16 = vmul.f32 %v15742_v31, %v10725_v1  ;;  %15369 = vmatprep.subr.bf16.mxu0 %v15368_v39  ;;  %v25318_v11 = vld [vmem:[#allocation116_spill] sm:$0xff]  ;;  %v15394_v40 = vpack.c.bf16 %v4486_v37, %v4474_v56  ;;  %v25344_v54 = vld [vmem:[#allocation22_spill] sm:$0xff] }
 0x206   : > { %v15370_v38 = vpack.c.bf16 %v25316_v60, %v25314_v3  ;;  %v10726_v13 = vsel %vm10583_vm1, %v25318_v11, %v25317_v0  ;;  %15391 = vmatpush1.bf16.msra.mxu1 %v15390_v32  ;;  %v10917_v29 = vmul.f32 %v15743_v22, %v10901_v27  ;;  %4274 = vmatprep.mubr.f32.mxu1 %v24876_v34  ;;  %v1609_v63 = vpop.f32.mrb[24].mxu0  ;;  %v25320_v2 = vld [vmem:[#allocation164_spill] sm:$0xff]  ;;  %v25322_v60 = vld [vmem:[#allocation14_spill] sm:$0xff]  ;;  %v25323_v3 = vld [vmem:[#allocation145_spill] sm:$0xff] }
 0x207   : > { %v10902_v1 = vsel %vm10583_vm1, %v25320_v2, %v25319_v17  ;;  %v25321_v39 = vld [vmem:[#allocation144_spill] sm:$0xff]  ;;  %v1611_v46 = vpop.f32.mrb[25].mxu0  ;;  %3673 = vmatmul.mubr.f32.gmra.mrb[34].mxu0 %v25322_v60  ;;  %15393 = vmatprep.subr.bf16.mxu1 %v15392_v47  ;;  %v25326_v27 = vld [vmem:[#allocation21_spill] sm:$0xff]  ;;  %v25328_v0 = vld [vmem:[#allocation3_spill] sm:$0xff] }
 0x208   : > { %v15744_v31 = vadd.f32 %v1609_v63, %v25321_v39  ;;  %v15745_v32 = vadd.f32 %v1611_v46, %v25323_v3  ;;  %3678 = vmatprep.mubr.f32.mxu0 %v24876_v34  ;;  %11731 = vperm.xlu1 %17165, %v19516_v6   ;;  %v19598_v56 = vpop.permute.xlu1 %11411  ;;  %v19600_v37 = vadd.f32 %v10917_v29, %v10741_v16  ;;  %v25327_v28 = vld [vmem:[#allocation148_spill] sm:$0xff]  ;;  %v25329_v17 = vld [vmem:[#allocation146_spill] sm:$0xff]  ;;  %v25331_v16 = vld [vmem:[#allocation179_spill] sm:$0xff] }
 0x209   : > { %25324 = vst [vmem:[#allocation107_spill] sm:$0xff] %v19598_v56  ;;  %4280 = vmatmul.mubr.f32.gmra.mrb[66].mxu1 %v25326_v27  ;;  %15371 = vmatpush1.bf16.msra.mxu0 %v15370_v38  ;;  %v10727_v47 = vsel %vm10583_vm1, %v25328_v0, %v25327_v28  ;;  %v25330_v46 = vld [vmem:[#allocation16_spill] sm:$0xff]  ;;  %v25332_v29 = vld [vmem:[#allocation106_spill] sm:$0xff]  ;;  %v25336_v3 = vld [vmem:[#allocation25_spill] sm:$0xff] }
 0x20a   : > { %25325 = vst [vmem:[#allocation78_spill] sm:$0xff] %v19600_v37  ;;  %v10742_v22 = vmul.f32 %v15744_v31, %v10726_v13  ;;  %v10918_v11 = vmul.f32 %v15745_v32, %v10902_v1  ;;  %4285 = vmatprep.mubr.f32.mxu1 %v24876_v34  ;;  %v1616_v63 = vpop.f32.mrb[26].mxu0  ;;  %15395 = vmatpush1.bf16.msra.mxu1 %v15394_v40  ;;  %v25334_v1 = vld [vmem:[#allocation147_spill] sm:$0xff]  ;;  %v25338_v0 = vld [vmem:[#allocation4_spill] sm:$0xff] }
 0x20b   : > { %v15746_v2 = vadd.f32 %v1616_v63, %v25329_v17  ;;  %v1618_v39 = vpop.f32.mrb[27].mxu0  ;;  %3682 = vmatmul.mubr.f32.gmra.mrb[36].mxu0 %v25330_v46  ;;  %v10903_v38 = vsel %vm10583_vm1, %v25332_v29, %v25331_v16  ;;  %v25333_v13 = vpack.c.bf16 %v19089_v58, %v19084_v62  ;;  %15373 = vmatprep.subr.bf16.mxu0 %v25338_v0  ;;  %v19626_v63 = vpop.permute.xlu0 %11139  ;;  %v25339_v17 = vld [vmem:[#allocation81_spill] sm:$0xff]  ;;  %v25340_v16 = vld [vmem:[#allocation119_spill] sm:$0xff] }
 0x20c   : > { %v15747_v31 = vadd.f32 %v1618_v39, %v25334_v1  ;;  %3687 = vmatprep.mubr.f32.mxu0 %v24876_v34  ;;  %11739 = vperm.xlu1 %17165, %v19549_v61   ;;  %v19620_v40 = vadd.f32 %v10918_v11, %v10742_v22  ;;  %v10728_v39 = vsel %vm10583_vm1, %v25340_v16, %v25339_v17  ;;  %v19634_v22 = vld [vmem:[%s17518_s15 + $0x50] sm:$0xff]  ;;  %v25342_v11 = vld [vmem:[#allocation166_spill] sm:$0xff]  ;;  %v25345_v17 = vld [vmem:[#allocation151_spill] sm:$0xff] }
 0x20d   : > { %15397 = vmatprep.subr.bf16.mxu1 %v25333_v13  ;;  %4291 = vmatmul.mubr.f32.gmra.mrb[68].mxu1 %v25336_v3  ;;  %v10743_v32 = vmul.f32 %v15746_v2, %v10727_v47  ;;  %v19623_v28 = vpop.permute.xlu1 %11467  ;;  %v25341_v47 = vld [vmem:[#allocation127_spill] sm:$0xff]  ;;  %v25343_v1 = vld [vmem:[#allocation150_spill] sm:$0xff]  ;;  %v25347_v16 = vld [vmem:[#allocation28_spill] sm:$0xff] }
 0x20e   : > { %25335 = vst [vmem:[#allocation104_spill] sm:$0xff] %v19620_v40  ;;  %25337 = vst [vmem:[#allocation122_spill] sm:$0xff] %v19623_v28  ;;  %v10919_v29 = vmul.f32 %v15747_v31, %v10903_v38  ;;  %4296 = vmatprep.mubr.f32.mxu1 %v24876_v34  ;;  %v1623_v13 = vpop.f32.mrb[28].mxu0  ;;  %11683 = vperm.xlu0 %17163, %v19634_v22   ;;  %v10904_v2 = vsel %vm10583_vm1, %v25342_v11, %v25341_v47  ;;  %v25349_v3 = vld [vmem:[#allocation152_spill] sm:$0xff]  ;;  %v25350_v47 = vld [vmem:[#allocation5_spill] sm:$0xff] }
 0x20f   : > { %v15748_v0 = vadd.f32 %v1623_v13, %v25343_v1  ;;  %v1625_v56 = vpop.f32.mrb[29].mxu0  ;;  %3691 = vmatmul.mubr.f32.gmra.mrb[38].mxu0 %v25344_v54  ;;  %v10729_v13 = vsel %vm10583_vm1, %v25350_v47, %v25349_v3  ;;  %v19657_v1 = vld [vmem:[%s17518_s15 + $0x60] sm:$0xff]  ;;  %v19666_v3 = vpop.permute.xlu0 %11147 }
 0x210   : > { %v15749_v38 = vadd.f32 %v1625_v56, %v25345_v17  ;;  %3696 = vmatprep.mubr.f32.mxu0 %v24876_v34  ;;  %11747 = vperm.xlu1 %17165, %v19634_v22   ;;  %v19646_v31 = vadd.f32 %v10919_v29, %v10743_v32  ;;  %v25351_v32 = vld [vmem:[#allocation154_spill] sm:$0xff] }
 0x211   : > { %4302 = vmatmul.mubr.f32.gmra.mrb[70].mxu1 %v25347_v16  ;;  %v10744_v28 = vmul.f32 %v15748_v0, %v10728_v39  ;;  %v19649_v46 = vpop.permute.xlu1 %11475  ;;  %v25352_v39 = vld [vmem:[#allocation23_spill] sm:$0xff]  ;;  %v25353_v0 = vld [vmem:[#allocation181_spill] sm:$0xff] }
 0x212   : > { %25346 = vst [vmem:[#allocation109_spill] sm:$0xff] %v19646_v31  ;;  %25348 = vst [vmem:[#allocation111_spill] sm:$0xff] %v19649_v46  ;;  %v10920_v11 = vmul.f32 %v15749_v38, %v10904_v2  ;;  %4307 = vmatprep.mubr.f32.mxu1 %v24876_v34  ;;  %v1630_v56 = vpop.f32.mrb[30].mxu0  ;;  %11691 = vperm.xlu0 %17163, %v19657_v1   ;;  %v25354_v46 = vld [vmem:[#allocation110_spill] sm:$0xff]  ;;  %v25355_v2 = vld [vmem:[#allocation155_spill] sm:$0xff] }
 0x213   : > { %v15750_v29 = vadd.f32 %v1630_v56, %v25351_v32  ;;  %v1632_v17 = vpop.f32.mrb[31].mxu0  ;;  %3700 = vmatmul.mubr.f32.gmra.mrb[40].mxu0 %v25352_v39  ;;  %v10905_v54 = vsel %vm10583_vm1, %v25354_v46, %v25353_v0  ;;  %v25357_v16 = vld [vmem:[#allocation31_spill] sm:$0xff]  ;;  %v19678_v31 = vld [vmem:[%s17518_s15 + $0x70] sm:$0xff]  ;;  %v17391_v0 = vmov 14  }
 0x214   : > { %v15751_v38 = vadd.f32 %v1632_v17, %v25355_v2  ;;  %3705 = vmatprep.mubr.f32.mxu0 %v24876_v34  ;;  %11755 = vperm.xlu1 %17165, %v19657_v1   ;;  %v19671_v47 = vadd.f32 %v10920_v11, %v10744_v28  ;;  %v25359_v46 = vld [vmem:[#allocation27_spill] sm:$0xff]  ;;  %v25361_v11 = vld [vmem:[#allocation34_spill] sm:$0xff]  ;;  %v25364_v17 = vld [vmem:[#allocation32_spill] sm:$0xff] }
 0x215   : > { %4313 = vmatmul.mubr.f32.gmra.mrb[72].mxu1 %v25357_v16  ;;  %v10745_v56 = vmul.f32 %v15750_v29, %v10729_v13  ;;  %v19674_v32 = vpop.permute.xlu1 %11479  ;;  %v19689_v29 = vpop.permute.xlu0 %11155  ;;  %v25393_v16 = vld [vmem:[#allocation66_spill] sm:$0xff] }
 0x216   : > { %25356 = vst [vmem:[#allocation135_spill] sm:$0xff] %v19671_v47  ;;  %25358 = vst [vmem:[#allocation72_spill] sm:$0xff] %v19674_v32  ;;  %v10921_v39 = vmul.f32 %v15751_v38, %v10905_v54  ;;  %4318 = vmatprep.mubr.f32.mxu1 %v24876_v34  ;;  %11699 = vperm.xlu0 %17163, %v19678_v31   ;;  %v25363_v54 = vmov 13   ;;  %v25367_v38 = vld [vmem:[#allocation36_spill] sm:$0xff]  ;;  %v25371_v32 = vld [vmem:[#allocation41_spill] sm:$0xff] }
 0x217   : > { %3709 = vmatmul.mubr.f32.gmra.mrb[42].mxu0 %v25359_v46  ;;  %v25384_v46 = vld [vmem:[#allocation56_spill] sm:$0xff] }
 0x218   : > { %3714 = vmatprep.mubr.f32.mxu0 %v24876_v34  ;;  %11763 = vperm.xlu1 %17165, %v19678_v31   ;;  %v19684_v28 = vadd.f32 %v10921_v39, %v10745_v56  ;;  %v25365_v39 = vld [vmem:[#allocation40_spill] sm:$0xff] }
 0x219   : > { %4324 = vmatmul.mubr.f32.gmra.mrb[74].mxu1 %v25361_v11  ;;  %v19687_v13 = vpop.permute.xlu1 %11487  ;;  %v19702_v56 = vpop.permute.xlu0 %11163  ;;  %v25387_v11 = vld [vmem:[#allocation58_spill] sm:$0xff]  ;;  %v25419_v47 = vld [vmem:[#allocation48_spill] sm:$0xff] }
 0x21a   : > { %25360 = vst [vmem:[#allocation113_spill] sm:$0xff] %v19684_v28  ;;  %25362 = vst [vmem:[#allocation92_spill] sm:$0xff] %v19687_v13  ;;  %4329 = vmatprep.mubr.f32.mxu1 %v24876_v34  ;;  %17164 = vset.pattern.permute.xlu0 %v25363_v54  ;;  %v25369_v54 = vld [vmem:[#allocation45_spill] sm:$0xff] }
 0x21b   : > { %3718 = vmatmul.mubr.f32.gmra.mrb[44].mxu0 %v25364_v17  ;;  %11707 = vperm.xlu0 %17164, %v19233_v12   ;;  %25368 = vst [vmem:[#allocation79_spill] sm:$0xff] %v19702_v56  ;;  %v19988_v56 = vld [vmem:[%s24520_s1 + $0x140] sm:$0xff] }
 0x21c   : > { %3723 = vmatprep.mubr.f32.mxu0 %v24876_v34  ;;  %17166 = vset.pattern.permute.xlu1 %v17391_v0 }
 0x21d   : > { %4335 = vmatmul.mubr.f32.gmra.mrb[76].mxu1 %v25365_v39  ;;  %11819 = vperm.xlu1 %17166, %v19233_v12   ;;  %v19698_v2 = vpop.permute.xlu1 %11495 }
 0x21e   : > { %25366 = vst [vmem:[#allocation114_spill] sm:$0xff] %v19698_v2  ;;  %4340 = vmatprep.mubr.f32.mxu1 %v24876_v34  ;;  %v25372_v2 = vld [vmem:[#allocation49_spill] sm:$0xff] }
 0x21f   : > { %3727 = vmatmul.mubr.f32.gmra.mrb[46].mxu0 %v25367_v38  ;;  %11719 = vperm.xlu0 %17164, %v19252_v5   ;;  %v19716_v38 = vpop.permute.xlu0 %11171 }
 0x220   : > { %3732 = vmatprep.mubr.f32.mxu0 %v24876_v34  ;;  %25373 = vst [vmem:[#allocation123_spill] sm:$0xff] %v19716_v38 }
 0x221   : > { %4346 = vmatmul.mubr.f32.gmra.mrb[78].mxu1 %v25369_v54  ;;  %11827 = vperm.xlu1 %17166, %v19092_v7   ;;  %v19708_v13 = vpop.permute.xlu1 %11503  ;;  %v25375_v54 = vld [vmem:[#allocation43_spill] sm:$0xff] }
 0x222   : > { %25370 = vst [vmem:[#allocation108_spill] sm:$0xff] %v19708_v13  ;;  %4351 = vmatprep.mubr.f32.mxu1 %v24876_v34  ;;  %v25376_v13 = vld [vmem:[#allocation53_spill] sm:$0xff] }
 0x223   : > { %3736 = vmatmul.mubr.f32.gmra.mrb[48].mxu0 %v25371_v32  ;;  %11727 = vperm.xlu0 %17164, %v19276_v53   ;;  %v19730_v39 = vpop.permute.xlu0 %11179 }
 0x224   : > { %3741 = vmatprep.mubr.f32.mxu0 %v24876_v34 }
 0x225   : > { %4357 = vmatmul.mubr.f32.gmra.mrb[80].mxu1 %v25372_v2  ;;  %11831 = vperm.xlu1 %17166, %v19252_v5   ;;  %v19718_v17 = vpop.permute.xlu1 %11511  ;;  %v25378_v2 = vld [vmem:[#allocation47_spill] sm:$0xff] }
 0x226   : > { %25374 = vst [vmem:[#allocation130_spill] sm:$0xff] %v19718_v17  ;;  %4362 = vmatprep.mubr.f32.mxu1 %v24876_v34  ;;  %v25379_v17 = vld [vmem:[#allocation55_spill] sm:$0xff] }
 0x227   : > { %3745 = vmatmul.mubr.f32.gmra.mrb[50].mxu0 %v25375_v54  ;;  %11735 = vperm.xlu0 %17164, %v19301_v23  }
 0x228   : > { %3750 = vmatprep.mubr.f32.mxu0 %v24876_v34 }
 0x229   : > { %4368 = vmatmul.mubr.f32.gmra.mrb[82].mxu1 %v25376_v13  ;;  %11839 = vperm.xlu1 %17166, %v19276_v53   ;;  %v19726_v32 = vpop.permute.xlu1 %11519  ;;  %v25381_v13 = vld [vmem:[#allocation50_spill] sm:$0xff] }
 0x22a   : > { %25377 = vst [vmem:[#allocation131_spill] sm:$0xff] %v19726_v32  ;;  %4373 = vmatprep.mubr.f32.mxu1 %v24876_v34  ;;  %v19740_v32 = vpop.permute.xlu0 %11191 }
 0x22b   : > { %3754 = vmatmul.mubr.f32.gmra.mrb[52].mxu0 %v25378_v2  ;;  %11743 = vperm.xlu0 %17164, %v19348_v21   ;;  %v25382_v2 = vld [vmem:[#allocation59_spill] sm:$0xff] }
 0x22c   : > { %3759 = vmatprep.mubr.f32.mxu0 %v24876_v34 }
 0x22d   : > { %4379 = vmatmul.mubr.f32.gmra.mrb[84].mxu1 %v25379_v17  ;;  %11847 = vperm.xlu1 %17166, %v19301_v23   ;;  %v19736_v54 = vpop.permute.xlu1 %11527 }
 0x22e   : > { %25380 = vst [vmem:[#allocation73_spill] sm:$0xff] %v19736_v54  ;;  %4384 = vmatprep.mubr.f32.mxu1 %v24876_v34  ;;  %v19750_v54 = vpop.permute.xlu0 %11199 }
 0x22f   : > { %3763 = vmatmul.mubr.f32.gmra.mrb[54].mxu0 %v25381_v13  ;;  %11751 = vperm.xlu0 %17164, %v19375_v14   ;;  %v25385_v13 = vld [vmem:[#allocation62_spill] sm:$0xff] }
 0x230   : > { %3768 = vmatprep.mubr.f32.mxu0 %v24876_v34 }
 0x231   : > { %4390 = vmatmul.mubr.f32.gmra.mrb[86].mxu1 %v25382_v2  ;;  %11855 = vperm.xlu1 %17166, %v19348_v21  }
 0x232   : > { %4395 = vmatprep.mubr.f32.mxu1 %v24876_v34  ;;  %v19747_v17 = vpop.permute.xlu1 %11535  ;;  %v19760_v28 = vpop.permute.xlu0 %11207 }
 0x233   : > { %25383 = vst [vmem:[#allocation136_spill] sm:$0xff] %v19747_v17  ;;  %3772 = vmatmul.mubr.f32.gmra.mrb[56].mxu0 %v25384_v46  ;;  %11759 = vperm.xlu0 %17164, %v19398_v52   ;;  %v25388_v17 = vld [vmem:[#allocation65_spill] sm:$0xff] }
 0x234   : > { %3777 = vmatprep.mubr.f32.mxu0 %v24876_v34 }
 0x235   : > { %4401 = vmatmul.mubr.f32.gmra.mrb[88].mxu1 %v25385_v13  ;;  %11863 = vperm.xlu1 %17166, %v19375_v14   ;;  %v25390_v13 = vld [vmem:[#allocation63_spill] sm:$0xff] }
 0x236   : > { %4406 = vmatprep.mubr.f32.mxu1 %v24876_v34  ;;  %v19757_v2 = vpop.permute.xlu1 %11539 }
 0x237   : > { %25386 = vst [vmem:[#allocation97_spill] sm:$0xff] %v19757_v2  ;;  %3781 = vmatmul.mubr.f32.gmra.mrb[58].mxu0 %v25387_v11  ;;  %11767 = vperm.xlu0 %17164, %v19423_v35   ;;  %v19771_v2 = vpop.permute.xlu0 %11215  ;;  %v25391_v11 = vld [vmem:[#allocation67_spill] sm:$0xff] }
 0x238   : > { %3786 = vmatprep.mubr.f32.mxu0 %v24876_v34 }
 0x239   : > { %4412 = vmatmul.mubr.f32.gmra.mrb[90].mxu1 %v25388_v17  ;;  %11871 = vperm.xlu1 %17166, %v19398_v52  }
 0x23a   : > { %4417 = vmatprep.mubr.f32.mxu1 %v24876_v34  ;;  %v19767_v46 = vpop.permute.xlu1 %11547 }
 0x23b   : > { %25389 = vst [vmem:[#allocation137_spill] sm:$0xff] %v19767_v46  ;;  %3790 = vmatmul.mubr.f32.gmra.mrb[60].mxu0 %v25390_v13  ;;  %17167 = vset.pattern.permute.xlu0 %v17391_v0  ;;  %v25394_v46 = vld [vmem:[#allocation68_spill] sm:$0xff]  ;;  %v24709_v0 = vmov 15  }
 0x23c   : > { %3795 = vmatprep.mubr.f32.mxu0 %v24876_v34  ;;  %11823 = vperm.xlu0 %17167, %v19072_v26  }
 0x23d   : > { %4423 = vmatmul.mubr.f32.gmra.mrb[92].mxu1 %v25391_v11  ;;  %11879 = vperm.xlu1 %17166, %v19423_v35   ;;  %v19790_v11 = vld [vmem:[%s24520_s1 + $0x48] sm:$0xff] }
 0x23e   : > { %4428 = vmatprep.mubr.f32.mxu1 %v24876_v34  ;;  %v19777_v17 = vpop.permute.xlu1 %11555 }
 0x23f   : > { %25392 = vst [vmem:[#allocation30_spill] sm:$0xff] %v19777_v17  ;;  %3799 = vmatmul.mubr.f32.gmra.mrb[62].mxu0 %v25393_v16  ;;  %v19795_v17 = vld [vmem:[%s24520_s1 + $0xc8] sm:$0xff]  ;;  %v25397_v16 = vpack.c.bf16 %v19313_v59, %v19308_v44 }
 0x240   : > { %3893 = vmatprep.mubr.f32.mxu0 %v24876_v34 }
 0x241   : > { %4434 = vmatmul.mubr.f32.gmra.mrb[94].mxu1 %v25394_v46  ;;  %17169 = vset.pattern.permute.xlu1 %v24709_v0  ;;  %v24710_v0 = vand.u32 4294901760, %v19795_v17 }
 0x242   : > { %4544 = vmatprep.mubr.f32.mxu1 %v24876_v34  ;;  %11887 = vperm.xlu1 %17169, %v19072_v26   ;;  %v19785_v13 = vpop.permute.xlu1 %11563  ;;  %v24711_v26 = vand.u32 4294901760, %v19790_v11 }
 0x243   : > { %25395 = vst [vmem:[#allocation112_spill] sm:$0xff] %v19785_v13  ;;  %3895 = vmatmul.mubr.f32.vlgmr.msra.gmra.mrb[32].mxu0 %v24959_v50  ;;  %v25396_v13 = vpack.c.bf16 %v19167_v43, %v19161_v33 }
 0x244   : > { %3900 = vmatprep.mubr.f32.mxu0 %v24876_v34  ;;  %15375 = vmatpush1.bf16.msra.mxu0 %v25174_v18 }
 0x245   : > { %4546 = vmatmul.mubr.f32.vlgmr.msra.gmra.mrb[64].mxu1 %v24959_v50  ;;  %15377 = vmatprep.subr.bf16.mxu0 %v25175_v19  ;;  %v19822_v19 = vpack.c.bf16 %v24710_v0, %v24711_v26  ;;  %v25405_v26 = vld [vmem:[#allocation15_spill] sm:$0xff] }
 0x246   : > { %15399 = vmatpush1.bf16.msra.mxu1 %v25396_v13  ;;  %4551 = vmatprep.mubr.f32.mxu1 %v24876_v34  ;;  %v25401_v13 = vld [vmem:[#allocation169_spill] sm:$0xff] }
 0x247   : > { %3902 = vmatmul.mubr.f32.gmra.mrb[34].mxu0 %v24964_v8  ;;  %15401 = vmatprep.subr.bf16.mxu1 %v25397_v16  ;;  %v19812_v18 = vpop.permute.xlu1 %11571  ;;  %25399 = vst [vmem:[#allocation139_spill] sm:$0xff] %v19822_v19  ;;  %v25400_v16 = vpack.c.bf16 %v19341_v55, %v19336_v4  ;;  %v25438_v55 = vld [vmem:[#allocation9_spill] sm:$0xff] }
 0x248   : > { %25398 = vst [vmem:[#allocation124_spill] sm:$0xff] %v19812_v18  ;;  %3907 = vmatprep.mubr.f32.mxu0 %v24876_v34  ;;  %11891 = vperm.xlu1 %17169, %v19092_v7  }
 0x249   : > { %4553 = vmatmul.mubr.f32.gmra.mrb[66].mxu1 %v24964_v8  ;;  %15379 = vmatpush1.bf16.msra.mxu0 %v25181_v20  ;;  %v19837_v20 = vpop.permute.xlu0 %11223 }
 0x24a   : > { %4558 = vmatprep.mubr.f32.mxu1 %v24876_v34  ;;  %15403 = vmatpush1.bf16.msra.mxu1 %v25400_v16 }
 0x24b   : > { %3909 = vmatmul.mubr.f32.gmra.mrb[36].mxu0 %v24970_v10  ;;  %15405 = vmatprep.subr.bf16.mxu1 %v25401_v13  ;;  %v19830_v7 = vpop.permute.xlu1 %11579 }
 0x24c   : > { %25402 = vst [vmem:[#allocation140_spill] sm:$0xff] %v19830_v7  ;;  %3914 = vmatprep.mubr.f32.mxu0 %v24876_v34  ;;  %11899 = vperm.xlu1 %17169, %v19108_v25   ;;  %v25408_v7 = vld [vmem:[#allocation20_spill] sm:$0xff] }
 0x24d   : > { %4560 = vmatmul.mubr.f32.gmra.mrb[68].mxu1 %v24970_v10  ;;  %15429 = vmatprep.subr.bf16.mxu0 %v19822_v19  ;;  %v19847_v0 = vpop.permute.xlu0 %11231 }
 0x24e   : > { %4565 = vmatprep.mubr.f32.mxu1 %v24876_v34  ;;  %11835 = vperm.xlu0 %17167, %v19108_v25   ;;  %25404 = vst [vmem:[#allocation142_spill] sm:$0xff] %v19847_v0  ;;  %v25427_v0 = vld [vmem:[#allocation57_spill] sm:$0xff] }
 0x24f   : > { %3916 = vmatmul.mubr.f32.gmra.mrb[38].mxu0 %v24973_v45  ;;  %v19841_v16 = vpop.permute.xlu1 %11587 }
 0x250   : > { %25403 = vst [vmem:[#allocation74_spill] sm:$0xff] %v19841_v16  ;;  %3921 = vmatprep.mubr.f32.mxu0 %v24876_v34  ;;  %11907 = vperm.xlu1 %17169, %v19516_v6  }
 0x251   : > { %4567 = vmatmul.mubr.f32.gmra.mrb[70].mxu1 %v24973_v45  ;;  %v19857_v16 = vpop.permute.xlu0 %11239 }
 0x252   : > { %4572 = vmatprep.mubr.f32.mxu1 %v24876_v34  ;;  %11843 = vperm.xlu0 %17167, %v19516_v6   ;;  %25407 = vst [vmem:[#allocation102_spill] sm:$0xff] %v19857_v16  ;;  %v19895_v16 = vld [vmem:[%s17518_s15 + $0x10] sm:$0xff] }
 0x253   : > { %3923 = vmatmul.mubr.f32.gmra.mrb[40].mxu0 %v25405_v26 }
 0x254   : > { %3928 = vmatprep.mubr.f32.mxu0 %v24876_v34  ;;  %11915 = vperm.xlu1 %17169, %v19549_v61   ;;  %v19853_v25 = vpop.permute.xlu1 %11643 }
 0x255   : > { %25406 = vst [vmem:[#allocation177_spill] sm:$0xff] %v19853_v25  ;;  %4574 = vmatmul.mubr.f32.gmra.mrb[72].mxu1 %v25405_v26  ;;  %v25410_v25 = vld [vmem:[#allocation26_spill] sm:$0xff] }
 0x256   : > { %4579 = vmatprep.mubr.f32.mxu1 %v24876_v34  ;;  %11851 = vperm.xlu0 %17167, %v19549_v61  }
 0x257   : > { %3930 = vmatmul.mubr.f32.gmra.mrb[42].mxu0 %v25408_v7 }
 0x258   : > { %3935 = vmatprep.mubr.f32.mxu0 %v24876_v34  ;;  %11923 = vperm.xlu1 %17169, %v19634_v22   ;;  %v19863_v18 = vpop.permute.xlu1 %11651 }
 0x259   : > { %25409 = vst [vmem:[#allocation143_spill] sm:$0xff] %v19863_v18  ;;  %4581 = vmatmul.mubr.f32.gmra.mrb[74].mxu1 %v25408_v7 }
 0x25a   : > { %4586 = vmatprep.mubr.f32.mxu1 %v24876_v34 }
 0x25b   : > { %3937 = vmatmul.mubr.f32.gmra.mrb[44].mxu0 %v25410_v25 }
 0x25c   : > { %3942 = vmatprep.mubr.f32.mxu0 %v24876_v34  ;;  %11931 = vperm.xlu1 %17169, %v19657_v1   ;;  %v19870_v19 = vpop.permute.xlu1 %11655 }
 0x25d   : > { %25411 = vst [vmem:[#allocation132_spill] sm:$0xff] %v19870_v19  ;;  %4588 = vmatmul.mubr.f32.gmra.mrb[76].mxu1 %v25410_v25  ;;  %v24714_v19 = vmov 16  }
 0x25e   : > { %4593 = vmatprep.mubr.f32.mxu1 %v24876_v34 }
 0x25f   : > { %3944 = vmatmul.mubr.f32.gmra.mrb[46].mxu0 %v24981_v49 }
 0x260   : > { %3949 = vmatprep.mubr.f32.mxu0 %v24876_v34  ;;  %11939 = vperm.xlu1 %17169, %v19678_v31   ;;  %v19877_v18 = vpop.permute.xlu1 %11663 }
 0x261   : > { %25412 = vst [vmem:[#allocation133_spill] sm:$0xff] %v19877_v18  ;;  %4595 = vmatmul.mubr.f32.gmra.mrb[78].mxu1 %v24981_v49 }
 0x262   : > { %4600 = vmatprep.mubr.f32.mxu1 %v24876_v34 }
 0x263   : > { %3951 = vmatmul.mubr.f32.gmra.mrb[48].mxu0 %v17711_v48 }
 0x264   : > { %3956 = vmatprep.mubr.f32.mxu0 %v24876_v34  ;;  %17170 = vset.pattern.permute.xlu1 %v24714_v19  ;;  %v19884_v46 = vpop.permute.xlu1 %11671  ;;  %v25415_v19 = vld [vmem:[#allocation39_spill] sm:$0xff] }
 0x265   : > { %25413 = vst [vmem:[#allocation80_spill] sm:$0xff] %v19884_v46  ;;  %4602 = vmatmul.mubr.f32.gmra.mrb[80].mxu1 %v17711_v48  ;;  %11995 = vperm.xlu1 %17170, %v19233_v12  }
 0x266   : > { %4607 = vmatprep.mubr.f32.mxu1 %v24876_v34 }
 0x267   : > { %3958 = vmatmul.mubr.f32.gmra.mrb[50].mxu0 %v17726_v30 }
 0x268   : > { %3963 = vmatprep.mubr.f32.mxu0 %v24876_v34  ;;  %v19891_v18 = vpop.permute.xlu1 %11679 }
 0x269   : > { %25414 = vst [vmem:[#allocation116_spill] sm:$0xff] %v19891_v18  ;;  %4609 = vmatmul.mubr.f32.gmra.mrb[82].mxu1 %v17726_v30  ;;  %12003 = vperm.xlu1 %17170, %v19895_v16   ;;  %v25417_v18 = vld [vmem:[#allocation42_spill] sm:$0xff] }
 0x26a   : > { %4614 = vmatprep.mubr.f32.mxu1 %v24876_v34 }
 0x26b   : > { %3965 = vmatmul.mubr.f32.gmra.mrb[52].mxu0 %v25415_v19 }
 0x26c   : > { %3970 = vmatprep.mubr.f32.mxu0 %v24876_v34  ;;  %v19901_v12 = vpop.permute.xlu1 %11687 }
 0x26d   : > { %25416 = vst [vmem:[#allocation125_spill] sm:$0xff] %v19901_v12  ;;  %4616 = vmatmul.mubr.f32.gmra.mrb[84].mxu1 %v25415_v19  ;;  %12007 = vperm.xlu1 %17170, %v19252_v5   ;;  %v25421_v5 = vld [vmem:[#allocation52_spill] sm:$0xff] }
 0x26e   : > { %4621 = vmatprep.mubr.f32.mxu1 %v24876_v34 }
 0x26f   : > { %3972 = vmatmul.mubr.f32.gmra.mrb[54].mxu0 %v25417_v18 }
 0x270   : > { %3977 = vmatprep.mubr.f32.mxu0 %v24876_v34  ;;  %v19908_v46 = vpop.permute.xlu1 %11695 }
 0x271   : > { %25418 = vst [vmem:[#allocation164_spill] sm:$0xff] %v19908_v46  ;;  %4623 = vmatmul.mubr.f32.gmra.mrb[86].mxu1 %v25417_v18  ;;  %12015 = vperm.xlu1 %17170, %v19276_v53   ;;  %v19927_v53 = vld [vmem:[%s24520_s1 + $0x40] sm:$0xff]  ;;  %v25423_v46 = vand.u32 4294901760, %v19790_v11 }
 0x272   : > { %4628 = vmatprep.mubr.f32.mxu1 %v24876_v34  ;;  %v24715_v40 = vand.u32 4294901760, %v19927_v53 }
 0x273   : > { %3979 = vmatmul.mubr.f32.gmra.mrb[56].mxu0 %v25419_v47  ;;  %v19940_v38 = vsub.f32 %v19790_v11, %v25423_v46  ;;  %v19956_v46 = vld [vmem:[%s24520_s1 + $0x148] sm:$0xff] }
 0x274   : > { %3984 = vmatprep.mubr.f32.mxu0 %v24876_v34  ;;  %v19915_v12 = vpop.permute.xlu1 %11703  ;;  %v19961_v11 = vld [vmem:[%s24520_s1 + $0x1c8] sm:$0xff] }
 0x275   : > { %25420 = vst [vmem:[#allocation144_spill] sm:$0xff] %v19915_v12  ;;  %4630 = vmatmul.mubr.f32.gmra.mrb[88].mxu1 %v25419_v47  ;;  %12023 = vperm.xlu1 %17170, %v19301_v23   ;;  %v19932_v12 = vld [vmem:[%s24520_s1 + $0xc0] sm:$0xff]  ;;  %25424 = vst [vmem:[#allocation148_spill] sm:$0xff] %v19940_v38 }
 0x276   : > { %4635 = vmatprep.mubr.f32.mxu1 %v24876_v34 }
 0x277   : > { %3986 = vmatmul.mubr.f32.gmra.mrb[58].mxu0 %v25421_v5 }
 0x278   : > { %3991 = vmatprep.mubr.f32.mxu0 %v24876_v34 }
 0x279   : > { %4637 = vmatmul.mubr.f32.gmra.mrb[90].mxu1 %v25421_v5  ;;  %12031 = vperm.xlu1 %17170, %v19348_v21   ;;  %v19934_v23 = vpop.permute.xlu1 %11711  ;;  %v25425_v21 = vand.u32 4294901760, %v19795_v17 }
 0x27a   : > { %25422 = vst [vmem:[#allocation145_spill] sm:$0xff] %v19934_v23  ;;  %4642 = vmatprep.mubr.f32.mxu1 %v24876_v34  ;;  %v19982_v23 = vpop.permute.xlu0 %11295  ;;  %11859 = vperm.xlu0 %17167, %v19634_v22  }
 0x27b   : > { %v19945_v13 = vsub.f32 %v19795_v17, %v25425_v21  ;;  %3993 = vmatmul.mubr.f32.gmra.mrb[60].mxu0 %v25427_v0  ;;  %25432 = vst [vmem:[#allocation147_spill] sm:$0xff] %v19982_v23  ;;  %v25436_v23 = vand.u32 4294901760, %v19961_v11 }
 0x27c   : > { %3998 = vmatprep.mubr.f32.mxu0 %v24876_v34 }
 0x27d   : > { %25426 = vst [vmem:[#allocation3_spill] sm:$0xff] %v19945_v13  ;;  %4644 = vmatmul.mubr.f32.gmra.mrb[92].mxu1 %v25427_v0  ;;  %12039 = vperm.xlu1 %17170, %v19375_v14   ;;  %v19963_v17 = vpop.permute.xlu1 %11715  ;;  %v25429_v14 = vand.u32 4294901760, %v19932_v12 }
 0x27e   : > { %25428 = vst [vmem:[#allocation146_spill] sm:$0xff] %v19963_v17  ;;  %4649 = vmatprep.mubr.f32.mxu1 %v24876_v34  ;;  %v25434_v17 = vand.u32 4294901760, %v19945_v13 }
 0x27f   : > { %4000 = vmatmul.mubr.f32.gmra.mrb[62].mxu0 %v25164_v57  ;;  %v19974_v60 = vpack.c.bf16 %v25429_v14, %v24715_v40  ;;  %v19993_v14 = vld [vmem:[%s24520_s1 + $0x1c0] sm:$0xff]  ;;  %v25433_v40 = vand.u32 4294901760, %v19940_v38 }
 0x280   : > { %4078 = vmatprep.mubr.f32.mxu0 %v24876_v34  ;;  %v5733_v27 = vsub.f32 %v19945_v13, %v25434_v17  ;;  %v25439_v13 = vld [vmem:[#allocation188_spill] sm:$0xff]  ;;  %v25444_v17 = vand.u32 4294901760, %v19089_v58  ;;  %v20043_v58 = vld [vmem:[%s17518_s15 + $0x8] sm:$0xff] }
 0x281   : > { %25430 = vst [vmem:[#allocation179_spill] sm:$0xff] %v19974_v60  ;;  %4651 = vmatmul.mubr.f32.gmra.mrb[94].mxu1 %v25164_v57  ;;  %12047 = vperm.xlu1 %17170, %v19398_v52   ;;  %v19980_v21 = vpop.permute.xlu1 %11723  ;;  %v5721_v52 = vsub.f32 %v19940_v38, %v25433_v40  ;;  %v20017_v38 = vpop.permute.xlu0 %11307 }
 0x282   : > { %25431 = vst [vmem:[#allocation106_spill] sm:$0xff] %v19980_v21  ;;  %4737 = vmatprep.mubr.f32.mxu1 %v24876_v34  ;;  %v25435_v21 = vand.u32 4294901760, %v19956_v46  ;;  %25440 = vst [vmem:[#allocation81_spill] sm:$0xff] %v20017_v38  ;;  %v25446_v38 = vand.u32 4294901760, %v19988_v56  ;;  %11867 = vperm.xlu0 %17167, %v19657_v1  }
 0x283   : > { %4080 = vmatmul.mubr.f32.vlgmr.msra.gmra.mrb[32].mxu0 %v24959_v50  ;;  %v5722_v50 = vand.u32 4294901760, %v5721_v52  ;;  %v25445_v52 = vld [vmem:[#allocation10_spill] sm:$0xff] }
 0x284   : > { %4085 = vmatprep.mubr.f32.mxu0 %v24876_v34  ;;  %15431 = vmatpush1.bf16.msra.mxu0 %v19974_v60  ;;  %v20009_v37 = vpack.c.bf16 %v25436_v23, %v25435_v21  ;;  %v5734_v60 = vand.u32 4294901760, %v5733_v27  ;;  %v25441_v23 = vld [vmem:[#allocation191_spill] sm:$0xff]  ;;  %v24726_v27 = vmov 17  }
 0x285   : > { %4740 = vmatmul.mubr.f32.vlgmr.msra.gmra.mrb[64].mxu1 %v25438_v55  ;;  %12055 = vperm.xlu1 %17170, %v19423_v35   ;;  %v25443_v35 = vand.u32 4294901760, %v19084_v62  ;;  %v25447_v55 = vand.u32 4294901760, %v19993_v14  ;;  %v20039_v62 = vpop.permute.xlu0 %11315 }
 0x286   : > { %25437 = vst [vmem:[#allocation4_spill] sm:$0xff] %v20009_v37  ;;  %15407 = vmatpush1.bf16.msra.mxu1 %v25439_v13  ;;  %4745 = vmatprep.mubr.f32.mxu1 %v24876_v34  ;;  %25450 = vst [vmem:[#allocation166_spill] sm:$0xff] %v20039_v62  ;;  %v25462_v62 = vld [vmem:[#allocation167_spill] sm:$0xff] }
 0x287   : > { %4087 = vmatmul.mubr.f32.gmra.mrb[34].mxu0 %v24964_v8  ;;  %15409 = vmatprep.subr.bf16.mxu1 %v25441_v23  ;;  %v20021_v21 = vpop.permute.xlu1 %11731  ;;  %v15412_v40 = vpack.c.bf16 %v25444_v17, %v25443_v35  ;;  %v20035_v23 = vpack.c.bf16 %v25447_v55, %v25446_v38  ;;  %v25452_v55 = vld [vmem:[#allocation12_spill] sm:$0xff]  ;;  %v25455_v38 = vld [vmem:[#allocation17_spill] sm:$0xff] }
 0x288   : > { %25442 = vst [vmem:[#allocation119_spill] sm:$0xff] %v20021_v21  ;;  %4092 = vmatprep.mubr.f32.mxu0 %v24876_v34  ;;  %15433 = vmatprep.subr.bf16.mxu0 %v20009_v37  ;;  %v25449_v21 = vld [vmem:[#allocation91_spill] sm:$0xff]  ;;  %v15436_v37 = vpack.c.bf16 %v5734_v60, %v5722_v50 }
 0x289   : > { %4748 = vmatmul.mubr.f32.gmra.mrb[66].mxu1 %v25445_v52  ;;  %17173 = vset.pattern.permute.xlu1 %v24726_v27  ;;  %25448 = vst [vmem:[#allocation127_spill] sm:$0xff] %v20035_v23  ;;  %v20052_v50 = vpop.permute.xlu0 %11323  ;;  %v25458_v27 = vld [vmem:[#allocation19_spill] sm:$0xff] }
 0x28a   : > { %4753 = vmatprep.mubr.f32.mxu1 %v24876_v34  ;;  %15411 = vmatpush1.bf16.msra.mxu1 %v25449_v21  ;;  %25453 = vst [vmem:[#allocation151_spill] sm:$0xff] %v20052_v50  ;;  %v25467_v52 = vld [vmem:[#allocation187_spill] sm:$0xff] }
 0x28b   : > { %4094 = vmatmul.mubr.f32.gmra.mrb[36].mxu0 %v24970_v10  ;;  %12063 = vperm.xlu1 %17173, %v20043_v58   ;;  %v20046_v17 = vpop.permute.xlu1 %11739 }
 0x28c   : > { %25451 = vst [vmem:[#allocation150_spill] sm:$0xff] %v20046_v17  ;;  %4099 = vmatprep.mubr.f32.mxu0 %v24876_v34  ;;  %15413 = vmatprep.subr.bf16.mxu1 %v15412_v40  ;;  %v25460_v17 = vld [vmem:[#allocation129_spill] sm:$0xff] }
 0x28d   : > { %4756 = vmatmul.mubr.f32.gmra.mrb[68].mxu1 %v25452_v55  ;;  %15435 = vmatpush1.bf16.msra.mxu0 %v20035_v23  ;;  %v20062_v40 = vpop.permute.xlu0 %11331  ;;  %v25464_v55 = vmov 15   ;;  %v25465_v23 = vld [vmem:[#allocation24_spill] sm:$0xff] }
 0x28e   : > { %4761 = vmatprep.mubr.f32.mxu1 %v24876_v34  ;;  %15437 = vmatprep.subr.bf16.mxu0 %v15436_v37  ;;  %25456 = vst [vmem:[#allocation5_spill] sm:$0xff] %v20062_v40  ;;  %v20066_v37 = vld [vmem:[%s17518_s15 + $0x20] sm:$0xff] }
 0x28f   : > { %4101 = vmatmul.mubr.f32.gmra.mrb[38].mxu0 %v24973_v45  ;;  %12067 = vperm.xlu1 %17173, %v19895_v16   ;;  %v20056_v60 = vpop.permute.xlu1 %11747 }
 0x290   : > { %25454 = vst [vmem:[#allocation152_spill] sm:$0xff] %v20056_v60  ;;  %4106 = vmatprep.mubr.f32.mxu0 %v24876_v34  ;;  %11875 = vperm.xlu0 %17167, %v19678_v31   ;;  %v25459_v60 = vld [vmem:[#allocation82_spill] sm:$0xff] }
 0x291   : > { %4764 = vmatmul.mubr.f32.gmra.mrb[70].mxu1 %v25455_v38  ;;  %v11066_v40 = vsel %vm10583_vm1, %v25460_v17, %v25459_v60  ;;  %v20079_v50 = vpop.permute.xlu0 %11339 }
 0x292   : > { %4769 = vmatprep.mubr.f32.mxu1 %v24876_v34  ;;  %25461 = vst [vmem:[#allocation181_spill] sm:$0xff] %v20079_v50  ;;  %v20093_v50 = vld [vmem:[%s17518_s15] sm:$0xff] }
 0x293   : > { %4108 = vmatmul.mubr.f32.gmra.mrb[40].mxu0 %v25405_v26  ;;  %12075 = vperm.xlu1 %17173, %v20066_v37   ;;  %v20069_v35 = vpop.permute.xlu1 %11755 }
 0x294   : > { %25457 = vst [vmem:[#allocation154_spill] sm:$0xff] %v20069_v35  ;;  %4113 = vmatprep.mubr.f32.mxu0 %v24876_v34  ;;  %v11242_v35 = vsel %vm10583_vm1, %v25462_v62, %v19730_v39  ;;  %17168 = vset.pattern.permute.xlu0 %v25464_v55  ;;  %v25466_v62 = vld [vmem:[#allocation157_spill] sm:$0xff]  ;;  %v25469_v55 = vld [vmem:[#allocation86_spill] sm:$0xff] }
 0x295   : > { %4772 = vmatmul.mubr.f32.gmra.mrb[72].mxu1 %v25458_v27  ;;  %11883 = vperm.xlu0 %17168, %v20093_v50  }
 0x296   : > { %4777 = vmatprep.mubr.f32.mxu1 %v24876_v34 }
 0x297   : > { %4115 = vmatmul.mubr.f32.gmra.mrb[42].mxu0 %v25408_v7  ;;  %12083 = vperm.xlu1 %17173, %v19516_v6   ;;  %v20087_v38 = vpop.permute.xlu1 %11763  ;;  %v11067_v6 = vsel %vm10583_vm1, %v25467_v52, %v25466_v62  ;;  %v25473_v7 = vld [vmem:[#allocation29_spill] sm:$0xff] }
 0x298   : > { %25463 = vst [vmem:[#allocation110_spill] sm:$0xff] %v20087_v38  ;;  %v2803_v27 = vpop.f32.mrb[32].mxu1  ;;  %4120 = vmatprep.mubr.f32.mxu0 %v24876_v34  ;;  %v20101_v38 = vpop.permute.xlu0 %11347 }
 0x299   : > { %v11082_v17 = vmul.f32 %v11066_v40, %v2803_v27  ;;  %v2805_v60 = vpop.f32.mrb[33].mxu1  ;;  %4780 = vmatmul.mubr.f32.gmra.mrb[74].mxu1 %v25465_v23  ;;  %25468 = vst [vmem:[#allocation155_spill] sm:$0xff] %v20101_v38  ;;  %v25470_v40 = vld [vmem:[#allocation178_spill] sm:$0xff] }
 0x29a   : > { %v11258_v39 = vmul.f32 %v11242_v35, %v2805_v60  ;;  %4785 = vmatprep.mubr.f32.mxu1 %v24876_v34  ;;  %v11243_v23 = vsel %vm10583_vm1, %v19561_v15, %v25470_v40  ;;  %v25475_v40 = vld [vmem:[#allocation134_spill] sm:$0xff] }
 0x29b   : > { %v11098_v27 = vadd.f32 %v11082_v17, %v25469_v55  ;;  %4122 = vmatmul.mubr.f32.gmra.mrb[44].mxu0 %v25410_v25  ;;  %12091 = vperm.xlu1 %17173, %v19549_v61   ;;  %v20117_v17 = vld [vmem:[%s17518_s15 + $0x18] sm:$0xff]  ;;  %v25474_v55 = vld [vmem:[#allocation158_spill] sm:$0xff] }
 0x29c   : > { %v2810_v35 = vpop.f32.mrb[34].mxu1  ;;  %4127 = vmatprep.mubr.f32.mxu0 %v24876_v34  ;;  %v20111_v60 = vpop.permute.xlu1 %11819  ;;  %11895 = vperm.xlu0 %17168, %v20117_v17   ;;  %v11068_v61 = vsel %vm10583_vm1, %v25475_v40, %v25474_v55 }
 0x29d   : > { %25471 = vst [vmem:[#allocation39_spill] sm:$0xff] %v20111_v60  ;;  %v20113_v52 = vadd.f32 %v11258_v39, %v11098_v27  ;;  %v11083_v62 = vmul.f32 %v11067_v6, %v2810_v35  ;;  %v2812_v38 = vpop.f32.mrb[35].mxu1  ;;  %4788 = vmatmul.mubr.f32.gmra.mrb[76].mxu1 %v25473_v7  ;;  %v20125_v60 = vpop.permute.xlu0 %11355  ;;  %v25477_v39 = vld [vmem:[#allocation95_spill] sm:$0xff]  ;;  %v25478_v27 = vld [vmem:[#allocation180_spill] sm:$0xff] }
 0x29e   : > { %v11259_v15 = vmul.f32 %v11243_v23, %v2812_v38  ;;  %4793 = vmatprep.mubr.f32.mxu1 %v24876_v34  ;;  %25476 = vst [vmem:[#allocation188_spill] sm:$0xff] %v20125_v60  ;;  %v25479_v35 = vld [vmem:[#allocation168_spill] sm:$0xff]  ;;  %v25482_v60 = vld [vmem:[#allocation33_spill] sm:$0xff] }
 0x29f   : > { %25472 = vst [vmem:[#allocation42_spill] sm:$0xff] %v20113_v52  ;;  %v11099_v6 = vadd.f32 %v11083_v62, %v25477_v39  ;;  %v11244_v7 = vsel %vm10583_vm1, %v25479_v35, %v25478_v27  ;;  %4129 = vmatmul.mubr.f32.gmra.mrb[46].mxu0 %v24981_v49  ;;  %12099 = vperm.xlu1 %17173, %v19634_v22   ;;  %v20141_v62 = vld [vmem:[%s17518_s15 + $0x28] sm:$0xff]  ;;  %v25483_v27 = vld [vmem:[#allocation121_spill] sm:$0xff]  ;;  %v25484_v35 = vld [vmem:[#allocation138_spill] sm:$0xff] }
 0x2a0   : > { %v2817_v23 = vpop.f32.mrb[36].mxu1  ;;  %4134 = vmatprep.mubr.f32.mxu0 %v24876_v34  ;;  %v20135_v38 = vpop.permute.xlu1 %11827  ;;  %11903 = vperm.xlu0 %17168, %v20141_v62   ;;  %v11069_v22 = vsel %vm10583_vm1, %v25484_v35, %v25483_v27 }
 0x2a1   : > { %25480 = vst [vmem:[#allocation91_spill] sm:$0xff] %v20135_v38  ;;  %v20137_v55 = vadd.f32 %v11259_v15, %v11099_v6  ;;  %v11084_v40 = vmul.f32 %v11068_v61, %v2817_v23  ;;  %v2819_v52 = vpop.f32.mrb[37].mxu1  ;;  %4796 = vmatmul.mubr.f32.gmra.mrb[78].mxu1 %v25482_v60  ;;  %v20149_v38 = vpop.permute.xlu0 %11367  ;;  %v25486_v15 = vld [vmem:[#allocation76_spill] sm:$0xff]  ;;  %v25487_v6 = vld [vmem:[#allocation170_spill] sm:$0xff]  ;;  %v25490_v60 = vld [vmem:[#allocation37_spill] sm:$0xff] }
 0x2a2   : > { %v11260_v39 = vmul.f32 %v11244_v7, %v2819_v52  ;;  %4801 = vmatprep.mubr.f32.mxu1 %v24876_v34  ;;  %25485 = vst [vmem:[#allocation129_spill] sm:$0xff] %v20149_v38  ;;  %v11245_v23 = vsel %vm10583_vm1, %v25487_v6, %v19740_v32  ;;  %v25492_v6 = vld [vmem:[#allocation190_spill] sm:$0xff] }
 0x2a3   : > { %25481 = vst [vmem:[#allocation82_spill] sm:$0xff] %v20137_v55  ;;  %v11100_v61 = vadd.f32 %v11084_v40, %v25486_v15  ;;  %4136 = vmatmul.mubr.f32.gmra.mrb[48].mxu0 %v17711_v48  ;;  %12107 = vperm.xlu1 %17173, %v19657_v1   ;;  %v20165_v40 = vld [vmem:[%s17518_s15 + $0x38] sm:$0xff]  ;;  %v25491_v15 = vld [vmem:[#allocation159_spill] sm:$0xff]  ;;  %v25544_v55 = vmov 16  }
 0x2a4   : > { %v2824_v7 = vpop.f32.mrb[38].mxu1  ;;  %4141 = vmatprep.mubr.f32.mxu0 %v24876_v34  ;;  %v20159_v52 = vpop.permute.xlu1 %11831  ;;  %11911 = vperm.xlu0 %17168, %v20165_v40   ;;  %v11070_v1 = vsel %vm10583_vm1, %v25492_v6, %v25491_v15 }
 0x2a5   : > { %25488 = vst [vmem:[#allocation167_spill] sm:$0xff] %v20159_v52  ;;  %v20161_v27 = vadd.f32 %v11260_v39, %v11100_v61  ;;  %v11085_v35 = vmul.f32 %v11069_v22, %v2824_v7  ;;  %v2826_v38 = vpop.f32.mrb[39].mxu1  ;;  %4804 = vmatmul.mubr.f32.gmra.mrb[80].mxu1 %v25490_v60  ;;  %v20173_v52 = vpop.permute.xlu0 %11375  ;;  %v25494_v39 = vld [vmem:[#allocation83_spill] sm:$0xff]  ;;  %v25495_v61 = vld [vmem:[#allocation182_spill] sm:$0xff] }
 0x2a6   : > { %v11261_v32 = vmul.f32 %v11245_v23, %v2826_v38  ;;  %4809 = vmatprep.mubr.f32.mxu1 %v24876_v34  ;;  %25493 = vst [vmem:[#allocation187_spill] sm:$0xff] %v20173_v52  ;;  %v11246_v7 = vsel %vm10583_vm1, %v19593_v9, %v25495_v61  ;;  %v25498_v60 = vld [vmem:[#allocation38_spill] sm:$0xff]  ;;  %v25500_v61 = vld [vmem:[#allocation141_spill] sm:$0xff] }
 0x2a7   : > { %25489 = vst [vmem:[#allocation157_spill] sm:$0xff] %v20161_v27  ;;  %v11101_v22 = vadd.f32 %v11085_v35, %v25494_v39  ;;  %4143 = vmatmul.mubr.f32.gmra.mrb[50].mxu0 %v17726_v30  ;;  %12115 = vperm.xlu1 %17173, %v19678_v31   ;;  %v20189_v35 = vld [vmem:[%s17518_s15 + $0x48] sm:$0xff]  ;;  %v25520_v27 = vld [vmem:[#allocation69_spill] sm:$0xff] }
 0x2a8   : > { %v2831_v38 = vpop.f32.mrb[40].mxu1  ;;  %4148 = vmatprep.mubr.f32.mxu0 %v24876_v34  ;;  %v20183_v23 = vpop.permute.xlu1 %11839  ;;  %11919 = vperm.xlu0 %17168, %v20189_v35   ;;  %v25499_v39 = vld [vmem:[#allocation115_spill] sm:$0xff] }
 0x2a9   : > { %25496 = vst [vmem:[#allocation86_spill] sm:$0xff] %v20183_v23  ;;  %v20185_v15 = vadd.f32 %v11261_v32, %v11101_v22  ;;  %v11086_v6 = vmul.f32 %v11070_v1, %v2831_v38  ;;  %v2833_v52 = vpop.f32.mrb[41].mxu1  ;;  %4812 = vmatmul.mubr.f32.gmra.mrb[82].mxu1 %v25498_v60  ;;  %v11071_v31 = vsel %vm10583_vm1, %v25500_v61, %v25499_v39  ;;  %v20197_v23 = vpop.permute.xlu0 %11383  ;;  %v25502_v32 = vld [vmem:[#allocation126_spill] sm:$0xff]  ;;  %v25503_v22 = vld [vmem:[#allocation171_spill] sm:$0xff]  ;;  %v20214_v60 = vld [vmem:[%s17518_s15 + $0x58] sm:$0xff] }
 0x2aa   : > { %v11262_v9 = vmul.f32 %v11246_v7, %v2833_v52  ;;  %4817 = vmatprep.mubr.f32.mxu1 %v24876_v34  ;;  %25501 = vst [vmem:[#allocation158_spill] sm:$0xff] %v20197_v23  ;;  %v11247_v38 = vsel %vm10583_vm1, %v25503_v22, %v19750_v54  ;;  %v24730_v52 = vmov 18   ;;  %v25506_v23 = vld [vmem:[#allocation44_spill] sm:$0xff] }
 0x2ab   : > { %25497 = vst [vmem:[#allocation178_spill] sm:$0xff] %v20185_v15  ;;  %v11102_v1 = vadd.f32 %v11086_v6, %v25502_v32  ;;  %4150 = vmatmul.mubr.f32.gmra.mrb[52].mxu0 %v25415_v19  ;;  %17174 = vset.pattern.permute.xlu1 %v24730_v52  ;;  %v25507_v22 = vld [vmem:[#allocation160_spill] sm:$0xff]  ;;  %v25508_v52 = vld [vmem:[#allocation94_spill] sm:$0xff] }
 0x2ac   : > { %v2838_v7 = vpop.f32.mrb[42].mxu1  ;;  %4155 = vmatprep.mubr.f32.mxu0 %v24876_v34  ;;  %12171 = vperm.xlu1 %17174, %v20093_v50   ;;  %v20208_v39 = vpop.permute.xlu1 %11847  ;;  %v11072_v15 = vsel %vm10583_vm1, %v25508_v52, %v25507_v22  ;;  %v25514_v22 = vand.u32 4294901760, %v19932_v12 }
 0x2ad   : > { %25504 = vst [vmem:[#allocation134_spill] sm:$0xff] %v20208_v39  ;;  %v20210_v61 = vadd.f32 %v11262_v9, %v11102_v1  ;;  %v11087_v6 = vmul.f32 %v11071_v31, %v2838_v7  ;;  %v2840_v32 = vpop.f32.mrb[43].mxu1  ;;  %4820 = vmatmul.mubr.f32.gmra.mrb[84].mxu1 %v25506_v23  ;;  %11927 = vperm.xlu0 %17168, %v20214_v60   ;;  %v20222_v39 = vpop.permute.xlu0 %11391  ;;  %v25510_v9 = vld [vmem:[#allocation96_spill] sm:$0xff]  ;;  %v25511_v1 = vld [vmem:[#allocation183_spill] sm:$0xff]  ;;  %v25518_v23 = vld [vmem:[#allocation46_spill] sm:$0xff] }
 0x2ae   : > { %v11263_v54 = vmul.f32 %v11247_v38, %v2840_v32  ;;  %4825 = vmatprep.mubr.f32.mxu1 %v24876_v34  ;;  %25509 = vst [vmem:[#allocation180_spill] sm:$0xff] %v20222_v39  ;;  %v11248_v7 = vsel %vm10583_vm1, %v19626_v63, %v25511_v1  ;;  %v25512_v32 = vand.u32 4294901760, %v19927_v53  ;;  %v20239_v39 = vsub.f32 %v19932_v12, %v25514_v22  ;;  %v25521_v22 = vld [vmem:[#allocation77_spill] sm:$0xff] }
 0x2af   : > { %25505 = vst [vmem:[#allocation95_spill] sm:$0xff] %v20210_v61  ;;  %v11103_v31 = vadd.f32 %v11087_v6, %v25510_v9  ;;  %4157 = vmatmul.mubr.f32.gmra.mrb[54].mxu0 %v25417_v18  ;;  %v20248_v61 = vld [vmem:[%s17518_s15 + $0x68] sm:$0xff] }
 0x2b0   : > { %v2845_v38 = vpop.f32.mrb[44].mxu1  ;;  %4162 = vmatprep.mubr.f32.mxu0 %v24876_v34  ;;  %v20234_v52 = vsub.f32 %v19927_v53, %v25512_v32  ;;  %25515 = vst [vmem:[#allocation121_spill] sm:$0xff] %v20239_v39  ;;  %12179 = vperm.xlu1 %17174, %v19895_v16   ;;  %v20242_v6 = vpop.permute.xlu1 %11855  ;;  %v25519_v32 = vld [vmem:[#allocation2_spill] sm:$0xff] }
 0x2b1   : > { %25516 = vst [vmem:[#allocation138_spill] sm:$0xff] %v20242_v6  ;;  %v20244_v63 = vadd.f32 %v11263_v54, %v11103_v31  ;;  %v11088_v9 = vmul.f32 %v11072_v15, %v2845_v38  ;;  %v2847_v1 = vpop.f32.mrb[45].mxu1  ;;  %4828 = vmatmul.mubr.f32.gmra.mrb[86].mxu1 %v25518_v23  ;;  %11935 = vperm.xlu0 %17168, %v20248_v61   ;;  %v25522_v54 = vld [vmem:[#allocation172_spill] sm:$0xff]  ;;  %v20262_v31 = vpop.permute.xlu0 %11399  ;;  %v25524_v38 = vand.u32 4294901760, %v19956_v46  ;;  %v25529_v23 = vand.u32 4294901760, %v19961_v11 }
 0x2b2   : > { %25513 = vst [vmem:[#allocation168_spill] sm:$0xff] %v20234_v52  ;;  %v11264_v53 = vmul.f32 %v11248_v7, %v2847_v1  ;;  %v11073_v12 = vsel %vm10583_vm1, %v25520_v27, %v25519_v32  ;;  %4833 = vmatprep.mubr.f32.mxu1 %v24876_v34  ;;  %v11249_v15 = vsel %vm10583_vm1, %v25522_v54, %v19760_v28  ;;  %25523 = vst [vmem:[#allocation170_spill] sm:$0xff] %v20262_v31  ;;  %v25528_v31 = vld [vmem:[#allocation51_spill] sm:$0xff] }
 0x2b3   : > { %25517 = vst [vmem:[#allocation76_spill] sm:$0xff] %v20244_v63  ;;  %v11104_v6 = vadd.f32 %v11088_v9, %v25521_v22  ;;  %4164 = vmatmul.mubr.f32.gmra.mrb[56].mxu0 %v25419_v47  ;;  %v20268_v27 = vsub.f32 %v19956_v46, %v25524_v38  ;;  %v20281_v63 = vsub.f32 %v19961_v11, %v25529_v23  ;;  %v20284_v46 = vld [vmem:[%s17518_s15 + $0x78] sm:$0xff]  ;;  %v25532_v1 = vld [vmem:[#allocation99_spill] sm:$0xff]  ;;  %v25535_v23 = vand.u32 4294901760, %v19988_v56 }
 0x2b4   : > { %v2852_v7 = vpop.f32.mrb[46].mxu1  ;;  %4169 = vmatprep.mubr.f32.mxu0 %v24876_v34  ;;  %12183 = vperm.xlu1 %17174, %v20117_v17   ;;  %v20273_v32 = vpop.permute.xlu1 %11863  ;;  %v25531_v9 = vld [vmem:[#allocation161_spill] sm:$0xff]  ;;  %v25546_v47 = vld [vmem:[#allocation35_spill] sm:$0xff] }
 0x2b5   : > { %25525 = vst [vmem:[#allocation159_spill] sm:$0xff] %v20268_v27  ;;  %25526 = vst [vmem:[#allocation190_spill] sm:$0xff] %v20273_v32  ;;  %v20275_v28 = vadd.f32 %v11264_v53, %v11104_v6  ;;  %v11089_v22 = vmul.f32 %v11073_v12, %v2852_v7  ;;  %v2854_v54 = vpop.f32.mrb[47].mxu1  ;;  %4836 = vmatmul.mubr.f32.gmra.mrb[88].mxu1 %v25528_v31  ;;  %11943 = vperm.xlu0 %17168, %v20284_v46   ;;  %v25533_v53 = vld [vmem:[#allocation101_spill] sm:$0xff]  ;;  %v25534_v7 = vld [vmem:[#allocation184_spill] sm:$0xff] }
 0x2b6   : > { %25530 = vst [vmem:[#allocation182_spill] sm:$0xff] %v20281_v63  ;;  %v11265_v38 = vmul.f32 %v11249_v15, %v2854_v54  ;;  %v11074_v6 = vsel %vm10583_vm1, %v25532_v1, %v25531_v9  ;;  %4841 = vmatprep.mubr.f32.mxu1 %v24876_v34  ;;  %v11250_v11 = vsel %vm10583_vm1, %v19666_v3, %v25534_v7  ;;  %v25537_v9 = vand.u32 4294901760, %v19993_v14 }
 0x2b7   : > { %25527 = vst [vmem:[#allocation83_spill] sm:$0xff] %v20275_v28  ;;  %v11105_v12 = vadd.f32 %v11089_v22, %v25533_v53  ;;  %4171 = vmatmul.mubr.f32.gmra.mrb[58].mxu0 %v25421_v5  ;;  %v20301_v15 = vsub.f32 %v19988_v56, %v25535_v23  ;;  %v25539_v22 = vand.u32 4294901760, %v20234_v52  ;;  %v25540_v53 = vand.u32 4294901760, %v20239_v39  ;;  %v25543_v28 = vld [vmem:[#allocation54_spill] sm:$0xff] }
 0x2b8   : > { %v2859_v54 = vpop.f32.mrb[48].mxu1  ;;  %4176 = vmatprep.mubr.f32.mxu0 %v24876_v34  ;;  %v20307_v1 = vsub.f32 %v19993_v14, %v25537_v9  ;;  %12191 = vperm.xlu1 %17174, %v20141_v62   ;;  %v20316_v56 = vpop.permute.xlu1 %11871 }
 0x2b9   : > { %25536 = vst [vmem:[#allocation115_spill] sm:$0xff] %v20301_v15  ;;  %v5727_v3 = vsub.f32 %v20234_v52, %v25539_v22  ;;  %v5739_v7 = vsub.f32 %v20239_v39, %v25540_v53  ;;  %25541 = vst [vmem:[#allocation126_spill] sm:$0xff] %v20316_v56  ;;  %v20318_v23 = vadd.f32 %v11265_v38, %v11105_v12  ;;  %v2861_v31 = vpop.f32.mrb[49].mxu1  ;;  %4844 = vmatmul.mubr.f32.gmra.mrb[90].mxu1 %v25543_v28  ;;  %v25545_v22 = vld [vmem:[#allocation90_spill] sm:$0xff]  ;;  %v20329_v38 = vpop.permute.xlu0 %11407 }
 0x2ba   : > { %25538 = vst [vmem:[#allocation141_spill] sm:$0xff] %v20307_v1  ;;  %v11090_v32 = vmul.f32 %v11074_v6, %v2859_v54  ;;  %17171 = vset.pattern.permute.xlu0 %v25544_v55  ;;  %v11266_v5 = vmul.f32 %v11250_v11, %v2861_v31  ;;  %v11075_v53 = vsel %vm10583_vm1, %v25546_v47, %v25545_v22  ;;  %25547 = vst [vmem:[#allocation160_spill] sm:$0xff] %v20329_v38  ;;  %v25548_v6 = vld [vmem:[#allocation71_spill] sm:$0xff]  ;;  %v25549_v54 = vld [vmem:[#allocation173_spill] sm:$0xff] }
 0x2bb   : > { %25542 = vst [vmem:[#allocation171_spill] sm:$0xff] %v20318_v23  ;;  %4849 = vmatprep.mubr.f32.mxu1 %v24876_v34  ;;  %11999 = vperm.xlu0 %17171, %v20043_v58   ;;  %v11251_v9 = vsel %vm10583_vm1, %v25549_v54, %v19771_v2  ;;  %v5728_v47 = vand.u32 4294901760, %v5727_v3  ;;  %v5740_v31 = vand.u32 4294901760, %v5739_v7  ;;  %v25552_v2 = vld [vmem:[#allocation60_spill] sm:$0xff]  ;;  %v25553_v54 = vand.u32 4294901760, %v20268_v27  ;;  %v25555_v11 = vld [vmem:[#allocation162_spill] sm:$0xff] }
 0x2bc   : > { %v11106_v12 = vadd.f32 %v11090_v32, %v25548_v6  ;;  %4178 = vmatmul.mubr.f32.gmra.mrb[60].mxu0 %v25427_v0  ;;  %v2866_v55 = vpop.f32.mrb[50].mxu1  ;;  %12199 = vperm.xlu1 %17174, %v20165_v40   ;;  %v20342_v14 = vpop.permute.xlu1 %11879  ;;  %v25554_v28 = vand.u32 4294901760, %v20281_v63  ;;  %v25556_v23 = vld [vmem:[#allocation194_spill] sm:$0xff] }
 0x2bd   : > { %4183 = vmatprep.mubr.f32.mxu0 %v24876_v34  ;;  %25550 = vst [vmem:[#allocation94_spill] sm:$0xff] %v20342_v14  ;;  %v11091_v6 = vmul.f32 %v11075_v53, %v2866_v55  ;;  %v2868_v56 = vpop.f32.mrb[51].mxu1  ;;  %4852 = vmatmul.mubr.f32.gmra.mrb[92].mxu1 %v25552_v2  ;;  %v5745_v38 = vsub.f32 %v20268_v27, %v25553_v54  ;;  %v25557_v53 = vld [vmem:[#allocation185_spill] sm:$0xff] }
 0x2be   : > { %v20344_v32 = vadd.f32 %v11266_v5, %v11106_v12  ;;  %v5757_v3 = vsub.f32 %v20281_v63, %v25554_v28  ;;  %v11267_v7 = vmul.f32 %v11251_v9, %v2868_v56  ;;  %v11076_v22 = vsel %vm10583_vm1, %v25556_v23, %v25555_v11  ;;  %4857 = vmatprep.mubr.f32.mxu1 %v24876_v34  ;;  %v20373_v11 = vpop.permute.xlu0 %11415 }
 0x2bf   : > { %12011 = vperm.xlu0 %17171, %v20066_v37   ;;  %v11107_v5 = vadd.f32 %v11091_v6, %v19546_v41  ;;  %v11252_v12 = vsel %vm10583_vm1, %v19689_v29, %v25557_v53  ;;  %v15438_v56 = vpack.c.bf16 %v5740_v31, %v5728_v47  ;;  %v25558_v23 = vand.u32 4294901760, %v20301_v15  ;;  %25560 = vst [vmem:[#allocation183_spill] sm:$0xff] %v20373_v11  ;;  %v25563_v31 = vld [vmem:[#allocation70_spill] sm:$0xff] }
 0x2c0   : > { %25551 = vst [vmem:[#allocation96_spill] sm:$0xff] %v20344_v32  ;;  %4185 = vmatmul.mubr.f32.gmra.mrb[62].mxu0 %v25164_v57  ;;  %v2873_v28 = vpop.f32.mrb[52].mxu1  ;;  %12207 = vperm.xlu1 %17174, %v20189_v35   ;;  %v25559_v41 = vand.u32 4294901760, %v20307_v1  ;;  %v5746_v53 = vand.u32 4294901760, %v5745_v38  ;;  %v5758_v14 = vand.u32 4294901760, %v5757_v3  ;;  %v25564_v32 = vld [vmem:[#allocation149_spill] sm:$0xff] }
 0x2c1   : > { %5541 = vmatprep.mubr.f32.mxu0 %v24876_v34  ;;  %v5751_v9 = vsub.f32 %v20301_v15, %v25558_v23  ;;  %v20375_v29 = vadd.f32 %v11267_v7, %v11107_v5  ;;  %v11092_v6 = vmul.f32 %v11076_v22, %v2873_v28  ;;  %v2875_v54 = vpop.f32.mrb[53].mxu1  ;;  %4860 = vmatmul.mubr.f32.gmra.mrb[94].mxu1 %v25298_v51  ;;  %v20378_v2 = vpop.permute.xlu1 %11887  ;;  %v25566_v7 = vand.u32 4294901760, %v19167_v43  ;;  %v20390_v5 = vld [vmem:[%s17518_s15 + $0x30] sm:$0xff]  ;;  %v25567_v3 = vld [vmem:[#allocation174_spill] sm:$0xff] }
 0x2c2   : > { %v5763_v55 = vsub.f32 %v20307_v1, %v25559_v41  ;;  %25562 = vst [vmem:[#allocation69_spill] sm:$0xff] %v20378_v2  ;;  %v11268_v47 = vmul.f32 %v11252_v12, %v2875_v54  ;;  %v11077_v23 = vsel %vm10583_vm1, %v25564_v32, %v25563_v31  ;;  %4938 = vmatprep.mubr.f32.mxu1 %v24876_v34  ;;  %v25565_v41 = vand.u32 4294901760, %v19161_v33  ;;  %v25598_v2 = vld [vmem:[#allocation109_spill] sm:$0xff] }
 0x2c3   : > { %25561 = vst [vmem:[#allocation2_spill] sm:$0xff] %v20375_v29  ;;  %12019 = vperm.xlu0 %17171, %v20390_v5   ;;  %v11108_v38 = vadd.f32 %v11092_v6, %v19575_v24  ;;  %v11253_v12 = vsel %vm10583_vm1, %v25567_v3, %v19837_v20  ;;  %v25568_v32 = vand.u32 4294901760, %v19308_v44  ;;  %v25569_v33 = vand.u32 4294901760, %v19313_v59  ;;  %v25572_v44 = vld [vmem:[#allocation163_spill] sm:$0xff]  ;;  %v25573_v59 = vld [vmem:[#allocation196_spill] sm:$0xff] }
 0x2c4   : > { %v15414_v22 = vpack.c.bf16 %v25566_v7, %v25565_v41  ;;  %5547 = vmatmul.mubr.f32.vlgmr.msra.gmra.mrb[64].mxu0 %v25312_v42  ;;  %v2880_v43 = vpop.f32.mrb[54].mxu1  ;;  %12215 = vperm.xlu1 %17174, %v20214_v60   ;;  %v5752_v54 = vand.u32 4294901760, %v5751_v9  ;;  %v25571_v41 = vld [vmem:[#allocation13_spill] sm:$0xff]  ;;  %v15440_v20 = vpack.c.bf16 %v5758_v14, %v5746_v53  ;;  %v5764_v7 = vand.u32 4294901760, %v5763_v55  ;;  %v25578_v14 = vld [vmem:[#allocation186_spill] sm:$0xff]  ;;  %v25579_v55 = vld [vmem:[#allocation79_spill] sm:$0xff] }
 0x2c5   : > { %v15416_v28 = vpack.c.bf16 %v25569_v33, %v25568_v32  ;;  %5552 = vmatprep.mubr.f32.mxu0 %v24876_v34  ;;  %v20405_v31 = vadd.f32 %v11268_v47, %v11108_v38  ;;  %v11093_v24 = vmul.f32 %v11077_v23, %v2880_v43  ;;  %v2882_v6 = vpop.f32.mrb[55].mxu1  ;;  %4942 = vmatmul.mubr.f32.vlgmr.msra.gmra.mrb[64].mxu1 %v25571_v41  ;;  %v25574_v9 = vand.u32 4294901760, %v19336_v4  ;;  %v25575_v47 = vld [vmem:[#allocation87_spill] sm:$0xff]  ;;  %v20417_v33 = vpop.permute.xlu0 %11471  ;;  %v25577_v43 = vld [vmem:[#allocation78_spill] sm:$0xff]  ;;  %v20803_v42 = vld [vmem:[%s24520_s1 + $0x150] sm:$0xff] }
 0x2c6   : > { %15439 = vmatpush1.bf16.msra.mxu0 %v15438_v56  ;;  %v11269_v3 = vmul.f32 %v11253_v12, %v2882_v6  ;;  %15415 = vmatpush1.bf16.msra.mxu1 %v15414_v22  ;;  %v11078_v32 = vsel %vm10583_vm1, %v25573_v59, %v25572_v44  ;;  %v25576_v38 = vand.u32 4294901760, %v25575_v47  ;;  %v11254_v53 = vsel %vm10583_vm1, %v25579_v55, %v25578_v14  ;;  %v25580_v22 = vld [vmem:[#allocation21_spill] sm:$0xff]  ;;  %v25586_v14 = vld [vmem:[#allocation148_spill] sm:$0xff]  ;;  %v25587_v55 = vld [vmem:[#allocation3_spill] sm:$0xff] }
 0x2c7   : > { %25570 = vst [vmem:[#allocation77_spill] sm:$0xff] %v20405_v31  ;;  %4947 = vmatprep.mubr.f32.mxu1 %v24876_v34  ;;  %v11109_v56 = vadd.f32 %v11093_v24, %v25577_v43  ;;  %15417 = vmatprep.subr.bf16.mxu1 %v15416_v28  ;;  %v20425_v12 = vpop.permute.xlu1 %11891  ;;  %v25583_v24 = vld [vmem:[#allocation14_spill] sm:$0xff]  ;;  %v25585_v43 = vld [vmem:[#allocation153_spill] sm:$0xff] }
 0x2c8   : > { %v15418_v23 = vpack.c.bf16 %v25576_v38, %v25574_v9  ;;  %5558 = vmatmul.mubr.f32.gmra.mrb[66].mxu0 %v25580_v22  ;;  %25581 = vst [vmem:[#allocation172_spill] sm:$0xff] %v20425_v12  ;;  %v2887_v6 = vpop.f32.mrb[56].mxu1  ;;  %12223 = vperm.xlu1 %17174, %v20248_v61   ;;  %v15442_v9 = vpack.c.bf16 %v5764_v7, %v5752_v54  ;;  %v25584_v38 = vld [vmem:[#allocation100_spill] sm:$0xff]  ;;  %v25591_v54 = vld [vmem:[#allocation25_spill] sm:$0xff]  ;;  %v25600_v22 = vld [vmem:[#allocation123_spill] sm:$0xff] }
 0x2c9   : > { %5563 = vmatprep.mubr.f32.mxu0 %v24876_v34  ;;  %v20429_v4 = vadd.f32 %v11269_v3, %v11109_v56  ;;  %v11094_v44 = vmul.f32 %v11078_v32, %v2887_v6  ;;  %v2889_v59 = vpop.f32.mrb[57].mxu1  ;;  %4951 = vmatmul.mubr.f32.gmra.mrb[66].mxu1 %v25583_v24  ;;  %v11079_v28 = vsel %vm10583_vm1, %v25585_v43, %v25584_v38  ;;  %v25588_v3 = vld [vmem:[#allocation104_spill] sm:$0xff]  ;;  %v25589_v32 = vld [vmem:[#allocation142_spill] sm:$0xff]  ;;  %v25590_v6 = vld [vmem:[#allocation175_spill] sm:$0xff] }
 0x2ca   : > { %15441 = vmatprep.subr.bf16.mxu0 %v15440_v20  ;;  %v11270_v47 = vmul.f32 %v11254_v53, %v2889_v59  ;;  %4956 = vmatprep.mubr.f32.mxu1 %v24876_v34  ;;  %v15444_v12 = vpack.c.bf16 %v25587_v55, %v25586_v14  ;;  %v11255_v20 = vsel %vm10583_vm1, %v25590_v6, %v25589_v32  ;;  %v25592_v7 = vld [vmem:[#allocation169_spill] sm:$0xff]  ;;  %v25653_v24 = vld [vmem:[#allocation6_spill] sm:$0xff] }
 0x2cb   : > { %25582 = vst [vmem:[#allocation161_spill] sm:$0xff] %v20429_v4  ;;  %15419 = vmatpush1.bf16.msra.mxu1 %v15418_v23  ;;  %v11110_v56 = vadd.f32 %v11094_v44, %v25588_v3  ;;  %v20446_v53 = vpop.permute.xlu1 %11899  ;;  %v20450_v23 = vpop.permute.xlu0 %11483  ;;  %v25595_v3 = vld [vmem:[#allocation16_spill] sm:$0xff]  ;;  %15443 = vmatpush1.bf16.msra.mxu0 %v15442_v9  ;;  %v25596_v6 = vld [vmem:[#allocation165_spill] sm:$0xff]  ;;  %v20469_v9 = vld [vmem:[%s17518_s15 + $0x40] sm:$0xff] }
 0x2cc   : > { %5569 = vmatmul.mubr.f32.gmra.mrb[68].mxu0 %v25591_v54  ;;  %15421 = vmatprep.subr.bf16.mxu1 %v25592_v7  ;;  %25593 = vst [vmem:[#allocation99_spill] sm:$0xff] %v20446_v53  ;;  %v2894_v59 = vpop.f32.mrb[58].mxu1  ;;  %v25597_v7 = vld [vmem:[#allocation198_spill] sm:$0xff]  ;;  %v25599_v54 = vld [vmem:[#allocation189_spill] sm:$0xff] }
 0x2cd   : > { %5574 = vmatprep.mubr.f32.mxu0 %v24876_v34  ;;  %12231 = vperm.xlu1 %17174, %v20284_v46   ;;  %v20452_v44 = vadd.f32 %v11270_v47, %v11110_v56  ;;  %v11095_v38 = vmul.f32 %v11079_v28, %v2894_v59  ;;  %v2896_v43 = vpop.f32.mrb[59].mxu1  ;;  %v11080_v53 = vsel %vm10583_vm1, %v25597_v7, %v25596_v6  ;;  %v25601_v28 = vld [vmem:[#allocation28_spill] sm:$0xff] }
 0x2ce   : > { %4960 = vmatmul.mubr.f32.gmra.mrb[68].mxu1 %v25595_v3  ;;  %v11271_v32 = vmul.f32 %v11255_v20, %v2896_v43  ;;  %15445 = vmatprep.subr.bf16.mxu0 %v15444_v12  ;;  %v11256_v47 = vsel %vm10583_vm1, %v25600_v22, %v25599_v54  ;;  %v24733_v12 = vmov 19   ;;  %v25604_v22 = vld [vmem:[#allocation22_spill] sm:$0xff]  ;;  %v25605_v43 = vld [vmem:[#allocation103_spill] sm:$0xff]  ;;  %v25606_v6 = vld [vmem:[#allocation156_spill] sm:$0xff] }
 0x2cf   : > { %25594 = vst [vmem:[#allocation101_spill] sm:$0xff] %v20452_v44  ;;  %4965 = vmatprep.mubr.f32.mxu1 %v24876_v34  ;;  %v11111_v11 = vadd.f32 %v11095_v38, %v25598_v2  ;;  %v20466_v56 = vpop.permute.xlu1 %11907  ;;  %12027 = vperm.xlu0 %17171, %v20469_v9   ;;  %v11081_v7 = vsel %vm10583_vm1, %v25606_v6, %v25605_v43  ;;  %v20508_v3 = vld [vmem:[%s17518_s15 + $0x60] sm:$0xff] }
 0x2d0   : > { %5580 = vmatmul.mubr.f32.gmra.mrb[70].mxu0 %v25601_v28  ;;  %25602 = vst [vmem:[#allocation184_spill] sm:$0xff] %v20466_v56  ;;  %v2901_v20 = vpop.f32.mrb[60].mxu1  ;;  %v20483_v56 = vpop.permute.xlu0 %11491  ;;  %v25607_v28 = vld [vmem:[#allocation135_spill] sm:$0xff] }
 0x2d1   : > { %5585 = vmatprep.mubr.f32.mxu0 %v24876_v34  ;;  %17177 = vset.pattern.permute.xlu1 %v24733_v12  ;;  %v20474_v2 = vadd.f32 %v11271_v32, %v11111_v11  ;;  %v11096_v59 = vmul.f32 %v11080_v53, %v2901_v20  ;;  %v2903_v38 = vpop.f32.mrb[61].mxu1  ;;  %v25608_v11 = vld [vmem:[#allocation102_spill] sm:$0xff]  ;;  %v25609_v32 = vld [vmem:[#allocation176_spill] sm:$0xff]  ;;  %v25610_v20 = vld [vmem:[#allocation31_spill] sm:$0xff] }
 0x2d2   : > { %4969 = vmatmul.mubr.f32.gmra.mrb[70].mxu1 %v25604_v22  ;;  %12239 = vperm.xlu1 %17177, %v20043_v58   ;;  %v11272_v54 = vmul.f32 %v11256_v47, %v2903_v38  ;;  %v11257_v53 = vsel %vm10583_vm1, %v25609_v32, %v25608_v11  ;;  %v20494_v38 = vld [vmem:[%s17518_s15 + $0x50] sm:$0xff]  ;;  %v25613_v22 = vld [vmem:[#allocation23_spill] sm:$0xff]  ;;  %v25614_v32 = vld [vmem:[#allocation113_spill] sm:$0xff] }
 0x2d3   : > { %25603 = vst [vmem:[#allocation90_spill] sm:$0xff] %v20474_v2  ;;  %4974 = vmatprep.mubr.f32.mxu1 %v24876_v34  ;;  %v11112_v12 = vadd.f32 %v11096_v59, %v25607_v28  ;;  %v20491_v47 = vpop.permute.xlu1 %11915  ;;  %12035 = vperm.xlu0 %17171, %v20494_v38  }
 0x2d4   : > { %5591 = vmatmul.mubr.f32.gmra.mrb[72].mxu0 %v25610_v20  ;;  %25611 = vst [vmem:[#allocation35_spill] sm:$0xff] %v20491_v47  ;;  %v2908_v43 = vpop.f32.mrb[62].mxu1  ;;  %v25615_v20 = vld [vmem:[#allocation34_spill] sm:$0xff] }
 0x2d5   : > { %5596 = vmatprep.mubr.f32.mxu0 %v24876_v34  ;;  %v20498_v6 = vadd.f32 %v11272_v54, %v11112_v12  ;;  %v11097_v28 = vmul.f32 %v11081_v7, %v2908_v43  ;;  %v2910_v59 = vpop.f32.mrb[63].mxu1  ;;  %v20512_v12 = vpop.permute.xlu0 %11499  ;;  %v25618_v7 = vld [vmem:[#allocation27_spill] sm:$0xff] }
 0x2d6   : > { %4978 = vmatmul.mubr.f32.gmra.mrb[72].mxu1 %v25613_v22  ;;  %12243 = vperm.xlu1 %17177, %v19895_v16   ;;  %v11273_v11 = vmul.f32 %v11257_v53, %v2910_v59  ;;  %v25619_v53 = vld [vmem:[#allocation40_spill] sm:$0xff] }
 0x2d7   : > { %25612 = vst [vmem:[#allocation71_spill] sm:$0xff] %v20498_v6  ;;  %4983 = vmatprep.mubr.f32.mxu1 %v24876_v34  ;;  %v11113_v47 = vadd.f32 %v11097_v28, %v25614_v32  ;;  %v20505_v2 = vpop.permute.xlu1 %11923  ;;  %12043 = vperm.xlu0 %17171, %v20508_v3   ;;  %v20523_v28 = vld [vmem:[%s17518_s15 + $0x70] sm:$0xff]  ;;  %v25651_v6 = vmov 18  }
 0x2d8   : > { %5602 = vmatmul.mubr.f32.gmra.mrb[74].mxu0 %v25615_v20  ;;  %25616 = vst [vmem:[#allocation173_spill] sm:$0xff] %v20505_v2  ;;  %v25621_v59 = vld [vmem:[#allocation32_spill] sm:$0xff]  ;;  %v25624_v2 = vmov 17  }
 0x2d9   : > { %5607 = vmatprep.mubr.f32.mxu0 %v24876_v34  ;;  %v20514_v54 = vadd.f32 %v11273_v11, %v11113_v47  ;;  %v20530_v47 = vpop.permute.xlu0 %11507  ;;  %v25622_v11 = vld [vmem:[#allocation45_spill] sm:$0xff] }
 0x2da   : > { %4987 = vmatmul.mubr.f32.gmra.mrb[74].mxu1 %v25618_v7  ;;  %12251 = vperm.xlu1 %17177, %v20066_v37  }
 0x2db   : > { %25617 = vst [vmem:[#allocation162_spill] sm:$0xff] %v20514_v54  ;;  %4992 = vmatprep.mubr.f32.mxu1 %v24876_v34  ;;  %v20520_v43 = vpop.permute.xlu1 %11931  ;;  %12051 = vperm.xlu0 %17171, %v20523_v28  }
 0x2dc   : > { %5613 = vmatmul.mubr.f32.gmra.mrb[76].mxu0 %v25619_v53  ;;  %25620 = vst [vmem:[#allocation194_spill] sm:$0xff] %v20520_v43  ;;  %v25625_v43 = vld [vmem:[#allocation36_spill] sm:$0xff]  ;;  %v25626_v53 = vld [vmem:[#allocation49_spill] sm:$0xff] }
 0x2dd   : > { %5618 = vmatprep.mubr.f32.mxu0 %v24876_v34 }
 0x2de   : > { %4996 = vmatmul.mubr.f32.gmra.mrb[76].mxu1 %v25621_v59  ;;  %12259 = vperm.xlu1 %17177, %v20390_v5  }
 0x2df   : > { %5001 = vmatprep.mubr.f32.mxu1 %v24876_v34  ;;  %v20533_v32 = vpop.permute.xlu1 %11939  ;;  %17172 = vset.pattern.permute.xlu0 %v25624_v2  ;;  %v25629_v2 = vld [vmem:[#allocation41_spill] sm:$0xff] }
 0x2e0   : > { %5624 = vmatmul.mubr.f32.gmra.mrb[78].mxu0 %v25622_v11  ;;  %25623 = vst [vmem:[#allocation185_spill] sm:$0xff] %v20533_v32  ;;  %12059 = vperm.xlu0 %17172, %v20093_v50   ;;  %v20545_v11 = vpop.permute.xlu0 %11515  ;;  %v25630_v32 = vld [vmem:[#allocation53_spill] sm:$0xff] }
 0x2e1   : > { %5629 = vmatprep.mubr.f32.mxu0 %v24876_v34  ;;  %25628 = vst [vmem:[#allocation149_spill] sm:$0xff] %v20545_v11  ;;  %v25655_v11 = vld [vmem:[#allocation191_spill] sm:$0xff] }
 0x2e2   : > { %5005 = vmatmul.mubr.f32.gmra.mrb[78].mxu1 %v25625_v43  ;;  %12267 = vperm.xlu1 %17177, %v20469_v9  }
 0x2e3   : > { %5010 = vmatprep.mubr.f32.mxu1 %v24876_v34 }
 0x2e4   : > { %5635 = vmatmul.mubr.f32.gmra.mrb[80].mxu0 %v25626_v53  ;;  %v20543_v59 = vpop.permute.xlu1 %11995  ;;  %12071 = vperm.xlu0 %17172, %v20117_v17   ;;  %v25632_v53 = vld [vmem:[#allocation43_spill] sm:$0xff] }
 0x2e5   : > { %5640 = vmatprep.mubr.f32.mxu0 %v24876_v34  ;;  %25627 = vst [vmem:[#allocation70_spill] sm:$0xff] %v20543_v59  ;;  %v20559_v59 = vpop.permute.xlu0 %11523 }
 0x2e6   : > { %5014 = vmatmul.mubr.f32.gmra.mrb[80].mxu1 %v25629_v2  ;;  %12275 = vperm.xlu1 %17177, %v20494_v38   ;;  %25633 = vst [vmem:[#allocation163_spill] sm:$0xff] %v20559_v59  ;;  %v25634_v2 = vld [vmem:[#allocation55_spill] sm:$0xff]  ;;  %v15448_v59 = vpack.c.bf16 %v20281_v63, %v20268_v27 }
 0x2e7   : > { %5019 = vmatprep.mubr.f32.mxu1 %v24876_v34 }
 0x2e8   : > { %5646 = vmatmul.mubr.f32.gmra.mrb[82].mxu0 %v25630_v32  ;;  %v20553_v43 = vpop.permute.xlu1 %12003  ;;  %12079 = vperm.xlu0 %17172, %v20141_v62   ;;  %v25636_v32 = vld [vmem:[#allocation47_spill] sm:$0xff] }
 0x2e9   : > { %5651 = vmatprep.mubr.f32.mxu0 %v24876_v34  ;;  %25631 = vst [vmem:[#allocation174_spill] sm:$0xff] %v20553_v43  ;;  %v25637_v43 = vld [vmem:[#allocation59_spill] sm:$0xff] }
 0x2ea   : > { %5023 = vmatmul.mubr.f32.gmra.mrb[82].mxu1 %v25632_v53  ;;  %12283 = vperm.xlu1 %17177, %v20508_v3   ;;  %v20571_v53 = vpop.permute.xlu0 %11531 }
 0x2eb   : > { %5028 = vmatprep.mubr.f32.mxu1 %v24876_v34 }
 0x2ec   : > { %5657 = vmatmul.mubr.f32.gmra.mrb[84].mxu0 %v25634_v2  ;;  %v20563_v20 = vpop.permute.xlu1 %12007  ;;  %12087 = vperm.xlu0 %17172, %v20165_v40   ;;  %v25639_v2 = vld [vmem:[#allocation50_spill] sm:$0xff] }
 0x2ed   : > { %5662 = vmatprep.mubr.f32.mxu0 %v24876_v34  ;;  %25635 = vst [vmem:[#allocation196_spill] sm:$0xff] %v20563_v20  ;;  %v24734_v20 = vmov 20  }
 0x2ee   : > { %5032 = vmatmul.mubr.f32.gmra.mrb[84].mxu1 %v25636_v32  ;;  %12291 = vperm.xlu1 %17177, %v20523_v28   ;;  %v25640_v32 = vld [vmem:[#allocation62_spill] sm:$0xff]  ;;  %v20584_v54 = vpop.permute.xlu0 %11543 }
 0x2ef   : > { %5037 = vmatprep.mubr.f32.mxu1 %v24876_v34 }
 0x2f0   : > { %5668 = vmatmul.mubr.f32.gmra.mrb[86].mxu0 %v25637_v43  ;;  %v20573_v7 = vpop.permute.xlu1 %12015  ;;  %12095 = vperm.xlu0 %17172, %v20189_v35  }
 0x2f1   : > { %5673 = vmatprep.mubr.f32.mxu0 %v24876_v34  ;;  %25638 = vst [vmem:[#allocation87_spill] sm:$0xff] %v20573_v7  ;;  %v25642_v7 = vld [vmem:[#allocation56_spill] sm:$0xff] }
 0x2f2   : > { %5041 = vmatmul.mubr.f32.gmra.mrb[86].mxu1 %v25639_v2  ;;  %17178 = vset.pattern.permute.xlu1 %v24734_v20  ;;  %v25643_v20 = vld [vmem:[#allocation65_spill] sm:$0xff] }
 0x2f3   : > { %5046 = vmatprep.mubr.f32.mxu1 %v24876_v34  ;;  %12347 = vperm.xlu1 %17178, %v20093_v50  }
 0x2f4   : > { %5679 = vmatmul.mubr.f32.gmra.mrb[88].mxu0 %v25640_v32  ;;  %v20582_v43 = vpop.permute.xlu1 %12023  ;;  %12103 = vperm.xlu0 %17172, %v20214_v60   ;;  %v20594_v32 = vpop.permute.xlu0 %11551 }
 0x2f5   : > { %5684 = vmatprep.mubr.f32.mxu0 %v24876_v34  ;;  %25641 = vst [vmem:[#allocation78_spill] sm:$0xff] %v20582_v43  ;;  %v25645_v43 = vld [vmem:[#allocation58_spill] sm:$0xff] }
 0x2f6   : > { %5050 = vmatmul.mubr.f32.gmra.mrb[88].mxu1 %v25642_v7  ;;  %v25646_v7 = vld [vmem:[#allocation67_spill] sm:$0xff] }
 0x2f7   : > { %5055 = vmatprep.mubr.f32.mxu1 %v24876_v34  ;;  %12355 = vperm.xlu1 %17178, %v19895_v16  }
 0x2f8   : > { %5690 = vmatmul.mubr.f32.gmra.mrb[90].mxu0 %v25643_v20  ;;  %v20592_v2 = vpop.permute.xlu1 %12031  ;;  %12111 = vperm.xlu0 %17172, %v20248_v61   ;;  %v20604_v20 = vpop.permute.xlu0 %11559 }
 0x2f9   : > { %5695 = vmatprep.mubr.f32.mxu0 %v24876_v34  ;;  %25644 = vst [vmem:[#allocation186_spill] sm:$0xff] %v20592_v2  ;;  %v25648_v2 = vld [vmem:[#allocation63_spill] sm:$0xff] }
 0x2fa   : > { %5059 = vmatmul.mubr.f32.gmra.mrb[90].mxu1 %v25645_v43  ;;  %v25649_v43 = vld [vmem:[#allocation68_spill] sm:$0xff] }
 0x2fb   : > { %5064 = vmatprep.mubr.f32.mxu1 %v24876_v34  ;;  %12359 = vperm.xlu1 %17178, %v20117_v17  }
 0x2fc   : > { %5701 = vmatmul.mubr.f32.gmra.mrb[92].mxu0 %v25646_v7  ;;  %v20602_v16 = vpop.permute.xlu1 %12039  ;;  %12119 = vperm.xlu0 %17172, %v20284_v46   ;;  %v15446_v7 = vpack.c.bf16 %v20239_v39, %v20234_v52  ;;  %v20630_v44 = vpop.permute.xlu0 %11567 }
 0x2fd   : > { %5706 = vmatprep.mubr.f32.mxu0 %v24876_v34  ;;  %25647 = vst [vmem:[#allocation79_spill] sm:$0xff] %v20602_v16  ;;  %v20617_v16 = vld [vmem:[%s24520_s1 + $0x58] sm:$0xff] }
 0x2fe   : > { %5068 = vmatmul.mubr.f32.gmra.mrb[92].mxu1 %v25648_v2  ;;  %v20622_v2 = vld [vmem:[%s24520_s1 + $0xd8] sm:$0xff] }
 0x2ff   : > { %5073 = vmatprep.mubr.f32.mxu1 %v24876_v34  ;;  %12367 = vperm.xlu1 %17178, %v20141_v62  }
 0x300   : > { %5712 = vmatmul.mubr.f32.gmra.mrb[94].mxu0 %v25649_v43  ;;  %v20624_v22 = vpop.permute.xlu1 %12047  ;;  %17175 = vset.pattern.permute.xlu0 %v25651_v6  ;;  %v25652_v43 = vld [vmem:[#allocation66_spill] sm:$0xff] }
 0x301   : > { %5822 = vmatprep.mubr.f32.mxu0 %v24876_v34  ;;  %25650 = vst [vmem:[#allocation100_spill] sm:$0xff] %v20624_v22  ;;  %12175 = vperm.xlu0 %17175, %v20043_v58   ;;  %v25656_v22 = vand.u32 4294901760, %v20617_v16 }
 0x302   : > { %5077 = vmatmul.mubr.f32.gmra.mrb[94].mxu1 %v25652_v43  ;;  %v15450_v43 = vpack.c.bf16 %v20307_v1, %v20301_v15  ;;  %v24739_v1 = vmov 22  }
 0x303   : > { %5171 = vmatprep.mubr.f32.mxu1 %v24876_v34  ;;  %12375 = vperm.xlu1 %17178, %v20165_v40  }
 0x304   : > { %5824 = vmatmul.mubr.f32.vlgmr.msra.gmra.mrb[64].mxu0 %v25653_v24  ;;  %v20639_v6 = vpop.permute.xlu1 %12055 }
 0x305   : > { %5829 = vmatprep.mubr.f32.mxu0 %v24876_v34  ;;  %15447 = vmatpush1.bf16.msra.mxu0 %v15446_v7  ;;  %25654 = vst [vmem:[#allocation153_spill] sm:$0xff] %v20639_v6  ;;  %v25657_v7 = vand.u32 4294901760, %v20622_v2 }
 0x306   : > { %5173 = vmatmul.mubr.f32.vlgmr.msra.gmra.mrb[64].mxu1 %v25653_v24  ;;  %15449 = vmatprep.subr.bf16.mxu0 %v15448_v59  ;;  %v20670_v59 = vpop.permute.xlu0 %11575 }
 0x307   : > { %15423 = vmatpush1.bf16.msra.mxu1 %v25439_v13  ;;  %5178 = vmatprep.mubr.f32.mxu1 %v24876_v34  ;;  %v20652_v4 = vpack.c.bf16 %v25657_v7, %v25656_v22  ;;  %v25660_v22 = vld [vmem:[#allocation139_spill] sm:$0xff]  ;;  %25662 = vst [vmem:[#allocation142_spill] sm:$0xff] %v20670_v59 }
 0x308   : > { %5831 = vmatmul.mubr.f32.gmra.mrb[66].mxu0 %v24964_v8  ;;  %15425 = vmatprep.subr.bf16.mxu1 %v25655_v11 }
 0x309   : > { %25658 = vst [vmem:[#allocation148_spill] sm:$0xff] %v20652_v4  ;;  %5836 = vmatprep.mubr.f32.mxu0 %v24876_v34  ;;  %12383 = vperm.xlu1 %17178, %v20189_v35  }
 0x30a   : > { %5180 = vmatmul.mubr.f32.gmra.mrb[66].mxu1 %v24964_v8  ;;  %15451 = vmatpush1.bf16.msra.mxu0 %v15450_v43  ;;  %v20659_v13 = vpop.permute.xlu1 %12063  ;;  %v20680_v11 = vpop.permute.xlu0 %11583 }
 0x30b   : > { %5185 = vmatprep.mubr.f32.mxu1 %v24876_v34  ;;  %15427 = vmatpush1.bf16.msra.mxu1 %v25449_v21  ;;  %25659 = vst [vmem:[#allocation3_spill] sm:$0xff] %v20659_v13  ;;  %25664 = vst [vmem:[#allocation169_spill] sm:$0xff] %v20680_v11 }
 0x30c   : > { %5838 = vmatmul.mubr.f32.gmra.mrb[68].mxu0 %v24970_v10  ;;  %15477 = vmatprep.subr.bf16.mxu1 %v20652_v4 }
 0x30d   : > { %5843 = vmatprep.mubr.f32.mxu0 %v24876_v34  ;;  %12391 = vperm.xlu1 %17178, %v20214_v60  }
 0x30e   : > { %5187 = vmatmul.mubr.f32.gmra.mrb[68].mxu1 %v24970_v10  ;;  %15453 = vmatprep.subr.bf16.mxu0 %v25660_v22  ;;  %v20668_v43 = vpop.permute.xlu1 %12067  ;;  %v20690_v6 = vpop.permute.xlu0 %11591 }
 0x30f   : > { %5192 = vmatprep.mubr.f32.mxu1 %v24876_v34  ;;  %25661 = vst [vmem:[#allocation104_spill] sm:$0xff] %v20668_v43  ;;  %12187 = vperm.xlu0 %17175, %v20066_v37   ;;  %25666 = vst [vmem:[#allocation198_spill] sm:$0xff] %v20690_v6  ;;  %v24735_v43 = vmov 21   ;;  %v25678_v6 = vand.u32 4294901760, %v20622_v2 }
 0x310   : > { %5845 = vmatmul.mubr.f32.gmra.mrb[70].mxu0 %v24973_v45 }
 0x311   : > { %5850 = vmatprep.mubr.f32.mxu0 %v24876_v34  ;;  %12399 = vperm.xlu1 %17178, %v20248_v61   ;;  %v20760_v22 = vsub.f32 %v20622_v2, %v25678_v6  ;;  %v254_v2 = vld [vmem:[%s24520_s1 + $0x50] sm:$0xff] }
 0x312   : > { %5194 = vmatmul.mubr.f32.gmra.mrb[70].mxu1 %v24973_v45  ;;  %v20678_v21 = vpop.permute.xlu1 %12075  ;;  %v20792_v15 = vpop.permute.xlu0 %11647 }
 0x313   : > { %5199 = vmatprep.mubr.f32.mxu1 %v24876_v34  ;;  %25663 = vst [vmem:[#allocation175_spill] sm:$0xff] %v20678_v21  ;;  %12195 = vperm.xlu0 %17175, %v20390_v5   ;;  %v25667_v21 = vld [vmem:[#allocation20_spill] sm:$0xff]  ;;  %25681 = vst [vmem:[#allocation191_spill] sm:$0xff] %v20792_v15  ;;  %v25683_v27 = vand.u32 4294901760, %v20760_v22 }
 0x314   : > { %5852 = vmatmul.mubr.f32.gmra.mrb[72].mxu0 %v25405_v26  ;;  %v20808_v15 = vld [vmem:[%s24520_s1 + $0x1d0] sm:$0xff] }
 0x315   : > { %5857 = vmatprep.mubr.f32.mxu0 %v24876_v34  ;;  %12407 = vperm.xlu1 %17178, %v20284_v46  }
 0x316   : > { %5201 = vmatmul.mubr.f32.gmra.mrb[72].mxu1 %v25405_v26  ;;  %v20688_v7 = vpop.permute.xlu1 %12083  ;;  %v20822_v39 = vpop.permute.xlu0 %11659 }
 0x317   : > { %5206 = vmatprep.mubr.f32.mxu1 %v24876_v34  ;;  %25665 = vst [vmem:[#allocation165_spill] sm:$0xff] %v20688_v7  ;;  %12203 = vperm.xlu0 %17175, %v20469_v9   ;;  %v20705_v7 = vld [vmem:[%s17518_s15 + $0x10] sm:$0xff]  ;;  %25685 = vst [vmem:[#allocation199_spill] sm:$0xff] %v20822_v39 }
 0x318   : > { %5859 = vmatmul.mubr.f32.gmra.mrb[74].mxu0 %v25667_v21 }
 0x319   : > { %5864 = vmatprep.mubr.f32.mxu0 %v24876_v34  ;;  %17181 = vset.pattern.permute.xlu1 %v24735_v43 }
 0x31a   : > { %5208 = vmatmul.mubr.f32.gmra.mrb[74].mxu1 %v25667_v21  ;;  %12415 = vperm.xlu1 %17181, %v20043_v58   ;;  %v20699_v13 = vpop.permute.xlu1 %12091 }
 0x31b   : > { %5213 = vmatprep.mubr.f32.mxu1 %v24876_v34  ;;  %25668 = vst [vmem:[#allocation109_spill] sm:$0xff] %v20699_v13  ;;  %12211 = vperm.xlu0 %17175, %v20494_v38  }
 0x31c   : > { %5866 = vmatmul.mubr.f32.gmra.mrb[76].mxu0 %v25410_v25 }
 0x31d   : > { %5871 = vmatprep.mubr.f32.mxu0 %v24876_v34 }
 0x31e   : > { %5215 = vmatmul.mubr.f32.gmra.mrb[76].mxu1 %v25410_v25  ;;  %12419 = vperm.xlu1 %17181, %v20705_v7   ;;  %v20709_v43 = vpop.permute.xlu1 %12099 }
 0x31f   : > { %5220 = vmatprep.mubr.f32.mxu1 %v24876_v34  ;;  %25669 = vst [vmem:[#allocation189_spill] sm:$0xff] %v20709_v43  ;;  %12219 = vperm.xlu0 %17175, %v20508_v3  }
 0x320   : > { %5873 = vmatmul.mubr.f32.gmra.mrb[78].mxu0 %v24981_v49 }
 0x321   : > { %5878 = vmatprep.mubr.f32.mxu0 %v24876_v34 }
 0x322   : > { %5222 = vmatmul.mubr.f32.gmra.mrb[78].mxu1 %v24981_v49  ;;  %12427 = vperm.xlu1 %17181, %v20066_v37   ;;  %v20716_v58 = vpop.permute.xlu1 %12107 }
 0x323   : > { %5227 = vmatprep.mubr.f32.mxu1 %v24876_v34  ;;  %25670 = vst [vmem:[#allocation123_spill] sm:$0xff] %v20716_v58  ;;  %v25674_v58 = vld [vmem:[#allocation48_spill] sm:$0xff] }
 0x324   : > { %5880 = vmatmul.mubr.f32.gmra.mrb[80].mxu0 %v17711_v48 }
 0x325   : > { %5885 = vmatprep.mubr.f32.mxu0 %v24876_v34 }
 0x326   : > { %5229 = vmatmul.mubr.f32.gmra.mrb[80].mxu1 %v17711_v48  ;;  %12435 = vperm.xlu1 %17181, %v20390_v5   ;;  %v20723_v43 = vpop.permute.xlu1 %12115 }
 0x327   : > { %5234 = vmatprep.mubr.f32.mxu1 %v24876_v34  ;;  %25671 = vst [vmem:[#allocation103_spill] sm:$0xff] %v20723_v43 }
 0x328   : > { %5887 = vmatmul.mubr.f32.gmra.mrb[82].mxu0 %v17726_v30 }
 0x329   : > { %5892 = vmatprep.mubr.f32.mxu0 %v24876_v34 }
 0x32a   : > { %5236 = vmatmul.mubr.f32.gmra.mrb[82].mxu1 %v17726_v30  ;;  %12443 = vperm.xlu1 %17181, %v20469_v9  }
 0x32b   : > { %5241 = vmatprep.mubr.f32.mxu1 %v24876_v34  ;;  %v20731_v37 = vpop.permute.xlu1 %12171 }
 0x32c   : > { %5894 = vmatmul.mubr.f32.gmra.mrb[84].mxu0 %v25415_v19  ;;  %25672 = vst [vmem:[#allocation156_spill] sm:$0xff] %v20731_v37  ;;  %v25677_v37 = vand.u32 4294901760, %v20617_v16 }
 0x32d   : > { %5899 = vmatprep.mubr.f32.mxu0 %v24876_v34 }
 0x32e   : > { %5243 = vmatmul.mubr.f32.gmra.mrb[84].mxu1 %v25415_v19  ;;  %12451 = vperm.xlu1 %17181, %v20494_v38   ;;  %v20755_v4 = vsub.f32 %v20617_v16, %v25677_v37  ;;  %v270_v16 = vld [vmem:[%s24520_s1 + $0xd0] sm:$0xff]  ;;  %v6749_v37 = vand.u32 4294901760, %v254_v2 }
 0x32f   : > { %5248 = vmatprep.mubr.f32.mxu1 %v24876_v34  ;;  %v20738_v43 = vpop.permute.xlu1 %12179  ;;  %v6753_v6 = vand.u32 4294901760, %v270_v16 }
 0x330   : > { %5901 = vmatmul.mubr.f32.gmra.mrb[86].mxu0 %v25417_v18  ;;  %25673 = vst [vmem:[#allocation135_spill] sm:$0xff] %v20738_v43  ;;  %v25676_v43 = vld [vmem:[#allocation52_spill] sm:$0xff]  ;;  %v25682_v41 = vand.u32 4294901760, %v20755_v4  ;;  %v20820_v11 = vsub.f32 %v254_v2, %v6749_v37  ;;  %v25687_v2 = vld [vmem:[#allocation9_spill] sm:$0xff] }
 0x331   : > { %5906 = vmatprep.mubr.f32.mxu0 %v24876_v34  ;;  %v20826_v52 = vpack.c.bf16 %v6753_v6, %v6749_v37 }
 0x332   : > { %5250 = vmatmul.mubr.f32.gmra.mrb[86].mxu1 %v25417_v18  ;;  %12459 = vperm.xlu1 %17181, %v20508_v3   ;;  %v6999_v63 = vsub.f32 %v20755_v4, %v25682_v41  ;;  %v25692_v41 = vld [vmem:[#allocation179_spill] sm:$0xff] }
 0x333   : > { %5255 = vmatprep.mubr.f32.mxu1 %v24876_v34  ;;  %v20745_v13 = vpop.permute.xlu1 %12183  ;;  %25686 = vst [vmem:[#allocation200_spill] sm:$0xff] %v20826_v52 }
 0x334   : > { %5908 = vmatmul.mubr.f32.gmra.mrb[88].mxu0 %v25674_v58  ;;  %25675 = vst [vmem:[#allocation102_spill] sm:$0xff] %v20745_v13  ;;  %v7000_v37 = vand.u32 4294901760, %v6999_v63 }
 0x335   : > { %5913 = vmatprep.mubr.f32.mxu0 %v24876_v34 }
 0x336   : > { %5257 = vmatmul.mubr.f32.gmra.mrb[88].mxu1 %v25674_v58  ;;  %12467 = vperm.xlu1 %17181, %v20523_v28  }
 0x337   : > { %5262 = vmatprep.mubr.f32.mxu1 %v24876_v34  ;;  %v20762_v13 = vpop.permute.xlu1 %12191 }
 0x338   : > { %5915 = vmatmul.mubr.f32.gmra.mrb[90].mxu0 %v25676_v43  ;;  %25679 = vst [vmem:[#allocation176_spill] sm:$0xff] %v20762_v13 }
 0x339   : > { %5920 = vmatprep.mubr.f32.mxu0 %v24876_v34 }
 0x33a   : > { %5264 = vmatmul.mubr.f32.gmra.mrb[90].mxu1 %v25676_v43  ;;  %17182 = vset.pattern.permute.xlu1 %v24739_v1  ;;  %v20789_v1 = vld [vmem:[%s24520_s1 + $0x1d8] sm:$0xff] }
 0x33b   : > { %5269 = vmatprep.mubr.f32.mxu1 %v24876_v34  ;;  %12523 = vperm.xlu1 %17182, %v20093_v50   ;;  %v20778_v13 = vpop.permute.xlu1 %12199  ;;  %v20784_v50 = vld [vmem:[%s24520_s1 + $0x158] sm:$0xff]  ;;  %v25689_v59 = vand.u32 4294901760, %v20789_v1 }
 0x33c   : > { %5922 = vmatmul.mubr.f32.gmra.mrb[92].mxu0 %v25427_v0  ;;  %25680 = vst [vmem:[#allocation113_spill] sm:$0xff] %v20778_v13  ;;  %v7011_v13 = vsub.f32 %v20760_v22, %v25683_v27  ;;  %v24748_v27 = vand.u32 4294901760, %v20803_v42  ;;  %v25688_v39 = vand.u32 4294901760, %v20784_v50 }
 0x33d   : > { %5927 = vmatprep.mubr.f32.mxu0 %v24876_v34 }
 0x33e   : > { %5271 = vmatmul.mubr.f32.gmra.mrb[92].mxu1 %v25427_v0  ;;  %v20840_v51 = vpack.c.bf16 %v25689_v59, %v25688_v39  ;;  %v7012_v29 = vand.u32 4294901760, %v7011_v13  ;;  %v25694_v39 = vand.u32 4294901760, %v20808_v15  ;;  %v20858_v13 = vpop.permute.xlu0 %11667  ;;  %v25697_v59 = vld [vmem:[#allocation10_spill] sm:$0xff]  ;;  %12227 = vperm.xlu0 %17175, %v20523_v28  }
 0x33f   : > { %5276 = vmatprep.mubr.f32.mxu1 %v24876_v34  ;;  %12531 = vperm.xlu1 %17182, %v20705_v7   ;;  %v20816_v31 = vpop.permute.xlu1 %12207  ;;  %v20898_v28 = vld [vmem:[%s17518_s15] sm:$0xff] }
 0x340   : > { %5929 = vmatmul.mubr.f32.gmra.mrb[94].mxu0 %v25164_v57  ;;  %25684 = vst [vmem:[#allocation48_spill] sm:$0xff] %v20816_v31  ;;  %25690 = vst [vmem:[#allocation201_spill] sm:$0xff] %v20840_v51  ;;  %v20856_v63 = vpack.c.bf16 %v25694_v39, %v24748_v27  ;;  %v15484_v31 = vpack.c.bf16 %v7012_v29, %v7000_v37  ;;  %v25700_v39 = vand.u32 4294901760, %v25586_v14  ;;  %v25701_v27 = vand.u32 4294901760, %v25587_v55  ;;  %v25703_v37 = vld [vmem:[#allocation12_spill] sm:$0xff]  ;;  %v25706_v14 = vld [vmem:[#allocation17_spill] sm:$0xff] }
 0x341   : > { %6015 = vmatprep.mubr.f32.mxu0 %v24876_v34  ;;  %v25709_v55 = vmov 19  }
 0x342   : > { %5278 = vmatmul.mubr.f32.gmra.mrb[94].mxu1 %v25164_v57  ;;  %v20833_v57 = vsub.f32 %v270_v16, %v6753_v6  ;;  %v25693_v16 = vld [vmem:[#allocation4_spill] sm:$0xff]  ;;  %25695 = vst [vmem:[#allocation179_spill] sm:$0xff] %v20856_v63  ;;  %v25699_v6 = vld [vmem:[#allocation127_spill] sm:$0xff]  ;;  %v20874_v29 = vpop.permute.xlu0 %11675  ;;  %17176 = vset.pattern.permute.xlu0 %v25709_v55  ;;  %v25714_v55 = vld [vmem:[#allocation122_spill] sm:$0xff] }
 0x343   : > { %5356 = vmatprep.mubr.f32.mxu1 %v24876_v34  ;;  %12535 = vperm.xlu1 %17182, %v20117_v17   ;;  %v20842_v17 = vpop.permute.xlu1 %12215  ;;  %25696 = vst [vmem:[#allocation4_spill] sm:$0xff] %v20858_v13  ;;  %v15460_v13 = vpack.c.bf16 %v25701_v27, %v25700_v39  ;;  %25702 = vst [vmem:[#allocation127_spill] sm:$0xff] %v20874_v29  ;;  %v25710_v27 = vld [vmem:[#allocation19_spill] sm:$0xff]  ;;  %v25712_v39 = vld [vmem:[#allocation192_spill] sm:$0xff] }
 0x344   : > { %6018 = vmatmul.mubr.f32.vlgmr.msra.gmra.mrb[64].mxu0 %v25687_v2  ;;  %25691 = vst [vmem:[#allocation202_spill] sm:$0xff] %v20842_v17  ;;  %12235 = vperm.xlu0 %17176, %v20898_v28   ;;  %v25809_v2 = vld [vmem:[#allocation121_spill] sm:$0xff] }
 0x345   : > { %6023 = vmatprep.mubr.f32.mxu0 %v24876_v34  ;;  %15455 = vmatpush1.bf16.msra.mxu0 %v25692_v41 }
 0x346   : > { %5358 = vmatmul.mubr.f32.vlgmr.msra.gmra.mrb[64].mxu1 %v25653_v24  ;;  %15457 = vmatprep.subr.bf16.mxu0 %v25693_v16 }
 0x347   : > { %15479 = vmatpush1.bf16.msra.mxu1 %v20826_v52  ;;  %5363 = vmatprep.mubr.f32.mxu1 %v24876_v34  ;;  %v20862_v17 = vpop.permute.xlu1 %12223  ;;  %v25807_v52 = vld [vmem:[#allocation168_spill] sm:$0xff] }
 0x348   : > { %6026 = vmatmul.mubr.f32.gmra.mrb[66].mxu0 %v25697_v59  ;;  %15481 = vmatprep.subr.bf16.mxu1 %v20840_v51  ;;  %25698 = vst [vmem:[#allocation203_spill] sm:$0xff] %v20862_v17  ;;  %v21017_v59 = vld [vmem:[%s17518_s15 + $0x48] sm:$0xff] }
 0x349   : > { %6031 = vmatprep.mubr.f32.mxu0 %v24876_v34  ;;  %12543 = vperm.xlu1 %17182, %v20141_v62   ;;  %v20883_v62 = vpop.permute.xlu0 %11683 }
 0x34a   : > { %5365 = vmatmul.mubr.f32.gmra.mrb[66].mxu1 %v24964_v8  ;;  %15459 = vmatpush1.bf16.msra.mxu0 %v25699_v6  ;;  %25705 = vst [vmem:[#allocation205_spill] sm:$0xff] %v20883_v62 }
 0x34b   : > { %5370 = vmatprep.mubr.f32.mxu1 %v24876_v34  ;;  %15483 = vmatpush1.bf16.msra.mxu1 %v20856_v63  ;;  %v25726_v63 = vld [vmem:[#allocation193_spill] sm:$0xff] }
 0x34c   : > { %6034 = vmatmul.mubr.f32.gmra.mrb[68].mxu0 %v25703_v37  ;;  %15485 = vmatprep.subr.bf16.mxu1 %v15484_v31  ;;  %v20877_v17 = vpop.permute.xlu1 %12231  ;;  %v25724_v37 = vld [vmem:[#allocation29_spill] sm:$0xff] }
 0x34d   : > { %25704 = vst [vmem:[#allocation204_spill] sm:$0xff] %v20877_v17  ;;  %6039 = vmatprep.mubr.f32.mxu0 %v24876_v34  ;;  %12551 = vperm.xlu1 %17182, %v20165_v40   ;;  %v20893_v40 = vpop.permute.xlu0 %11691 }
 0x34e   : > { %5372 = vmatmul.mubr.f32.gmra.mrb[68].mxu1 %v24970_v10  ;;  %15461 = vmatprep.subr.bf16.mxu0 %v15460_v13  ;;  %25708 = vst [vmem:[#allocation207_spill] sm:$0xff] %v20893_v40  ;;  %v25711_v13 = vld [vmem:[#allocation188_spill] sm:$0xff] }
 0x34f   : > { %5377 = vmatprep.mubr.f32.mxu1 %v24876_v34 }
 0x350   : > { %6042 = vmatmul.mubr.f32.gmra.mrb[70].mxu0 %v25706_v14  ;;  %v25718_v14 = vld [vmem:[#allocation147_spill] sm:$0xff] }
 0x351   : > { %6047 = vmatprep.mubr.f32.mxu0 %v24876_v34  ;;  %12559 = vperm.xlu1 %17182, %v20189_v35   ;;  %v20889_v31 = vpop.permute.xlu1 %12239  ;;  %v11418_v35 = vsel %vm10583_vm1, %v25712_v39, %v25711_v13  ;;  %v20915_v62 = vpop.permute.xlu0 %11699  ;;  %v25716_v39 = vld [vmem:[#allocation24_spill] sm:$0xff] }
 0x352   : > { %25707 = vst [vmem:[#allocation206_spill] sm:$0xff] %v20889_v31  ;;  %5379 = vmatmul.mubr.f32.gmra.mrb[70].mxu1 %v24973_v45  ;;  %v11594_v31 = vsel %vm10583_vm1, %v25714_v55, %v20571_v53  ;;  %25715 = vst [vmem:[#allocation192_spill] sm:$0xff] %v20915_v62  ;;  %v25721_v62 = vld [vmem:[#allocation136_spill] sm:$0xff] }
 0x353   : > { %5384 = vmatprep.mubr.f32.mxu1 %v24876_v34 }
 0x354   : > { %6050 = vmatmul.mubr.f32.gmra.mrb[72].mxu0 %v25710_v27  ;;  %v20919_v27 = vld [vmem:[%s17518_s15 + $0x18] sm:$0xff] }
 0x355   : > { %6055 = vmatprep.mubr.f32.mxu0 %v24876_v34  ;;  %12567 = vperm.xlu1 %17182, %v20214_v60   ;;  %v20907_v17 = vpop.permute.xlu1 %12243 }
 0x356   : > { %25713 = vst [vmem:[#allocation188_spill] sm:$0xff] %v20907_v17  ;;  %5386 = vmatmul.mubr.f32.gmra.mrb[72].mxu1 %v25405_v26  ;;  %v4081_v40 = vpop.f32.mrb[32].mxu0  ;;  %12247 = vperm.xlu0 %17176, %v20919_v27   ;;  %v25717_v17 = vld [vmem:[#allocation93_spill] sm:$0xff] }
 0x357   : > { %5391 = vmatprep.mubr.f32.mxu1 %v24876_v34  ;;  %v11434_v29 = vmul.f32 %v11418_v35, %v4081_v40  ;;  %v4083_v13 = vpop.f32.mrb[33].mxu0  ;;  %v11419_v53 = vsel %vm10583_vm1, %v25718_v14, %v25717_v17  ;;  %v25720_v40 = vld [vmem:[#allocation42_spill] sm:$0xff] }
 0x358   : > { %6058 = vmatmul.mubr.f32.gmra.mrb[74].mxu0 %v25716_v39  ;;  %v11610_v60 = vmul.f32 %v11594_v31, %v4083_v13  ;;  %v11595_v31 = vsel %vm10583_vm1, %v20417_v33, %v25721_v62  ;;  %v20937_v39 = vpop.permute.xlu0 %11707 }
 0x359   : > { %6063 = vmatprep.mubr.f32.mxu0 %v24876_v34  ;;  %12575 = vperm.xlu1 %17182, %v20248_v61   ;;  %v20928_v55 = vpop.permute.xlu1 %12251  ;;  %v11450_v35 = vadd.f32 %v11434_v29, %v25720_v40  ;;  %25722 = vst [vmem:[#allocation93_spill] sm:$0xff] %v20937_v39  ;;  %v25725_v40 = vld [vmem:[#allocation85_spill] sm:$0xff]  ;;  %v25735_v39 = vld [vmem:[#allocation195_spill] sm:$0xff] }
 0x35a   : > { %25719 = vst [vmem:[#allocation122_spill] sm:$0xff] %v20928_v55  ;;  %5393 = vmatmul.mubr.f32.gmra.mrb[74].mxu1 %v25667_v21  ;;  %v4088_v13 = vpop.f32.mrb[34].mxu0  ;;  %v20943_v55 = vld [vmem:[%s17518_s15 + $0x28] sm:$0xff]  ;;  %v11420_v33 = vsel %vm10583_vm1, %v25726_v63, %v25725_v40 }
 0x35b   : > { %5398 = vmatprep.mubr.f32.mxu1 %v24876_v34  ;;  %v20939_v17 = vadd.f32 %v11610_v60, %v11450_v35  ;;  %v11435_v14 = vmul.f32 %v11419_v53, %v4088_v13  ;;  %v4090_v61 = vpop.f32.mrb[35].mxu0  ;;  %12255 = vperm.xlu0 %17176, %v20943_v55   ;;  %v25728_v60 = vld [vmem:[#allocation82_spill] sm:$0xff]  ;;  %v25729_v35 = vld [vmem:[#allocation97_spill] sm:$0xff]  ;;  %v25730_v13 = vld [vmem:[#allocation111_spill] sm:$0xff] }
 0x35c   : > { %6066 = vmatmul.mubr.f32.gmra.mrb[76].mxu0 %v25724_v37  ;;  %v11611_v29 = vmul.f32 %v11595_v31, %v4090_v61  ;;  %v11596_v31 = vsel %vm10583_vm1, %v25730_v13, %v25729_v35  ;;  %v20961_v37 = vpop.permute.xlu0 %11719  ;;  %v25736_v13 = vand.u32 4294901760, %v20784_v50 }
 0x35d   : > { %25723 = vst [vmem:[#allocation147_spill] sm:$0xff] %v20939_v17  ;;  %6071 = vmatprep.mubr.f32.mxu0 %v24876_v34  ;;  %12583 = vperm.xlu1 %17182, %v20284_v46   ;;  %v20952_v62 = vpop.permute.xlu1 %12259  ;;  %v11451_v53 = vadd.f32 %v11435_v14, %v25728_v60  ;;  %25731 = vst [vmem:[#allocation136_spill] sm:$0xff] %v20961_v37  ;;  %v25734_v17 = vld [vmem:[#allocation129_spill] sm:$0xff] }
 0x35e   : > { %25727 = vst [vmem:[#allocation42_spill] sm:$0xff] %v20952_v62  ;;  %5400 = vmatmul.mubr.f32.gmra.mrb[76].mxu1 %v25410_v25  ;;  %v4095_v61 = vpop.f32.mrb[36].mxu0  ;;  %v25733_v62 = vld [vmem:[#allocation33_spill] sm:$0xff]  ;;  %v11421_v14 = vsel %vm10583_vm1, %v25735_v39, %v25734_v17 }
 0x35f   : > { %5405 = vmatprep.mubr.f32.mxu1 %v24876_v34  ;;  %v20963_v63 = vadd.f32 %v11611_v29, %v11451_v53  ;;  %v11436_v46 = vmul.f32 %v11420_v33, %v4095_v61  ;;  %v4097_v40 = vpop.f32.mrb[37].mxu0  ;;  %v20971_v60 = vld [vmem:[%s17518_s15 + $0x38] sm:$0xff]  ;;  %v20977_v29 = vsub.f32 %v20784_v50, %v25736_v13  ;;  %v25738_v33 = vand.u32 4294901760, %v20789_v1 }
 0x360   : > { %6074 = vmatmul.mubr.f32.gmra.mrb[78].mxu0 %v25733_v62  ;;  %12263 = vperm.xlu0 %17176, %v20971_v60   ;;  %v11612_v35 = vmul.f32 %v11596_v31, %v4097_v40  ;;  %v24751_v61 = vmov 23   ;;  %v25740_v39 = vld [vmem:[#allocation157_spill] sm:$0xff]  ;;  %v25741_v31 = vld [vmem:[#allocation72_spill] sm:$0xff]  ;;  %v20993_v40 = vld [vmem:[%s17518_s15 + $0x8] sm:$0xff]  ;;  %v25743_v13 = vand.u32 4294901760, %v20803_v42 }
 0x361   : > { %25732 = vst [vmem:[#allocation85_spill] sm:$0xff] %v20963_v63  ;;  %25737 = vst [vmem:[#allocation193_spill] sm:$0xff] %v20977_v29  ;;  %v20982_v53 = vsub.f32 %v20789_v1, %v25738_v33  ;;  %6079 = vmatprep.mubr.f32.mxu0 %v24876_v34  ;;  %17185 = vset.pattern.permute.xlu1 %v24751_v61  ;;  %v11452_v17 = vadd.f32 %v11436_v46, %v25740_v39  ;;  %v20996_v1 = vpop.permute.xlu1 %12267  ;;  %v21004_v46 = vpop.permute.xlu0 %11727  ;;  %v25749_v63 = vld [vmem:[#allocation37_spill] sm:$0xff]  ;;  %v25755_v39 = vld [vmem:[#allocation38_spill] sm:$0xff] }
 0x362   : > { %5407 = vmatmul.mubr.f32.gmra.mrb[78].mxu1 %v24981_v49  ;;  %v11597_v50 = vsel %vm10583_vm1, %v25741_v31, %v20584_v54  ;;  %12591 = vperm.xlu1 %17185, %v20993_v40   ;;  %25742 = vst [vmem:[#allocation97_spill] sm:$0xff] %v20996_v1  ;;  %v21002_v33 = vsub.f32 %v20803_v42, %v25743_v13  ;;  %v4102_v61 = vpop.f32.mrb[38].mxu0  ;;  %25745 = vst [vmem:[#allocation129_spill] sm:$0xff] %v21004_v46  ;;  %v25747_v31 = vand.u32 4294901760, %v20808_v15  ;;  %v25750_v13 = vld [vmem:[#allocation98_spill] sm:$0xff]  ;;  %v25751_v46 = vld [vmem:[#allocation81_spill] sm:$0xff] }
 0x363   : > { %25739 = vst [vmem:[#allocation82_spill] sm:$0xff] %v20982_v53  ;;  %5412 = vmatprep.mubr.f32.mxu1 %v24876_v34  ;;  %v21008_v54 = vadd.f32 %v11612_v35, %v11452_v17  ;;  %v11437_v1 = vmul.f32 %v11421_v14, %v4102_v61  ;;  %v4104_v62 = vpop.f32.mrb[39].mxu0  ;;  %v11422_v35 = vsel %vm10583_vm1, %v25751_v46, %v25750_v13  ;;  %v25753_v61 = vld [vmem:[#allocation137_spill] sm:$0xff] }
 0x364   : > { %25744 = vst [vmem:[#allocation111_spill] sm:$0xff] %v21002_v33  ;;  %v21013_v37 = vsub.f32 %v20808_v15, %v25747_v31  ;;  %6082 = vmatmul.mubr.f32.gmra.mrb[80].mxu0 %v25749_v63  ;;  %12271 = vperm.xlu0 %17176, %v21017_v59   ;;  %v11613_v42 = vmul.f32 %v11597_v50, %v4104_v62  ;;  %v25752_v15 = vld [vmem:[#allocation178_spill] sm:$0xff]  ;;  %v25758_v62 = vld [vmem:[#allocation197_spill] sm:$0xff] }
 0x365   : > { %25746 = vst [vmem:[#allocation195_spill] sm:$0xff] %v21008_v54  ;;  %6087 = vmatprep.mubr.f32.mxu0 %v24876_v34  ;;  %v11453_v14 = vadd.f32 %v11437_v1, %v25752_v15  ;;  %v11598_v17 = vsel %vm10583_vm1, %v20450_v23, %v25753_v61  ;;  %v21038_v1 = vpop.permute.xlu1 %12275  ;;  %v21041_v15 = vld [vmem:[%s17518_s15 + $0x58] sm:$0xff]  ;;  %v25757_v61 = vld [vmem:[#allocation187_spill] sm:$0xff]  ;;  %v25771_v54 = vld [vmem:[#allocation46_spill] sm:$0xff] }
 0x366   : > { %25748 = vst [vmem:[#allocation157_spill] sm:$0xff] %v21013_v37  ;;  %5414 = vmatmul.mubr.f32.gmra.mrb[80].mxu1 %v17711_v48  ;;  %12595 = vperm.xlu1 %17185, %v20705_v7   ;;  %v4109_v50 = vpop.f32.mrb[40].mxu0  ;;  %25756 = vst [vmem:[#allocation98_spill] sm:$0xff] %v21038_v1  ;;  %v11423_v63 = vsel %vm10583_vm1, %v25758_v62, %v25757_v61 }
 0x367   : > { %5419 = vmatprep.mubr.f32.mxu1 %v24876_v34  ;;  %v21035_v46 = vadd.f32 %v11613_v42, %v11453_v14  ;;  %v11438_v31 = vmul.f32 %v11422_v35, %v4109_v50  ;;  %v4111_v13 = vpop.f32.mrb[41].mxu0  ;;  %v21049_v42 = vpop.permute.xlu0 %11735  ;;  %v25760_v35 = vld [vmem:[#allocation95_spill] sm:$0xff]  ;;  %v25761_v50 = vld [vmem:[#allocation92_spill] sm:$0xff] }
 0x368   : > { %6090 = vmatmul.mubr.f32.gmra.mrb[82].mxu0 %v25755_v39  ;;  %12279 = vperm.xlu0 %17176, %v21041_v15   ;;  %v11614_v23 = vmul.f32 %v11598_v17, %v4111_v13  ;;  %25759 = vst [vmem:[#allocation81_spill] sm:$0xff] %v21049_v42  ;;  %v11599_v1 = vsel %vm10583_vm1, %v25761_v50, %v20594_v32  ;;  %v21058_v39 = vld [vmem:[%s17518_s15 + $0x20] sm:$0xff]  ;;  %v25763_v42 = vld [vmem:[#allocation44_spill] sm:$0xff] }
 0x369   : > { %25754 = vst [vmem:[#allocation72_spill] sm:$0xff] %v21035_v46  ;;  %6095 = vmatprep.mubr.f32.mxu0 %v24876_v34  ;;  %v11454_v14 = vadd.f32 %v11438_v31, %v25760_v35  ;;  %v21066_v46 = vld [vmem:[%s17518_s15 + $0x68] sm:$0xff]  ;;  %v25764_v32 = vld [vmem:[#allocation120_spill] sm:$0xff]  ;;  %v25765_v35 = vld [vmem:[#allocation166_spill] sm:$0xff] }
 0x36a   : > { %5421 = vmatmul.mubr.f32.gmra.mrb[82].mxu1 %v17726_v30  ;;  %12603 = vperm.xlu1 %17185, %v21058_v39   ;;  %v4116_v17 = vpop.f32.mrb[42].mxu0  ;;  %v11424_v50 = vsel %vm10583_vm1, %v25765_v35, %v25764_v32 }
 0x36b   : > { %5426 = vmatprep.mubr.f32.mxu1 %v24876_v34  ;;  %v21062_v62 = vadd.f32 %v11614_v23, %v11454_v14  ;;  %v11439_v13 = vmul.f32 %v11423_v63, %v4116_v17  ;;  %v4118_v61 = vpop.f32.mrb[43].mxu0  ;;  %v25766_v23 = vld [vmem:[#allocation76_spill] sm:$0xff]  ;;  %v25767_v14 = vld [vmem:[#allocation30_spill] sm:$0xff] }
 0x36c   : > { %6098 = vmatmul.mubr.f32.gmra.mrb[84].mxu0 %v25763_v42  ;;  %12287 = vperm.xlu0 %17176, %v21066_v46   ;;  %v11615_v31 = vmul.f32 %v11599_v1, %v4118_v61  ;;  %v11600_v17 = vsel %vm10583_vm1, %v20483_v56, %v25767_v14  ;;  %v21081_v42 = vpop.permute.xlu1 %12283  ;;  %v21084_v61 = vpop.permute.xlu0 %11743 }
 0x36d   : > { %25762 = vst [vmem:[#allocation178_spill] sm:$0xff] %v21062_v62  ;;  %6103 = vmatprep.mubr.f32.mxu0 %v24876_v34  ;;  %v11455_v63 = vadd.f32 %v11439_v13, %v25766_v23  ;;  %25768 = vst [vmem:[#allocation137_spill] sm:$0xff] %v21081_v42  ;;  %v21090_v13 = vld [vmem:[%s17518_s15 + $0x78] sm:$0xff]  ;;  %v25772_v23 = vld [vmem:[#allocation158_spill] sm:$0xff] }
 0x36e   : > { %5428 = vmatmul.mubr.f32.gmra.mrb[84].mxu1 %v25415_v19  ;;  %12611 = vperm.xlu1 %17185, %v20390_v5   ;;  %v4123_v1 = vpop.f32.mrb[44].mxu0  ;;  %25769 = vst [vmem:[#allocation187_spill] sm:$0xff] %v21084_v61  ;;  %v25773_v5 = vld [vmem:[#allocation84_spill] sm:$0xff] }
 0x36f   : > { %5433 = vmatprep.mubr.f32.mxu1 %v24876_v34  ;;  %v21086_v32 = vadd.f32 %v11615_v31, %v11455_v63  ;;  %v11440_v35 = vmul.f32 %v11424_v50, %v4123_v1  ;;  %v4125_v62 = vpop.f32.mrb[45].mxu0  ;;  %v11425_v14 = vsel %vm10583_vm1, %v25773_v5, %v25772_v23  ;;  %v25774_v31 = vld [vmem:[#allocation83_spill] sm:$0xff]  ;;  %v25775_v50 = vld [vmem:[#allocation114_spill] sm:$0xff] }
 0x370   : > { %6106 = vmatmul.mubr.f32.gmra.mrb[86].mxu0 %v25771_v54  ;;  %12295 = vperm.xlu0 %17176, %v21090_v13   ;;  %v11616_v56 = vmul.f32 %v11600_v17, %v4125_v62  ;;  %v11601_v1 = vsel %vm10583_vm1, %v25775_v50, %v20604_v20  ;;  %v25777_v5 = vld [vmem:[#allocation51_spill] sm:$0xff]  ;;  %v21109_v61 = vpop.permute.xlu1 %12291  ;;  %v25779_v54 = vmov 20   ;;  %v21117_v50 = vpop.permute.xlu0 %11751 }
 0x371   : > { %25770 = vst [vmem:[#allocation197_spill] sm:$0xff] %v21086_v32  ;;  %6111 = vmatprep.mubr.f32.mxu0 %v24876_v34  ;;  %v11456_v63 = vadd.f32 %v11440_v35, %v25774_v31  ;;  %25778 = vst [vmem:[#allocation92_spill] sm:$0xff] %v21109_v61  ;;  %v25780_v31 = vld [vmem:[#allocation128_spill] sm:$0xff]  ;;  %v25781_v32 = vld [vmem:[#allocation151_spill] sm:$0xff] }
 0x372   : > { %5435 = vmatmul.mubr.f32.gmra.mrb[86].mxu1 %v25417_v18  ;;  %12619 = vperm.xlu1 %17185, %v20469_v9   ;;  %v4130_v62 = vpop.f32.mrb[46].mxu0  ;;  %v11426_v20 = vsel %vm10583_vm1, %v25781_v32, %v25780_v31  ;;  %25782 = vst [vmem:[#allocation120_spill] sm:$0xff] %v21117_v50  ;;  %v25786_v50 = vld [vmem:[#allocation54_spill] sm:$0xff] }
 0x373   : > { %5440 = vmatprep.mubr.f32.mxu1 %v24876_v34  ;;  %v21106_v17 = vadd.f32 %v11616_v56, %v11456_v63  ;;  %v11441_v42 = vmul.f32 %v11425_v14, %v4130_v62  ;;  %v4132_v23 = vpop.f32.mrb[47].mxu0  ;;  %v25783_v56 = vld [vmem:[#allocation171_spill] sm:$0xff]  ;;  %v25784_v63 = vld [vmem:[#allocation112_spill] sm:$0xff]  ;;  %v24754_v62 = vand.u32 4294901760, %v20833_v57 }
 0x374   : > { %6114 = vmatmul.mubr.f32.gmra.mrb[88].mxu0 %v25777_v5  ;;  %17179 = vset.pattern.permute.xlu0 %v25779_v54  ;;  %v11617_v35 = vmul.f32 %v11601_v1, %v4132_v23  ;;  %v11602_v54 = vsel %vm10583_vm1, %v20512_v12, %v25784_v63  ;;  %v24753_v1 = vand.u32 4294901760, %v20820_v11  ;;  %v25788_v5 = vld [vmem:[#allocation117_spill] sm:$0xff] }
 0x375   : > { %25776 = vst [vmem:[#allocation95_spill] sm:$0xff] %v21106_v17  ;;  %6119 = vmatprep.mubr.f32.mxu0 %v24876_v34  ;;  %12351 = vperm.xlu0 %17179, %v20993_v40   ;;  %v11457_v14 = vadd.f32 %v11441_v42, %v25783_v56  ;;  %v25787_v56 = vld [vmem:[#allocation180_spill] sm:$0xff] }
 0x376   : > { %5442 = vmatmul.mubr.f32.gmra.mrb[88].mxu1 %v25674_v58  ;;  %12627 = vperm.xlu1 %17185, %v20494_v38   ;;  %v4137_v32 = vpop.f32.mrb[48].mxu0  ;;  %v11427_v12 = vsel %vm10583_vm1, %v25788_v5, %v25787_v56  ;;  %v25789_v38 = vld [vmem:[#allocation108_spill] sm:$0xff] }
 0x377   : > { %5447 = vmatprep.mubr.f32.mxu1 %v24876_v34  ;;  %v21130_v23 = vadd.f32 %v11617_v35, %v11457_v14  ;;  %v11442_v31 = vmul.f32 %v11426_v20, %v4137_v32  ;;  %v4139_v61 = vpop.f32.mrb[49].mxu0  ;;  %v11603_v63 = vsel %vm10583_vm1, %v25789_v38, %v20630_v44  ;;  %v25790_v35 = vld [vmem:[#allocation96_spill] sm:$0xff]  ;;  %v7017_v32 = vsub.f32 %v20833_v57, %v24754_v62  ;;  %v21159_v38 = vpop.permute.xlu0 %11759 }
 0x378   : > { %6122 = vmatmul.mubr.f32.gmra.mrb[90].mxu0 %v25786_v50  ;;  %v11618_v42 = vmul.f32 %v11602_v54, %v4139_v61  ;;  %v7005_v61 = vsub.f32 %v20820_v11, %v24753_v1  ;;  %v21151_v54 = vpop.permute.xlu1 %12347  ;;  %25792 = vst [vmem:[#allocation30_spill] sm:$0xff] %v21159_v38  ;;  %v25794_v14 = vld [vmem:[#allocation60_spill] sm:$0xff]  ;;  %v25796_v50 = vld [vmem:[#allocation5_spill] sm:$0xff] }
 0x379   : > { %25785 = vst [vmem:[#allocation166_spill] sm:$0xff] %v21130_v23  ;;  %6127 = vmatprep.mubr.f32.mxu0 %v24876_v34  ;;  %12363 = vperm.xlu0 %17179, %v21058_v39   ;;  %v11458_v20 = vadd.f32 %v11442_v31, %v25790_v35  ;;  %25791 = vst [vmem:[#allocation76_spill] sm:$0xff] %v21151_v54  ;;  %v25795_v54 = vld [vmem:[#allocation105_spill] sm:$0xff]  ;;  %v25797_v62 = vld [vmem:[#allocation124_spill] sm:$0xff] }
 0x37a   : > { %5449 = vmatmul.mubr.f32.gmra.mrb[90].mxu1 %v25676_v43  ;;  %12635 = vperm.xlu1 %17185, %v20508_v3   ;;  %v4144_v44 = vpop.f32.mrb[50].mxu0  ;;  %v11428_v23 = vsel %vm10583_vm1, %v25796_v50, %v25795_v54  ;;  %v11604_v56 = vsel %vm10583_vm1, %v20530_v47, %v25797_v62  ;;  %v21174_v31 = vld [vmem:[%s17518_s15 + $0x30] sm:$0xff]  ;;  %v25799_v50 = vand.u32 4294901760, %v20977_v29  ;;  %v7006_v62 = vand.u32 4294901760, %v7005_v61  ;;  %v25805_v61 = vld [vmem:[#allocation142_spill] sm:$0xff] }
 0x37b   : > { %5454 = vmatprep.mubr.f32.mxu1 %v24876_v34  ;;  %v21161_v3 = vadd.f32 %v11618_v42, %v11458_v20  ;;  %v11443_v35 = vmul.f32 %v11427_v12, %v4144_v44  ;;  %v4146_v1 = vpop.f32.mrb[51].mxu0  ;;  %v25798_v42 = vld [vmem:[#allocation2_spill] sm:$0xff]  ;;  %v24755_v12 = vmov 24   ;;  %v25800_v20 = vand.u32 4294901760, %v20982_v53 }
 0x37c   : > { %6130 = vmatmul.mubr.f32.gmra.mrb[92].mxu0 %v25794_v14  ;;  %v11619_v5 = vmul.f32 %v11603_v63, %v4146_v1  ;;  %v7023_v63 = vsub.f32 %v20977_v29, %v25799_v50  ;;  %v7018_v44 = vand.u32 4294901760, %v7017_v32  ;;  %v25806_v32 = vld [vmem:[#allocation130_spill] sm:$0xff] }
 0x37d   : > { %25793 = vst [vmem:[#allocation158_spill] sm:$0xff] %v21161_v3  ;;  %6135 = vmatprep.mubr.f32.mxu0 %v24876_v34  ;;  %12371 = vperm.xlu0 %17179, %v21174_v31   ;;  %v11459_v1 = vadd.f32 %v11443_v35, %v25798_v42  ;;  %v7035_v54 = vsub.f32 %v20982_v53, %v25800_v20  ;;  %v25801_v35 = vand.u32 4294901760, %v21002_v33  ;;  %v25804_v20 = vld [vmem:[#allocation64_spill] sm:$0xff] }
 0x37e   : > { %5456 = vmatmul.mubr.f32.gmra.mrb[92].mxu1 %v25427_v0  ;;  %17186 = vset.pattern.permute.xlu1 %v24755_v12  ;;  %v4151_v47 = vpop.f32.mrb[52].mxu0  ;;  %v25802_v12 = vand.u32 4294901760, %v21013_v37  ;;  %v11605_v51 = vsel %vm10583_vm1, %v25806_v32, %v25805_v61  ;;  %v25810_v0 = vand.u32 4294901760, %v25809_v2  ;;  %v25817_v61 = vld [vmem:[#allocation182_spill] sm:$0xff] }
 0x37f   : > { %5461 = vmatprep.mubr.f32.mxu1 %v24876_v34  ;;  %12699 = vperm.xlu1 %17186, %v20898_v28   ;;  %v7029_v42 = vsub.f32 %v21002_v33, %v25801_v35  ;;  %v21194_v50 = vadd.f32 %v11619_v5, %v11459_v1  ;;  %v11444_v14 = vmul.f32 %v11428_v23, %v4151_v47  ;;  %v4153_v3 = vpop.f32.mrb[53].mxu0  ;;  %v25808_v35 = vand.u32 4294901760, %v25807_v52  ;;  %v21208_v5 = vpop.permute.xlu0 %11767  ;;  %v25813_v23 = vld [vmem:[#allocation61_spill] sm:$0xff] }
 0x380   : > { %v7041_v38 = vsub.f32 %v21013_v37, %v25802_v12  ;;  %6138 = vmatmul.mubr.f32.gmra.mrb[94].mxu0 %v25804_v20  ;;  %v11620_v17 = vmul.f32 %v11604_v56, %v4153_v3  ;;  %v21206_v12 = vpop.permute.xlu1 %12355  ;;  %25812 = vst [vmem:[#allocation114_spill] sm:$0xff] %v21208_v5  ;;  %v25814_v56 = vld [vmem:[#allocation77_spill] sm:$0xff]  ;;  %v7024_v1 = vand.u32 4294901760, %v7023_v63  ;;  %v7036_v47 = vand.u32 4294901760, %v7035_v54  ;;  %v25815_v20 = vld [vmem:[#allocation159_spill] sm:$0xff] }
 0x381   : > { %25803 = vst [vmem:[#allocation84_spill] sm:$0xff] %v21194_v50  ;;  %6216 = vmatprep.mubr.f32.mxu0 %v24876_v34  ;;  %v15462_v43 = vpack.c.bf16 %v25810_v0, %v25808_v35  ;;  %25811 = vst [vmem:[#allocation83_spill] sm:$0xff] %v21206_v12  ;;  %12379 = vperm.xlu0 %17179, %v20469_v9   ;;  %v11460_v3 = vadd.f32 %v11444_v14, %v25814_v56  ;;  %v25816_v50 = vand.u32 4294901760, %v25815_v20  ;;  %v25819_v35 = vld [vmem:[#allocation170_spill] sm:$0xff]  ;;  %v25820_v12 = vld [vmem:[#allocation75_spill] sm:$0xff] }
 0x382   : > { %5463 = vmatmul.mubr.f32.gmra.mrb[94].mxu1 %v25813_v23  ;;  %v25818_v32 = vand.u32 4294901760, %v25817_v61  ;;  %v15486_v0 = vpack.c.bf16 %v7018_v44, %v7006_v62  ;;  %v4158_v2 = vpop.f32.mrb[54].mxu0  ;;  %v11429_v9 = vsel %vm10583_vm1, %v25820_v12, %v25819_v35  ;;  %v7030_v5 = vand.u32 4294901760, %v7029_v42  ;;  %v25821_v56 = vld [vmem:[#allocation13_spill] sm:$0xff]  ;;  %v25822_v61 = vld [vmem:[#allocation88_spill] sm:$0xff]  ;;  %v25824_v44 = vld [vmem:[#allocation18_spill] sm:$0xff] }
 0x383   : > { %6819 = vmatprep.mubr.f32.mxu1 %v24876_v34  ;;  %12703 = vperm.xlu1 %17186, %v20993_v40   ;;  %v7042_v14 = vand.u32 4294901760, %v7041_v38  ;;  %v21223_v63 = vadd.f32 %v11620_v17, %v11460_v3  ;;  %v11445_v54 = vmul.f32 %v11429_v9, %v4158_v2  ;;  %v4160_v20 = vpop.f32.mrb[55].mxu0  ;;  %v25825_v12 = vld [vmem:[#allocation161_spill] sm:$0xff]  ;;  %v25826_v38 = vld [vmem:[#allocation140_spill] sm:$0xff]  ;;  %v15488_v2 = vpack.c.bf16 %v7036_v47, %v7024_v1 }
 0x384   : > { %v15464_v52 = vpack.c.bf16 %v25818_v32, %v25816_v50  ;;  %6220 = vmatmul.mubr.f32.vlgmr.msra.gmra.mrb[64].mxu0 %v25821_v56  ;;  %v11621_v50 = vmul.f32 %v11605_v51, %v4160_v20  ;;  %v25823_v32 = vld [vmem:[#allocation181_spill] sm:$0xff]  ;;  %v21238_v9 = vpop.permute.xlu1 %12359 }
 0x385   : > { %v11430_v62 = vsel %vm10583_vm1, %v25823_v32, %v25822_v61  ;;  %6225 = vmatprep.mubr.f32.mxu0 %v24876_v34  ;;  %15463 = vmatpush1.bf16.msra.mxu0 %v15462_v43  ;;  %v11461_v42 = vadd.f32 %v11445_v54, %v25825_v12  ;;  %v25827_v17 = vld [vmem:[#allocation149_spill] sm:$0xff]  ;;  %v15490_v35 = vpack.c.bf16 %v7042_v14, %v7030_v5  ;;  %v25830_v32 = vld [vmem:[#allocation14_spill] sm:$0xff]  ;;  %v24763_v54 = vmov 25   ;;  %v21244_v12 = vpop.permute.xlu0 %11823  ;;  %v25834_v14 = vld [vmem:[#allocation131_spill] sm:$0xff] }
 0x386   : > { %6825 = vmatmul.mubr.f32.vlgmr.msra.gmra.mrb[96].mxu1 %v25824_v44  ;;  %v11606_v3 = vsel %vm10583_vm1, %v25827_v17, %v25826_v38  ;;  %15465 = vmatprep.subr.bf16.mxu0 %v15464_v52  ;;  %v4165_v51 = vpop.f32.mrb[56].mxu0  ;;  %25828 = vst [vmem:[#allocation128_spill] sm:$0xff] %v21238_v9  ;;  %v25831_v47 = vld [vmem:[#allocation21_spill] sm:$0xff]  ;;  %v25947_v44 = vld [vmem:[#allocation200_spill] sm:$0xff] }
 0x387   : > { %15487 = vmatpush1.bf16.msra.mxu1 %v15486_v0  ;;  %6830 = vmatprep.mubr.f32.mxu1 %v24876_v34  ;;  %v21240_v20 = vadd.f32 %v11621_v50, %v11461_v42  ;;  %v11446_v43 = vmul.f32 %v11430_v62, %v4165_v51  ;;  %v4167_v61 = vpop.f32.mrb[57].mxu0  ;;  %v25832_v5 = vld [vmem:[#allocation101_spill] sm:$0xff]  ;;  %v25835_v42 = vld [vmem:[#allocation160_spill] sm:$0xff] }
 0x388   : > { %6229 = vmatmul.mubr.f32.gmra.mrb[66].mxu0 %v25830_v32  ;;  %17187 = vset.pattern.permute.xlu1 %v24763_v54  ;;  %v11622_v1 = vmul.f32 %v11606_v3, %v4167_v61  ;;  %v25833_v0 = vld [vmem:[#allocation169_spill] sm:$0xff]  ;;  %v25837_v3 = vld [vmem:[#allocation115_spill] sm:$0xff] }
 0x389   : > { %25829 = vst [vmem:[#allocation151_spill] sm:$0xff] %v21240_v20  ;;  %6234 = vmatprep.mubr.f32.mxu0 %v24876_v34  ;;  %12767 = vperm.xlu1 %17187, %v20993_v40   ;;  %v11462_v52 = vadd.f32 %v11446_v43, %v25832_v5  ;;  %v11607_v50 = vsel %vm10583_vm1, %v25834_v14, %v25833_v0  ;;  %v25836_v38 = vld [vmem:[#allocation89_spill] sm:$0xff]  ;;  %v25838_v51 = vand.u32 4294901760, %v25837_v3  ;;  %v25842_v0 = vld [vmem:[#allocation16_spill] sm:$0xff]  ;;  %v25845_v20 = vld [vmem:[#allocation155_spill] sm:$0xff] }
 0x38a   : > { %6836 = vmatmul.mubr.f32.gmra.mrb[98].mxu1 %v25831_v47  ;;  %15489 = vmatprep.subr.bf16.mxu1 %v15488_v2  ;;  %v4172_v62 = vpop.f32.mrb[58].mxu0  ;;  %v11431_v17 = vsel %vm10583_vm1, %v25836_v38, %v25835_v42  ;;  %v25839_v61 = vld [vmem:[#allocation141_spill] sm:$0xff]  ;;  %v25843_v2 = vpack.c.bf16 %v20760_v22, %v20755_v4  ;;  %v25844_v47 = vld [vmem:[#allocation107_spill] sm:$0xff]  ;;  %v24765_v42 = vmov 27   ;;  %v25849_v38 = vld [vmem:[#allocation74_spill] sm:$0xff] }
 0x38b   : > { %6841 = vmatprep.mubr.f32.mxu1 %v24876_v34  ;;  %15491 = vmatpush1.bf16.msra.mxu1 %v15490_v35  ;;  %v25840_v54 = vand.u32 4294901760, %v25839_v61  ;;  %v21263_v5 = vadd.f32 %v11622_v1, %v11462_v52  ;;  %v11447_v9 = vmul.f32 %v11431_v17, %v4172_v62  ;;  %v4174_v32 = vpop.f32.mrb[59].mxu0  ;;  %v11432_v35 = vsel %vm10583_vm1, %v25845_v20, %v25844_v47  ;;  %v25847_v1 = vld [vmem:[#allocation25_spill] sm:$0xff]  ;;  %v25848_v52 = vld [vmem:[#allocation90_spill] sm:$0xff]  ;;  %v25850_v17 = vld [vmem:[#allocation163_spill] sm:$0xff]  ;;  %v21284_v20 = vpop.permute.xlu0 %11835 }
 0x38c   : > { %6238 = vmatmul.mubr.f32.gmra.mrb[68].mxu0 %v25842_v0  ;;  %15493 = vmatprep.subr.bf16.mxu1 %v25843_v2  ;;  %v11623_v14 = vmul.f32 %v11607_v50, %v4174_v32  ;;  %v11608_v32 = vsel %vm10583_vm1, %v25850_v17, %v25849_v38  ;;  %v25852_v61 = vld [vmem:[#allocation22_spill] sm:$0xff]  ;;  %v25854_v38 = vld [vmem:[#allocation28_spill] sm:$0xff]  ;;  %v25855_v17 = vld [vmem:[#allocation71_spill] sm:$0xff] }
 0x38d   : > { %v15466_v43 = vpack.c.bf16 %v25840_v54, %v25838_v51  ;;  %25841 = vst [vmem:[#allocation171_spill] sm:$0xff] %v21263_v5  ;;  %6243 = vmatprep.mubr.f32.mxu0 %v24876_v34  ;;  %17188 = vset.pattern.permute.xlu1 %v24765_v42  ;;  %v21275_v54 = vpop.permute.xlu1 %12367  ;;  %v11463_v62 = vadd.f32 %v11447_v9, %v25848_v52  ;;  %v25853_v9 = vld [vmem:[#allocation139_spill] sm:$0xff]  ;;  %v21293_v52 = vld [vmem:[%s17518_s15 + $0x50] sm:$0xff] }
 0x38e   : > { %25846 = vst [vmem:[#allocation112_spill] sm:$0xff] %v21275_v54  ;;  %6847 = vmatmul.mubr.f32.gmra.mrb[100].mxu1 %v25847_v1  ;;  %12939 = vperm.xlu1 %17188, %v20898_v28  }
 0x38f   : > { %6852 = vmatprep.mubr.f32.mxu1 %v24876_v34  ;;  %v4179_v47 = vpop.f32.mrb[60].mxu0  ;;  %15467 = vmatpush1.bf16.msra.mxu0 %v15466_v43  ;;  %v21287_v50 = vadd.f32 %v11623_v14, %v11463_v62  ;;  %v25856_v43 = vld [vmem:[#allocation198_spill] sm:$0xff]  ;;  %v25857_v14 = vld [vmem:[#allocation73_spill] sm:$0xff]  ;;  %v24767_v62 = vmov 26  }
 0x390   : > { %v11448_v3 = vmul.f32 %v11432_v35, %v4179_v47  ;;  %v4181_v51 = vpop.f32.mrb[61].mxu0  ;;  %6247 = vmatmul.mubr.f32.gmra.mrb[70].mxu0 %v25852_v61  ;;  %15469 = vmatprep.subr.bf16.mxu0 %v25853_v9  ;;  %v11609_v35 = vsel %vm10583_vm1, %v25857_v14, %v25856_v43  ;;  %v25858_v47 = vld [vmem:[#allocation183_spill] sm:$0xff]  ;;  %v21314_v14 = vpop.permute.xlu0 %11843 }
 0x391   : > { %25851 = vst [vmem:[#allocation180_spill] sm:$0xff] %v21287_v50  ;;  %v11624_v2 = vmul.f32 %v11608_v32, %v4181_v51  ;;  %6252 = vmatprep.mubr.f32.mxu0 %v24876_v34  ;;  %12387 = vperm.xlu0 %17179, %v21293_v52   ;;  %v25859_v51 = vld [vmem:[#allocation118_spill] sm:$0xff]  ;;  %v25862_v43 = vld [vmem:[#allocation23_spill] sm:$0xff] }
 0x392   : > { %6858 = vmatmul.mubr.f32.gmra.mrb[102].mxu1 %v25854_v38  ;;  %v11464_v42 = vadd.f32 %v11448_v3, %v25855_v17  ;;  %17189 = vset.pattern.permute.xlu1 %v24767_v62  ;;  %v11433_v9 = vsel %vm10583_vm1, %v25859_v51, %v25858_v47  ;;  %v21309_v3 = vpop.permute.xlu1 %12375  ;;  %v21318_v38 = vld [vmem:[%s17518_s15 + $0x60] sm:$0xff]  ;;  %v25863_v47 = vld [vmem:[#allocation31_spill] sm:$0xff] }
 0x393   : > { %6863 = vmatprep.mubr.f32.mxu1 %v24876_v34  ;;  %v4186_v32 = vpop.f32.mrb[62].mxu0  ;;  %12879 = vperm.xlu1 %17189, %v20993_v40   ;;  %25860 = vst [vmem:[#allocation117_spill] sm:$0xff] %v21309_v3  ;;  %v25864_v51 = vld [vmem:[#allocation162_spill] sm:$0xff] }
 0x394   : > { %v21311_v17 = vadd.f32 %v11624_v2, %v11464_v42  ;;  %v11449_v54 = vmul.f32 %v11433_v9, %v4186_v32  ;;  %v4188_v61 = vpop.f32.mrb[63].mxu0  ;;  %6256 = vmatmul.mubr.f32.gmra.mrb[72].mxu0 %v25862_v43  ;;  %v25865_v42 = vmov 24   ;;  %v25867_v32 = vld [vmem:[#allocation27_spill] sm:$0xff]  ;;  %v25869_v9 = vld [vmem:[#allocation34_spill] sm:$0xff]  ;;  %v25876_v43 = vld [vmem:[#allocation45_spill] sm:$0xff] }
 0x395   : > { %v11625_v62 = vmul.f32 %v11609_v35, %v4188_v61  ;;  %6261 = vmatprep.mubr.f32.mxu0 %v24876_v34  ;;  %12395 = vperm.xlu0 %17179, %v21318_v38   ;;  %v21333_v35 = vld [vmem:[%s17518_s15 + $0x70] sm:$0xff] }
 0x396   : > { %25861 = vst [vmem:[#allocation108_spill] sm:$0xff] %v21311_v17  ;;  %6869 = vmatmul.mubr.f32.gmra.mrb[104].mxu1 %v25863_v47  ;;  %v11465_v3 = vadd.f32 %v11449_v54, %v25864_v51  ;;  %v21330_v61 = vpop.permute.xlu1 %12383  ;;  %v21337_v54 = vpop.permute.xlu0 %11851  ;;  %v25872_v51 = vld [vmem:[#allocation40_spill] sm:$0xff]  ;;  %v25888_v17 = vmov 29  }
 0x397   : > { %6874 = vmatprep.mubr.f32.mxu1 %v24876_v34  ;;  %17190 = vset.pattern.permute.xlu1 %v25865_v42  ;;  %25868 = vst [vmem:[#allocation105_spill] sm:$0xff] %v21330_v61  ;;  %v25873_v61 = vmov 21  }
 0x398   : > { %v21325_v2 = vadd.f32 %v11625_v62, %v11465_v3  ;;  %6265 = vmatmul.mubr.f32.gmra.mrb[74].mxu0 %v25867_v32  ;;  %12707 = vperm.xlu1 %17190, %v20705_v7   ;;  %v25870_v62 = vld [vmem:[#allocation32_spill] sm:$0xff]  ;;  %v25871_v3 = vmov 25  }
 0x399   : > { %6270 = vmatprep.mubr.f32.mxu0 %v24876_v34  ;;  %12403 = vperm.xlu0 %17179, %v21333_v35  }
 0x39a   : > { %25866 = vst [vmem:[#allocation96_spill] sm:$0xff] %v21325_v2  ;;  %6880 = vmatmul.mubr.f32.gmra.mrb[106].mxu1 %v25869_v9  ;;  %v21347_v32 = vpop.permute.xlu1 %12391  ;;  %v25875_v9 = vld [vmem:[#allocation36_spill] sm:$0xff]  ;;  %v21351_v2 = vpop.permute.xlu0 %11859 }
 0x39b   : > { %6885 = vmatprep.mubr.f32.mxu1 %v24876_v34  ;;  %25874 = vst [vmem:[#allocation5_spill] sm:$0xff] %v21347_v32 }
 0x39c   : > { %6274 = vmatmul.mubr.f32.gmra.mrb[76].mxu0 %v25870_v62  ;;  %17191 = vset.pattern.permute.xlu1 %v25871_v3  ;;  %v24769_v62 = vmov 29  }
 0x39d   : > { %6279 = vmatprep.mubr.f32.mxu0 %v24876_v34  ;;  %12771 = vperm.xlu1 %17191, %v20705_v7  }
 0x39e   : > { %6891 = vmatmul.mubr.f32.gmra.mrb[108].mxu1 %v25872_v51  ;;  %17180 = vset.pattern.permute.xlu0 %v25873_v61  ;;  %v25877_v61 = vld [vmem:[#allocation41_spill] sm:$0xff]  ;;  %v21361_v32 = vpop.permute.xlu1 %12399  ;;  %v21365_v51 = vpop.permute.xlu0 %11867 }
 0x39f   : > { %6896 = vmatprep.mubr.f32.mxu1 %v24876_v34  ;;  %12411 = vperm.xlu0 %17180, %v20898_v28   ;;  %25878 = vst [vmem:[#allocation124_spill] sm:$0xff] %v21361_v32  ;;  %25880 = vst [vmem:[#allocation2_spill] sm:$0xff] %v21365_v51  ;;  %v24771_v32 = vmov 28   ;;  %v25949_v51 = vld [vmem:[#allocation201_spill] sm:$0xff] }
 0x3a0   : > { %6283 = vmatmul.mubr.f32.gmra.mrb[78].mxu0 %v25875_v9  ;;  %v25879_v9 = vld [vmem:[#allocation49_spill] sm:$0xff] }
 0x3a1   : > { %6288 = vmatprep.mubr.f32.mxu0 %v24876_v34  ;;  %17192 = vset.pattern.permute.xlu1 %v24769_v62  ;;  %v25881_v62 = vld [vmem:[#allocation43_spill] sm:$0xff] }
 0x3a2   : > { %6902 = vmatmul.mubr.f32.gmra.mrb[110].mxu1 %v25876_v43  ;;  %13115 = vperm.xlu1 %17192, %v20898_v28   ;;  %v25884_v43 = vld [vmem:[#allocation47_spill] sm:$0xff]  ;;  %v21379_v47 = vpop.permute.xlu0 %11875 }
 0x3a3   : > { %6907 = vmatprep.mubr.f32.mxu1 %v24876_v34  ;;  %12423 = vperm.xlu0 %17180, %v20919_v27   ;;  %25885 = vst [vmem:[#allocation130_spill] sm:$0xff] %v21379_v47  ;;  %v24773_v47 = vmov 30  }
 0x3a4   : > { %6292 = vmatmul.mubr.f32.gmra.mrb[80].mxu0 %v25877_v61  ;;  %v25882_v61 = vld [vmem:[#allocation53_spill] sm:$0xff] }
 0x3a5   : > { %6297 = vmatprep.mubr.f32.mxu0 %v24876_v34 }
 0x3a6   : > { %6913 = vmatmul.mubr.f32.gmra.mrb[112].mxu1 %v25879_v9  ;;  %17193 = vset.pattern.permute.xlu1 %v25865_v42  ;;  %v21375_v9 = vpop.permute.xlu1 %12407 }
 0x3a7   : > { %6918 = vmatprep.mubr.f32.mxu1 %v24876_v34  ;;  %12711 = vperm.xlu1 %17193, %v20919_v27   ;;  %25883 = vst [vmem:[#allocation142_spill] sm:$0xff] %v21375_v9  ;;  %v25890_v9 = vld [vmem:[#allocation59_spill] sm:$0xff] }
 0x3a8   : > { %6301 = vmatmul.mubr.f32.gmra.mrb[82].mxu0 %v25881_v62  ;;  %12431 = vperm.xlu0 %17180, %v20943_v55   ;;  %v25886_v62 = vld [vmem:[#allocation55_spill] sm:$0xff] }
 0x3a9   : > { %6306 = vmatprep.mubr.f32.mxu0 %v24876_v34 }
 0x3aa   : > { %6924 = vmatmul.mubr.f32.gmra.mrb[114].mxu1 %v25882_v61  ;;  %v25887_v61 = vld [vmem:[#allocation50_spill] sm:$0xff] }
 0x3ab   : > { %6929 = vmatprep.mubr.f32.mxu1 %v24876_v34  ;;  %17194 = vset.pattern.permute.xlu1 %v24771_v32  ;;  %v21389_v32 = vpop.permute.xlu1 %12415 }
 0x3ac   : > { %6310 = vmatmul.mubr.f32.gmra.mrb[84].mxu0 %v25884_v43  ;;  %13055 = vperm.xlu1 %17194, %v20993_v40   ;;  %25889 = vst [vmem:[#allocation168_spill] sm:$0xff] %v21389_v32  ;;  %v21392_v43 = vpop.permute.xlu0 %11883 }
 0x3ad   : > { %6315 = vmatprep.mubr.f32.mxu0 %v24876_v34  ;;  %12439 = vperm.xlu0 %17180, %v20971_v60   ;;  %v25891_v60 = vld [vmem:[#allocation56_spill] sm:$0xff] }
 0x3ae   : > { %6935 = vmatmul.mubr.f32.gmra.mrb[116].mxu1 %v25886_v62  ;;  %v25893_v62 = vld [vmem:[#allocation62_spill] sm:$0xff] }
 0x3af   : > { %6940 = vmatprep.mubr.f32.mxu1 %v24876_v34  ;;  %v21402_v32 = vpop.permute.xlu1 %12419 }
 0x3b0   : > { %6319 = vmatmul.mubr.f32.gmra.mrb[86].mxu0 %v25887_v61  ;;  %17195 = vset.pattern.permute.xlu1 %v25888_v17  ;;  %v25892_v61 = vmov 27   ;;  %25894 = vst [vmem:[#allocation121_spill] sm:$0xff] %v21402_v32 }
 0x3b1   : > { %6324 = vmatprep.mubr.f32.mxu0 %v24876_v34  ;;  %13119 = vperm.xlu1 %17195, %v20993_v40  }
 0x3b2   : > { %6946 = vmatmul.mubr.f32.gmra.mrb[118].mxu1 %v25890_v9  ;;  %12447 = vperm.xlu0 %17180, %v21017_v59   ;;  %v21404_v9 = vpop.permute.xlu0 %11895  ;;  %v25895_v59 = vld [vmem:[#allocation58_spill] sm:$0xff] }
 0x3b3   : > { %6951 = vmatprep.mubr.f32.mxu1 %v24876_v34 }
 0x3b4   : > { %6328 = vmatmul.mubr.f32.gmra.mrb[88].mxu0 %v25891_v60  ;;  %v25896_v60 = vld [vmem:[#allocation65_spill] sm:$0xff] }
 0x3b5   : > { %6333 = vmatprep.mubr.f32.mxu0 %v24876_v34  ;;  %17196 = vset.pattern.permute.xlu1 %v25892_v61 }
 0x3b6   : > { %6957 = vmatmul.mubr.f32.gmra.mrb[120].mxu1 %v25893_v62  ;;  %12947 = vperm.xlu1 %17196, %v20705_v7   ;;  %v25897_v7 = vld [vmem:[#allocation63_spill] sm:$0xff]  ;;  %v21414_v32 = vpop.permute.xlu0 %11903 }
 0x3b7   : > { %6962 = vmatprep.mubr.f32.mxu1 %v24876_v34  ;;  %12455 = vperm.xlu0 %17180, %v21041_v15   ;;  %v21418_v15 = vpop.permute.xlu1 %12427 }
 0x3b8   : > { %6337 = vmatmul.mubr.f32.gmra.mrb[90].mxu0 %v25895_v59  ;;  %25898 = vst [vmem:[#allocation61_spill] sm:$0xff] %v21418_v15  ;;  %v25899_v59 = vld [vmem:[#allocation67_spill] sm:$0xff] }
 0x3b9   : > { %6342 = vmatprep.mubr.f32.mxu0 %v24876_v34 }
 0x3ba   : > { %6968 = vmatmul.mubr.f32.gmra.mrb[122].mxu1 %v25896_v60  ;;  %17197 = vset.pattern.permute.xlu1 %v24773_v47  ;;  %v25900_v60 = vmov 26   ;;  %v25901_v47 = vld [vmem:[#allocation66_spill] sm:$0xff] }
 0x3bb   : > { %6973 = vmatprep.mubr.f32.mxu1 %v24876_v34  ;;  %13227 = vperm.xlu1 %17197, %v20898_v28   ;;  %v21431_v15 = vpop.permute.xlu1 %12435 }
 0x3bc   : > { %6346 = vmatmul.mubr.f32.gmra.mrb[92].mxu0 %v25897_v7  ;;  %12463 = vperm.xlu0 %17180, %v21066_v46   ;;  %v21426_v7 = vpop.permute.xlu0 %11911  ;;  %v25902_v46 = vld [vmem:[#allocation68_spill] sm:$0xff]  ;;  %25903 = vst [vmem:[#allocation77_spill] sm:$0xff] %v21431_v15  ;;  %v21447_v15 = vld [vmem:[%s24520_s1 + $0xe8] sm:$0xff] }
 0x3bd   : > { %6351 = vmatprep.mubr.f32.mxu0 %v24876_v34 }
 0x3be   : > { %6979 = vmatmul.mubr.f32.gmra.mrb[124].mxu1 %v25899_v59  ;;  %v24775_v59 = vmov 31  }
 0x3bf   : > { %6984 = vmatprep.mubr.f32.mxu1 %v24876_v34  ;;  %17199 = vset.pattern.permute.xlu1 %v25900_v60  ;;  %v21461_v62 = vpop.permute.xlu1 %12443 }
 0x3c0   : > { %6355 = vmatmul.mubr.f32.gmra.mrb[94].mxu0 %v25901_v47  ;;  %12887 = vperm.xlu1 %17199, %v20919_v27   ;;  %v25904_v47 = vpack.c.bf16 %v20833_v57, %v20820_v11  ;;  %25906 = vst [vmem:[#allocation159_spill] sm:$0xff] %v21461_v62 }
 0x3c1   : > { %6449 = vmatprep.mubr.f32.mxu0 %v24876_v34  ;;  %12471 = vperm.xlu0 %17180, %v21090_v13   ;;  %v21442_v13 = vld [vmem:[%s24520_s1 + $0x68] sm:$0xff] }
 0x3c2   : > { %6990 = vmatmul.mubr.f32.gmra.mrb[126].mxu1 %v25902_v46  ;;  %v21453_v46 = vpop.permute.xlu0 %11919  ;;  %v24778_v50 = vand.u32 4294901760, %v21442_v13 }
 0x3c3   : > { %7100 = vmatprep.mubr.f32.mxu1 %v24876_v34 }
 0x3c4   : > { %6451 = vmatmul.mubr.f32.vlgmr.msra.gmra.mrb[64].mxu0 %v25653_v24  ;;  %17200 = vset.pattern.permute.xlu1 %v25892_v61 }
 0x3c5   : > { %6456 = vmatprep.mubr.f32.mxu0 %v24876_v34  ;;  %12951 = vperm.xlu1 %17200, %v20919_v27  }
 0x3c6   : > { %7102 = vmatmul.mubr.f32.vlgmr.msra.gmra.mrb[96].mxu1 %v25653_v24  ;;  %15471 = vmatpush1.bf16.msra.mxu0 %v25692_v41  ;;  %v25905_v41 = vpack.c.bf16 %v20982_v53, %v20977_v29  ;;  %v21471_v0 = vpop.permute.xlu0 %11927 }
 0x3c7   : > { %15495 = vmatpush1.bf16.msra.mxu1 %v25904_v47  ;;  %7107 = vmatprep.mubr.f32.mxu1 %v24876_v34  ;;  %v24777_v47 = vand.u32 4294901760, %v21447_v15 }
 0x3c8   : > { %6458 = vmatmul.mubr.f32.gmra.mrb[66].mxu0 %v24964_v8  ;;  %15497 = vmatprep.subr.bf16.mxu1 %v25905_v41  ;;  %v25907_v41 = vpack.c.bf16 %v21013_v37, %v21002_v33  ;;  %v25944_v33 = vld [vmem:[#allocation9_spill] sm:$0xff] }
 0x3c9   : > { %6463 = vmatprep.mubr.f32.mxu0 %v24876_v34  ;;  %17201 = vset.pattern.permute.xlu1 %v24775_v59  ;;  %v21481_v59 = vpack.c.bf16 %v24777_v47, %v24778_v50  ;;  %v25912_v47 = vmov 22   ;;  %v25913_v50 = vmov 28  }
 0x3ca   : > { %7109 = vmatmul.mubr.f32.gmra.mrb[98].mxu1 %v24964_v8  ;;  %13295 = vperm.xlu1 %17201, %v20993_v40  }
 0x3cb   : > { %7114 = vmatprep.mubr.f32.mxu1 %v24876_v34  ;;  %15499 = vmatpush1.bf16.msra.mxu1 %v25907_v41  ;;  %25908 = vst [vmem:[#allocation182_spill] sm:$0xff] %v21481_v59  ;;  %v21489_v41 = vpop.permute.xlu0 %11935 }
 0x3cc   : > { %6465 = vmatmul.mubr.f32.gmra.mrb[68].mxu0 %v24970_v10  ;;  %15473 = vmatprep.subr.bf16.mxu0 %v25693_v16  ;;  %v21487_v16 = vpop.permute.xlu1 %12451  ;;  %25910 = vst [vmem:[#allocation75_spill] sm:$0xff] %v21489_v41  ;;  %v21648_v41 = vld [vmem:[%s24520_s1 + $0x1e8] sm:$0xff] }
 0x3cd   : > { %6470 = vmatprep.mubr.f32.mxu0 %v24876_v34  ;;  %15475 = vmatpush1.bf16.msra.mxu0 %v25699_v6  ;;  %25909 = vst [vmem:[#allocation170_spill] sm:$0xff] %v21487_v16  ;;  %v25911_v6 = vld [vmem:[#allocation148_spill] sm:$0xff] }
 0x3ce   : > { %7116 = vmatmul.mubr.f32.gmra.mrb[100].mxu1 %v24970_v10  ;;  %17202 = vset.pattern.permute.xlu1 %v25865_v42  ;;  %v21501_v16 = vld [vmem:[%s17518_s15 + $0x10] sm:$0xff] }
 0x3cf   : > { %7121 = vmatprep.mubr.f32.mxu1 %v24876_v34  ;;  %12715 = vperm.xlu1 %17202, %v21058_v39   ;;  %25914 = vst [vmem:[#allocation88_spill] sm:$0xff] %v21501_v16 }
 0x3d0   : > { %6472 = vmatmul.mubr.f32.gmra.mrb[70].mxu0 %v24973_v45  ;;  %15501 = vmatprep.subr.bf16.mxu1 %v25911_v6  ;;  %v21505_v62 = vpop.permute.xlu1 %12459  ;;  %v21507_v6 = vpop.permute.xlu0 %11943 }
 0x3d1   : > { %6477 = vmatprep.mubr.f32.mxu0 %v24876_v34  ;;  %15525 = vmatprep.subr.bf16.mxu0 %v21481_v59  ;;  %25915 = vst [vmem:[#allocation181_spill] sm:$0xff] %v21505_v62  ;;  %25916 = vst [vmem:[#allocation161_spill] sm:$0xff] %v21507_v6  ;;  %v25930_v59 = vmov 23  }
 0x3d2   : > { %7123 = vmatmul.mubr.f32.gmra.mrb[102].mxu1 %v24973_v45  ;;  %17183 = vset.pattern.permute.xlu0 %v25912_v47 }
 0x3d3   : > { %7128 = vmatprep.mubr.f32.mxu1 %v24876_v34  ;;  %17203 = vset.pattern.permute.xlu1 %v25913_v50 }
 0x3d4   : > { %6479 = vmatmul.mubr.f32.gmra.mrb[72].mxu0 %v25405_v26  ;;  %13059 = vperm.xlu1 %17203, %v21501_v16   ;;  %v21516_v47 = vpop.permute.xlu0 %11999 }
 0x3d5   : > { %6484 = vmatprep.mubr.f32.mxu0 %v24876_v34  ;;  %12527 = vperm.xlu0 %17183, %v20993_v40   ;;  %25917 = vst [vmem:[#allocation140_spill] sm:$0xff] %v21516_v47  ;;  %v21521_v40 = vpop.permute.xlu1 %12467  ;;  %v21544_v47 = vld [vmem:[%s17518_s15 + $0x40] sm:$0xff] }
 0x3d6   : > { %7130 = vmatmul.mubr.f32.gmra.mrb[104].mxu1 %v25405_v26  ;;  %25918 = vst [vmem:[#allocation149_spill] sm:$0xff] %v21521_v40 }
 0x3d7   : > { %7135 = vmatprep.mubr.f32.mxu1 %v24876_v34 }
 0x3d8   : > { %6486 = vmatmul.mubr.f32.gmra.mrb[74].mxu0 %v25667_v21  ;;  %17204 = vset.pattern.permute.xlu1 %v25888_v17  ;;  %v21526_v62 = vpop.permute.xlu0 %12011 }
 0x3d9   : > { %6491 = vmatprep.mubr.f32.mxu0 %v24876_v34  ;;  %13123 = vperm.xlu1 %17204, %v21501_v16   ;;  %25919 = vst [vmem:[#allocation101_spill] sm:$0xff] %v21526_v62  ;;  %v21534_v40 = vpop.permute.xlu1 %12523 }
 0x3da   : > { %7137 = vmatmul.mubr.f32.gmra.mrb[106].mxu1 %v25667_v21  ;;  %12539 = vperm.xlu0 %17183, %v21058_v39   ;;  %25920 = vst [vmem:[#allocation169_spill] sm:$0xff] %v21534_v40 }
 0x3db   : > { %7142 = vmatprep.mubr.f32.mxu1 %v24876_v34 }
 0x3dc   : > { %6493 = vmatmul.mubr.f32.gmra.mrb[76].mxu0 %v25410_v25  ;;  %v21540_v62 = vpop.permute.xlu0 %12019 }
 0x3dd   : > { %6498 = vmatprep.mubr.f32.mxu0 %v24876_v34  ;;  %17205 = vset.pattern.permute.xlu1 %v25871_v3  ;;  %25921 = vst [vmem:[#allocation131_spill] sm:$0xff] %v21540_v62  ;;  %v21551_v40 = vpop.permute.xlu1 %12531 }
 0x3de   : > { %7144 = vmatmul.mubr.f32.gmra.mrb[108].mxu1 %v25410_v25  ;;  %12783 = vperm.xlu1 %17205, %v20943_v55   ;;  %25922 = vst [vmem:[#allocation160_spill] sm:$0xff] %v21551_v40 }
 0x3df   : > { %7149 = vmatprep.mubr.f32.mxu1 %v24876_v34  ;;  %12547 = vperm.xlu0 %17183, %v21174_v31  }
 0x3e0   : > { %6500 = vmatmul.mubr.f32.gmra.mrb[78].mxu0 %v24981_v49  ;;  %v21556_v62 = vpop.permute.xlu0 %12027 }
 0x3e1   : > { %6505 = vmatprep.mubr.f32.mxu0 %v24876_v34  ;;  %25923 = vst [vmem:[#allocation89_spill] sm:$0xff] %v21556_v62  ;;  %v21565_v40 = vpop.permute.xlu1 %12535  ;;  %v25926_v62 = vmov 31  }
 0x3e2   : > { %7151 = vmatmul.mubr.f32.gmra.mrb[110].mxu1 %v24981_v49  ;;  %17206 = vset.pattern.permute.xlu1 %v25913_v50  ;;  %25924 = vst [vmem:[#allocation115_spill] sm:$0xff] %v21565_v40 }
 0x3e3   : > { %7156 = vmatprep.mubr.f32.mxu1 %v24876_v34  ;;  %13063 = vperm.xlu1 %17206, %v20919_v27  }
 0x3e4   : > { %6507 = vmatmul.mubr.f32.gmra.mrb[80].mxu0 %v17711_v48  ;;  %12555 = vperm.xlu0 %17183, %v21544_v47  }
 0x3e5   : > { %6512 = vmatprep.mubr.f32.mxu0 %v24876_v34  ;;  %v21578_v40 = vpop.permute.xlu1 %12543 }
 0x3e6   : > { %7158 = vmatmul.mubr.f32.gmra.mrb[112].mxu1 %v17711_v48  ;;  %25927 = vst [vmem:[#allocation107_spill] sm:$0xff] %v21578_v40  ;;  %v25932_v40 = vmov 30  }
 0x3e7   : > { %7163 = vmatprep.mubr.f32.mxu1 %v24876_v34  ;;  %17207 = vset.pattern.permute.xlu1 %v25900_v60 }
 0x3e8   : > { %6514 = vmatmul.mubr.f32.gmra.mrb[82].mxu0 %v17726_v30  ;;  %12891 = vperm.xlu1 %17207, %v21058_v39  }
 0x3e9   : > { %6519 = vmatprep.mubr.f32.mxu0 %v24876_v34  ;;  %12563 = vperm.xlu0 %17183, %v21293_v52   ;;  %v21570_v52 = vpop.permute.xlu0 %12035 }
 0x3ea   : > { %7165 = vmatmul.mubr.f32.gmra.mrb[114].mxu1 %v17726_v30  ;;  %25925 = vst [vmem:[#allocation141_spill] sm:$0xff] %v21570_v52  ;;  %v25929_v52 = vld [vmem:[#allocation52_spill] sm:$0xff] }
 0x3eb   : > { %7170 = vmatprep.mubr.f32.mxu1 %v24876_v34 }
 0x3ec   : > { %6521 = vmatmul.mubr.f32.gmra.mrb[84].mxu0 %v25415_v19  ;;  %17208 = vset.pattern.permute.xlu1 %v25892_v61 }
 0x3ed   : > { %6526 = vmatprep.mubr.f32.mxu0 %v24876_v34  ;;  %12955 = vperm.xlu1 %17208, %v21058_v39  }
 0x3ee   : > { %7172 = vmatmul.mubr.f32.gmra.mrb[116].mxu1 %v25415_v19  ;;  %12571 = vperm.xlu0 %17183, %v21318_v38   ;;  %v21583_v38 = vpop.permute.xlu0 %12043 }
 0x3ef   : > { %7177 = vmatprep.mubr.f32.mxu1 %v24876_v34  ;;  %25928 = vst [vmem:[#allocation155_spill] sm:$0xff] %v21583_v38 }
 0x3f0   : > { %6528 = vmatmul.mubr.f32.gmra.mrb[86].mxu0 %v25417_v18 }
 0x3f1   : > { %6533 = vmatprep.mubr.f32.mxu0 %v24876_v34  ;;  %17209 = vset.pattern.permute.xlu1 %v25926_v62 }
 0x3f2   : > { %7179 = vmatmul.mubr.f32.gmra.mrb[118].mxu1 %v25417_v18  ;;  %13299 = vperm.xlu1 %17209, %v21501_v16   ;;  %v21598_v38 = vpop.permute.xlu0 %12051  ;;  %v25934_v16 = vld [vmem:[#allocation57_spill] sm:$0xff] }
 0x3f3   : > { %7184 = vmatprep.mubr.f32.mxu1 %v24876_v34  ;;  %12579 = vperm.xlu0 %17183, %v21333_v35   ;;  %v21592_v35 = vpop.permute.xlu1 %12551  ;;  %25933 = vst [vmem:[#allocation74_spill] sm:$0xff] %v21598_v38  ;;  %v21618_v38 = vld [vmem:[%s24520_s1 + $0x60] sm:$0xff] }
 0x3f4   : > { %6535 = vmatmul.mubr.f32.gmra.mrb[88].mxu0 %v25674_v58  ;;  %25931 = vst [vmem:[#allocation90_spill] sm:$0xff] %v21592_v35 }
 0x3f5   : > { %6540 = vmatprep.mubr.f32.mxu0 %v24876_v34 }
 0x3f6   : > { %7186 = vmatmul.mubr.f32.gmra.mrb[120].mxu1 %v25674_v58  ;;  %17210 = vset.pattern.permute.xlu1 %v25900_v60 }
 0x3f7   : > { %7191 = vmatprep.mubr.f32.mxu1 %v24876_v34  ;;  %12895 = vperm.xlu1 %17210, %v20943_v55   ;;  %v21626_v1 = vpop.permute.xlu1 %12559 }
 0x3f8   : > { %6542 = vmatmul.mubr.f32.gmra.mrb[90].mxu0 %v25929_v52  ;;  %17184 = vset.pattern.permute.xlu0 %v25930_v59  ;;  %v25936_v59 = vand.u32 4294901760, %v21447_v15  ;;  %25938 = vst [vmem:[#allocation139_spill] sm:$0xff] %v21626_v1  ;;  %v21643_v1 = vld [vmem:[%s24520_s1 + $0x168] sm:$0xff] }
 0x3f9   : > { %6547 = vmatprep.mubr.f32.mxu0 %v24876_v34  ;;  %12587 = vperm.xlu0 %17184, %v20898_v28   ;;  %v25935_v28 = vand.u32 4294901760, %v21442_v13 }
 0x3fa   : > { %7193 = vmatmul.mubr.f32.gmra.mrb[122].mxu1 %v25929_v52  ;;  %v21613_v6 = vsub.f32 %v21447_v15, %v25936_v59  ;;  %v21632_v59 = vld [vmem:[%s17518_s15 + $0x18] sm:$0xff] }
 0x3fb   : > { %7198 = vmatprep.mubr.f32.mxu1 %v24876_v34  ;;  %17211 = vset.pattern.permute.xlu1 %v25932_v40  ;;  %v21608_v35 = vsub.f32 %v21442_v13, %v25935_v28  ;;  %v21637_v28 = vpop.permute.xlu0 %12059  ;;  %v21658_v13 = vld [vmem:[%s24520_s1 + $0x160] sm:$0xff]  ;;  %v21667_v15 = vpop.permute.xlu1 %12567 }
 0x3fc   : > { %6549 = vmatmul.mubr.f32.gmra.mrb[92].mxu0 %v25934_v16  ;;  %13239 = vperm.xlu1 %17211, %v20919_v27   ;;  %25937 = vst [vmem:[#allocation163_spill] sm:$0xff] %v21613_v6  ;;  %25939 = vst [vmem:[#allocation71_spill] sm:$0xff] %v21637_v28  ;;  %v21663_v28 = vld [vmem:[%s24520_s1 + $0x1e0] sm:$0xff] }
 0x3fd   : > { %6554 = vmatprep.mubr.f32.mxu0 %v24876_v34  ;;  %12599 = vperm.xlu0 %17184, %v20919_v27   ;;  %v21623_v27 = vld [vmem:[%s24520_s1 + $0xe0] sm:$0xff]  ;;  %25940 = vst [vmem:[#allocation198_spill] sm:$0xff] %v21667_v15  ;;  %v25945_v53 = vand.u32 4294901760, %v21608_v35  ;;  %v25946_v15 = vand.u32 4294901760, %v21613_v6 }
 0x3fe   : > { %7200 = vmatmul.mubr.f32.gmra.mrb[124].mxu1 %v25934_v16  ;;  %v25942_v5 = vand.u32 4294901760, %v21623_v27 }
 0x3ff   : > { %7205 = vmatprep.mubr.f32.mxu1 %v24876_v34  ;;  %v8277_v29 = vsub.f32 %v21608_v35, %v25945_v53  ;;  %v8289_v56 = vsub.f32 %v21613_v6, %v25946_v15  ;;  %v21689_v37 = vpop.permute.xlu0 %12071  ;;  %v25950_v53 = vand.u32 4294901760, %v21643_v1  ;;  %v25951_v15 = vand.u32 4294901760, %v21648_v41  ;;  %v21709_v6 = vpop.permute.xlu1 %12575 }
 0x400   : > { %6556 = vmatmul.mubr.f32.gmra.mrb[94].mxu0 %v25813_v23  ;;  %17212 = vset.pattern.permute.xlu1 %v25926_v62  ;;  %25948 = vst [vmem:[#allocation183_spill] sm:$0xff] %v21689_v37  ;;  %25957 = vst [vmem:[#allocation162_spill] sm:$0xff] %v21709_v6  ;;  %v25970_v6 = vld [vmem:[#allocation177_spill] sm:$0xff] }
 0x401   : > { %6634 = vmatprep.mubr.f32.mxu0 %v24876_v34  ;;  %13303 = vperm.xlu1 %17212, %v21632_v59  }
 0x402   : > { %7207 = vmatmul.mubr.f32.gmra.mrb[126].mxu1 %v25813_v23  ;;  %12607 = vperm.xlu0 %17184, %v20943_v55   ;;  %v25941_v55 = vand.u32 4294901760, %v21618_v38 }
 0x403   : > { %7293 = vmatprep.mubr.f32.mxu1 %v24876_v34 }
 0x404   : > { %6636 = vmatmul.mubr.f32.vlgmr.msra.gmra.mrb[64].mxu0 %v25653_v24  ;;  %v21673_v24 = vpack.c.bf16 %v25942_v5, %v25941_v55  ;;  %v25954_v55 = vand.u32 4294901760, %v20755_v4  ;;  %v25955_v5 = vand.u32 4294901760, %v20760_v22  ;;  %v21721_v4 = vpop.permute.xlu0 %12079  ;;  %v25962_v22 = vld [vmem:[#allocation12_spill] sm:$0xff] }
 0x405   : > { %6641 = vmatprep.mubr.f32.mxu0 %v24876_v34  ;;  %17213 = vset.pattern.permute.xlu1 %v25871_v3  ;;  %25961 = vst [vmem:[#allocation57_spill] sm:$0xff] %v21721_v4 }
 0x406   : > { %25943 = vst [vmem:[#allocation73_spill] sm:$0xff] %v21673_v24  ;;  %7296 = vmatmul.mubr.f32.vlgmr.msra.gmra.mrb[96].mxu1 %v25944_v33  ;;  %12787 = vperm.xlu1 %17213, %v21174_v31   ;;  %v21699_v33 = vpack.c.bf16 %v25951_v15, %v25950_v53  ;;  %v15508_v37 = vpack.c.bf16 %v25955_v5, %v25954_v55  ;;  %v25958_v53 = vand.u32 4294901760, %v21658_v13  ;;  %v25959_v15 = vand.u32 4294901760, %v21663_v28  ;;  %v25964_v5 = vld [vmem:[#allocation17_spill] sm:$0xff]  ;;  %v21749_v55 = vld [vmem:[%s17518_s15 + $0x48] sm:$0xff] }
 0x407   : > { %15503 = vmatpush1.bf16.msra.mxu1 %v25947_v44  ;;  %7301 = vmatprep.mubr.f32.mxu1 %v24876_v34  ;;  %v25953_v44 = vld [vmem:[#allocation10_spill] sm:$0xff] }
 0x408   : > { %6643 = vmatmul.mubr.f32.gmra.mrb[66].mxu0 %v24964_v8  ;;  %15505 = vmatprep.subr.bf16.mxu1 %v25949_v51  ;;  %25952 = vst [vmem:[#allocation118_spill] sm:$0xff] %v21699_v33  ;;  %v8278_v51 = vand.u32 4294901760, %v8277_v29  ;;  %v8290_v8 = vand.u32 4294901760, %v8289_v56  ;;  %v21733_v56 = vpop.permute.xlu1 %12583 }
 0x409   : > { %6648 = vmatprep.mubr.f32.mxu0 %v24876_v34  ;;  %15527 = vmatpush1.bf16.msra.mxu0 %v21673_v24  ;;  %v25956_v24 = vld [vmem:[#allocation179_spill] sm:$0xff] }
 0x40a   : > { %7304 = vmatmul.mubr.f32.gmra.mrb[98].mxu1 %v25953_v44  ;;  %17214 = vset.pattern.permute.xlu1 %v25913_v50  ;;  %v21715_v44 = vpack.c.bf16 %v25959_v15, %v25958_v53  ;;  %v15532_v29 = vpack.c.bf16 %v8290_v8, %v8278_v51  ;;  %25963 = vst [vmem:[#allocation179_spill] sm:$0xff] %v21733_v56  ;;  %v21737_v8 = vpop.permute.xlu0 %12087  ;;  %v25968_v53 = vld [vmem:[#allocation39_spill] sm:$0xff]  ;;  %v25969_v56 = vld [vmem:[#allocation93_spill] sm:$0xff] }
 0x40b   : > { %7309 = vmatprep.mubr.f32.mxu1 %v24876_v34  ;;  %15507 = vmatpush1.bf16.msra.mxu1 %v25956_v24  ;;  %25965 = vst [vmem:[#allocation208_spill] sm:$0xff] %v21737_v8  ;;  %v11946_v15 = vsel %vm10583_vm1, %v25968_v53, %v21392_v43  ;;  %v11770_v8 = vsel %vm10583_vm1, %v25970_v6, %v25969_v56  ;;  %v25973_v53 = vld [vmem:[#allocation145_spill] sm:$0xff]  ;;  %v25975_v6 = vld [vmem:[#allocation147_spill] sm:$0xff] }
 0x40c   : > { %25960 = vst [vmem:[#allocation52_spill] sm:$0xff] %v21715_v44  ;;  %6650 = vmatmul.mubr.f32.gmra.mrb[68].mxu0 %v24970_v10  ;;  %13067 = vperm.xlu1 %17214, %v21058_v39   ;;  %v21730_v39 = vld [vmem:[%s17518_s15 + $0x38] sm:$0xff]  ;;  %v21746_v51 = vpop.permute.xlu1 %12591 }
 0x40d   : > { %6655 = vmatprep.mubr.f32.mxu0 %v24876_v34  ;;  %15529 = vmatprep.subr.bf16.mxu0 %v21699_v33  ;;  %25967 = vst [vmem:[#allocation209_spill] sm:$0xff] %v21746_v51 }
 0x40e   : > { %7312 = vmatmul.mubr.f32.gmra.mrb[100].mxu1 %v25962_v22  ;;  %15509 = vmatprep.subr.bf16.mxu1 %v15508_v37  ;;  %v25966_v37 = vld [vmem:[#allocation19_spill] sm:$0xff]  ;;  %v21762_v51 = vpop.permute.xlu0 %12095 }
 0x40f   : > { %7317 = vmatprep.mubr.f32.mxu1 %v24876_v34  ;;  %15531 = vmatpush1.bf16.msra.mxu0 %v21715_v44  ;;  %25971 = vst [vmem:[#allocation39_spill] sm:$0xff] %v21762_v51  ;;  %v25974_v44 = vld [vmem:[#allocation191_spill] sm:$0xff]  ;;  %v25979_v51 = vld [vmem:[#allocation29_spill] sm:$0xff] }
 0x410   : > { %6657 = vmatmul.mubr.f32.gmra.mrb[70].mxu0 %v24973_v45  ;;  %17215 = vset.pattern.permute.xlu1 %v25865_v42  ;;  %v11771_v33 = vsel %vm10583_vm1, %v25974_v44, %v25973_v53  ;;  %v21772_v22 = vld [vmem:[%s17518_s15 + $0x28] sm:$0xff] }
 0x411   : > { %6662 = vmatprep.mubr.f32.mxu0 %v24876_v34  ;;  %12727 = vperm.xlu1 %17215, %v21730_v39  }
 0x412   : > { %7320 = vmatmul.mubr.f32.gmra.mrb[102].mxu1 %v25964_v5  ;;  %15533 = vmatprep.subr.bf16.mxu0 %v15532_v29  ;;  %v25972_v5 = vld [vmem:[#allocation24_spill] sm:$0xff] }
 0x413   : > { %7325 = vmatprep.mubr.f32.mxu1 %v24876_v34  ;;  %12615 = vperm.xlu0 %17184, %v21730_v39  }
 0x414   : > { %6664 = vmatmul.mubr.f32.gmra.mrb[72].mxu0 %v25405_v26  ;;  %v25983_v26 = vld [vmem:[#allocation91_spill] sm:$0xff] }
 0x415   : > { %6669 = vmatprep.mubr.f32.mxu0 %v24876_v34  ;;  %17216 = vset.pattern.permute.xlu1 %v25871_v3 }
 0x416   : > { %7328 = vmatmul.mubr.f32.gmra.mrb[104].mxu1 %v25966_v37  ;;  %12791 = vperm.xlu1 %17216, %v21730_v39  }
 0x417   : > { %7333 = vmatprep.mubr.f32.mxu1 %v24876_v34  ;;  %12623 = vperm.xlu0 %17184, %v21749_v55  }
 0x418   : > { %6671 = vmatmul.mubr.f32.gmra.mrb[74].mxu0 %v25667_v21  ;;  %v25982_v21 = vld [vmem:[#allocation172_spill] sm:$0xff] }
 0x419   : > { %v5359_v29 = vpop.f32.mrb[64].mxu1  ;;  %6676 = vmatprep.mubr.f32.mxu0 %v24876_v34 }
 0x41a   : > { %v11786_v4 = vmul.f32 %v11770_v8, %v5359_v29  ;;  %v5361_v37 = vpop.f32.mrb[65].mxu1  ;;  %7336 = vmatmul.mubr.f32.gmra.mrb[106].mxu1 %v25972_v5  ;;  %17217 = vset.pattern.permute.xlu1 %v25888_v17  ;;  %v25976_v8 = vld [vmem:[#allocation69_spill] sm:$0xff] }
 0x41b   : > { %v11962_v43 = vmul.f32 %v11946_v15, %v5361_v37  ;;  %7341 = vmatprep.mubr.f32.mxu1 %v24876_v34  ;;  %13135 = vperm.xlu1 %17217, %v21772_v22   ;;  %v11947_v29 = vsel %vm10583_vm1, %v21244_v12, %v25976_v8  ;;  %v21782_v37 = vld [vmem:[%s17518_s15 + $0x58] sm:$0xff]  ;;  %v21786_v15 = vpop.permute.xlu1 %12595  ;;  %v21793_v12 = vpop.permute.xlu0 %12103 }
 0x41c   : > { %v11802_v56 = vadd.f32 %v11786_v4, %v25975_v6  ;;  %6678 = vmatmul.mubr.f32.gmra.mrb[76].mxu0 %v25410_v25  ;;  %12631 = vperm.xlu0 %17184, %v21782_v37   ;;  %25977 = vst [vmem:[#allocation93_spill] sm:$0xff] %v21786_v15  ;;  %25980 = vst [vmem:[#allocation145_spill] sm:$0xff] %v21793_v12  ;;  %v25981_v8 = vld [vmem:[#allocation85_spill] sm:$0xff]  ;;  %v11948_v15 = vsel %vm10583_vm1, %v25983_v26, %v25982_v21  ;;  %v25989_v12 = vld [vmem:[#allocation195_spill] sm:$0xff] }
 0x41d   : > { %v5366_v44 = vpop.f32.mrb[66].mxu1  ;;  %6683 = vmatprep.mubr.f32.mxu0 %v24876_v34 }
 0x41e   : > { %v21788_v53 = vadd.f32 %v11962_v43, %v11802_v56  ;;  %v11787_v4 = vmul.f32 %v11771_v33, %v5366_v44  ;;  %v5368_v6 = vpop.f32.mrb[67].mxu1  ;;  %7344 = vmatmul.mubr.f32.gmra.mrb[108].mxu1 %v25979_v51  ;;  %v25984_v43 = vld [vmem:[#allocation146_spill] sm:$0xff]  ;;  %v25985_v56 = vld [vmem:[#allocation143_spill] sm:$0xff] }
 0x41f   : > { %v11963_v5 = vmul.f32 %v11947_v29, %v5368_v6  ;;  %7349 = vmatprep.mubr.f32.mxu1 %v24876_v34  ;;  %17218 = vset.pattern.permute.xlu1 %v25900_v60  ;;  %v11772_v29 = vsel %vm10583_vm1, %v25985_v56, %v25984_v43  ;;  %v21808_v44 = vld [vmem:[%s17518_s15 + $0x68] sm:$0xff]  ;;  %v25987_v6 = vld [vmem:[#allocation33_spill] sm:$0xff] }
 0x420   : > { %25978 = vst [vmem:[#allocation177_spill] sm:$0xff] %v21788_v53  ;;  %v11803_v25 = vadd.f32 %v11787_v4, %v25981_v8  ;;  %6685 = vmatmul.mubr.f32.gmra.mrb[78].mxu0 %v24981_v49  ;;  %12899 = vperm.xlu1 %17218, %v21174_v31   ;;  %v21815_v8 = vpop.permute.xlu1 %12603  ;;  %v25990_v56 = vld [vmem:[#allocation167_spill] sm:$0xff] }
 0x421   : > { %v5373_v33 = vpop.f32.mrb[68].mxu1  ;;  %6690 = vmatprep.mubr.f32.mxu0 %v24876_v34  ;;  %12639 = vperm.xlu0 %17184, %v21808_v44   ;;  %25988 = vst [vmem:[#allocation147_spill] sm:$0xff] %v21815_v8  ;;  %v11949_v51 = vsel %vm10583_vm1, %v25990_v56, %v21404_v9  ;;  %v25995_v56 = vld [vmem:[#allocation37_spill] sm:$0xff] }
 0x422   : > { %v21811_v4 = vadd.f32 %v11963_v5, %v11803_v25  ;;  %v11788_v26 = vmul.f32 %v11772_v29, %v5373_v33  ;;  %v5375_v21 = vpop.f32.mrb[69].mxu1  ;;  %7352 = vmatmul.mubr.f32.gmra.mrb[110].mxu1 %v25987_v6  ;;  %v25991_v5 = vld [vmem:[#allocation136_spill] sm:$0xff]  ;;  %v21830_v29 = vld [vmem:[%s17518_s15 + $0x20] sm:$0xff] }
 0x423   : > { %v11964_v31 = vmul.f32 %v11948_v15, %v5375_v21  ;;  %7357 = vmatprep.mubr.f32.mxu1 %v24876_v34  ;;  %v25992_v33 = vld [vmem:[#allocation132_spill] sm:$0xff]  ;;  %v25996_v6 = vld [vmem:[#allocation106_spill] sm:$0xff] }
 0x424   : > { %25986 = vst [vmem:[#allocation191_spill] sm:$0xff] %v21811_v4  ;;  %v11804_v43 = vadd.f32 %v11788_v26, %v25989_v12  ;;  %6692 = vmatmul.mubr.f32.gmra.mrb[80].mxu0 %v17711_v48  ;;  %17219 = vset.pattern.permute.xlu1 %v25932_v40  ;;  %v11773_v15 = vsel %vm10583_vm1, %v25992_v33, %v25991_v5  ;;  %v21833_v12 = vpop.permute.xlu0 %12111  ;;  %v25997_v4 = vld [vmem:[#allocation199_spill] sm:$0xff]  ;;  %v21845_v33 = vld [vmem:[%s17518_s15] sm:$0xff] }
 0x425   : > { %v5380_v25 = vpop.f32.mrb[70].mxu1  ;;  %6697 = vmatprep.mubr.f32.mxu0 %v24876_v34  ;;  %13243 = vperm.xlu1 %17219, %v21830_v29   ;;  %25993 = vst [vmem:[#allocation69_spill] sm:$0xff] %v21833_v12  ;;  %v11774_v5 = vsel %vm10583_vm1, %v25997_v4, %v25996_v6  ;;  %25998 = vst [vmem:[#allocation172_spill] sm:$0xff] %v21845_v33  ;;  %v21856_v4 = vpop.permute.xlu1 %12611 }
 0x426   : > { %v21835_v9 = vadd.f32 %v11964_v31, %v11804_v43  ;;  %v11789_v26 = vmul.f32 %v11773_v15, %v5380_v25  ;;  %v5382_v21 = vpop.f32.mrb[71].mxu1  ;;  %7360 = vmatmul.mubr.f32.gmra.mrb[112].mxu1 %v25995_v56  ;;  %17198 = vset.pattern.permute.xlu0 %v25926_v62  ;;  %v25999_v31 = vld [vmem:[#allocation72_spill] sm:$0xff]  ;;  %v26000_v25 = vld [vmem:[#allocation99_spill] sm:$0xff]  ;;  %26001 = vst [vmem:[#allocation91_spill] sm:$0xff] %v21856_v4  ;;  %v26003_v56 = vld [vmem:[#allocation38_spill] sm:$0xff] }
 0x427   : > { %v11965_v8 = vmul.f32 %v11949_v51, %v5382_v21  ;;  %7365 = vmatprep.mubr.f32.mxu1 %v24876_v34  ;;  %13291 = vperm.xlu0 %17198, %v21845_v33   ;;  %v11950_v15 = vsel %vm10583_vm1, %v21284_v20, %v26000_v25 }
 0x428   : > { %25994 = vst [vmem:[#allocation85_spill] sm:$0xff] %v21835_v9  ;;  %v11805_v43 = vadd.f32 %v11789_v26, %v25999_v31  ;;  %6699 = vmatmul.mubr.f32.gmra.mrb[82].mxu0 %v17726_v30  ;;  %v21863_v20 = vpop.permute.xlu0 %12119  ;;  %v26005_v31 = vld [vmem:[#allocation178_spill] sm:$0xff] }
 0x429   : > { %v5387_v51 = vpop.f32.mrb[72].mxu1  ;;  %6704 = vmatprep.mubr.f32.mxu0 %v24876_v34  ;;  %17220 = vset.pattern.permute.xlu1 %v25926_v62  ;;  %26004 = vst [vmem:[#allocation143_spill] sm:$0xff] %v21863_v20  ;;  %v26006_v9 = vld [vmem:[#allocation86_spill] sm:$0xff]  ;;  %v26012_v20 = vld [vmem:[#allocation4_spill] sm:$0xff] }
 0x42a   : > { %v21858_v6 = vadd.f32 %v11965_v8, %v11805_v43  ;;  %v11790_v21 = vmul.f32 %v11774_v5, %v5387_v51  ;;  %v5389_v12 = vpop.f32.mrb[73].mxu1  ;;  %7368 = vmatmul.mubr.f32.gmra.mrb[114].mxu1 %v26003_v56  ;;  %13307 = vperm.xlu1 %17220, %v21830_v29   ;;  %v11951_v8 = vsel %vm10583_vm1, %v26006_v9, %v21414_v32  ;;  %v26007_v43 = vld [vmem:[#allocation129_spill] sm:$0xff]  ;;  %v26011_v9 = vld [vmem:[#allocation119_spill] sm:$0xff] }
 0x42b   : > { %v11966_v26 = vmul.f32 %v11950_v15, %v5389_v12  ;;  %7373 = vmatprep.mubr.f32.mxu1 %v24876_v34  ;;  %13311 = vperm.xlu0 %17198, %v21772_v22   ;;  %v26008_v51 = vld [vmem:[#allocation133_spill] sm:$0xff]  ;;  %v11776_v56 = vsel %vm10583_vm1, %v26012_v20, %v26011_v9 }
 0x42c   : > { %26002 = vst [vmem:[#allocation146_spill] sm:$0xff] %v21858_v6  ;;  %v11806_v25 = vadd.f32 %v11790_v21, %v26005_v31  ;;  %6706 = vmatmul.mubr.f32.gmra.mrb[84].mxu0 %v25415_v19  ;;  %v11775_v12 = vsel %vm10583_vm1, %v26008_v51, %v26007_v43  ;;  %v26010_v31 = vld [vmem:[#allocation44_spill] sm:$0xff]  ;;  %v21887_v43 = vpop.permute.xlu1 %12619  ;;  %v26021_v6 = vld [vmem:[#allocation46_spill] sm:$0xff] }
 0x42d   : > { %v5394_v5 = vpop.f32.mrb[74].mxu1  ;;  %6711 = vmatprep.mubr.f32.mxu0 %v24876_v34  ;;  %26013 = vst [vmem:[#allocation167_spill] sm:$0xff] %v21887_v43 }
 0x42e   : > { %v21877_v15 = vadd.f32 %v11966_v26, %v11806_v25  ;;  %v11791_v4 = vmul.f32 %v11775_v12, %v5394_v5  ;;  %v5396_v21 = vpop.f32.mrb[75].mxu1  ;;  %7376 = vmatmul.mubr.f32.gmra.mrb[116].mxu1 %v26010_v31  ;;  %17221 = vset.pattern.permute.xlu1 %v25892_v61  ;;  %v26014_v26 = vld [vmem:[#allocation197_spill] sm:$0xff]  ;;  %v26015_v5 = vld [vmem:[#allocation184_spill] sm:$0xff]  ;;  %v26016_v12 = vand.u32 4294901760, %v21618_v38 }
 0x42f   : > { %v11967_v32 = vmul.f32 %v11951_v8, %v5396_v21  ;;  %7381 = vmatprep.mubr.f32.mxu1 %v24876_v34  ;;  %12967 = vperm.xlu1 %17221, %v21730_v39   ;;  %v11952_v51 = vsel %vm10583_vm1, %v21314_v14, %v26015_v5  ;;  %v21896_v8 = vld [vmem:[%s17518_s15 + $0x30] sm:$0xff]  ;;  %v26018_v14 = vand.u32 4294901760, %v21643_v1  ;;  %v21915_v5 = vpop.permute.xlu0 %12175 }
 0x430   : > { %26009 = vst [vmem:[#allocation195_spill] sm:$0xff] %v21877_v15  ;;  %v11807_v25 = vadd.f32 %v11791_v4, %v26014_v26  ;;  %6713 = vmatmul.mubr.f32.gmra.mrb[86].mxu0 %v25417_v18  ;;  %13315 = vperm.xlu0 %17198, %v21896_v8   ;;  %v21903_v21 = vsub.f32 %v21618_v38, %v26016_v12  ;;  %v26017_v4 = vand.u32 4294901760, %v21623_v27  ;;  %26019 = vst [vmem:[#allocation136_spill] sm:$0xff] %v21915_v5 }
 0x431   : > { %v5401_v20 = vpop.f32.mrb[76].mxu1  ;;  %6718 = vmatprep.mubr.f32.mxu0 %v24876_v34  ;;  %v21913_v26 = vsub.f32 %v21643_v1, %v26018_v14  ;;  %v26022_v38 = vand.u32 4294901760, %v21648_v41  ;;  %v26024_v1 = vld [vmem:[#allocation95_spill] sm:$0xff]  ;;  %v26025_v14 = vld [vmem:[#allocation134_spill] sm:$0xff] }
 0x432   : > { %v21908_v9 = vsub.f32 %v21623_v27, %v26017_v4  ;;  %v21917_v43 = vadd.f32 %v11967_v32, %v11807_v25  ;;  %v11792_v31 = vmul.f32 %v11776_v56, %v5401_v20  ;;  %v5403_v15 = vpop.f32.mrb[77].mxu1  ;;  %7384 = vmatmul.mubr.f32.gmra.mrb[118].mxu1 %v26021_v6  ;;  %v11953_v56 = vsel %vm10583_vm1, %v26025_v14, %v21426_v7  ;;  %v26026_v25 = vld [vmem:[#allocation81_spill] sm:$0xff]  ;;  %v26030_v6 = vld [vmem:[#allocation51_spill] sm:$0xff]  ;;  %v26032_v20 = vld [vmem:[#allocation166_spill] sm:$0xff] }
 0x433   : > { %v21923_v12 = vsub.f32 %v21648_v41, %v26022_v38  ;;  %v11968_v27 = vmul.f32 %v11952_v51, %v5403_v15  ;;  %7389 = vmatprep.mubr.f32.mxu1 %v24876_v34  ;;  %17222 = vset.pattern.permute.xlu1 %v25932_v40  ;;  %v26027_v41 = vld [vmem:[#allocation80_spill] sm:$0xff]  ;;  %v21939_v51 = vpop.permute.xlu1 %12627  ;;  %v26033_v7 = vld [vmem:[#allocation150_spill] sm:$0xff] }
 0x434   : > { %26020 = vst [vmem:[#allocation132_spill] sm:$0xff] %v21917_v43  ;;  %v11808_v4 = vadd.f32 %v11792_v31, %v26024_v1  ;;  %6720 = vmatmul.mubr.f32.gmra.mrb[88].mxu0 %v25674_v58  ;;  %13247 = vperm.xlu1 %17222, %v21772_v22   ;;  %v11777_v15 = vsel %vm10583_vm1, %v26027_v41, %v26026_v25  ;;  %26028 = vst [vmem:[#allocation199_spill] sm:$0xff] %v21939_v51  ;;  %v21951_v31 = vpop.permute.xlu0 %12187  ;;  %v26034_v43 = vld [vmem:[#allocation127_spill] sm:$0xff] }
 0x435   : > { %26023 = vst [vmem:[#allocation106_spill] sm:$0xff] %v21923_v12  ;;  %v5408_v32 = vpop.f32.mrb[78].mxu1  ;;  %6725 = vmatprep.mubr.f32.mxu0 %v24876_v34  ;;  %17231 = vset.pattern.permute.xlu0 %v25871_v3  ;;  %26031 = vst [vmem:[#allocation99_spill] sm:$0xff] %v21951_v31 }
 0x436   : > { %v21945_v38 = vadd.f32 %v11968_v27, %v11808_v4  ;;  %v11793_v1 = vmul.f32 %v11777_v15, %v5408_v32  ;;  %v5410_v14 = vpop.f32.mrb[79].mxu1  ;;  %7392 = vmatmul.mubr.f32.gmra.mrb[120].mxu1 %v26030_v6  ;;  %12763 = vperm.xlu0 %17231, %v21845_v33   ;;  %v11778_v27 = vsel %vm10583_vm1, %v26034_v43, %v26033_v7  ;;  %v26035_v4 = vld [vmem:[#allocation35_spill] sm:$0xff]  ;;  %v26036_v15 = vand.u32 4294901760, %v21903_v21  ;;  %v26040_v6 = vld [vmem:[#allocation54_spill] sm:$0xff] }
 0x437   : > { %v11969_v41 = vmul.f32 %v11953_v56, %v5410_v14  ;;  %7397 = vmatprep.mubr.f32.mxu1 %v24876_v34  ;;  %v11954_v32 = vsel %vm10583_vm1, %v21337_v54, %v26035_v4  ;;  %v26037_v43 = vand.u32 4294901760, %v21908_v9 }
 0x438   : > { %26029 = vst [vmem:[#allocation72_spill] sm:$0xff] %v21945_v38  ;;  %v11809_v51 = vadd.f32 %v11793_v1, %v26032_v20  ;;  %6727 = vmatmul.mubr.f32.gmra.mrb[90].mxu0 %v25929_v52  ;;  %17223 = vset.pattern.permute.xlu1 %v25865_v42  ;;  %v8283_v20 = vsub.f32 %v21903_v21, %v26036_v15  ;;  %v26038_v1 = vand.u32 4294901760, %v21913_v26  ;;  %v26041_v38 = vand.u32 4294901760, %v21923_v12 }
 0x439   : > { %v5415_v56 = vpop.f32.mrb[80].mxu1  ;;  %6732 = vmatprep.mubr.f32.mxu0 %v24876_v34  ;;  %12731 = vperm.xlu1 %17223, %v21544_v47   ;;  %v8295_v7 = vsub.f32 %v21908_v9, %v26037_v43  ;;  %v26042_v43 = vand.u32 4294901760, %v21658_v13 }
 0x43a   : > { %v8301_v54 = vsub.f32 %v21913_v26, %v26038_v1  ;;  %v21975_v14 = vadd.f32 %v11969_v41, %v11809_v51  ;;  %v11794_v4 = vmul.f32 %v11778_v27, %v5415_v56  ;;  %v5417_v25 = vpop.f32.mrb[81].mxu1  ;;  %7400 = vmatmul.mubr.f32.gmra.mrb[122].mxu1 %v26040_v6  ;;  %v8313_v31 = vsub.f32 %v21923_v12, %v26041_v38  ;;  %v21993_v27 = vpop.permute.xlu1 %12635  ;;  %v26047_v56 = vld [vmem:[#allocation158_spill] sm:$0xff]  ;;  %v26049_v6 = vld [vmem:[#allocation187_spill] sm:$0xff] }
 0x43b   : > { %12775 = vperm.xlu0 %17231, %v21632_v59   ;;  %v11970_v15 = vmul.f32 %v11954_v32, %v5417_v25  ;;  %7405 = vmatprep.mubr.f32.mxu1 %v24876_v34  ;;  %v21986_v5 = vsub.f32 %v21658_v13, %v26042_v43  ;;  %v26044_v51 = vand.u32 4294901760, %v21663_v28  ;;  %26046 = vst [vmem:[#allocation133_spill] sm:$0xff] %v21993_v27  ;;  %v26048_v38 = vld [vmem:[#allocation138_spill] sm:$0xff]  ;;  %v26050_v13 = vld [vmem:[#allocation116_spill] sm:$0xff] }
 0x43c   : > { %26039 = vst [vmem:[#allocation178_spill] sm:$0xff] %v21975_v14  ;;  %v11810_v1 = vadd.f32 %v11794_v4, %v26047_v56  ;;  %v11955_v25 = vsel %vm10583_vm1, %v26048_v38, %v21453_v46  ;;  %6734 = vmatmul.mubr.f32.gmra.mrb[92].mxu0 %v25934_v16  ;;  %v11779_v43 = vsel %vm10583_vm1, %v26050_v13, %v26049_v6  ;;  %v22007_v4 = vpop.permute.xlu0 %12195  ;;  %v26052_v38 = vld [vmem:[#allocation60_spill] sm:$0xff]  ;;  %v8302_v14 = vand.u32 4294901760, %v8301_v54 }
 0x43d   : > { %26043 = vst [vmem:[#allocation86_spill] sm:$0xff] %v21986_v5  ;;  %v21991_v41 = vsub.f32 %v21663_v28, %v26044_v51  ;;  %v5422_v32 = vpop.f32.mrb[82].mxu1  ;;  %6739 = vmatprep.mubr.f32.mxu0 %v24876_v34  ;;  %17224 = vset.pattern.permute.xlu1 %v25871_v3  ;;  %v8284_v28 = vand.u32 4294901760, %v8283_v20  ;;  %v8296_v51 = vand.u32 4294901760, %v8295_v7  ;;  %v8314_v53 = vand.u32 4294901760, %v8313_v31  ;;  %v26053_v7 = vld [vmem:[#allocation84_spill] sm:$0xff] }
 0x43e   : > { %v22009_v56 = vadd.f32 %v11970_v15, %v11810_v1  ;;  %v11795_v27 = vmul.f32 %v11779_v43, %v5422_v32  ;;  %v5424_v46 = vpop.f32.mrb[83].mxu1  ;;  %7408 = vmatmul.mubr.f32.gmra.mrb[124].mxu1 %v26052_v38  ;;  %12795 = vperm.xlu1 %17224, %v21544_v47   ;;  %v26054_v1 = vld [vmem:[#allocation173_spill] sm:$0xff]  ;;  %v26055_v31 = vld [vmem:[#allocation152_spill] sm:$0xff]  ;;  %v26057_v43 = vand.u32 4294901760, %v20820_v11 }
 0x43f   : > { %26045 = vst [vmem:[#allocation129_spill] sm:$0xff] %v21991_v41  ;;  %v11971_v33 = vmul.f32 %v11955_v25, %v5424_v46  ;;  %7413 = vmatprep.mubr.f32.mxu1 %v24876_v34  ;;  %12779 = vperm.xlu0 %17231, %v21830_v29   ;;  %v11956_v32 = vsel %vm10583_vm1, %v21351_v2, %v26054_v1  ;;  %v26056_v25 = vld [vmem:[#allocation205_spill] sm:$0xff]  ;;  %v26058_v46 = vand.u32 4294901760, %v20833_v57  ;;  %v26061_v38 = vld [vmem:[#allocation64_spill] sm:$0xff]  ;;  %v26062_v57 = vand.u32 4294901760, %v21986_v5 }
 0x440   : > { %26051 = vst [vmem:[#allocation119_spill] sm:$0xff] %v22009_v56  ;;  %v11811_v15 = vadd.f32 %v11795_v27, %v26053_v7  ;;  %6741 = vmatmul.mubr.f32.gmra.mrb[94].mxu0 %v25813_v23  ;;  %v11780_v13 = vsel %vm10583_vm1, %v26056_v25, %v26055_v31  ;;  %v22032_v27 = vpop.permute.xlu1 %12699  ;;  %v15534_v7 = vpack.c.bf16 %v8296_v51, %v8284_v28  ;;  %v26063_v28 = vand.u32 4294901760, %v21991_v41  ;;  %v22046_v51 = vpop.permute.xlu0 %12203  ;;  %v26066_v25 = vld [vmem:[#allocation120_spill] sm:$0xff] }
 0x441   : > { %v5429_v54 = vpop.f32.mrb[84].mxu1  ;;  %v15510_v20 = vpack.c.bf16 %v26058_v46, %v26057_v43  ;;  %8097 = vmatprep.mubr.f32.mxu0 %v24876_v34  ;;  %26059 = vst [vmem:[#allocation4_spill] sm:$0xff] %v22032_v27  ;;  %v15536_v56 = vpack.c.bf16 %v8314_v53, %v8302_v14  ;;  %v8307_v11 = vsub.f32 %v21986_v5, %v26062_v57  ;;  %v26065_v14 = vld [vmem:[#allocation18_spill] sm:$0xff] }
 0x442   : > { %v22034_v6 = vadd.f32 %v11971_v33, %v11811_v15  ;;  %v11796_v2 = vmul.f32 %v11780_v13, %v5429_v54  ;;  %v5431_v1 = vpop.f32.mrb[85].mxu1  ;;  %7416 = vmatmul.mubr.f32.gmra.mrb[126].mxu1 %v26061_v38  ;;  %17225 = vset.pattern.permute.xlu1 %v25888_v17  ;;  %v8319_v33 = vsub.f32 %v21991_v41, %v26063_v28  ;;  %v26064_v54 = vld [vmem:[#allocation190_spill] sm:$0xff]  ;;  %v26067_v13 = vld [vmem:[#allocation125_spill] sm:$0xff] }
 0x443   : > { %v11972_v31 = vmul.f32 %v11956_v32, %v5431_v1  ;;  %7494 = vmatprep.mubr.f32.mxu1 %v24876_v34  ;;  %13139 = vperm.xlu1 %17225, %v21896_v8   ;;  %v11957_v53 = vsel %vm10583_vm1, %v26064_v54, %v21471_v0  ;;  %v11781_v43 = vsel %vm10583_vm1, %v26067_v13, %v26066_v25  ;;  %v26069_v1 = vld [vmem:[#allocation13_spill] sm:$0xff]  ;;  %v26072_v28 = vld [vmem:[#allocation82_spill] sm:$0xff]  ;;  %v26075_v13 = vld [vmem:[#allocation111_spill] sm:$0xff] }
 0x444   : > { %26060 = vst [vmem:[#allocation197_spill] sm:$0xff] %v22034_v6  ;;  %v11812_v15 = vadd.f32 %v11796_v2, %v21223_v63  ;;  %8103 = vmatmul.mubr.f32.vlgmr.msra.gmra.mrb[96].mxu0 %v26065_v14  ;;  %12799 = vperm.xlu0 %17231, %v21749_v55   ;;  %v26070_v0 = vld [vmem:[#allocation193_spill] sm:$0xff]  ;;  %v26073_v54 = vand.u32 4294901760, %v26072_v28  ;;  %v22068_v25 = vpop.permute.xlu1 %12703  ;;  %v26081_v6 = vld [vmem:[#allocation2_spill] sm:$0xff] }
 0x445   : > { %v5436_v32 = vpop.f32.mrb[86].mxu1  ;;  %8108 = vmatprep.mubr.f32.mxu0 %v24876_v34  ;;  %15535 = vmatpush1.bf16.msra.mxu0 %v15534_v7  ;;  %v26071_v57 = vand.u32 4294901760, %v26070_v0  ;;  %26074 = vst [vmem:[#allocation95_spill] sm:$0xff] %v22068_v25  ;;  %v26076_v7 = vand.u32 4294901760, %v26075_v13  ;;  %v26080_v0 = vld [vmem:[#allocation194_spill] sm:$0xff] }
 0x446   : > { %v22060_v46 = vadd.f32 %v11972_v31, %v11812_v15  ;;  %v11797_v63 = vmul.f32 %v11781_v43, %v5436_v32  ;;  %v5438_v2 = vpop.f32.mrb[87].mxu1  ;;  %7498 = vmatmul.mubr.f32.vlgmr.msra.gmra.mrb[96].mxu1 %v26069_v1  ;;  %15537 = vmatprep.subr.bf16.mxu0 %v15536_v56  ;;  %v26077_v31 = vld [vmem:[#allocation157_spill] sm:$0xff]  ;;  %v8308_v43 = vand.u32 4294901760, %v8307_v11  ;;  %v26079_v1 = vld [vmem:[#allocation151_spill] sm:$0xff]  ;;  %v11958_v56 = vsel %vm10583_vm1, %v26081_v6, %v26080_v0  ;;  %v22087_v11 = vpop.permute.xlu0 %12211  ;;  %v26089_v0 = vld [vmem:[#allocation126_spill] sm:$0xff] }
 0x447   : > { %v15512_v27 = vpack.c.bf16 %v26073_v54, %v26071_v57  ;;  %v11973_v14 = vmul.f32 %v11957_v53, %v5438_v2  ;;  %15511 = vmatpush1.bf16.msra.mxu1 %v15510_v20  ;;  %7503 = vmatprep.mubr.f32.mxu1 %v24876_v34  ;;  %v26078_v15 = vand.u32 4294901760, %v26077_v31  ;;  %v26082_v53 = vld [vmem:[#allocation21_spill] sm:$0xff]  ;;  %v26083_v2 = vld [vmem:[#allocation154_spill] sm:$0xff]  ;;  %v26084_v57 = vld [vmem:[#allocation207_spill] sm:$0xff] }
 0x448   : > { %26068 = vst [vmem:[#allocation184_spill] sm:$0xff] %v22060_v46  ;;  %v8320_v46 = vand.u32 4294901760, %v8319_v33  ;;  %v11813_v38 = vadd.f32 %v11797_v63, %v26079_v1  ;;  %8114 = vmatmul.mubr.f32.gmra.mrb[98].mxu0 %v26082_v53  ;;  %17226 = vset.pattern.permute.xlu1 %v25865_v42  ;;  %v11782_v28 = vsel %vm10583_vm1, %v26084_v57, %v26083_v2  ;;  %v26086_v1 = vld [vmem:[#allocation14_spill] sm:$0xff]  ;;  %v26090_v57 = vld [vmem:[#allocation25_spill] sm:$0xff] }
 0x449   : > { %v15514_v32 = vpack.c.bf16 %v26078_v15, %v26076_v7  ;;  %v5443_v20 = vpop.f32.mrb[88].mxu1  ;;  %8119 = vmatprep.mubr.f32.mxu0 %v24876_v34  ;;  %12735 = vperm.xlu1 %17226, %v21749_v55   ;;  %v26087_v7 = vld [vmem:[#allocation171_spill] sm:$0xff]  ;;  %v26101_v25 = vld [vmem:[#allocation130_spill] sm:$0xff] }
 0x44a   : > { %v22089_v33 = vadd.f32 %v11973_v14, %v11813_v38  ;;  %v11798_v63 = vmul.f32 %v11782_v28, %v5443_v20  ;;  %v5445_v6 = vpop.f32.mrb[89].mxu1  ;;  %7507 = vmatmul.mubr.f32.gmra.mrb[98].mxu1 %v26086_v1  ;;  %15513 = vmatprep.subr.bf16.mxu1 %v15512_v27  ;;  %v15538_v13 = vpack.c.bf16 %v8320_v46, %v8308_v43  ;;  %v26088_v15 = vld [vmem:[#allocation75_spill] sm:$0xff]  ;;  %v26091_v38 = vld [vmem:[#allocation148_spill] sm:$0xff] }
 0x44b   : > { %v11974_v54 = vmul.f32 %v11958_v56, %v5445_v6  ;;  %7512 = vmatprep.mubr.f32.mxu1 %v24876_v34  ;;  %15515 = vmatpush1.bf16.msra.mxu1 %v15514_v32  ;;  %v11959_v2 = vsel %vm10583_vm1, %v26089_v0, %v26088_v15  ;;  %v26092_v14 = vld [vmem:[#allocation163_spill] sm:$0xff]  ;;  %v26093_v56 = vld [vmem:[#allocation30_spill] sm:$0xff]  ;;  %v26094_v28 = vld [vmem:[#allocation164_spill] sm:$0xff]  ;;  %v22107_v32 = vpop.permute.xlu1 %12767  ;;  %v22115_v0 = vpop.permute.xlu0 %12219 }
 0x44c   : > { %26085 = vst [vmem:[#allocation134_spill] sm:$0xff] %v22089_v33  ;;  %v11814_v31 = vadd.f32 %v11798_v63, %v26087_v7  ;;  %8125 = vmatmul.mubr.f32.gmra.mrb[100].mxu0 %v26090_v57  ;;  %15517 = vmatprep.subr.bf16.mxu1 %v26091_v38  ;;  %v15540_v20 = vpack.c.bf16 %v26092_v14, %v21608_v35  ;;  %26095 = vst [vmem:[#allocation81_spill] sm:$0xff] %v22107_v32  ;;  %v26097_v7 = vld [vmem:[#allocation16_spill] sm:$0xff]  ;;  %v22158_v57 = vld [vmem:[%s17518_s15 + $0x8] sm:$0xff] }
 0x44d   : > { %v5450_v27 = vpop.f32.mrb[90].mxu1  ;;  %v11783_v46 = vsel %vm10583_vm1, %v26094_v28, %v26093_v56  ;;  %8130 = vmatprep.mubr.f32.mxu0 %v24876_v34  ;;  %17227 = vset.pattern.permute.xlu1 %v25913_v50  ;;  %26098 = vst [vmem:[#allocation166_spill] sm:$0xff] %v22115_v0  ;;  %v26099_v38 = vld [vmem:[#allocation180_spill] sm:$0xff]  ;;  %v26100_v28 = vld [vmem:[#allocation185_spill] sm:$0xff] }
 0x44e   : > { %v22110_v43 = vadd.f32 %v11974_v54, %v11814_v31  ;;  %v11799_v63 = vmul.f32 %v11783_v46, %v5450_v27  ;;  %v5452_v6 = vpop.f32.mrb[91].mxu1  ;;  %7516 = vmatmul.mubr.f32.gmra.mrb[100].mxu1 %v26097_v7  ;;  %13079 = vperm.xlu1 %17227, %v21730_v39   ;;  %v11960_v54 = vsel %vm10583_vm1, %v26101_v25, %v26100_v28  ;;  %v26102_v31 = vld [vmem:[#allocation28_spill] sm:$0xff]  ;;  %v26103_v46 = vld [vmem:[#allocation110_spill] sm:$0xff] }
 0x44f   : > { %v11975_v15 = vmul.f32 %v11959_v2, %v5452_v6  ;;  %7521 = vmatprep.mubr.f32.mxu1 %v24876_v34  ;;  %15539 = vmatpush1.bf16.msra.mxu0 %v15538_v13  ;;  %v26104_v32 = vld [vmem:[#allocation192_spill] sm:$0xff]  ;;  %v26106_v25 = vld [vmem:[#allocation22_spill] sm:$0xff]  ;;  %v22137_v28 = vpop.permute.xlu1 %12939  ;;  %v15544_v7 = vpack.c.bf16 %v21923_v12, %v21913_v26 }
 0x450   : > { %26096 = vst [vmem:[#allocation80_spill] sm:$0xff] %v22110_v43  ;;  %v11815_v56 = vadd.f32 %v11799_v63, %v26099_v38  ;;  %8136 = vmatmul.mubr.f32.gmra.mrb[102].mxu0 %v26102_v31  ;;  %15541 = vmatprep.subr.bf16.mxu0 %v15540_v20  ;;  %v11784_v2 = vsel %vm10583_vm1, %v26104_v32, %v26103_v46  ;;  %v22129_v13 = vld [vmem:[%s17518_s15 + $0x50] sm:$0xff]  ;;  %26107 = vst [vmem:[#allocation127_spill] sm:$0xff] %v22137_v28  ;;  %v26109_v31 = vld [vmem:[#allocation31_spill] sm:$0xff] }
 0x451   : > { %v5457_v27 = vpop.f32.mrb[92].mxu1  ;;  %8141 = vmatprep.mubr.f32.mxu0 %v24876_v34  ;;  %12803 = vperm.xlu0 %17231, %v22129_v13   ;;  %v26108_v32 = vld [vmem:[#allocation108_spill] sm:$0xff] }
 0x452   : > { %v22132_v63 = vadd.f32 %v11975_v15, %v11815_v56  ;;  %v11800_v6 = vmul.f32 %v11784_v2, %v5457_v27  ;;  %v5459_v38 = vpop.f32.mrb[93].mxu1  ;;  %7525 = vmatmul.mubr.f32.gmra.mrb[102].mxu1 %v26106_v25  ;;  %17228 = vset.pattern.permute.xlu1 %v25888_v17  ;;  %v26110_v56 = vld [vmem:[#allocation114_spill] sm:$0xff]  ;;  %v26111_v27 = vld [vmem:[#allocation144_spill] sm:$0xff] }
 0x453   : > { %v11976_v20 = vmul.f32 %v11960_v54, %v5459_v38  ;;  %7530 = vmatprep.mubr.f32.mxu1 %v24876_v34  ;;  %13143 = vperm.xlu1 %17228, %v21730_v39   ;;  %v11785_v2 = vsel %vm10583_vm1, %v26111_v27, %v26110_v56  ;;  %v22147_v54 = vpop.permute.xlu0 %12227  ;;  %v26186_v33 = vld [vmem:[#allocation172_spill] sm:$0xff] }
 0x454   : > { %26105 = vst [vmem:[#allocation150_spill] sm:$0xff] %v22132_v63  ;;  %v11816_v46 = vadd.f32 %v11800_v6, %v26108_v32  ;;  %8147 = vmatmul.mubr.f32.gmra.mrb[104].mxu0 %v26109_v31  ;;  %26112 = vst [vmem:[#allocation35_spill] sm:$0xff] %v22147_v54  ;;  %v26114_v63 = vld [vmem:[#allocation161_spill] sm:$0xff]  ;;  %v26115_v6 = vld [vmem:[#allocation94_spill] sm:$0xff] }
 0x455   : > { %v5464_v15 = vpop.f32.mrb[94].mxu1  ;;  %8152 = vmatprep.mubr.f32.mxu0 %v24876_v34  ;;  %17236 = vset.pattern.permute.xlu0 %v25932_v40  ;;  %v11961_v32 = vsel %vm10583_vm1, %v26115_v6, %v26114_v63  ;;  %v26116_v31 = vld [vmem:[#allocation23_spill] sm:$0xff]  ;;  %v22167_v63 = vpop.permute.xlu1 %12879  ;;  %v26122_v6 = vld [vmem:[#allocation88_spill] sm:$0xff]  ;;  %v26156_v54 = vld [vmem:[#allocation201_spill] sm:$0xff] }
 0x456   : > { %v22150_v38 = vadd.f32 %v11976_v20, %v11816_v46  ;;  %v11801_v28 = vmul.f32 %v11785_v2, %v5464_v15  ;;  %v5466_v25 = vpop.f32.mrb[95].mxu1  ;;  %7534 = vmatmul.mubr.f32.gmra.mrb[104].mxu1 %v26116_v31  ;;  %13231 = vperm.xlu0 %17236, %v22158_v57   ;;  %v26117_v20 = vld [vmem:[#allocation96_spill] sm:$0xff]  ;;  %v26118_v15 = vld [vmem:[#allocation34_spill] sm:$0xff]  ;;  %26119 = vst [vmem:[#allocation138_spill] sm:$0xff] %v22167_v63  ;;  %v26121_v2 = vld [vmem:[#allocation27_spill] sm:$0xff] }
 0x457   : > { %v11977_v56 = vmul.f32 %v11961_v32, %v5466_v25  ;;  %7539 = vmatprep.mubr.f32.mxu1 %v24876_v34  ;;  %17229 = vset.pattern.permute.xlu1 %v25892_v61  ;;  %v22174_v25 = vpop.permute.xlu0 %12235  ;;  %v26123_v32 = vld [vmem:[#allocation40_spill] sm:$0xff]  ;;  %v26128_v63 = vld [vmem:[#allocation49_spill] sm:$0xff] }
 0x458   : > { %26113 = vst [vmem:[#allocation158_spill] sm:$0xff] %v22150_v38  ;;  %v11817_v46 = vadd.f32 %v11801_v28, %v26117_v20  ;;  %8158 = vmatmul.mubr.f32.gmra.mrb[106].mxu0 %v26118_v15  ;;  %12971 = vperm.xlu1 %17229, %v21544_v47   ;;  %v26124_v28 = vld [vmem:[#allocation32_spill] sm:$0xff]  ;;  %v26126_v20 = vld [vmem:[#allocation45_spill] sm:$0xff]  ;;  %v26155_v38 = vld [vmem:[#allocation7_spill] sm:$0xff] }
 0x459   : > { %8163 = vmatprep.mubr.f32.mxu0 %v24876_v34  ;;  %v26142_v15 = vld [vmem:[#allocation65_spill] sm:$0xff]  ;;  %v26149_v31 = vld [vmem:[#allocation68_spill] sm:$0xff] }
 0x45a   : > { %v22169_v27 = vadd.f32 %v11977_v56, %v11817_v46  ;;  %7543 = vmatmul.mubr.f32.gmra.mrb[106].mxu1 %v26121_v2  ;;  %13235 = vperm.xlu0 %17236, %v26122_v6   ;;  %v22183_v56 = vpop.permute.xlu1 %12707  ;;  %v26127_v6 = vld [vmem:[#allocation36_spill] sm:$0xff]  ;;  %v26144_v2 = vld [vmem:[#allocation58_spill] sm:$0xff] }
 0x45b   : > { %7548 = vmatprep.mubr.f32.mxu1 %v24876_v34  ;;  %26125 = vst [vmem:[#allocation116_spill] sm:$0xff] %v22183_v56  ;;  %v22188_v46 = vpop.permute.xlu0 %12247 }
 0x45c   : > { %26120 = vst [vmem:[#allocation187_spill] sm:$0xff] %v22169_v27  ;;  %8169 = vmatmul.mubr.f32.gmra.mrb[108].mxu0 %v26123_v32  ;;  %17230 = vset.pattern.permute.xlu1 %v25932_v40  ;;  %v26131_v32 = vld [vmem:[#allocation53_spill] sm:$0xff]  ;;  %v26147_v27 = vld [vmem:[#allocation63_spill] sm:$0xff] }
 0x45d   : > { %8174 = vmatprep.mubr.f32.mxu0 %v24876_v34  ;;  %13251 = vperm.xlu1 %17230, %v21896_v8  }
 0x45e   : > { %7552 = vmatmul.mubr.f32.gmra.mrb[108].mxu1 %v26124_v28  ;;  %13255 = vperm.xlu0 %17236, %v21730_v39   ;;  %v22196_v56 = vpop.permute.xlu1 %12771  ;;  %v26135_v28 = vld [vmem:[#allocation47_spill] sm:$0xff] }
 0x45f   : > { %7557 = vmatprep.mubr.f32.mxu1 %v24876_v34  ;;  %26129 = vst [vmem:[#allocation84_spill] sm:$0xff] %v22196_v56 }
 0x460   : > { %8180 = vmatmul.mubr.f32.gmra.mrb[110].mxu0 %v26126_v20  ;;  %v26130_v20 = vld [vmem:[#allocation41_spill] sm:$0xff] }
 0x461   : > { %8185 = vmatprep.mubr.f32.mxu0 %v24876_v34  ;;  %17232 = vset.pattern.permute.xlu1 %v25900_v60 }
 0x462   : > { %7561 = vmatmul.mubr.f32.gmra.mrb[110].mxu1 %v26127_v6  ;;  %12911 = vperm.xlu1 %17232, %v21749_v55   ;;  %v22202_v6 = vpop.permute.xlu0 %12255  ;;  %v22210_v56 = vpop.permute.xlu1 %13115 }
 0x463   : > { %7566 = vmatprep.mubr.f32.mxu1 %v24876_v34  ;;  %13259 = vperm.xlu0 %17236, %v21544_v47   ;;  %26133 = vst [vmem:[#allocation173_spill] sm:$0xff] %v22210_v56 }
 0x464   : > { %8191 = vmatmul.mubr.f32.gmra.mrb[112].mxu0 %v26128_v63  ;;  %v26132_v63 = vld [vmem:[#allocation43_spill] sm:$0xff] }
 0x465   : > { %8196 = vmatprep.mubr.f32.mxu0 %v24876_v34 }
 0x466   : > { %7570 = vmatmul.mubr.f32.gmra.mrb[112].mxu1 %v26130_v20  ;;  %17233 = vset.pattern.permute.xlu1 %v25892_v61  ;;  %v26134_v20 = vld [vmem:[#allocation55_spill] sm:$0xff]  ;;  %v22224_v56 = vpop.permute.xlu1 %12711 }
 0x467   : > { %7575 = vmatprep.mubr.f32.mxu1 %v24876_v34  ;;  %12975 = vperm.xlu1 %17233, %v21749_v55   ;;  %26137 = vst [vmem:[#allocation152_spill] sm:$0xff] %v22224_v56 }
 0x468   : > { %8202 = vmatmul.mubr.f32.gmra.mrb[114].mxu0 %v26131_v32  ;;  %17243 = vset.pattern.permute.xlu0 %v25865_v42  ;;  %v22216_v32 = vpop.permute.xlu0 %12263 }
 0x469   : > { %8207 = vmatprep.mubr.f32.mxu0 %v24876_v34  ;;  %12719 = vperm.xlu0 %17243, %v21772_v22  }
 0x46a   : > { %7579 = vmatmul.mubr.f32.gmra.mrb[114].mxu1 %v26132_v63  ;;  %v26136_v63 = vld [vmem:[#allocation59_spill] sm:$0xff]  ;;  %v22238_v56 = vpop.permute.xlu1 %13055 }
 0x46b   : > { %7584 = vmatprep.mubr.f32.mxu1 %v24876_v34  ;;  %17234 = vset.pattern.permute.xlu1 %v25926_v62  ;;  %26141 = vst [vmem:[#allocation205_spill] sm:$0xff] %v22238_v56  ;;  %v22254_v56 = vld [vmem:[%s17518_s15 + $0x70] sm:$0xff] }
 0x46c   : > { %8213 = vmatmul.mubr.f32.gmra.mrb[116].mxu0 %v26134_v20  ;;  %13319 = vperm.xlu1 %17234, %v21730_v39   ;;  %v26138_v39 = vld [vmem:[#allocation50_spill] sm:$0xff]  ;;  %v22230_v20 = vpop.permute.xlu0 %12271 }
 0x46d   : > { %8218 = vmatprep.mubr.f32.mxu0 %v24876_v34  ;;  %12723 = vperm.xlu0 %17243, %v21896_v8  }
 0x46e   : > { %7588 = vmatmul.mubr.f32.gmra.mrb[116].mxu1 %v26135_v28  ;;  %v26139_v28 = vld [vmem:[#allocation62_spill] sm:$0xff] }
 0x46f   : > { %7593 = vmatprep.mubr.f32.mxu1 %v24876_v34 }
 0x470   : > { %8224 = vmatmul.mubr.f32.gmra.mrb[118].mxu0 %v26136_v63  ;;  %17235 = vset.pattern.permute.xlu1 %v25865_v42  ;;  %v26140_v63 = vld [vmem:[#allocation56_spill] sm:$0xff] }
 0x471   : > { %8229 = vmatprep.mubr.f32.mxu0 %v24876_v34  ;;  %12739 = vperm.xlu1 %17235, %v22129_v13  }
 0x472   : > { %7597 = vmatmul.mubr.f32.gmra.mrb[118].mxu1 %v26138_v39  ;;  %12743 = vperm.xlu0 %17243, %v21782_v37   ;;  %v22241_v39 = vld [vmem:[%s17518_s15 + $0x60] sm:$0xff] }
 0x473   : > { %7602 = vmatprep.mubr.f32.mxu1 %v24876_v34 }
 0x474   : > { %8235 = vmatmul.mubr.f32.gmra.mrb[120].mxu0 %v26139_v28  ;;  %v22246_v28 = vpop.permute.xlu0 %12279 }
 0x475   : > { %8240 = vmatprep.mubr.f32.mxu0 %v24876_v34  ;;  %17237 = vset.pattern.permute.xlu1 %v25913_v50  ;;  %26143 = vst [vmem:[#allocation190_spill] sm:$0xff] %v22246_v28 }
 0x476   : > { %7606 = vmatmul.mubr.f32.gmra.mrb[120].mxu1 %v26140_v63  ;;  %13083 = vperm.xlu1 %17237, %v21544_v47   ;;  %v26145_v63 = vld [vmem:[#allocation67_spill] sm:$0xff] }
 0x477   : > { %7611 = vmatprep.mubr.f32.mxu1 %v24876_v34  ;;  %12747 = vperm.xlu0 %17243, %v22241_v39  }
 0x478   : > { %8246 = vmatmul.mubr.f32.gmra.mrb[122].mxu0 %v26142_v15  ;;  %v22258_v15 = vpop.permute.xlu1 %13119 }
 0x479   : > { %8251 = vmatprep.mubr.f32.mxu0 %v24876_v34  ;;  %26146 = vst [vmem:[#allocation120_spill] sm:$0xff] %v22258_v15  ;;  %v15542_v15 = vpack.c.bf16 %v21908_v9, %v21903_v21 }
 0x47a   : > { %7615 = vmatmul.mubr.f32.gmra.mrb[122].mxu1 %v26144_v2  ;;  %17238 = vset.pattern.permute.xlu1 %v25888_v17  ;;  %v22263_v2 = vpop.permute.xlu0 %12287 }
 0x47b   : > { %7620 = vmatprep.mubr.f32.mxu1 %v24876_v34  ;;  %13147 = vperm.xlu1 %17238, %v21544_v47   ;;  %26148 = vst [vmem:[#allocation125_spill] sm:$0xff] %v22263_v2  ;;  %v26150_v47 = vld [vmem:[#allocation66_spill] sm:$0xff] }
 0x47c   : > { %8257 = vmatmul.mubr.f32.gmra.mrb[124].mxu0 %v26145_v63  ;;  %12755 = vperm.xlu0 %17243, %v22254_v56   ;;  %v22274_v63 = vpop.permute.xlu1 %12947 }
 0x47d   : > { %8262 = vmatprep.mubr.f32.mxu0 %v24876_v34  ;;  %26151 = vst [vmem:[#allocation193_spill] sm:$0xff] %v22274_v63  ;;  %v26154_v63 = vld [vmem:[#allocation200_spill] sm:$0xff] }
 0x47e   : > { %7624 = vmatmul.mubr.f32.gmra.mrb[124].mxu1 %v26147_v27  ;;  %v26152_v27 = vld [vmem:[#allocation6_spill] sm:$0xff] }
 0x47f   : > { %7629 = vmatprep.mubr.f32.mxu1 %v24876_v34  ;;  %17239 = vset.pattern.permute.xlu1 %v25871_v3 }
 0x480   : > { %8268 = vmatmul.mubr.f32.gmra.mrb[126].mxu0 %v26149_v31  ;;  %12807 = vperm.xlu1 %17239, %v21782_v37   ;;  %v22283_v31 = vld [vmem:[%s24520_s1 + $0x78] sm:$0xff]  ;;  %v22301_v53 = vpop.permute.xlu1 %13227 }
 0x481   : > { %8378 = vmatprep.mubr.f32.mxu0 %v24876_v34  ;;  %17260 = vset.pattern.permute.xlu0 %v25888_v17  ;;  %v24801_v2 = vand.u32 4294901760, %v22283_v31  ;;  %26157 = vst [vmem:[#allocation111_spill] sm:$0xff] %v22301_v53 }
 0x482   : > { %7633 = vmatmul.mubr.f32.gmra.mrb[126].mxu1 %v26150_v47  ;;  %13127 = vperm.xlu0 %17260, %v21632_v59   ;;  %v22288_v59 = vld [vmem:[%s24520_s1 + $0xf8] sm:$0xff]  ;;  %v22290_v47 = vpop.permute.xlu0 %12295 }
 0x483   : > { %7727 = vmatprep.mubr.f32.mxu1 %v24876_v34  ;;  %26153 = vst [vmem:[#allocation82_spill] sm:$0xff] %v22290_v47  ;;  %v24800_v43 = vand.u32 4294901760, %v22288_v59  ;;  %v22481_v47 = vld [vmem:[%s24520_s1 + $0x1f0] sm:$0xff] }
 0x484   : > { %8380 = vmatmul.mubr.f32.vlgmr.msra.gmra.mrb[96].mxu0 %v26152_v27  ;;  %17240 = vset.pattern.permute.xlu1 %v25913_v50 }
 0x485   : > { %8385 = vmatprep.mubr.f32.mxu0 %v24876_v34  ;;  %13087 = vperm.xlu1 %17240, %v21749_v55  }
 0x486   : > { %7729 = vmatmul.mubr.f32.vlgmr.msra.gmra.mrb[96].mxu1 %v26152_v27  ;;  %15543 = vmatpush1.bf16.msra.mxu0 %v15542_v15  ;;  %v15546_v15 = vpack.c.bf16 %v21991_v41, %v21986_v5 }
 0x487   : > { %15519 = vmatpush1.bf16.msra.mxu1 %v26154_v63  ;;  %7734 = vmatprep.mubr.f32.mxu1 %v24876_v34  ;;  %v22318_v63 = vpack.c.bf16 %v24800_v43, %v24801_v2  ;;  %v26163_v43 = vld [vmem:[#allocation15_spill] sm:$0xff]  ;;  %v22339_v2 = vld [vmem:[%s17518_s15 + $0x40] sm:$0xff] }
 0x488   : > { %8387 = vmatmul.mubr.f32.gmra.mrb[98].mxu0 %v26155_v38  ;;  %15521 = vmatprep.subr.bf16.mxu1 %v26156_v54  ;;  %v22311_v54 = vpop.permute.xlu0 %12351 }
 0x489   : > { %8392 = vmatprep.mubr.f32.mxu0 %v24876_v34  ;;  %17241 = vset.pattern.permute.xlu1 %v25900_v60  ;;  %26158 = vst [vmem:[#allocation157_spill] sm:$0xff] %v22311_v54  ;;  %26159 = vst [vmem:[#allocation151_spill] sm:$0xff] %v22318_v63  ;;  %v22455_v54 = vld [vmem:[%s24520_s1 + $0x178] sm:$0xff] }
 0x48a   : > { %7736 = vmatmul.mubr.f32.gmra.mrb[98].mxu1 %v26155_v38  ;;  %12915 = vperm.xlu1 %17241, %v22129_v13  }
 0x48b   : > { %7741 = vmatprep.mubr.f32.mxu1 %v24876_v34  ;;  %15523 = vmatpush1.bf16.msra.mxu1 %v25956_v24  ;;  %v22323_v24 = vpop.permute.xlu1 %12887 }
 0x48c   : > { %8394 = vmatmul.mubr.f32.gmra.mrb[100].mxu0 %v24970_v10  ;;  %15545 = vmatprep.subr.bf16.mxu0 %v15544_v7  ;;  %26160 = vst [vmem:[#allocation194_spill] sm:$0xff] %v22323_v24  ;;  %v22330_v7 = vpop.permute.xlu0 %12363  ;;  %v26166_v24 = vld [vmem:[#allocation20_spill] sm:$0xff] }
 0x48d   : > { %8399 = vmatprep.mubr.f32.mxu0 %v24876_v34  ;;  %15547 = vmatpush1.bf16.msra.mxu0 %v15546_v15  ;;  %26161 = vst [vmem:[#allocation2_spill] sm:$0xff] %v22330_v7  ;;  %v26162_v15 = vld [vmem:[#allocation182_spill] sm:$0xff] }
 0x48e   : > { %7743 = vmatmul.mubr.f32.gmra.mrb[100].mxu1 %v24970_v10  ;;  %17242 = vset.pattern.permute.xlu1 %v25892_v61  ;;  %v26168_v7 = vld [vmem:[#allocation26_spill] sm:$0xff] }
 0x48f   : > { %7748 = vmatprep.mubr.f32.mxu1 %v24876_v34  ;;  %12979 = vperm.xlu1 %17242, %v22129_v13   ;;  %v22342_v53 = vpop.permute.xlu1 %12951 }
 0x490   : > { %8401 = vmatmul.mubr.f32.gmra.mrb[102].mxu0 %v24973_v45  ;;  %15573 = vmatprep.subr.bf16.mxu1 %v22318_v63  ;;  %26164 = vst [vmem:[#allocation154_spill] sm:$0xff] %v22342_v53  ;;  %v26188_v63 = vand.u32 4294901760, %v22455_v54 }
 0x491   : > { %8406 = vmatprep.mubr.f32.mxu0 %v24876_v34  ;;  %15549 = vmatprep.subr.bf16.mxu0 %v26162_v15 }
 0x492   : > { %7750 = vmatmul.mubr.f32.gmra.mrb[102].mxu1 %v24973_v45  ;;  %13131 = vperm.xlu0 %17260, %v21830_v29   ;;  %v22348_v29 = vpop.permute.xlu0 %12371 }
 0x493   : > { %7755 = vmatprep.mubr.f32.mxu1 %v24876_v34  ;;  %17244 = vset.pattern.permute.xlu1 %v25926_v62  ;;  %26165 = vst [vmem:[#allocation207_spill] sm:$0xff] %v22348_v29  ;;  %v22356_v53 = vpop.permute.xlu1 %13295 }
 0x494   : > { %8408 = vmatmul.mubr.f32.gmra.mrb[104].mxu0 %v26163_v43  ;;  %13323 = vperm.xlu1 %17244, %v22339_v2   ;;  %26167 = vst [vmem:[#allocation171_spill] sm:$0xff] %v22356_v53 }
 0x495   : > { %8413 = vmatprep.mubr.f32.mxu0 %v24876_v34 }
 0x496   : > { %7757 = vmatmul.mubr.f32.gmra.mrb[104].mxu1 %v26163_v43  ;;  %13151 = vperm.xlu0 %17260, %v21749_v55   ;;  %v22362_v29 = vpop.permute.xlu0 %12379 }
 0x497   : > { %7762 = vmatprep.mubr.f32.mxu1 %v24876_v34  ;;  %26169 = vst [vmem:[#allocation75_spill] sm:$0xff] %v22362_v29  ;;  %v22369_v53 = vpop.permute.xlu1 %12715 }
 0x498   : > { %8415 = vmatmul.mubr.f32.gmra.mrb[106].mxu0 %v26166_v24  ;;  %17245 = vset.pattern.permute.xlu1 %v25900_v60  ;;  %26170 = vst [vmem:[#allocation126_spill] sm:$0xff] %v22369_v53 }
 0x499   : > { %8420 = vmatprep.mubr.f32.mxu0 %v24876_v34  ;;  %12919 = vperm.xlu1 %17245, %v21782_v37  }
 0x49a   : > { %7764 = vmatmul.mubr.f32.gmra.mrb[106].mxu1 %v26166_v24  ;;  %13155 = vperm.xlu0 %17260, %v22129_v13   ;;  %v22376_v29 = vpop.permute.xlu0 %12387 }
 0x49b   : > { %7769 = vmatprep.mubr.f32.mxu1 %v24876_v34  ;;  %26171 = vst [vmem:[#allocation148_spill] sm:$0xff] %v22376_v29  ;;  %v22383_v53 = vpop.permute.xlu1 %13059  ;;  %v26181_v29 = vand.u32 4294901760, %v22288_v59 }
 0x49c   : > { %8422 = vmatmul.mubr.f32.gmra.mrb[108].mxu0 %v26168_v7  ;;  %26172 = vst [vmem:[#allocation163_spill] sm:$0xff] %v22383_v53 }
 0x49d   : > { %8427 = vmatprep.mubr.f32.mxu0 %v24876_v34  ;;  %17246 = vset.pattern.permute.xlu1 %v25932_v40 }
 0x49e   : > { %7771 = vmatmul.mubr.f32.gmra.mrb[108].mxu1 %v26168_v7  ;;  %13263 = vperm.xlu1 %17246, %v21749_v55  }
 0x49f   : > { %7776 = vmatprep.mubr.f32.mxu1 %v24876_v34  ;;  %13163 = vperm.xlu0 %17260, %v22241_v39  }
 0x4a0   : > { %8429 = vmatmul.mubr.f32.gmra.mrb[110].mxu0 %v24981_v49 }
 0x4a1   : > { %8434 = vmatprep.mubr.f32.mxu0 %v24876_v34 }
 0x4a2   : > { %7778 = vmatmul.mubr.f32.gmra.mrb[110].mxu1 %v24981_v49  ;;  %17247 = vset.pattern.permute.xlu1 %v25926_v62 }
 0x4a3   : > { %7783 = vmatprep.mubr.f32.mxu1 %v24876_v34  ;;  %13327 = vperm.xlu1 %17247, %v21749_v55   ;;  %v22390_v55 = vpop.permute.xlu0 %12395 }
 0x4a4   : > { %8436 = vmatmul.mubr.f32.gmra.mrb[112].mxu0 %v17711_v48  ;;  %17263 = vset.pattern.permute.xlu0 %v25892_v61  ;;  %26173 = vst [vmem:[#allocation30_spill] sm:$0xff] %v22390_v55 }
 0x4a5   : > { %8441 = vmatprep.mubr.f32.mxu0 %v24876_v34  ;;  %12943 = vperm.xlu0 %17263, %v22158_v57   ;;  %v22397_v57 = vpop.permute.xlu1 %13123 }
 0x4a6   : > { %7785 = vmatmul.mubr.f32.gmra.mrb[112].mxu1 %v17711_v48  ;;  %26174 = vst [vmem:[#allocation164_spill] sm:$0xff] %v22397_v57 }
 0x4a7   : > { %7790 = vmatprep.mubr.f32.mxu1 %v24876_v34  ;;  %17248 = vset.pattern.permute.xlu1 %v25871_v3 }
 0x4a8   : > { %8443 = vmatmul.mubr.f32.gmra.mrb[114].mxu0 %v17726_v30  ;;  %12811 = vperm.xlu1 %17248, %v22241_v39  }
 0x4a9   : > { %8448 = vmatprep.mubr.f32.mxu0 %v24876_v34  ;;  %12959 = vperm.xlu0 %17263, %v21772_v22   ;;  %v22404_v22 = vpop.permute.xlu0 %12403  ;;  %v22411_v53 = vpop.permute.xlu1 %12783 }
 0x4aa   : > { %7792 = vmatmul.mubr.f32.gmra.mrb[114].mxu1 %v17726_v30  ;;  %26175 = vst [vmem:[#allocation180_spill] sm:$0xff] %v22404_v22  ;;  %26176 = vst [vmem:[#allocation185_spill] sm:$0xff] %v22411_v53  ;;  %v258_v22 = vld [vmem:[%s24520_s1 + $0x70] sm:$0xff] }
 0x4ab   : > { %7797 = vmatprep.mubr.f32.mxu1 %v24876_v34 }
 0x4ac   : > { %8450 = vmatmul.mubr.f32.gmra.mrb[116].mxu0 %v25415_v19  ;;  %17249 = vset.pattern.permute.xlu1 %v25913_v50 }
 0x4ad   : > { %8455 = vmatprep.mubr.f32.mxu0 %v24876_v34  ;;  %13091 = vperm.xlu1 %17249, %v22129_v13   ;;  %v22425_v57 = vpop.permute.xlu1 %13063 }
 0x4ae   : > { %7799 = vmatmul.mubr.f32.gmra.mrb[116].mxu1 %v25415_v19  ;;  %12963 = vperm.xlu0 %17263, %v21896_v8   ;;  %v22417_v8 = vpop.permute.xlu0 %12411  ;;  %26178 = vst [vmem:[#allocation110_spill] sm:$0xff] %v22425_v57  ;;  %v26180_v57 = vand.u32 4294901760, %v22283_v31 }
 0x4af   : > { %7804 = vmatprep.mubr.f32.mxu1 %v24876_v34  ;;  %26177 = vst [vmem:[#allocation130_spill] sm:$0xff] %v22417_v8  ;;  %v26187_v8 = vld [vmem:[#allocation9_spill] sm:$0xff] }
 0x4b0   : > { %8457 = vmatmul.mubr.f32.gmra.mrb[118].mxu0 %v25417_v18  ;;  %v22445_v55 = vsub.f32 %v22283_v31, %v26180_v57  ;;  %v26183_v57 = vmov 23  }
 0x4b1   : > { %8462 = vmatprep.mubr.f32.mxu0 %v24876_v34  ;;  %17250 = vset.pattern.permute.xlu1 %v25865_v42  ;;  %v22464_v31 = vpop.permute.xlu1 %12891 }
 0x4b2   : > { %7806 = vmatmul.mubr.f32.gmra.mrb[118].mxu1 %v25417_v18  ;;  %12751 = vperm.xlu1 %17250, %v21808_v44   ;;  %v22431_v53 = vpop.permute.xlu0 %12423  ;;  %26182 = vst [vmem:[#allocation108_spill] sm:$0xff] %v22464_v31  ;;  %v22476_v31 = vld [vmem:[%s24520_s1 + $0x170] sm:$0xff] }
 0x4b3   : > { %7811 = vmatprep.mubr.f32.mxu1 %v24876_v34  ;;  %12983 = vperm.xlu0 %17263, %v21782_v37   ;;  %26179 = vst [vmem:[#allocation192_spill] sm:$0xff] %v22431_v53  ;;  %v22450_v53 = vsub.f32 %v22288_v59, %v26181_v29  ;;  %v9305_v59 = vand.u32 4294901760, %v258_v22  ;;  %v24809_v12 = vand.u32 4294901760, %v22476_v31 }
 0x4b4   : > { %8464 = vmatmul.mubr.f32.gmra.mrb[120].mxu0 %v25674_v58 }
 0x4b5   : > { %8469 = vmatprep.mubr.f32.mxu0 %v24876_v34  ;;  %v22492_v0 = vsub.f32 %v258_v22, %v9305_v59  ;;  %v26195_v22 = vld [vmem:[#allocation10_spill] sm:$0xff] }
 0x4b6   : > { %7813 = vmatmul.mubr.f32.gmra.mrb[120].mxu1 %v25674_v58  ;;  %17251 = vset.pattern.permute.xlu1 %v25871_v3  ;;  %v22483_v15 = vpop.permute.xlu0 %12431 }
 0x4b7   : > { %7818 = vmatprep.mubr.f32.mxu1 %v24876_v34  ;;  %12815 = vperm.xlu1 %17251, %v21808_v44   ;;  %26184 = vst [vmem:[#allocation114_spill] sm:$0xff] %v22483_v15 }
 0x4b8   : > { %8471 = vmatmul.mubr.f32.gmra.mrb[122].mxu0 %v25929_v52  ;;  %12991 = vperm.xlu0 %17263, %v21808_v44   ;;  %v274_v44 = vld [vmem:[%s24520_s1 + $0xf0] sm:$0xff] }
 0x4b9   : > { %8476 = vmatprep.mubr.f32.mxu0 %v24876_v34  ;;  %v9309_v29 = vand.u32 4294901760, %v274_v44 }
 0x4ba   : > { %7820 = vmatmul.mubr.f32.gmra.mrb[122].mxu1 %v25929_v52 }
 0x4bb   : > { %7825 = vmatprep.mubr.f32.mxu1 %v24876_v34  ;;  %17252 = vset.pattern.permute.xlu1 %v25888_v17  ;;  %v22490_v1 = vpack.c.bf16 %v9309_v29, %v9305_v59  ;;  %v22497_v15 = vsub.f32 %v274_v44, %v9309_v29  ;;  %v22508_v59 = vpop.permute.xlu1 %12955  ;;  %v26193_v29 = vand.u32 4294901760, %v22450_v53 }
 0x4bc   : > { %8478 = vmatmul.mubr.f32.gmra.mrb[124].mxu0 %v25934_v16  ;;  %13159 = vperm.xlu1 %17252, %v21782_v37   ;;  %v22460_v37 = vld [vmem:[%s24520_s1 + $0x1f8] sm:$0xff]  ;;  %26191 = vst [vmem:[#allocation94_spill] sm:$0xff] %v22508_v59 }
 0x4bd   : > { %8483 = vmatprep.mubr.f32.mxu0 %v24876_v34  ;;  %12995 = vperm.xlu0 %17263, %v22254_v56   ;;  %26185 = vst [vmem:[#allocation144_spill] sm:$0xff] %v22490_v1  ;;  %v26189_v5 = vand.u32 4294901760, %v22460_v37  ;;  %v9567_v41 = vsub.f32 %v22450_v53, %v26193_v29  ;;  %v26198_v59 = vld [vmem:[#allocation73_spill] sm:$0xff] }
 0x4be   : > { %7827 = vmatmul.mubr.f32.gmra.mrb[124].mxu1 %v25934_v16 }
 0x4bf   : > { %7832 = vmatprep.mubr.f32.mxu1 %v24876_v34  ;;  %v22504_v28 = vpack.c.bf16 %v26189_v5, %v26188_v63  ;;  %v22524_v63 = vpop.permute.xlu0 %12439 }
 0x4c0   : > { %8485 = vmatmul.mubr.f32.gmra.mrb[126].mxu0 %v25813_v23  ;;  %17253 = vset.pattern.permute.xlu1 %v26183_v57  ;;  %26194 = vst [vmem:[#allocation96_spill] sm:$0xff] %v22524_v63  ;;  %v22538_v63 = vpop.permute.xlu1 %13299 }
 0x4c1   : > { %8571 = vmatprep.mubr.f32.mxu0 %v24876_v34  ;;  %12643 = vperm.xlu1 %17253, %v22254_v56   ;;  %26190 = vst [vmem:[#allocation161_spill] sm:$0xff] %v22504_v28  ;;  %26199 = vst [vmem:[#allocation200_spill] sm:$0xff] %v22538_v63  ;;  %v26205_v63 = vand.u32 4294901760, %v26092_v14  ;;  %v26209_v14 = vld [vmem:[#allocation19_spill] sm:$0xff] }
 0x4c2   : > { %7834 = vmatmul.mubr.f32.gmra.mrb[126].mxu1 %v25813_v23  ;;  %17268 = vset.pattern.permute.xlu0 %v25900_v60 }
 0x4c3   : > { %7912 = vmatprep.mubr.f32.mxu1 %v24876_v34  ;;  %12875 = vperm.xlu0 %17268, %v26186_v33   ;;  %v26192_v33 = vand.u32 4294901760, %v22445_v55 }
 0x4c4   : > { %8574 = vmatmul.mubr.f32.vlgmr.msra.gmra.mrb[96].mxu0 %v26187_v8  ;;  %v26214_v8 = vld [vmem:[#allocation24_spill] sm:$0xff] }
 0x4c5   : > { %8579 = vmatprep.mubr.f32.mxu0 %v24876_v34  ;;  %17254 = vset.pattern.permute.xlu1 %v25892_v61  ;;  %v9555_v44 = vsub.f32 %v22445_v55, %v26192_v33  ;;  %v26196_v33 = vand.u32 4294901760, %v22481_v47 }
 0x4c6   : > { %7914 = vmatmul.mubr.f32.vlgmr.msra.gmra.mrb[96].mxu1 %v26152_v27  ;;  %12987 = vperm.xlu1 %17254, %v22241_v39  }
 0x4c7   : > { %15575 = vmatpush1.bf16.msra.mxu1 %v22490_v1  ;;  %7919 = vmatprep.mubr.f32.mxu1 %v24876_v34  ;;  %v22532_v29 = vpack.c.bf16 %v26196_v33, %v24809_v12  ;;  %v9556_v5 = vand.u32 4294901760, %v9555_v44  ;;  %v9568_v1 = vand.u32 4294901760, %v9567_v41  ;;  %v22545_v44 = vpop.permute.xlu0 %12447  ;;  %v26202_v41 = vld [vmem:[#allocation118_spill] sm:$0xff]  ;;  %v26203_v12 = vld [vmem:[#allocation52_spill] sm:$0xff] }
 0x4c8   : > { %8582 = vmatmul.mubr.f32.gmra.mrb[98].mxu0 %v26195_v22  ;;  %15577 = vmatprep.subr.bf16.mxu1 %v22504_v28  ;;  %v26200_v22 = vld [vmem:[#allocation12_spill] sm:$0xff]  ;;  %26201 = vst [vmem:[#allocation201_spill] sm:$0xff] %v22545_v44  ;;  %v22558_v44 = vld [vmem:[%s17518_s15 + $0x78] sm:$0xff] }
 0x4c9   : > { %26197 = vst [vmem:[#allocation88_spill] sm:$0xff] %v22532_v29  ;;  %8587 = vmatprep.mubr.f32.mxu0 %v24876_v34  ;;  %15551 = vmatpush1.bf16.msra.mxu0 %v26198_v59  ;;  %v15580_v33 = vpack.c.bf16 %v9568_v1, %v9556_v5  ;;  %v22561_v1 = vpop.permute.xlu1 %12895  ;;  %v22573_v5 = vld [vmem:[%s17518_s15 + $0x68] sm:$0xff] }
 0x4ca   : > { %7921 = vmatmul.mubr.f32.gmra.mrb[98].mxu1 %v26155_v38  ;;  %17255 = vset.pattern.permute.xlu1 %v25932_v40  ;;  %26207 = vst [vmem:[#allocation172_spill] sm:$0xff] %v22561_v1  ;;  %v26212_v1 = vld [vmem:[#allocation71_spill] sm:$0xff] }
 0x4cb   : > { %7926 = vmatprep.mubr.f32.mxu1 %v24876_v34  ;;  %13267 = vperm.xlu1 %17255, %v22129_v13   ;;  %v26204_v13 = vand.u32 4294901760, %v21608_v35  ;;  %v22567_v35 = vpop.permute.xlu0 %12455 }
 0x4cc   : > { %8590 = vmatmul.mubr.f32.gmra.mrb[100].mxu0 %v26200_v22  ;;  %15579 = vmatpush1.bf16.msra.mxu1 %v22532_v29  ;;  %v26206_v29 = vld [vmem:[#allocation17_spill] sm:$0xff]  ;;  %26208 = vst [vmem:[#allocation73_spill] sm:$0xff] %v22567_v35  ;;  %v26213_v35 = vld [vmem:[#allocation70_spill] sm:$0xff] }
 0x4cd   : > { %8595 = vmatprep.mubr.f32.mxu0 %v24876_v34  ;;  %15553 = vmatprep.subr.bf16.mxu0 %v26202_v41  ;;  %v15556_v22 = vpack.c.bf16 %v26205_v63, %v26204_v13  ;;  %v26210_v63 = vld [vmem:[#allocation156_spill] sm:$0xff]  ;;  %v17361_v13 = vld [vmem:[%s17518_s15 + $0x38] sm:$0xff] }
 0x4ce   : > { %7928 = vmatmul.mubr.f32.gmra.mrb[100].mxu1 %v24970_v10  ;;  %15555 = vmatpush1.bf16.msra.mxu0 %v26203_v12 }
 0x4cf   : > { %7933 = vmatprep.mubr.f32.mxu1 %v24876_v34  ;;  %17256 = vset.pattern.permute.xlu1 %v26183_v57  ;;  %v17359_v57 = vld [vmem:[%s17518_s15 + $0x10] sm:$0xff] }
 0x4d0   : > { %8598 = vmatmul.mubr.f32.gmra.mrb[102].mxu0 %v26206_v29  ;;  %12647 = vperm.xlu1 %17256, %v22558_v44  }
 0x4d1   : > { %8603 = vmatprep.mubr.f32.mxu0 %v24876_v34  ;;  %15581 = vmatprep.subr.bf16.mxu1 %v15580_v33  ;;  %v12298_v33 = vsel %vm10583_vm1, %v26210_v63, %v22174_v25  ;;  %v22591_v25 = vpop.permute.xlu0 %12463  ;;  %v26216_v63 = vld [vmem:[#allocation177_spill] sm:$0xff] }
 0x4d2   : > { %7935 = vmatmul.mubr.f32.gmra.mrb[102].mxu1 %v24973_v45  ;;  %12883 = vperm.xlu0 %17268, %v17359_v57   ;;  %26215 = vst [vmem:[#allocation52_spill] sm:$0xff] %v22591_v25  ;;  %v26218_v45 = vld [vmem:[#allocation136_spill] sm:$0xff] }
 0x4d3   : > { %7940 = vmatprep.mubr.f32.mxu1 %v24876_v34  ;;  %15557 = vmatprep.subr.bf16.mxu0 %v15556_v22  ;;  %v22582_v22 = vpop.permute.xlu1 %13239 }
 0x4d4   : > { %8606 = vmatmul.mubr.f32.gmra.mrb[104].mxu0 %v26209_v14  ;;  %17257 = vset.pattern.permute.xlu1 %v25900_v60  ;;  %26211 = vst [vmem:[#allocation118_spill] sm:$0xff] %v22582_v22  ;;  %v12122_v14 = vsel %vm10583_vm1, %v26213_v35, %v26212_v1  ;;  %v26217_v22 = vld [vmem:[#allocation206_spill] sm:$0xff]  ;;  %v26219_v35 = vld [vmem:[#allocation3_spill] sm:$0xff] }
 0x4d5   : > { %8611 = vmatprep.mubr.f32.mxu0 %v24876_v34  ;;  %12927 = vperm.xlu1 %17257, %v22573_v5   ;;  %v12299_v1 = vsel %vm10583_vm1, %v26218_v45, %v26217_v22  ;;  %v26224_v22 = vld [vmem:[#allocation191_spill] sm:$0xff] }
 0x4d6   : > { %7942 = vmatmul.mubr.f32.gmra.mrb[104].mxu1 %v26163_v43  ;;  %12903 = vperm.xlu0 %17268, %v17361_v13  }
 0x4d7   : > { %7947 = vmatprep.mubr.f32.mxu1 %v24876_v34  ;;  %v6637_v57 = vpop.f32.mrb[64].mxu0  ;;  %v22613_v45 = vpop.permute.xlu1 %13303 }
 0x4d8   : > { %v12138_v29 = vmul.f32 %v12122_v14, %v6637_v57  ;;  %v6639_v28 = vpop.f32.mrb[65].mxu0  ;;  %8614 = vmatmul.mubr.f32.gmra.mrb[106].mxu0 %v26214_v8  ;;  %v26220_v14 = vld [vmem:[#allocation140_spill] sm:$0xff]  ;;  %v22607_v57 = vld [vmem:[%s17518_s15 + $0x58] sm:$0xff]  ;;  %26223 = vst [vmem:[#allocation71_spill] sm:$0xff] %v22613_v45 }
 0x4d9   : > { %v12314_v43 = vmul.f32 %v12298_v33, %v6639_v28  ;;  %8619 = vmatprep.mubr.f32.mxu0 %v24876_v34  ;;  %17258 = vset.pattern.permute.xlu1 %v25932_v40  ;;  %v12123_v33 = vsel %vm10583_vm1, %v26220_v14, %v26219_v35  ;;  %v26222_v8 = vld [vmem:[#allocation29_spill] sm:$0xff]  ;;  %v22624_v14 = vpop.permute.xlu0 %12471  ;;  %v26229_v45 = vld [vmem:[#allocation188_spill] sm:$0xff] }
 0x4da   : > { %7949 = vmatmul.mubr.f32.gmra.mrb[106].mxu1 %v26166_v24  ;;  %v12154_v13 = vadd.f32 %v12138_v29, %v26216_v63  ;;  %12907 = vperm.xlu0 %17268, %v22339_v2   ;;  %26227 = vst [vmem:[#allocation70_spill] sm:$0xff] %v22624_v14  ;;  %v26241_v14 = vand.u32 4294901760, %v22481_v47 }
 0x4db   : > { %7954 = vmatprep.mubr.f32.mxu1 %v24876_v34  ;;  %v6644_v28 = vpop.f32.mrb[66].mxu0  ;;  %13271 = vperm.xlu1 %17258, %v22607_v57  }
 0x4dc   : > { %v22610_v29 = vadd.f32 %v12314_v43, %v12154_v13  ;;  %v12139_v63 = vmul.f32 %v12123_v33, %v6644_v28  ;;  %v6646_v25 = vpop.f32.mrb[67].mxu0  ;;  %8622 = vmatmul.mubr.f32.gmra.mrb[108].mxu0 %v26222_v8  ;;  %v26225_v43 = vld [vmem:[#allocation104_spill] sm:$0xff]  ;;  %v26226_v13 = vld [vmem:[#allocation174_spill] sm:$0xff]  ;;  %v26231_v8 = vld [vmem:[#allocation33_spill] sm:$0xff] }
 0x4dd   : > { %v12315_v2 = vmul.f32 %v12299_v1, %v6646_v25  ;;  %8627 = vmatprep.mubr.f32.mxu0 %v24876_v34  ;;  %v12124_v28 = vsel %vm10583_vm1, %v26226_v13, %v26225_v43  ;;  %v26232_v43 = vand.u32 4294901760, %v22455_v54 }
 0x4de   : > { %26221 = vst [vmem:[#allocation156_spill] sm:$0xff] %v22610_v29  ;;  %7956 = vmatmul.mubr.f32.gmra.mrb[108].mxu1 %v26168_v7  ;;  %v12155_v24 = vadd.f32 %v12139_v63, %v26224_v22  ;;  %12923 = vperm.xlu0 %17268, %v22241_v39   ;;  %v26230_v63 = vld [vmem:[#allocation135_spill] sm:$0xff] }
 0x4df   : > { %7961 = vmatprep.mubr.f32.mxu1 %v24876_v34  ;;  %v6651_v35 = vpop.f32.mrb[68].mxu0  ;;  %17259 = vset.pattern.permute.xlu1 %v25926_v62  ;;  %v12300_v22 = vsel %vm10583_vm1, %v26230_v63, %v26229_v45  ;;  %v22638_v13 = vsub.f32 %v22455_v54, %v26232_v43  ;;  %v26234_v45 = vld [vmem:[#allocation85_spill] sm:$0xff]  ;;  %v26236_v54 = vand.u32 4294901760, %v22476_v31 }
 0x4e0   : > { %v22627_v25 = vadd.f32 %v12315_v2, %v12155_v24  ;;  %v12140_v1 = vmul.f32 %v12124_v28, %v6651_v35  ;;  %v6653_v33 = vpop.f32.mrb[69].mxu0  ;;  %8630 = vmatmul.mubr.f32.gmra.mrb[110].mxu0 %v26231_v8  ;;  %13335 = vperm.xlu1 %17259, %v22607_v57   ;;  %v26233_v24 = vand.u32 4294901760, %v22460_v37  ;;  %v22649_v28 = vpop.permute.xlu1 %12787 }
 0x4e1   : > { %v12316_v29 = vmul.f32 %v12300_v22, %v6653_v33  ;;  %8635 = vmatprep.mubr.f32.mxu0 %v24876_v34  ;;  %26235 = vst [vmem:[#allocation206_spill] sm:$0xff] %v22649_v28  ;;  %v22655_v33 = vsub.f32 %v22476_v31, %v26236_v54  ;;  %v26238_v22 = vld [vmem:[#allocation196_spill] sm:$0xff]  ;;  %v22672_v31 = vsub.f32 %v22481_v47, %v26241_v14  ;;  %v26244_v47 = vld [vmem:[#allocation122_spill] sm:$0xff]  ;;  %v26245_v14 = vld [vmem:[#allocation99_spill] sm:$0xff] }
 0x4e2   : > { %26228 = vst [vmem:[#allocation177_spill] sm:$0xff] %v22627_v25  ;;  %v22643_v2 = vsub.f32 %v22460_v37, %v26233_v24  ;;  %7963 = vmatmul.mubr.f32.gmra.mrb[110].mxu1 %v24981_v49  ;;  %v12156_v35 = vadd.f32 %v12140_v1, %v26234_v45  ;;  %12935 = vperm.xlu0 %17268, %v22558_v44   ;;  %v26237_v37 = vld [vmem:[#allocation183_spill] sm:$0xff]  ;;  %v26239_v24 = vld [vmem:[#allocation102_spill] sm:$0xff]  ;;  %v26242_v25 = vld [vmem:[#allocation37_spill] sm:$0xff] }
 0x4e3   : > { %7968 = vmatprep.mubr.f32.mxu1 %v24876_v34  ;;  %v6658_v63 = vpop.f32.mrb[70].mxu0  ;;  %v12125_v43 = vsel %vm10583_vm1, %v26238_v22, %v26237_v37  ;;  %v12301_v1 = vsel %vm10583_vm1, %v26239_v24, %v22188_v46  ;;  %v22677_v46 = vpop.permute.xlu0 %12527  ;;  %v26247_v24 = vld [vmem:[#allocation101_spill] sm:$0xff]  ;;  %v17363_v45 = vld [vmem:[%s17518_s15] sm:$0xff] }
 0x4e4   : > { %v22667_v28 = vadd.f32 %v12316_v29, %v12156_v35  ;;  %v12141_v54 = vmul.f32 %v12125_v43, %v6658_v63  ;;  %v6660_v8 = vpop.f32.mrb[71].mxu0  ;;  %8638 = vmatmul.mubr.f32.gmra.mrb[112].mxu0 %v26242_v25  ;;  %17261 = vset.pattern.permute.xlu1 %v25871_v3  ;;  %v26243_v29 = vld [vmem:[#allocation146_spill] sm:$0xff]  ;;  %v12302_v63 = vsel %vm10583_vm1, %v26245_v14, %v26244_v47  ;;  %v26246_v43 = vld [vmem:[#allocation175_spill] sm:$0xff]  ;;  %v22698_v25 = vpop.permute.xlu1 %13067 }
 0x4e5   : > { %v12317_v37 = vmul.f32 %v12301_v1, %v6660_v8  ;;  %8643 = vmatprep.mubr.f32.mxu0 %v24876_v34  ;;  %12819 = vperm.xlu1 %17261, %v22254_v56   ;;  %v12126_v1 = vsel %vm10583_vm1, %v26247_v24, %v26246_v43  ;;  %v26249_v14 = vld [vmem:[#allocation38_spill] sm:$0xff]  ;;  %26250 = vst [vmem:[#allocation140_spill] sm:$0xff] %v22698_v25 }
 0x4e6   : > { %26240 = vst [vmem:[#allocation136_spill] sm:$0xff] %v22667_v28  ;;  %7970 = vmatmul.mubr.f32.gmra.mrb[112].mxu1 %v17711_v48  ;;  %v12157_v35 = vadd.f32 %v12141_v54, %v26243_v29  ;;  %17271 = vset.pattern.permute.xlu0 %v25913_v50  ;;  %v26251_v28 = vld [vmem:[#allocation195_spill] sm:$0xff] }
 0x4e7   : > { %7975 = vmatprep.mubr.f32.mxu1 %v24876_v34  ;;  %v6665_v22 = vpop.f32.mrb[72].mxu0  ;;  %13051 = vperm.xlu0 %17271, %v17363_v45   ;;  %v22709_v24 = vpop.permute.xlu0 %12539 }
 0x4e8   : > { %v22695_v54 = vadd.f32 %v12317_v37, %v12157_v35  ;;  %v12142_v29 = vmul.f32 %v12126_v1, %v6665_v22  ;;  %v6667_v47 = vpop.f32.mrb[73].mxu0  ;;  %8646 = vmatmul.mubr.f32.gmra.mrb[114].mxu0 %v26249_v14  ;;  %v26252_v37 = vld [vmem:[#allocation57_spill] sm:$0xff]  ;;  %v26253_v35 = vld [vmem:[#allocation87_spill] sm:$0xff]  ;;  %v26255_v14 = vld [vmem:[#allocation176_spill] sm:$0xff] }
 0x4e9   : > { %v12318_v8 = vmul.f32 %v12302_v63, %v6667_v47  ;;  %8651 = vmatprep.mubr.f32.mxu0 %v24876_v34  ;;  %17262 = vset.pattern.permute.xlu1 %v25913_v50  ;;  %v12127_v22 = vsel %vm10583_vm1, %v26253_v35, %v26252_v37  ;;  %v17364_v1 = vld [vmem:[%s17518_s15 + $0x28] sm:$0xff]  ;;  %v26257_v37 = vld [vmem:[#allocation132_spill] sm:$0xff] }
 0x4ea   : > { %26248 = vst [vmem:[#allocation3_spill] sm:$0xff] %v22695_v54  ;;  %7977 = vmatmul.mubr.f32.gmra.mrb[114].mxu1 %v17726_v30  ;;  %v12158_v43 = vadd.f32 %v12142_v29, %v26251_v28  ;;  %v12303_v28 = vsel %vm10583_vm1, %v26255_v14, %v22202_v6  ;;  %v26256_v29 = vld [vmem:[#allocation44_spill] sm:$0xff]  ;;  %13099 = vperm.xlu1 %17262, %v22241_v39   ;;  %v26260_v14 = vld [vmem:[#allocation165_spill] sm:$0xff] }
 0x4eb   : > { %7982 = vmatprep.mubr.f32.mxu1 %v24876_v34  ;;  %v6672_v45 = vpop.f32.mrb[74].mxu0  ;;  %13071 = vperm.xlu0 %17271, %v17364_v1   ;;  %v17365_v1 = vld [vmem:[%s17518_s15 + $0x30] sm:$0xff] }
 0x4ec   : > { %v22712_v63 = vadd.f32 %v12318_v8, %v12158_v43  ;;  %v12143_v47 = vmul.f32 %v12127_v22, %v6672_v45  ;;  %v6674_v25 = vpop.f32.mrb[75].mxu0  ;;  %8654 = vmatmul.mubr.f32.gmra.mrb[116].mxu0 %v26256_v29  ;;  %v26258_v8 = vld [vmem:[#allocation42_spill] sm:$0xff]  ;;  %v22727_v45 = vpop.permute.xlu1 %12727 }
 0x4ed   : > { %v12319_v54 = vmul.f32 %v12303_v28, %v6674_v25  ;;  %8659 = vmatprep.mubr.f32.mxu0 %v24876_v34  ;;  %v12304_v43 = vsel %vm10583_vm1, %v22007_v4, %v26258_v8  ;;  %26259 = vst [vmem:[#allocation104_spill] sm:$0xff] %v22727_v45  ;;  %v26261_v25 = vld [vmem:[#allocation131_spill] sm:$0xff]  ;;  %v26262_v29 = vld [vmem:[#allocation46_spill] sm:$0xff]  ;;  %v22739_v4 = vpop.permute.xlu0 %12547  ;;  %v26264_v8 = vld [vmem:[#allocation72_spill] sm:$0xff] }
 0x4ee   : > { %26254 = vst [vmem:[#allocation191_spill] sm:$0xff] %v22712_v63  ;;  %7984 = vmatmul.mubr.f32.gmra.mrb[116].mxu1 %v25415_v19  ;;  %v12159_v35 = vadd.f32 %v12143_v47, %v26257_v37  ;;  %v12128_v22 = vsel %vm10583_vm1, %v26261_v25, %v26260_v14  ;;  %26263 = vst [vmem:[#allocation174_spill] sm:$0xff] %v22739_v4  ;;  %17264 = vset.pattern.permute.xlu1 %v25865_v42 }
 0x4ef   : > { %7989 = vmatprep.mubr.f32.mxu1 %v24876_v34  ;;  %v6679_v6 = vpop.f32.mrb[76].mxu0  ;;  %13075 = vperm.xlu0 %17271, %v17365_v1  }
 0x4f0   : > { %v22735_v28 = vadd.f32 %v12319_v54, %v12159_v35  ;;  %v12144_v47 = vmul.f32 %v12128_v22, %v6679_v6  ;;  %v6681_v37 = vpop.f32.mrb[77].mxu0  ;;  %8662 = vmatmul.mubr.f32.gmra.mrb[118].mxu0 %v26262_v29  ;;  %12759 = vperm.xlu1 %17264, %v22558_v44   ;;  %v26265_v35 = vld [vmem:[#allocation208_spill] sm:$0xff]  ;;  %v26266_v6 = vld [vmem:[#allocation78_spill] sm:$0xff]  ;;  %v26268_v22 = vld [vmem:[#allocation113_spill] sm:$0xff] }
 0x4f1   : > { %v12320_v63 = vmul.f32 %v12304_v43, %v6681_v37  ;;  %8667 = vmatprep.mubr.f32.mxu0 %v24876_v34  ;;  %v12129_v43 = vsel %vm10583_vm1, %v26266_v6, %v26265_v35  ;;  %v12305_v1 = vsel %vm10583_vm1, %v26268_v22, %v22216_v32  ;;  %v22758_v37 = vpop.permute.xlu1 %12791  ;;  %v26271_v35 = vld [vmem:[#allocation178_spill] sm:$0xff]  ;;  %v26273_v6 = vld [vmem:[#allocation109_spill] sm:$0xff]  ;;  %v26297_v29 = vld [vmem:[#allocation64_spill] sm:$0xff] }
 0x4f2   : > { %7991 = vmatmul.mubr.f32.gmra.mrb[118].mxu1 %v25417_v18  ;;  %v12160_v45 = vadd.f32 %v12144_v47, %v26264_v8  ;;  %v26269_v47 = vld [vmem:[#allocation51_spill] sm:$0xff]  ;;  %26270 = vst [vmem:[#allocation135_spill] sm:$0xff] %v22758_v37  ;;  %v26280_v22 = vld [vmem:[#allocation186_spill] sm:$0xff] }
 0x4f3   : > { %7996 = vmatprep.mubr.f32.mxu1 %v24876_v34  ;;  %v6686_v54 = vpop.f32.mrb[78].mxu0  ;;  %13095 = vperm.xlu0 %17271, %v22607_v57  }
 0x4f4   : > { %v22751_v14 = vadd.f32 %v12320_v63, %v12160_v45  ;;  %v12145_v25 = vmul.f32 %v12129_v43, %v6686_v54  ;;  %v6688_v42 = vpop.f32.mrb[79].mxu0  ;;  %8670 = vmatmul.mubr.f32.gmra.mrb[120].mxu0 %v26269_v47  ;;  %v26272_v63 = vld [vmem:[#allocation97_spill] sm:$0xff]  ;;  %17265 = vset.pattern.permute.xlu1 %v25871_v3 }
 0x4f5   : > { %v12321_v8 = vmul.f32 %v12305_v1, %v6688_v42  ;;  %8675 = vmatprep.mubr.f32.mxu0 %v24876_v34  ;;  %v12306_v45 = vsel %vm10583_vm1, %v22046_v51, %v26272_v63  ;;  %v26274_v43 = vld [vmem:[#allocation89_spill] sm:$0xff]  ;;  %12823 = vperm.xlu1 %17265, %v22558_v44   ;;  %v26277_v63 = vld [vmem:[#allocation54_spill] sm:$0xff]  ;;  %v26279_v1 = vld [vmem:[#allocation39_spill] sm:$0xff] }
 0x4f6   : > { %26267 = vst [vmem:[#allocation188_spill] sm:$0xff] %v22751_v14  ;;  %7998 = vmatmul.mubr.f32.gmra.mrb[120].mxu1 %v25674_v58  ;;  %v12161_v57 = vadd.f32 %v12145_v25, %v26271_v35  ;;  %v12130_v42 = vsel %vm10583_vm1, %v26274_v43, %v26273_v6  ;;  %v22775_v25 = vpop.permute.xlu0 %12555  ;;  %v26278_v6 = vld [vmem:[#allocation119_spill] sm:$0xff] }
 0x4f7   : > { %8003 = vmatprep.mubr.f32.mxu1 %v24876_v34  ;;  %v6693_v32 = vpop.f32.mrb[80].mxu0  ;;  %26275 = vst [vmem:[#allocation85_spill] sm:$0xff] %v22775_v25  ;;  %13103 = vperm.xlu0 %17271, %v22573_v5   ;;  %v26287_v25 = vld [vmem:[#allocation60_spill] sm:$0xff] }
 0x4f8   : > { %v22779_v51 = vadd.f32 %v12321_v8, %v12161_v57  ;;  %v12146_v35 = vmul.f32 %v12130_v42, %v6693_v32  ;;  %v6695_v3 = vpop.f32.mrb[81].mxu0  ;;  %8678 = vmatmul.mubr.f32.gmra.mrb[122].mxu0 %v26277_v63  ;;  %v12131_v8 = vsel %vm10583_vm1, %v26280_v22, %v26279_v1  ;;  %v26281_v57 = vld [vmem:[#allocation48_spill] sm:$0xff]  ;;  %v26282_v42 = vand.u32 4294901760, %v22492_v0  ;;  %v26293_v63 = vld [vmem:[#allocation98_spill] sm:$0xff] }
 0x4f9   : > { %v12322_v37 = vmul.f32 %v12306_v45, %v6695_v3  ;;  %8683 = vmatprep.mubr.f32.mxu0 %v24876_v34  ;;  %v12307_v32 = vsel %vm10583_vm1, %v26281_v57, %v22230_v20  ;;  %v22798_v3 = vpop.permute.xlu1 %13135  ;;  %v26285_v22 = vand.u32 4294901760, %v22638_v13  ;;  %17266 = vset.pattern.permute.xlu1 %v25888_v17 }
 0x4fa   : > { %26276 = vst [vmem:[#allocation183_spill] sm:$0xff] %v22779_v51  ;;  %8005 = vmatmul.mubr.f32.gmra.mrb[122].mxu1 %v25929_v52  ;;  %v12162_v43 = vadd.f32 %v12146_v35, %v26278_v6  ;;  %v9561_v45 = vsub.f32 %v22492_v0, %v26282_v42  ;;  %26283 = vst [vmem:[#allocation196_spill] sm:$0xff] %v22798_v3  ;;  %v26284_v35 = vand.u32 4294901760, %v22497_v15  ;;  %v26288_v51 = vand.u32 4294901760, %v22643_v2 }
 0x4fb   : > { %8010 = vmatprep.mubr.f32.mxu1 %v24876_v34  ;;  %v6700_v54 = vpop.f32.mrb[82].mxu0  ;;  %v9579_v1 = vsub.f32 %v22638_v13, %v26285_v22  ;;  %13167 = vperm.xlu1 %17266, %v22573_v5   ;;  %v22818_v22 = vpop.permute.xlu0 %12563 }
 0x4fc   : > { %v9573_v6 = vsub.f32 %v22497_v15, %v26284_v35  ;;  %v22810_v57 = vadd.f32 %v12322_v37, %v12162_v43  ;;  %v12147_v42 = vmul.f32 %v12131_v8, %v6700_v54  ;;  %v6702_v3 = vpop.f32.mrb[83].mxu0  ;;  %8686 = vmatmul.mubr.f32.gmra.mrb[124].mxu0 %v26287_v25  ;;  %v9591_v35 = vsub.f32 %v22643_v2, %v26288_v51  ;;  %v26290_v37 = vld [vmem:[#allocation197_spill] sm:$0xff] }
 0x4fd   : > { %v12323_v47 = vmul.f32 %v12307_v32, %v6702_v3  ;;  %8691 = vmatprep.mubr.f32.mxu0 %v24876_v34  ;;  %26289 = vst [vmem:[#allocation146_spill] sm:$0xff] %v22818_v22  ;;  %13111 = vperm.xlu0 %17271, %v22558_v44   ;;  %v26291_v43 = vld [vmem:[#allocation189_spill] sm:$0xff]  ;;  %v12308_v51 = vsel %vm10583_vm1, %v22087_v11, %v26293_v63  ;;  %v9562_v3 = vand.u32 4294901760, %v9561_v45  ;;  %v26294_v25 = vand.u32 4294901760, %v22655_v33  ;;  %v22842_v45 = vpop.permute.xlu1 %12899 }
 0x4fe   : > { %26286 = vst [vmem:[#allocation102_spill] sm:$0xff] %v22810_v57  ;;  %8012 = vmatmul.mubr.f32.gmra.mrb[124].mxu1 %v25934_v16  ;;  %v12163_v54 = vadd.f32 %v12147_v42, %v26290_v37  ;;  %v26292_v8 = vld [vmem:[#allocation141_spill] sm:$0xff]  ;;  %v9574_v22 = vand.u32 4294901760, %v9573_v6  ;;  %v26295_v42 = vand.u32 4294901760, %v22672_v31  ;;  %v9580_v11 = vand.u32 4294901760, %v9579_v1  ;;  %26298 = vst [vmem:[#allocation99_spill] sm:$0xff] %v22842_v45 }
 0x4ff   : > { %v12132_v20 = vsel %vm10583_vm1, %v26292_v8, %v26291_v43  ;;  %8017 = vmatprep.mubr.f32.mxu1 %v24876_v34  ;;  %v6707_v32 = vpop.f32.mrb[84].mxu0  ;;  %v9585_v57 = vsub.f32 %v22655_v33, %v26294_v25  ;;  %v9592_v63 = vand.u32 4294901760, %v9591_v35  ;;  %17267 = vset.pattern.permute.xlu1 %v25900_v60  ;;  %v26299_v25 = vand.u32 4294901760, %v21903_v21  ;;  %v26303_v60 = vld [vmem:[#allocation106_spill] sm:$0xff] }
 0x500   : > { %v9597_v37 = vsub.f32 %v22672_v31, %v26295_v42  ;;  %v22838_v14 = vadd.f32 %v12323_v47, %v12163_v54  ;;  %v12148_v43 = vmul.f32 %v12132_v20, %v6707_v32  ;;  %v6709_v8 = vpop.f32.mrb[85].mxu0  ;;  %8694 = vmatmul.mubr.f32.gmra.mrb[126].mxu0 %v26297_v29  ;;  %v26300_v42 = vand.u32 4294901760, %v21908_v9  ;;  %12931 = vperm.xlu1 %17267, %v22254_v56   ;;  %v26301_v20 = vld [vmem:[#allocation184_spill] sm:$0xff]  ;;  %v26306_v9 = vld [vmem:[#allocation79_spill] sm:$0xff]  ;;  %v26308_v29 = vld [vmem:[#allocation202_spill] sm:$0xff] }
 0x501   : > { %v12324_v6 = vmul.f32 %v12308_v51, %v6709_v8  ;;  %8772 = vmatprep.mubr.f32.mxu0 %v24876_v34  ;;  %v26302_v35 = vand.u32 4294901760, %v21913_v26  ;;  %v26304_v54 = vand.u32 4294901760, %v26303_v60  ;;  %17276 = vset.pattern.permute.xlu0 %v25926_v62  ;;  %v15582_v51 = vpack.c.bf16 %v9574_v22, %v9562_v3  ;;  %v26305_v8 = vld [vmem:[#allocation145_spill] sm:$0xff] }
 0x502   : > { %26296 = vst [vmem:[#allocation122_spill] sm:$0xff] %v22838_v14  ;;  %v15558_v47 = vpack.c.bf16 %v26300_v42, %v26299_v25  ;;  %8019 = vmatmul.mubr.f32.gmra.mrb[126].mxu1 %v25813_v23  ;;  %v12164_v1 = vadd.f32 %v12148_v43, %v26301_v20  ;;  %v12133_v25 = vsel %vm10583_vm1, %v26306_v9, %v26305_v8  ;;  %v22862_v42 = vpop.permute.xlu0 %12571  ;;  %v9586_v45 = vand.u32 4294901760, %v9585_v57  ;;  %v17366_v20 = vld [vmem:[%s17518_s15 + $0x50] sm:$0xff]  ;;  %v26309_v3 = vld [vmem:[#allocation13_spill] sm:$0xff]  ;;  %v26310_v57 = vld [vmem:[#allocation86_spill] sm:$0xff] }
 0x503   : > { %v15560_v32 = vpack.c.bf16 %v26304_v54, %v26302_v35  ;;  %9375 = vmatprep.mubr.f32.mxu1 %v24876_v34  ;;  %v6714_v21 = vpop.f32.mrb[86].mxu0  ;;  %v9598_v43 = vand.u32 4294901760, %v9597_v37  ;;  %13331 = vperm.xlu0 %17276, %v17366_v20   ;;  %v26307_v54 = vld [vmem:[#allocation190_spill] sm:$0xff]  ;;  %v15584_v14 = vpack.c.bf16 %v9592_v63, %v9580_v11  ;;  %v26311_v37 = vand.u32 4294901760, %v26310_v57  ;;  %v26312_v8 = vld [vmem:[#allocation129_spill] sm:$0xff]  ;;  %v22879_v20 = vpop.permute.xlu1 %13243  ;;  %v26317_v11 = vld [vmem:[#allocation123_spill] sm:$0xff] }
 0x504   : > { %v22865_v26 = vadd.f32 %v12324_v6, %v12164_v1  ;;  %v12149_v35 = vmul.f32 %v12133_v25, %v6714_v21  ;;  %v6716_v60 = vpop.f32.mrb[87].mxu0  ;;  %v12309_v22 = vsel %vm10583_vm1, %v26308_v29, %v26307_v54  ;;  %8776 = vmatmul.mubr.f32.vlgmr.msra.gmra.mrb[96].mxu0 %v26309_v3  ;;  %v26313_v9 = vand.u32 4294901760, %v26312_v8  ;;  %v26314_v1 = vld [vmem:[#allocation18_spill] sm:$0xff]  ;;  %26316 = vst [vmem:[#allocation175_spill] sm:$0xff] %v22879_v20  ;;  %v26318_v63 = vld [vmem:[#allocation155_spill] sm:$0xff] }
 0x505   : > { %v12325_v4 = vmul.f32 %v12309_v22, %v6716_v60  ;;  %8781 = vmatprep.mubr.f32.mxu0 %v24876_v34  ;;  %15559 = vmatpush1.bf16.msra.mxu0 %v15558_v47  ;;  %v26315_v21 = vld [vmem:[#allocation134_spill] sm:$0xff]  ;;  %v12134_v47 = vsel %vm10583_vm1, %v26318_v63, %v26317_v11  ;;  %v15586_v60 = vpack.c.bf16 %v9598_v43, %v9586_v45 }
 0x506   : > { %v15562_v6 = vpack.c.bf16 %v26313_v9, %v26311_v37  ;;  %9381 = vmatmul.mubr.f32.vlgmr.msra.gmra.mrb[128].mxu1 %v26314_v1  ;;  %v12165_v25 = vadd.f32 %v12149_v35, %v26315_v21  ;;  %15561 = vmatprep.subr.bf16.mxu0 %v15560_v32  ;;  %v26319_v37 = vld [vmem:[#allocation137_spill] sm:$0xff]  ;;  %v26320_v8 = vld [vmem:[#allocation166_spill] sm:$0xff]  ;;  %v26323_v1 = vld [vmem:[#allocation80_spill] sm:$0xff] }
 0x507   : > { %15583 = vmatpush1.bf16.msra.mxu1 %v15582_v51  ;;  %9386 = vmatprep.mubr.f32.mxu1 %v24876_v34  ;;  %v6721_v29 = vpop.f32.mrb[88].mxu0  ;;  %v12310_v32 = vsel %vm10583_vm1, %v26320_v8, %v26319_v37  ;;  %v26321_v35 = vld [vmem:[#allocation14_spill] sm:$0xff]  ;;  %v26322_v9 = vld [vmem:[#allocation21_spill] sm:$0xff]  ;;  %v26330_v37 = vpack.c.bf16 %v22450_v53, %v22445_v55  ;;  %v22912_v8 = vpop.permute.xlu1 %13307 }
 0x508   : > { %v22886_v54 = vadd.f32 %v12325_v4, %v12165_v25  ;;  %v12150_v22 = vmul.f32 %v12134_v47, %v6721_v29  ;;  %v6723_v57 = vpop.f32.mrb[89].mxu0  ;;  %8785 = vmatmul.mubr.f32.gmra.mrb[98].mxu0 %v26321_v35  ;;  %15585 = vmatprep.subr.bf16.mxu1 %v15584_v14  ;;  %v26324_v4 = vld [vmem:[#allocation182_spill] sm:$0xff]  ;;  %v26325_v21 = vld [vmem:[#allocation69_spill] sm:$0xff]  ;;  %v26326_v25 = vld [vmem:[#allocation100_spill] sm:$0xff]  ;;  %26331 = vst [vmem:[#allocation101_spill] sm:$0xff] %v22912_v8 }
 0x509   : > { %v12326_v51 = vmul.f32 %v12310_v32, %v6723_v57  ;;  %8790 = vmatprep.mubr.f32.mxu0 %v24876_v34  ;;  %15563 = vmatpush1.bf16.msra.mxu0 %v15562_v6  ;;  %v12135_v29 = vsel %vm10583_vm1, %v26326_v25, %v26325_v21  ;;  %v26327_v6 = vld [vmem:[#allocation125_spill] sm:$0xff]  ;;  %v26328_v47 = vld [vmem:[#allocation203_spill] sm:$0xff]  ;;  %v26329_v57 = vld [vmem:[#allocation16_spill] sm:$0xff]  ;;  %v22924_v21 = vpop.permute.xlu0 %12579 }
 0x50a   : > { %9392 = vmatmul.mubr.f32.gmra.mrb[130].mxu1 %v26322_v9  ;;  %v12166_v45 = vadd.f32 %v12150_v22, %v26323_v1  ;;  %15565 = vmatprep.subr.bf16.mxu0 %v26324_v4  ;;  %v12311_v22 = vsel %vm10583_vm1, %v26328_v47, %v26327_v6  ;;  %v26335_v4 = vld [vmem:[#allocation74_spill] sm:$0xff]  ;;  %v26336_v6 = vld [vmem:[#allocation92_spill] sm:$0xff]  ;;  %v26337_v47 = vld [vmem:[#allocation35_spill] sm:$0xff] }
 0x50b   : > { %9397 = vmatprep.mubr.f32.mxu1 %v24876_v34  ;;  %v6728_v43 = vpop.f32.mrb[90].mxu0  ;;  %15587 = vmatpush1.bf16.msra.mxu1 %v15586_v60  ;;  %v26332_v60 = vld [vmem:[#allocation25_spill] sm:$0xff] }
 0x50c   : > { %v22902_v14 = vadd.f32 %v12326_v51, %v12166_v45  ;;  %v12151_v11 = vmul.f32 %v12135_v29, %v6728_v43  ;;  %v6730_v63 = vpop.f32.mrb[91].mxu0  ;;  %8794 = vmatmul.mubr.f32.gmra.mrb[100].mxu0 %v26329_v57  ;;  %15589 = vmatprep.subr.bf16.mxu1 %v26330_v37  ;;  %v26333_v51 = vld [vmem:[#allocation150_spill] sm:$0xff]  ;;  %v26334_v45 = vld [vmem:[#allocation103_spill] sm:$0xff] }
 0x50d   : > { %v12327_v32 = vmul.f32 %v12311_v22, %v6730_v63  ;;  %8799 = vmatprep.mubr.f32.mxu0 %v24876_v34  ;;  %17269 = vset.pattern.permute.xlu1 %v25932_v40  ;;  %v12136_v43 = vsel %vm10583_vm1, %v26335_v4, %v26334_v45  ;;  %v26338_v22 = vld [vmem:[#allocation22_spill] sm:$0xff]  ;;  %v26343_v4 = vld [vmem:[#allocation153_spill] sm:$0xff]  ;;  %v22954_v8 = vpop.permute.xlu0 %12587 }
 0x50e   : > { %9403 = vmatmul.mubr.f32.gmra.mrb[132].mxu1 %v26332_v60  ;;  %v12167_v9 = vadd.f32 %v12151_v11, %v26333_v51  ;;  %13275 = vperm.xlu1 %17269, %v22241_v39   ;;  %v12312_v11 = vsel %vm10583_vm1, %v26337_v47, %v26336_v6  ;;  %v26339_v60 = vld [vmem:[#allocation28_spill] sm:$0xff]  ;;  %v26340_v51 = vld [vmem:[#allocation158_spill] sm:$0xff] }
 0x50f   : > { %9408 = vmatprep.mubr.f32.mxu1 %v24876_v34  ;;  %v6735_v1 = vpop.f32.mrb[92].mxu0  ;;  %13343 = vperm.xlu0 %17276, %v22573_v5  }
 0x510   : > { %v22926_v25 = vadd.f32 %v12327_v32, %v12167_v9  ;;  %v12152_v29 = vmul.f32 %v12136_v43, %v6735_v1  ;;  %v6737_v63 = vpop.f32.mrb[93].mxu0  ;;  %8803 = vmatmul.mubr.f32.gmra.mrb[102].mxu0 %v26338_v22  ;;  %v22938_v32 = vpop.permute.xlu1 %12967  ;;  %v26342_v1 = vld [vmem:[#allocation143_spill] sm:$0xff] }
 0x511   : > { %v12328_v37 = vmul.f32 %v12312_v11, %v6737_v63  ;;  %8808 = vmatprep.mubr.f32.mxu0 %v24876_v34  ;;  %26341 = vst [vmem:[#allocation195_spill] sm:$0xff] %v22938_v32  ;;  %v12137_v43 = vsel %vm10583_vm1, %v26343_v4, %v26342_v1  ;;  %v26344_v11 = vld [vmem:[#allocation82_spill] sm:$0xff]  ;;  %v26347_v1 = vld [vmem:[#allocation31_spill] sm:$0xff]  ;;  %v26404_v32 = vld [vmem:[#allocation88_spill] sm:$0xff] }
 0x512   : > { %9414 = vmatmul.mubr.f32.gmra.mrb[134].mxu1 %v26339_v60  ;;  %v12168_v45 = vadd.f32 %v12152_v29, %v26340_v51  ;;  %17270 = vset.pattern.permute.xlu1 %v25926_v62  ;;  %v26345_v29 = vld [vmem:[#allocation204_spill] sm:$0xff]  ;;  %v26346_v51 = vld [vmem:[#allocation23_spill] sm:$0xff] }
 0x513   : > { %9419 = vmatprep.mubr.f32.mxu1 %v24876_v34  ;;  %v6742_v9 = vpop.f32.mrb[94].mxu0  ;;  %13339 = vperm.xlu1 %17270, %v22241_v39   ;;  %v12313_v60 = vsel %vm10583_vm1, %v26345_v29, %v26344_v11  ;;  %v26348_v39 = vld [vmem:[#allocation187_spill] sm:$0xff]  ;;  %v17367_v11 = vld [vmem:[%s17518_s15 + $0x70] sm:$0xff]  ;;  %v26357_v29 = vld [vmem:[#allocation41_spill] sm:$0xff] }
 0x514   : > { %v22946_v63 = vadd.f32 %v12328_v37, %v12168_v45  ;;  %v12153_v6 = vmul.f32 %v12137_v43, %v6742_v9  ;;  %v6744_v47 = vpop.f32.mrb[95].mxu0  ;;  %8812 = vmatmul.mubr.f32.gmra.mrb[104].mxu0 %v26346_v51  ;;  %13347 = vperm.xlu0 %17276, %v22254_v56   ;;  %v26349_v9 = vld [vmem:[#allocation27_spill] sm:$0xff]  ;;  %v22965_v4 = vpop.permute.xlu1 %13247  ;;  %v26351_v56 = vld [vmem:[#allocation34_spill] sm:$0xff]  ;;  %v26352_v43 = vld [vmem:[#allocation32_spill] sm:$0xff] }
 0x515   : > { %v12329_v20 = vmul.f32 %v12313_v60, %v6744_v47  ;;  %8817 = vmatprep.mubr.f32.mxu0 %v24876_v34  ;;  %26350 = vst [vmem:[#allocation57_spill] sm:$0xff] %v22965_v4  ;;  %v26356_v47 = vld [vmem:[#allocation45_spill] sm:$0xff] }
 0x516   : > { %9425 = vmatmul.mubr.f32.gmra.mrb[136].mxu1 %v26347_v1  ;;  %v12169_v37 = vadd.f32 %v12153_v6, %v26348_v39  ;;  %v26355_v6 = vld [vmem:[#allocation36_spill] sm:$0xff]  ;;  %v26359_v60 = vld [vmem:[#allocation49_spill] sm:$0xff] }
 0x517   : > { %9430 = vmatprep.mubr.f32.mxu1 %v24876_v34  ;;  %17272 = vset.pattern.permute.xlu1 %v25892_v61  ;;  %v26353_v61 = vld [vmem:[#allocation40_spill] sm:$0xff]  ;;  %v26361_v1 = vld [vmem:[#allocation53_spill] sm:$0xff] }
 0x518   : > { %v22961_v45 = vadd.f32 %v12329_v20, %v12169_v37  ;;  %8821 = vmatmul.mubr.f32.gmra.mrb[106].mxu0 %v26349_v9  ;;  %12999 = vperm.xlu1 %17272, %v22558_v44   ;;  %v22975_v20 = vpop.permute.xlu1 %12731  ;;  %v26363_v37 = vld [vmem:[#allocation47_spill] sm:$0xff] }
 0x519   : > { %8826 = vmatprep.mubr.f32.mxu0 %v24876_v34  ;;  %26354 = vst [vmem:[#allocation87_spill] sm:$0xff] %v22975_v20  ;;  %v26401_v20 = vand.u32 4294901760, %v22450_v53 }
 0x51a   : > { %9436 = vmatmul.mubr.f32.gmra.mrb[138].mxu1 %v26351_v56  ;;  %v26365_v56 = vld [vmem:[#allocation50_spill] sm:$0xff] }
 0x51b   : > { %9441 = vmatprep.mubr.f32.mxu1 %v24876_v34 }
 0x51c   : > { %8830 = vmatmul.mubr.f32.gmra.mrb[108].mxu0 %v26352_v43  ;;  %17273 = vset.pattern.permute.xlu1 %v25932_v40 }
 0x51d   : > { %8835 = vmatprep.mubr.f32.mxu0 %v24876_v34  ;;  %13279 = vperm.xlu1 %17273, %v22573_v5   ;;  %v22985_v5 = vpop.permute.xlu1 %12795 }
 0x51e   : > { %9447 = vmatmul.mubr.f32.gmra.mrb[140].mxu1 %v26353_v61  ;;  %26358 = vst [vmem:[#allocation176_spill] sm:$0xff] %v22985_v5 }
 0x51f   : > { %9452 = vmatprep.mubr.f32.mxu1 %v24876_v34 }
 0x520   : > { %8839 = vmatmul.mubr.f32.gmra.mrb[110].mxu0 %v26355_v6 }
 0x521   : > { %8844 = vmatprep.mubr.f32.mxu0 %v24876_v34  ;;  %17274 = vset.pattern.permute.xlu1 %v25913_v50  ;;  %v26360_v50 = vld [vmem:[#allocation43_spill] sm:$0xff]  ;;  %v22994_v39 = vpop.permute.xlu1 %13139 }
 0x522   : > { %9458 = vmatmul.mubr.f32.gmra.mrb[142].mxu1 %v26356_v47  ;;  %13107 = vperm.xlu1 %17274, %v17367_v11   ;;  %26362 = vst [vmem:[#allocation132_spill] sm:$0xff] %v22994_v39  ;;  %v26367_v47 = vld [vmem:[#allocation59_spill] sm:$0xff] }
 0x523   : > { %9463 = vmatprep.mubr.f32.mxu1 %v24876_v34 }
 0x524   : > { %8848 = vmatmul.mubr.f32.gmra.mrb[112].mxu0 %v26357_v29 }
 0x525   : > { %8853 = vmatprep.mubr.f32.mxu0 %v24876_v34  ;;  %v23004_v61 = vpop.permute.xlu1 %12735 }
 0x526   : > { %9469 = vmatmul.mubr.f32.gmra.mrb[144].mxu1 %v26359_v60  ;;  %17275 = vset.pattern.permute.xlu1 %v25888_v17  ;;  %v26364_v17 = vld [vmem:[#allocation55_spill] sm:$0xff]  ;;  %26366 = vst [vmem:[#allocation42_spill] sm:$0xff] %v23004_v61  ;;  %v26368_v60 = vld [vmem:[#allocation56_spill] sm:$0xff]  ;;  %v26397_v61 = vld [vmem:[#allocation9_spill] sm:$0xff] }
 0x527   : > { %9474 = vmatprep.mubr.f32.mxu1 %v24876_v34  ;;  %13171 = vperm.xlu1 %17275, %v17367_v11  }
 0x528   : > { %8857 = vmatmul.mubr.f32.gmra.mrb[114].mxu0 %v26360_v50 }
 0x529   : > { %8862 = vmatprep.mubr.f32.mxu0 %v24876_v34 }
 0x52a   : > { %9480 = vmatmul.mubr.f32.gmra.mrb[146].mxu1 %v26361_v1  ;;  %v26369_v1 = vld [vmem:[#allocation62_spill] sm:$0xff] }
 0x52b   : > { %9485 = vmatprep.mubr.f32.mxu1 %v24876_v34  ;;  %13175 = vperm.xlu1 %17275, %v22558_v44  }
 0x52c   : > { %8866 = vmatmul.mubr.f32.gmra.mrb[116].mxu0 %v26363_v37 }
 0x52d   : > { %8871 = vmatprep.mubr.f32.mxu0 %v24876_v34 }
 0x52e   : > { %9491 = vmatmul.mubr.f32.gmra.mrb[148].mxu1 %v26364_v17  ;;  %v26372_v17 = vld [vmem:[#allocation65_spill] sm:$0xff] }
 0x52f   : > { %9496 = vmatprep.mubr.f32.mxu1 %v24876_v34  ;;  %17277 = vset.pattern.permute.xlu1 %v25932_v40  ;;  %v23013_v40 = vpop.permute.xlu1 %13079 }
 0x530   : > { %8875 = vmatmul.mubr.f32.gmra.mrb[118].mxu0 %v26365_v56  ;;  %13283 = vperm.xlu1 %17277, %v17367_v11   ;;  %26370 = vst [vmem:[#allocation165_spill] sm:$0xff] %v23013_v40  ;;  %v26371_v11 = vld [vmem:[#allocation58_spill] sm:$0xff] }
 0x531   : > { %8880 = vmatprep.mubr.f32.mxu0 %v24876_v34  ;;  %v26376_v40 = vld [vmem:[#allocation66_spill] sm:$0xff] }
 0x532   : > { %9502 = vmatmul.mubr.f32.gmra.mrb[150].mxu1 %v26367_v47  ;;  %v26373_v47 = vld [vmem:[#allocation63_spill] sm:$0xff] }
 0x533   : > { %9507 = vmatprep.mubr.f32.mxu1 %v24876_v34  ;;  %v23023_v39 = vpop.permute.xlu1 %13143 }
 0x534   : > { %8884 = vmatmul.mubr.f32.gmra.mrb[120].mxu0 %v26368_v60  ;;  %13287 = vperm.xlu1 %17277, %v22558_v44   ;;  %26374 = vst [vmem:[#allocation131_spill] sm:$0xff] %v23023_v39  ;;  %v26388_v39 = vld [vmem:[#allocation20_spill] sm:$0xff] }
 0x535   : > { %8889 = vmatprep.mubr.f32.mxu0 %v24876_v34 }
 0x536   : > { %9513 = vmatmul.mubr.f32.gmra.mrb[152].mxu1 %v26369_v1  ;;  %v26375_v1 = vld [vmem:[#allocation67_spill] sm:$0xff] }
 0x537   : > { %9518 = vmatprep.mubr.f32.mxu1 %v24876_v34 }
 0x538   : > { %8893 = vmatmul.mubr.f32.gmra.mrb[122].mxu0 %v26371_v11  ;;  %17278 = vset.pattern.permute.xlu1 %v25926_v62  ;;  %v26377_v62 = vld [vmem:[#allocation68_spill] sm:$0xff] }
 0x539   : > { %8898 = vmatprep.mubr.f32.mxu0 %v24876_v34  ;;  %13351 = vperm.xlu1 %17278, %v22558_v44   ;;  %v23031_v44 = vpop.permute.xlu1 %12971 }
 0x53a   : > { %9524 = vmatmul.mubr.f32.gmra.mrb[154].mxu1 %v26372_v17  ;;  %26378 = vst [vmem:[#allocation72_spill] sm:$0xff] %v23031_v44  ;;  %v26379_v17 = vpack.c.bf16 %v22497_v15, %v22492_v0  ;;  %v26402_v44 = vld [vmem:[#allocation10_spill] sm:$0xff] }
 0x53b   : > { %9529 = vmatprep.mubr.f32.mxu1 %v24876_v34 }
 0x53c   : > { %8902 = vmatmul.mubr.f32.gmra.mrb[124].mxu0 %v26373_v47 }
 0x53d   : > { %8907 = vmatprep.mubr.f32.mxu0 %v24876_v34 }
 0x53e   : > { %9535 = vmatmul.mubr.f32.gmra.mrb[156].mxu1 %v26375_v1  ;;  %v26380_v1 = vpack.c.bf16 %v22643_v2, %v22638_v13 }
 0x53f   : > { %9540 = vmatprep.mubr.f32.mxu1 %v24876_v34 }
 0x540   : > { %8911 = vmatmul.mubr.f32.gmra.mrb[126].mxu0 %v26376_v40 }
 0x541   : > { %9005 = vmatprep.mubr.f32.mxu0 %v24876_v34 }
 0x542   : > { %9546 = vmatmul.mubr.f32.gmra.mrb[158].mxu1 %v26377_v62  ;;  %v23047_v62 = vpop.permute.xlu1 %13251 }
 0x543   : > { %9656 = vmatprep.mubr.f32.mxu1 %v24876_v34  ;;  %26381 = vst [vmem:[#allocation208_spill] sm:$0xff] %v23047_v62 }
 0x544   : > { %9007 = vmatmul.mubr.f32.vlgmr.msra.gmra.mrb[96].mxu0 %v26152_v27 }
 0x545   : > { %9012 = vmatprep.mubr.f32.mxu0 %v24876_v34  ;;  %15567 = vmatpush1.bf16.msra.mxu0 %v26198_v59  ;;  %v26382_v59 = vpack.c.bf16 %v22672_v31, %v22655_v33 }
 0x546   : > { %9658 = vmatmul.mubr.f32.vlgmr.msra.gmra.mrb[128].mxu1 %v26152_v27  ;;  %15569 = vmatprep.subr.bf16.mxu0 %v26202_v41  ;;  %v26383_v41 = vld [vmem:[#allocation151_spill] sm:$0xff] }
 0x547   : > { %15591 = vmatpush1.bf16.msra.mxu1 %v26379_v17  ;;  %9663 = vmatprep.mubr.f32.mxu1 %v24876_v34  ;;  %v23060_v17 = vpop.permute.xlu1 %12911 }
 0x548   : > { %9014 = vmatmul.mubr.f32.gmra.mrb[98].mxu0 %v26155_v38  ;;  %15593 = vmatprep.subr.bf16.mxu1 %v26380_v1  ;;  %26384 = vst [vmem:[#allocation78_spill] sm:$0xff] %v23060_v17  ;;  %v26386_v1 = vld [vmem:[#allocation15_spill] sm:$0xff]  ;;  %v26398_v17 = vld [vmem:[#allocation144_spill] sm:$0xff] }
 0x549   : > { %9019 = vmatprep.mubr.f32.mxu0 %v24876_v34  ;;  %15571 = vmatpush1.bf16.msra.mxu0 %v26203_v12  ;;  %v26385_v12 = vld [vmem:[#allocation11_spill] sm:$0xff] }
 0x54a   : > { %9665 = vmatmul.mubr.f32.gmra.mrb[130].mxu1 %v26155_v38 }
 0x54b   : > { %9670 = vmatprep.mubr.f32.mxu1 %v24876_v34  ;;  %15595 = vmatpush1.bf16.msra.mxu1 %v26382_v59  ;;  %v23068_v59 = vpop.permute.xlu1 %12975 }
 0x54c   : > { %9021 = vmatmul.mubr.f32.gmra.mrb[100].mxu0 %v24970_v10  ;;  %15597 = vmatprep.subr.bf16.mxu1 %v26383_v41  ;;  %26387 = vst [vmem:[#allocation113_spill] sm:$0xff] %v23068_v59  ;;  %v26400_v59 = vand.u32 4294901760, %v22445_v55  ;;  %v26405_v55 = vld [vmem:[#allocation12_spill] sm:$0xff] }
 0x54d   : > { %9026 = vmatprep.mubr.f32.mxu0 %v24876_v34 }
 0x54e   : > { %9672 = vmatmul.mubr.f32.gmra.mrb[132].mxu1 %v24970_v10  ;;  %v15604_v5 = vpack.c.bf16 %v26401_v20, %v26400_v59  ;;  %v26408_v59 = vld [vmem:[#allocation19_spill] sm:$0xff] }
 0x54f   : > { %9677 = vmatprep.mubr.f32.mxu1 %v24876_v34  ;;  %v23076_v62 = vpop.permute.xlu1 %13319 }
 0x550   : > { %9028 = vmatmul.mubr.f32.gmra.mrb[102].mxu0 %v26385_v12  ;;  %26389 = vst [vmem:[#allocation178_spill] sm:$0xff] %v23076_v62 }
 0x551   : > { %9033 = vmatprep.mubr.f32.mxu0 %v24876_v34 }
 0x552   : > { %9679 = vmatmul.mubr.f32.gmra.mrb[134].mxu1 %v26385_v12 }
 0x553   : > { %9684 = vmatprep.mubr.f32.mxu1 %v24876_v34  ;;  %v23084_v4 = vpop.permute.xlu1 %12739 }
 0x554   : > { %9035 = vmatmul.mubr.f32.gmra.mrb[104].mxu0 %v26386_v1  ;;  %26390 = vst [vmem:[#allocation97_spill] sm:$0xff] %v23084_v4 }
 0x555   : > { %9040 = vmatprep.mubr.f32.mxu0 %v24876_v34 }
 0x556   : > { %9686 = vmatmul.mubr.f32.gmra.mrb[136].mxu1 %v26386_v1 }
 0x557   : > { %9691 = vmatprep.mubr.f32.mxu1 %v24876_v34  ;;  %v23092_v62 = vpop.permute.xlu1 %13083 }
 0x558   : > { %9042 = vmatmul.mubr.f32.gmra.mrb[106].mxu0 %v26388_v39  ;;  %26391 = vst [vmem:[#allocation109_spill] sm:$0xff] %v23092_v62 }
 0x559   : > { %9047 = vmatprep.mubr.f32.mxu0 %v24876_v34 }
 0x55a   : > { %9693 = vmatmul.mubr.f32.gmra.mrb[138].mxu1 %v26388_v39 }
 0x55b   : > { %9698 = vmatprep.mubr.f32.mxu1 %v24876_v34  ;;  %v23100_v4 = vpop.permute.xlu1 %13147 }
 0x55c   : > { %9049 = vmatmul.mubr.f32.gmra.mrb[108].mxu0 %v26168_v7  ;;  %26392 = vst [vmem:[#allocation89_spill] sm:$0xff] %v23100_v4 }
 0x55d   : > { %9054 = vmatprep.mubr.f32.mxu0 %v24876_v34 }
 0x55e   : > { %9700 = vmatmul.mubr.f32.gmra.mrb[140].mxu1 %v26168_v7 }
 0x55f   : > { %9705 = vmatprep.mubr.f32.mxu1 %v24876_v34  ;;  %v23108_v62 = vpop.permute.xlu1 %12807 }
 0x560   : > { %9056 = vmatmul.mubr.f32.gmra.mrb[110].mxu0 %v24981_v49  ;;  %26393 = vst [vmem:[#allocation119_spill] sm:$0xff] %v23108_v62 }
 0x561   : > { %9061 = vmatprep.mubr.f32.mxu0 %v24876_v34 }
 0x562   : > { %9707 = vmatmul.mubr.f32.gmra.mrb[142].mxu1 %v24981_v49 }
 0x563   : > { %9712 = vmatprep.mubr.f32.mxu1 %v24876_v34  ;;  %v23116_v4 = vpop.permute.xlu1 %13087 }
 0x564   : > { %9063 = vmatmul.mubr.f32.gmra.mrb[112].mxu0 %v17711_v48  ;;  %26394 = vst [vmem:[#allocation39_spill] sm:$0xff] %v23116_v4 }
 0x565   : > { %9068 = vmatprep.mubr.f32.mxu0 %v24876_v34 }
 0x566   : > { %9714 = vmatmul.mubr.f32.gmra.mrb[144].mxu1 %v17711_v48 }
 0x567   : > { %9719 = vmatprep.mubr.f32.mxu1 %v24876_v34  ;;  %v23124_v62 = vpop.permute.xlu1 %12915 }
 0x568   : > { %9070 = vmatmul.mubr.f32.gmra.mrb[114].mxu0 %v17726_v30  ;;  %26395 = vst [vmem:[#allocation186_spill] sm:$0xff] %v23124_v62  ;;  %v26399_v62 = vld [vmem:[#allocation161_spill] sm:$0xff] }
 0x569   : > { %9075 = vmatprep.mubr.f32.mxu0 %v24876_v34 }
 0x56a   : > { %9721 = vmatmul.mubr.f32.gmra.mrb[146].mxu1 %v17726_v30 }
 0x56b   : > { %9726 = vmatprep.mubr.f32.mxu1 %v24876_v34  ;;  %v23132_v4 = vpop.permute.xlu1 %12979 }
 0x56c   : > { %9077 = vmatmul.mubr.f32.gmra.mrb[116].mxu0 %v25415_v19  ;;  %26396 = vst [vmem:[#allocation48_spill] sm:$0xff] %v23132_v4  ;;  %v23145_v4 = vpop.permute.xlu0 %12599 }
 0x56d   : > { %9082 = vmatprep.mubr.f32.mxu0 %v24876_v34 }
 0x56e   : > { %9728 = vmatmul.mubr.f32.gmra.mrb[148].mxu1 %v25415_v19 }
 0x56f   : > { %9733 = vmatprep.mubr.f32.mxu1 %v24876_v34 }
 0x570   : > { %9084 = vmatmul.mubr.f32.gmra.mrb[118].mxu0 %v25417_v18  ;;  %v23156_v53 = vpop.permute.xlu0 %12607 }
 0x571   : > { %9089 = vmatprep.mubr.f32.mxu0 %v24876_v34 }
 0x572   : > { %9735 = vmatmul.mubr.f32.gmra.mrb[150].mxu1 %v25417_v18 }
 0x573   : > { %9740 = vmatprep.mubr.f32.mxu1 %v24876_v34 }
 0x574   : > { %9091 = vmatmul.mubr.f32.gmra.mrb[120].mxu0 %v25674_v58 }
 0x575   : > { %9096 = vmatprep.mubr.f32.mxu0 %v24876_v34 }
 0x576   : > { %9742 = vmatmul.mubr.f32.gmra.mrb[152].mxu1 %v25674_v58 }
 0x577   : > { %9747 = vmatprep.mubr.f32.mxu1 %v24876_v34 }
 0x578   : > { %9098 = vmatmul.mubr.f32.gmra.mrb[122].mxu0 %v25929_v52 }
 0x579   : > { %9103 = vmatprep.mubr.f32.mxu0 %v24876_v34 }
 0x57a   : > { %9749 = vmatmul.mubr.f32.gmra.mrb[154].mxu1 %v25929_v52 }
 0x57b   : > { %9754 = vmatprep.mubr.f32.mxu1 %v24876_v34 }
 0x57c   : > { %9105 = vmatmul.mubr.f32.gmra.mrb[124].mxu0 %v25934_v16 }
 0x57d   : > { %9110 = vmatprep.mubr.f32.mxu0 %v24876_v34 }
 0x57e   : > { %9756 = vmatmul.mubr.f32.gmra.mrb[156].mxu1 %v25934_v16 }
 0x57f   : > { %9761 = vmatprep.mubr.f32.mxu1 %v24876_v34 }
 0x580   : > { %9112 = vmatmul.mubr.f32.gmra.mrb[126].mxu0 %v25813_v23 }
 0x581   : > { %9190 = vmatprep.mubr.f32.mxu0 %v24876_v34 }
 0x582   : > { %9763 = vmatmul.mubr.f32.gmra.mrb[158].mxu1 %v25813_v23 }
 0x583   : > { %9849 = vmatprep.mubr.f32.mxu1 %v24876_v34 }
 0x584   : > { %9192 = vmatmul.mubr.f32.vlgmr.msra.gmra.mrb[96].mxu0 %v26152_v27 }
 0x585   : > { %9197 = vmatprep.mubr.f32.mxu0 %v24876_v34 }
 0x586   : > { %9852 = vmatmul.mubr.f32.vlgmr.msra.gmra.mrb[128].mxu1 %v26397_v61  ;;  %v23148_v61 = vpop.permute.xlu1 %13323 }
 0x587   : > { %15599 = vmatpush1.bf16.msra.mxu1 %v26398_v17  ;;  %9857 = vmatprep.mubr.f32.mxu1 %v24876_v34  ;;  %26403 = vst [vmem:[#allocation197_spill] sm:$0xff] %v23148_v61 }
 0x588   : > { %9199 = vmatmul.mubr.f32.gmra.mrb[98].mxu0 %v26155_v38  ;;  %15601 = vmatprep.subr.bf16.mxu1 %v26399_v62  ;;  %v26414_v62 = vld [vmem:[#allocation156_spill] sm:$0xff] }
 0x589   : > { %9204 = vmatprep.mubr.f32.mxu0 %v24876_v34 }
 0x58a   : > { %9860 = vmatmul.mubr.f32.gmra.mrb[130].mxu1 %v26402_v44  ;;  %v23159_v20 = vpop.permute.xlu1 %12919  ;;  %v26407_v44 = vld [vmem:[#allocation17_spill] sm:$0xff] }
 0x58b   : > { %9865 = vmatprep.mubr.f32.mxu1 %v24876_v34  ;;  %15603 = vmatpush1.bf16.msra.mxu1 %v26404_v32  ;;  %26406 = vst [vmem:[#allocation189_spill] sm:$0xff] %v23159_v20  ;;  %v26410_v20 = vld [vmem:[#allocation130_spill] sm:$0xff]  ;;  %v26412_v32 = vld [vmem:[#allocation169_spill] sm:$0xff] }
 0x58c   : > { %9206 = vmatmul.mubr.f32.gmra.mrb[100].mxu0 %v24970_v10  ;;  %15605 = vmatprep.subr.bf16.mxu1 %v15604_v5  ;;  %v23166_v5 = vpop.permute.xlu0 %12615 }
 0x58d   : > { %9211 = vmatprep.mubr.f32.mxu0 %v24876_v34 }
 0x58e   : > { %9868 = vmatmul.mubr.f32.gmra.mrb[132].mxu1 %v26405_v55  ;;  %v23169_v55 = vpop.permute.xlu1 %13263 }
 0x58f   : > { %9873 = vmatprep.mubr.f32.mxu1 %v24876_v34  ;;  %26409 = vst [vmem:[#allocation141_spill] sm:$0xff] %v23169_v55  ;;  %v26413_v55 = vld [vmem:[#allocation24_spill] sm:$0xff] }
 0x590   : > { %9213 = vmatmul.mubr.f32.gmra.mrb[102].mxu0 %v26385_v12  ;;  %v26411_v12 = vld [vmem:[#allocation76_spill] sm:$0xff] }
 0x591   : > { %9218 = vmatprep.mubr.f32.mxu0 %v24876_v34 }
 0x592   : > { %9876 = vmatmul.mubr.f32.gmra.mrb[134].mxu1 %v26407_v44  ;;  %v12474_v44 = vsel %vm10583_vm1, %v26411_v12, %v26410_v20  ;;  %v23188_v12 = vpop.permute.xlu1 %13327  ;;  %v26416_v20 = vld [vmem:[#allocation168_spill] sm:$0xff] }
 0x593   : > { %9881 = vmatprep.mubr.f32.mxu1 %v24876_v34  ;;  %26415 = vst [vmem:[#allocation98_spill] sm:$0xff] %v23188_v12  ;;  %v26421_v12 = vld [vmem:[#allocation177_spill] sm:$0xff] }
 0x594   : > { %9220 = vmatmul.mubr.f32.gmra.mrb[104].mxu0 %v26386_v1 }
 0x595   : > { %9225 = vmatprep.mubr.f32.mxu0 %v24876_v34 }
 0x596   : > { %9884 = vmatmul.mubr.f32.gmra.mrb[136].mxu1 %v26408_v59  ;;  %v12650_v59 = vsel %vm10583_vm1, %v26412_v32, %v22954_v8 }
 0x597   : > { %9889 = vmatprep.mubr.f32.mxu1 %v24876_v34 }
 0x598   : > { %9227 = vmatmul.mubr.f32.gmra.mrb[106].mxu0 %v26388_v39  ;;  %v23184_v39 = vpop.permute.xlu0 %12623 }
 0x599   : > { %v7915_v61 = vpop.f32.mrb[96].mxu1  ;;  %9232 = vmatprep.mubr.f32.mxu0 %v24876_v34 }
 0x59a   : > { %v12490_v1 = vmul.f32 %v12474_v44, %v7915_v61  ;;  %v7917_v10 = vpop.f32.mrb[97].mxu1  ;;  %9892 = vmatmul.mubr.f32.gmra.mrb[138].mxu1 %v26413_v55  ;;  %v26417_v44 = vld [vmem:[#allocation157_spill] sm:$0xff] }
 0x59b   : > { %v12666_v38 = vmul.f32 %v12650_v59, %v7917_v10  ;;  %9897 = vmatprep.mubr.f32.mxu1 %v24876_v34  ;;  %v12475_v27 = vsel %vm10583_vm1, %v26417_v44, %v26416_v20  ;;  %v26419_v55 = vld [vmem:[#allocation209_spill] sm:$0xff] }
 0x59c   : > { %v12506_v17 = vadd.f32 %v12490_v1, %v26414_v62  ;;  %9234 = vmatmul.mubr.f32.gmra.mrb[108].mxu0 %v26168_v7  ;;  %v12651_v62 = vsel %vm10583_vm1, %v22677_v46, %v26419_v55  ;;  %v26420_v1 = vld [vmem:[#allocation29_spill] sm:$0xff] }
 0x59d   : > { %v7922_v61 = vpop.f32.mrb[98].mxu1  ;;  %9239 = vmatprep.mubr.f32.mxu0 %v24876_v34  ;;  %v26422_v44 = vld [vmem:[#allocation121_spill] sm:$0xff] }
 0x59e   : > { %v23195_v8 = vadd.f32 %v12666_v38, %v12506_v17  ;;  %v12491_v10 = vmul.f32 %v12475_v27, %v7922_v61  ;;  %v7924_v32 = vpop.f32.mrb[99].mxu1  ;;  %9900 = vmatmul.mubr.f32.gmra.mrb[140].mxu1 %v26420_v1  ;;  %v26423_v38 = vld [vmem:[#allocation83_spill] sm:$0xff]  ;;  %v23210_v17 = vpop.permute.xlu0 %12631  ;;  %v26425_v55 = vld [vmem:[#allocation93_spill] sm:$0xff] }
 0x59f   : > { %v12667_v59 = vmul.f32 %v12651_v62, %v7924_v32  ;;  %9905 = vmatprep.mubr.f32.mxu1 %v24876_v34  ;;  %v12476_v27 = vsel %vm10583_vm1, %v26423_v38, %v26422_v44  ;;  %v26426_v62 = vld [vmem:[#allocation160_spill] sm:$0xff]  ;;  %v23219_v1 = vpop.permute.xlu1 %12811 }
 0x5a0   : > { %26418 = vst [vmem:[#allocation184_spill] sm:$0xff] %v23195_v8  ;;  %v12507_v7 = vadd.f32 %v12491_v10, %v26421_v12  ;;  %9241 = vmatmul.mubr.f32.gmra.mrb[110].mxu0 %v24981_v49  ;;  %v12652_v12 = vsel %vm10583_vm1, %v26426_v62, %v26425_v55  ;;  %v26427_v10 = vld [vmem:[#allocation33_spill] sm:$0xff]  ;;  %26428 = vst [vmem:[#allocation145_spill] sm:$0xff] %v23219_v1  ;;  %v26429_v44 = vld [vmem:[#allocation136_spill] sm:$0xff] }
 0x5a1   : > { %v7929_v20 = vpop.f32.mrb[100].mxu1  ;;  %9246 = vmatprep.mubr.f32.mxu0 %v24876_v34 }
 0x5a2   : > { %v23212_v46 = vadd.f32 %v12667_v59, %v12507_v7  ;;  %v12492_v61 = vmul.f32 %v12476_v27, %v7929_v20  ;;  %v7931_v32 = vpop.f32.mrb[101].mxu1  ;;  %9908 = vmatmul.mubr.f32.gmra.mrb[142].mxu1 %v26427_v10  ;;  %v26430_v59 = vld [vmem:[#allocation192_spill] sm:$0xff]  ;;  %v23237_v1 = vpop.permute.xlu0 %12639 }
 0x5a3   : > { %v12668_v8 = vmul.f32 %v12652_v12, %v7931_v32  ;;  %9913 = vmatprep.mubr.f32.mxu1 %v24876_v34  ;;  %v26431_v20 = vld [vmem:[#allocation128_spill] sm:$0xff]  ;;  %v26433_v32 = vld [vmem:[#allocation115_spill] sm:$0xff] }
 0x5a4   : > { %26424 = vst [vmem:[#allocation106_spill] sm:$0xff] %v23212_v46  ;;  %v12508_v38 = vadd.f32 %v12492_v61, %v26429_v44  ;;  %9248 = vmatmul.mubr.f32.gmra.mrb[112].mxu0 %v17711_v48  ;;  %v12477_v27 = vsel %vm10583_vm1, %v26431_v20, %v26430_v59  ;;  %v12653_v12 = vsel %vm10583_vm1, %v26433_v32, %v23145_v4  ;;  %v26434_v61 = vld [vmem:[#allocation37_spill] sm:$0xff]  ;;  %v26435_v46 = vld [vmem:[#allocation3_spill] sm:$0xff]  ;;  %v26438_v20 = vld [vmem:[#allocation2_spill] sm:$0xff] }
 0x5a5   : > { %v7936_v7 = vpop.f32.mrb[102].mxu1  ;;  %9253 = vmatprep.mubr.f32.mxu0 %v24876_v34 }
 0x5a6   : > { %v23229_v55 = vadd.f32 %v12668_v8, %v12508_v38  ;;  %v12493_v62 = vmul.f32 %v12477_v27, %v7936_v7  ;;  %v7938_v10 = vpop.f32.mrb[103].mxu1  ;;  %9916 = vmatmul.mubr.f32.gmra.mrb[144].mxu1 %v26434_v61  ;;  %v23241_v8 = vpop.permute.xlu1 %13091  ;;  %v26437_v7 = vld [vmem:[#allocation61_spill] sm:$0xff] }
 0x5a7   : > { %v12669_v44 = vmul.f32 %v12653_v12, %v7938_v10  ;;  %9921 = vmatprep.mubr.f32.mxu1 %v24876_v34  ;;  %26436 = vst [vmem:[#allocation190_spill] sm:$0xff] %v23241_v8  ;;  %v12478_v27 = vsel %vm10583_vm1, %v26438_v20, %v26437_v7  ;;  %v26439_v12 = vld [vmem:[#allocation147_spill] sm:$0xff]  ;;  %v26442_v20 = vld [vmem:[#allocation114_spill] sm:$0xff] }
 0x5a8   : > { %26432 = vst [vmem:[#allocation79_spill] sm:$0xff] %v23229_v55  ;;  %v12509_v59 = vadd.f32 %v12493_v62, %v26435_v46  ;;  %9255 = vmatmul.mubr.f32.gmra.mrb[114].mxu0 %v17726_v30  ;;  %v12654_v46 = vsel %vm10583_vm1, %v22709_v24, %v26439_v12  ;;  %v26440_v62 = vld [vmem:[#allocation38_spill] sm:$0xff]  ;;  %v26441_v8 = vld [vmem:[#allocation191_spill] sm:$0xff] }
 0x5a9   : > { %v7943_v38 = vpop.f32.mrb[104].mxu1  ;;  %9260 = vmatprep.mubr.f32.mxu0 %v24876_v34  ;;  %v26446_v12 = vld [vmem:[#allocation107_spill] sm:$0xff] }
 0x5aa   : > { %v23248_v4 = vadd.f32 %v12669_v44, %v12509_v59  ;;  %v12494_v10 = vmul.f32 %v12478_v27, %v7943_v38  ;;  %v7945_v32 = vpop.f32.mrb[105].mxu1  ;;  %9924 = vmatmul.mubr.f32.gmra.mrb[146].mxu1 %v26440_v62  ;;  %v26443_v44 = vld [vmem:[#allocation112_spill] sm:$0xff]  ;;  %v23263_v38 = vpop.permute.xlu0 %13291 }
 0x5ab   : > { %v12670_v61 = vmul.f32 %v12654_v46, %v7945_v32  ;;  %9929 = vmatprep.mubr.f32.mxu1 %v24876_v34  ;;  %v12479_v59 = vsel %vm10583_vm1, %v26443_v44, %v26442_v20  ;;  %26444 = vst [vmem:[#allocation202_spill] sm:$0xff] %v23263_v38  ;;  %v23272_v46 = vpop.permute.xlu1 %12751 }
 0x5ac   : > { %v12510_v55 = vadd.f32 %v12494_v10, %v26441_v8  ;;  %9262 = vmatmul.mubr.f32.gmra.mrb[116].mxu0 %v25415_v19  ;;  %v12655_v8 = vsel %vm10583_vm1, %v26446_v12, %v23156_v53  ;;  %v26447_v10 = vld [vmem:[#allocation44_spill] sm:$0xff]  ;;  %26448 = vst [vmem:[#allocation86_spill] sm:$0xff] %v23272_v46 }
 0x5ad   : > { %v7950_v7 = vpop.f32.mrb[106].mxu1  ;;  %9267 = vmatprep.mubr.f32.mxu0 %v24876_v34  ;;  %v26456_v46 = vld [vmem:[#allocation188_spill] sm:$0xff] }
 0x5ae   : > { %v23265_v24 = vadd.f32 %v12670_v61, %v12510_v55  ;;  %v12495_v27 = vmul.f32 %v12479_v59, %v7950_v7  ;;  %v7952_v32 = vpop.f32.mrb[107].mxu1  ;;  %9932 = vmatmul.mubr.f32.gmra.mrb[148].mxu1 %v26447_v10  ;;  %v26449_v61 = vld [vmem:[#allocation77_spill] sm:$0xff]  ;;  %v26450_v7 = vld [vmem:[#allocation207_spill] sm:$0xff]  ;;  %v23290_v38 = vpop.permute.xlu0 %13311 }
 0x5af   : > { %v12671_v62 = vmul.f32 %v12655_v8, %v7952_v32  ;;  %9937 = vmatprep.mubr.f32.mxu1 %v24876_v34  ;;  %v12480_v44 = vsel %vm10583_vm1, %v26450_v7, %v26449_v61  ;;  %v26452_v10 = vld [vmem:[#allocation91_spill] sm:$0xff]  ;;  %v26453_v32 = vld [vmem:[#allocation174_spill] sm:$0xff]  ;;  %26455 = vst [vmem:[#allocation18_spill] sm:$0xff] %v23290_v38  ;;  %v26459_v7 = vld [vmem:[#allocation117_spill] sm:$0xff] }
 0x5b0   : > { %26445 = vst [vmem:[#allocation13_spill] sm:$0xff] %v23265_v24  ;;  %v12511_v20 = vadd.f32 %v12495_v27, %v22735_v28  ;;  %9269 = vmatmul.mubr.f32.gmra.mrb[118].mxu0 %v25417_v18  ;;  %v12656_v8 = vsel %vm10583_vm1, %v26453_v32, %v26452_v10  ;;  %v26454_v28 = vld [vmem:[#allocation46_spill] sm:$0xff]  ;;  %v26463_v38 = vld [vmem:[#allocation183_spill] sm:$0xff] }
 0x5b1   : > { %v7957_v55 = vpop.f32.mrb[108].mxu1  ;;  %9274 = vmatprep.mubr.f32.mxu0 %v24876_v34 }
 0x5b2   : > { %v23282_v53 = vadd.f32 %v12671_v62, %v12511_v20  ;;  %v12496_v59 = vmul.f32 %v12480_v44, %v7957_v55  ;;  %v7959_v12 = vpop.f32.mrb[109].mxu1  ;;  %9940 = vmatmul.mubr.f32.gmra.mrb[150].mxu1 %v26454_v28  ;;  %v23294_v62 = vpop.permute.xlu1 %12815  ;;  %v26458_v55 = vld [vmem:[#allocation96_spill] sm:$0xff] }
 0x5b3   : > { %v12672_v27 = vmul.f32 %v12656_v8, %v7959_v12  ;;  %9945 = vmatprep.mubr.f32.mxu1 %v24876_v34  ;;  %26457 = vst [vmem:[#allocation134_spill] sm:$0xff] %v23294_v62  ;;  %v12481_v44 = vsel %vm10583_vm1, %v26459_v7, %v26458_v55  ;;  %v26461_v8 = vld [vmem:[#allocation90_spill] sm:$0xff]  ;;  %v26464_v7 = vld [vmem:[#allocation159_spill] sm:$0xff] }
 0x5b4   : > { %26451 = vst [vmem:[#allocation129_spill] sm:$0xff] %v23282_v53  ;;  %v12512_v61 = vadd.f32 %v12496_v59, %v26456_v46  ;;  %9276 = vmatmul.mubr.f32.gmra.mrb[120].mxu0 %v25674_v58  ;;  %v12657_v46 = vsel %vm10583_vm1, %v26461_v8, %v23166_v5  ;;  %v26462_v59 = vld [vmem:[#allocation51_spill] sm:$0xff]  ;;  %v26485_v53 = vand.u32 4294901760, %v22497_v15 }
 0x5b5   : > { %v7964_v20 = vpop.f32.mrb[110].mxu1  ;;  %9281 = vmatprep.mubr.f32.mxu0 %v24876_v34  ;;  %v26468_v8 = vld [vmem:[#allocation167_spill] sm:$0xff] }
 0x5b6   : > { %v23301_v10 = vadd.f32 %v12672_v27, %v12512_v61  ;;  %v12497_v12 = vmul.f32 %v12481_v44, %v7964_v20  ;;  %v7966_v32 = vpop.f32.mrb[111].mxu1  ;;  %9948 = vmatmul.mubr.f32.gmra.mrb[152].mxu1 %v26462_v59  ;;  %v26465_v27 = vld [vmem:[#allocation75_spill] sm:$0xff]  ;;  %v23316_v20 = vpop.permute.xlu0 %13315 }
 0x5b7   : > { %v12673_v28 = vmul.f32 %v12657_v46, %v7966_v32  ;;  %9953 = vmatprep.mubr.f32.mxu1 %v24876_v34  ;;  %v12482_v61 = vsel %vm10583_vm1, %v26465_v27, %v26464_v7  ;;  %26466 = vst [vmem:[#allocation155_spill] sm:$0xff] %v23316_v20  ;;  %v26469_v46 = vld [vmem:[#allocation85_spill] sm:$0xff]  ;;  %v23325_v59 = vpop.permute.xlu1 %13159  ;;  %v26472_v7 = vld [vmem:[#allocation102_spill] sm:$0xff] }
 0x5b8   : > { %26460 = vst [vmem:[#allocation123_spill] sm:$0xff] %v23301_v10  ;;  %v12513_v62 = vadd.f32 %v12497_v12, %v26463_v38  ;;  %9283 = vmatmul.mubr.f32.gmra.mrb[122].mxu0 %v25929_v52  ;;  %v12658_v38 = vsel %vm10583_vm1, %v26469_v46, %v26468_v8  ;;  %v26470_v12 = vld [vmem:[#allocation54_spill] sm:$0xff]  ;;  %26471 = vst [vmem:[#allocation166_spill] sm:$0xff] %v23325_v59 }
 0x5b9   : > { %v7971_v55 = vpop.f32.mrb[112].mxu1  ;;  %9288 = vmatprep.mubr.f32.mxu0 %v24876_v34  ;;  %v26478_v20 = vld [vmem:[#allocation122_spill] sm:$0xff] }
 0x5ba   : > { %v23318_v5 = vadd.f32 %v12673_v28, %v12513_v62  ;;  %v12498_v44 = vmul.f32 %v12482_v61, %v7971_v55  ;;  %v7973_v32 = vpop.f32.mrb[113].mxu1  ;;  %9956 = vmatmul.mubr.f32.gmra.mrb[154].mxu1 %v26470_v12  ;;  %v26473_v28 = vld [vmem:[#allocation201_spill] sm:$0xff]  ;;  %v23343_v59 = vpop.permute.xlu0 %12763 }
 0x5bb   : > { %v12674_v10 = vmul.f32 %v12658_v38, %v7973_v32  ;;  %9961 = vmatprep.mubr.f32.mxu1 %v24876_v34  ;;  %v26474_v55 = vld [vmem:[#allocation105_spill] sm:$0xff]  ;;  %v26476_v32 = vld [vmem:[#allocation139_spill] sm:$0xff] }
 0x5bc   : > { %26467 = vst [vmem:[#allocation137_spill] sm:$0xff] %v23318_v5  ;;  %v12514_v27 = vadd.f32 %v12498_v44, %v26472_v7  ;;  %9290 = vmatmul.mubr.f32.gmra.mrb[124].mxu0 %v25934_v16  ;;  %v12483_v61 = vsel %vm10583_vm1, %v26474_v55, %v26473_v28  ;;  %v12659_v38 = vsel %vm10583_vm1, %v26476_v32, %v23184_v39  ;;  %v26477_v44 = vld [vmem:[#allocation60_spill] sm:$0xff] }
 0x5bd   : > { %v7978_v62 = vpop.f32.mrb[114].mxu1  ;;  %9295 = vmatprep.mubr.f32.mxu0 %v24876_v34  ;;  %v26480_v55 = vld [vmem:[#allocation148_spill] sm:$0xff] }
 0x5be   : > { %v23335_v8 = vadd.f32 %v12674_v10, %v12514_v27  ;;  %v12499_v46 = vmul.f32 %v12483_v61, %v7978_v62  ;;  %v7980_v12 = vpop.f32.mrb[115].mxu1  ;;  %9964 = vmatmul.mubr.f32.gmra.mrb[156].mxu1 %v26477_v44  ;;  %v12644_v10 = vpop.permute.xlu1 %12643  ;;  %v26479_v62 = vld [vmem:[#allocation170_spill] sm:$0xff]  ;;  %v26483_v5 = vld [vmem:[#allocation64_spill] sm:$0xff] }
 0x5bf   : > { %v12675_v7 = vmul.f32 %v12659_v38, %v7980_v12  ;;  %9969 = vmatprep.mubr.f32.mxu1 %v24876_v34  ;;  %v12484_v61 = vsel %vm10583_vm1, %v26480_v55, %v26479_v62  ;;  %v26481_v12 = vld [vmem:[#allocation199_spill] sm:$0xff]  ;;  %v26482_v38 = vld [vmem:[#allocation146_spill] sm:$0xff] }
 0x5c0   : > { %26475 = vst [vmem:[#allocation14_spill] sm:$0xff] %v23335_v8  ;;  %v12515_v28 = vadd.f32 %v12499_v46, %v26478_v20  ;;  %9297 = vmatmul.mubr.f32.gmra.mrb[126].mxu0 %v25813_v23  ;;  %v12660_v44 = vsel %vm10583_vm1, %v26482_v38, %v26481_v12  ;;  %v26484_v46 = vand.u32 4294901760, %v22492_v0  ;;  %v26489_v12 = vld [vmem:[#allocation5_spill] sm:$0xff] }
 0x5c1   : > { %v7985_v27 = vpop.f32.mrb[116].mxu1 }
 0x5c2   : > { %v23351_v8 = vadd.f32 %v12675_v7, %v12515_v28  ;;  %v12500_v39 = vmul.f32 %v12484_v61, %v7985_v27  ;;  %v7987_v32 = vpop.f32.mrb[117].mxu1  ;;  %9972 = vmatmul.mubr.f32.gmra.mrb[158].mxu1 %v26483_v5  ;;  %v15606_v24 = vpack.c.bf16 %v26485_v53, %v26484_v46  ;;  %v26486_v28 = vand.u32 4294901760, %v22638_v13  ;;  %v26488_v61 = vld [vmem:[#allocation73_spill] sm:$0xff]  ;;  %v26490_v53 = vld [vmem:[#allocation198_spill] sm:$0xff] }
 0x5c3   : > { %v12676_v20 = vmul.f32 %v12660_v44, %v7987_v32  ;;  %10050 = vmatprep.mubr.f32.mxu1 %v24876_v34  ;;  %v26487_v27 = vand.u32 4294901760, %v22643_v2  ;;  %v12485_v5 = vsel %vm10583_vm1, %v26489_v12, %v26488_v61  ;;  %v23372_v32 = vpop.permute.xlu0 %12775  ;;  %v12661_v13 = vsel %vm10583_vm1, %v26490_v53, %v23210_v17  ;;  %v23381_v2 = vpop.permute.xlu1 %12987  ;;  %v26495_v61 = vld [vmem:[#allocation133_spill] sm:$0xff] }
 0x5c4   : > { %v12516_v7 = vadd.f32 %v12500_v39, %v22865_v26  ;;  %v26491_v39 = vand.u32 4294901760, %v22655_v33  ;;  %v26492_v44 = vand.u32 4294901760, %v22672_v31  ;;  %v12662_v33 = vsel %vm10583_vm1, %v22862_v42, %v26495_v61  ;;  %v26502_v61 = vld [vmem:[#allocation142_spill] sm:$0xff] }
 0x5c5   : > { %v15608_v62 = vpack.c.bf16 %v26487_v27, %v26486_v28  ;;  %v7992_v55 = vpop.f32.mrb[118].mxu1  ;;  %v26493_v28 = vld [vmem:[#allocation181_spill] sm:$0xff]  ;;  %v26494_v27 = vld [vmem:[#allocation30_spill] sm:$0xff] }
 0x5c6   : > { %v23374_v38 = vadd.f32 %v12676_v20, %v12516_v7  ;;  %v12501_v0 = vmul.f32 %v12485_v5, %v7992_v55  ;;  %v7994_v15 = vpop.f32.mrb[119].mxu1  ;;  %10054 = vmatmul.mubr.f32.vlgmr.msra.gmra.mrb[128].mxu1 %v26309_v3  ;;  %v15610_v20 = vpack.c.bf16 %v26492_v44, %v26491_v39  ;;  %v12486_v3 = vsel %vm10583_vm1, %v26494_v27, %v26493_v28 }
 0x5c7   : > { %v12677_v26 = vmul.f32 %v12661_v13, %v7994_v15  ;;  %15607 = vmatpush1.bf16.msra.mxu1 %v15606_v24  ;;  %10059 = vmatprep.mubr.f32.mxu1 %v24876_v34  ;;  %v23405_v12 = vpop.permute.xlu1 %13267  ;;  %v26497_v15 = vld [vmem:[#allocation124_spill] sm:$0xff]  ;;  %v12664_v44 = vsel %vm10583_vm1, %v22924_v21, %v12644_v10 }
 0x5c8   : > { %v12517_v46 = vadd.f32 %v12501_v0, %v22886_v54  ;;  %15609 = vmatprep.subr.bf16.mxu1 %v15608_v62  ;;  %v23401_v54 = vpop.permute.xlu0 %12779  ;;  %v26496_v0 = vld [vmem:[#allocation52_spill] sm:$0xff] }
 0x5c9   : > { %v7999_v7 = vpop.f32.mrb[120].mxu1  ;;  %v12487_v42 = vsel %vm10583_vm1, %v26497_v15, %v26496_v0  ;;  %v26503_v0 = vld [vmem:[#allocation179_spill] sm:$0xff] }
 0x5ca   : > { %v23393_v17 = vadd.f32 %v12677_v26, %v12517_v46  ;;  %v12502_v55 = vmul.f32 %v12486_v3, %v7999_v7  ;;  %v8001_v24 = vpop.f32.mrb[121].mxu1  ;;  %10063 = vmatmul.mubr.f32.gmra.mrb[130].mxu1 %v26321_v35  ;;  %v26498_v26 = vld [vmem:[#allocation162_spill] sm:$0xff]  ;;  %v26499_v46 = vld [vmem:[#allocation149_spill] sm:$0xff]  ;;  %v26500_v7 = vld [vmem:[#allocation180_spill] sm:$0xff] }
 0x5cb   : > { %v12678_v31 = vmul.f32 %v12662_v33, %v8001_v24  ;;  %10068 = vmatprep.mubr.f32.mxu1 %v24876_v34  ;;  %15611 = vmatpush1.bf16.msra.mxu1 %v15610_v20  ;;  %v12663_v39 = vsel %vm10583_vm1, %v26498_v26, %v23237_v1  ;;  %v12488_v28 = vsel %vm10583_vm1, %v26500_v7, %v26499_v46  ;;  %v26501_v24 = vld [vmem:[#allocation70_spill] sm:$0xff] }
 0x5cc   : > { %v12518_v62 = vadd.f32 %v12502_v55, %v22902_v14  ;;  %15613 = vmatprep.subr.bf16.mxu1 %v26383_v41  ;;  %v12648_v55 = vpop.permute.xlu1 %12647  ;;  %v12489_v33 = vsel %vm10583_vm1, %v26502_v61, %v26501_v24  ;;  %v26513_v46 = vld [vmem:[#allocation26_spill] sm:$0xff] }
 0x5cd   : > { %v8006_v5 = vpop.f32.mrb[122].mxu1 }
 0x5ce   : > { %v23411_v53 = vadd.f32 %v12678_v31, %v12518_v62  ;;  %v12503_v35 = vmul.f32 %v12487_v42, %v8006_v5  ;;  %v8008_v13 = vpop.f32.mrb[123].mxu1  ;;  %10072 = vmatmul.mubr.f32.gmra.mrb[132].mxu1 %v26329_v57  ;;  %v23430_v57 = vpop.permute.xlu0 %12799 }
 0x5cf   : > { %v12679_v14 = vmul.f32 %v12663_v39, %v8008_v13  ;;  %10077 = vmatprep.mubr.f32.mxu1 %v24876_v34  ;;  %v26510_v39 = vld [vmem:[#allocation11_spill] sm:$0xff] }
 0x5d0   : > { %v12519_v41 = vadd.f32 %v12503_v35, %v22926_v25  ;;  %v23547_v24 = vpop.permute.xlu1 %12927 }
 0x5d1   : > { %v8013_v20 = vpop.f32.mrb[124].mxu1 }
 0x5d2   : > { %v23427_v27 = vadd.f32 %v12679_v14, %v12519_v41  ;;  %v12504_v1 = vmul.f32 %v12488_v28, %v8013_v20  ;;  %v8015_v3 = vpop.f32.mrb[125].mxu1  ;;  %10081 = vmatmul.mubr.f32.gmra.mrb[134].mxu1 %v26338_v22  ;;  %v12665_v22 = vsel %vm10583_vm1, %v26503_v0, %v12648_v55  ;;  %v23446_v42 = vpop.permute.xlu0 %12803  ;;  %v26511_v41 = vld [vmem:[#allocation15_spill] sm:$0xff]  ;;  %v26516_v0 = vld [vmem:[#allocation4_spill] sm:$0xff] }
 0x5d3   : > { %v12680_v25 = vmul.f32 %v12664_v44, %v8015_v3  ;;  %10086 = vmatprep.mubr.f32.mxu1 %v24876_v34  ;;  %v26512_v44 = vld [vmem:[#allocation20_spill] sm:$0xff] }
 0x5d4   : > { %v12520_v21 = vadd.f32 %v12504_v1, %v22946_v63 }
 0x5d5   : > { %v8020_v10 = vpop.f32.mrb[126].mxu1 }
 0x5d6   : > { %v23438_v31 = vadd.f32 %v12680_v25, %v12520_v21  ;;  %v12505_v62 = vmul.f32 %v12489_v33, %v8020_v10  ;;  %v8022_v5 = vpop.f32.mrb[127].mxu1  ;;  %10090 = vmatmul.mubr.f32.gmra.mrb[136].mxu1 %v26346_v51  ;;  %v23453_v13 = vpop.permute.xlu0 %13231 }
 0x5d7   : > { %v12681_v15 = vmul.f32 %v12665_v22, %v8022_v5  ;;  %10095 = vmatprep.mubr.f32.mxu1 %v24876_v34  ;;  %v23555_v33 = vpop.permute.xlu1 %13271  ;;  %v12826_v22 = vsel %vm10583_vm1, %v26516_v0, %v23343_v59 }
 0x5d8   : > { %v12521_v63 = vadd.f32 %v12505_v62, %v22961_v45  ;;  %26515 = vst [vmem:[#allocation80_spill] sm:$0xff] %v23555_v33  ;;  %v26524_v33 = vld [vmem:[#allocation84_spill] sm:$0xff] }
 0x5da   : > { %v23448_v35 = vadd.f32 %v12681_v15, %v12521_v63  ;;  %10099 = vmatmul.mubr.f32.gmra.mrb[138].mxu1 %v26349_v9  ;;  %v23458_v51 = vpop.permute.xlu0 %13235 }
 0x5db   : > { %10104 = vmatprep.mubr.f32.mxu1 %v24876_v34 }
 0x5de   : > { %10108 = vmatmul.mubr.f32.gmra.mrb[140].mxu1 %v26352_v43  ;;  %v23463_v45 = vpop.permute.xlu0 %13255 }
 0x5df   : > { %10113 = vmatprep.mubr.f32.mxu1 %v24876_v34 }
 0x5e2   : > { %10117 = vmatmul.mubr.f32.gmra.mrb[142].mxu1 %v26355_v6  ;;  %v23468_v9 = vpop.permute.xlu0 %13259 }
 0x5e3   : > { %10122 = vmatprep.mubr.f32.mxu1 %v24876_v34 }
 0x5e6   : > { %10126 = vmatmul.mubr.f32.gmra.mrb[144].mxu1 %v26357_v29  ;;  %v23473_v43 = vpop.permute.xlu0 %12719 }
 0x5e7   : > { %10131 = vmatprep.mubr.f32.mxu1 %v24876_v34 }
 0x5ea   : > { %10135 = vmatmul.mubr.f32.gmra.mrb[146].mxu1 %v26360_v50  ;;  %v23478_v6 = vpop.permute.xlu0 %12723  ;;  %v26504_v50 = vld [vmem:[#allocation6_spill] sm:$0xff] }
 0x5eb   : > { %10140 = vmatprep.mubr.f32.mxu1 %v24876_v34 }
 0x5ee   : > { %10144 = vmatmul.mubr.f32.gmra.mrb[148].mxu1 %v26363_v37  ;;  %v23483_v29 = vpop.permute.xlu0 %12743  ;;  %v26505_v37 = vld [vmem:[#allocation144_spill] sm:$0xff] }
 0x5ef   : > { %10149 = vmatprep.mubr.f32.mxu1 %v24876_v34 }
 0x5f2   : > { %10153 = vmatmul.mubr.f32.gmra.mrb[150].mxu1 %v26365_v56  ;;  %v26506_v56 = vld [vmem:[#allocation161_spill] sm:$0xff] }
 0x5f3   : > { %10158 = vmatprep.mubr.f32.mxu1 %v24876_v34 }
 0x5f6   : > { %10162 = vmatmul.mubr.f32.gmra.mrb[152].mxu1 %v26368_v60  ;;  %v23490_v60 = vpop.permute.xlu0 %12747 }
 0x5f7   : > { %10167 = vmatprep.mubr.f32.mxu1 %v24876_v34 }
 0x5fa   : > { %10171 = vmatmul.mubr.f32.gmra.mrb[154].mxu1 %v26371_v11  ;;  %v26507_v11 = vld [vmem:[#allocation7_spill] sm:$0xff]  ;;  %v23496_v26 = vpop.permute.xlu0 %12755 }
 0x5fb   : > { %10176 = vmatprep.mubr.f32.mxu1 %v24876_v34 }
 0x5fe   : > { %10180 = vmatmul.mubr.f32.gmra.mrb[156].mxu1 %v26373_v47  ;;  %v26508_v47 = vld [vmem:[#allocation88_spill] sm:$0xff]  ;;  %v23501_v14 = vpop.permute.xlu0 %13127 }
 0x5ff   : > { %10185 = vmatprep.mubr.f32.mxu1 %v24876_v34 }
 0x602   : > { %10189 = vmatmul.mubr.f32.gmra.mrb[158].mxu1 %v26376_v40  ;;  %v26509_v40 = vld [vmem:[#allocation8_spill] sm:$0xff]  ;;  %v23506_v20 = vpop.permute.xlu0 %13131 }
 0x603   : > { %10283 = vmatprep.mubr.f32.mxu1 %v24876_v34 }
 0x606   : > { %10285 = vmatmul.mubr.f32.vlgmr.msra.gmra.mrb[128].mxu1 %v26504_v50  ;;  %v23511_v7 = vpop.permute.xlu0 %13151 }
 0x607   : > { %15615 = vmatpush1.bf16.msra.mxu1 %v26505_v37  ;;  %10290 = vmatprep.mubr.f32.mxu1 %v24876_v34 }
 0x608   : > { %15617 = vmatprep.subr.bf16.mxu1 %v26506_v56 }
 0x60a   : > { %10292 = vmatmul.mubr.f32.gmra.mrb[130].mxu1 %v26507_v11  ;;  %v23516_v28 = vpop.permute.xlu0 %13155 }
 0x60b   : > { %10297 = vmatprep.mubr.f32.mxu1 %v24876_v34  ;;  %15619 = vmatpush1.bf16.msra.mxu1 %v26508_v47  ;;  %v26519_v47 = vld [vmem:[#allocation184_spill] sm:$0xff] }
 0x60e   : > { %10299 = vmatmul.mubr.f32.gmra.mrb[132].mxu1 %v26509_v40  ;;  %v23521_v1 = vpop.permute.xlu0 %13163 }
 0x60f   : > { %10304 = vmatprep.mubr.f32.mxu1 %v24876_v34  ;;  %26514 = vst [vmem:[#allocation21_spill] sm:$0xff] %v23521_v1  ;;  %v26521_v1 = vld [vmem:[#allocation95_spill] sm:$0xff] }
 0x612   : > { %10306 = vmatmul.mubr.f32.gmra.mrb[134].mxu1 %v26510_v39  ;;  %v12944_v3 = vpop.permute.xlu0 %12943 }
 0x613   : > { %10311 = vmatprep.mubr.f32.mxu1 %v24876_v34 }
 0x616   : > { %10313 = vmatmul.mubr.f32.gmra.mrb[136].mxu1 %v26511_v41  ;;  %v23529_v55 = vpop.permute.xlu0 %12959 }
 0x617   : > { %10318 = vmatprep.mubr.f32.mxu1 %v24876_v34 }
 0x61a   : > { %10320 = vmatmul.mubr.f32.gmra.mrb[138].mxu1 %v26512_v44  ;;  %v23534_v25 = vpop.permute.xlu0 %12963 }
 0x61b   : > { %10325 = vmatprep.mubr.f32.mxu1 %v24876_v34 }
 0x61e   : > { %10327 = vmatmul.mubr.f32.gmra.mrb[140].mxu1 %v26513_v46  ;;  %v23539_v21 = vpop.permute.xlu0 %12983 }
 0x61f   : > { %10332 = vmatprep.mubr.f32.mxu1 %v24876_v34 }
 0x622   : > { %10334 = vmatmul.mubr.f32.gmra.mrb[142].mxu1 %v24981_v49  ;;  %v23544_v10 = vpop.permute.xlu0 %12991 }
 0x623   : > { %10339 = vmatprep.mubr.f32.mxu1 %v24876_v34 }
 0x626   : > { %10341 = vmatmul.mubr.f32.gmra.mrb[144].mxu1 %v17711_v48  ;;  %v23551_v61 = vpop.permute.xlu0 %12995 }
 0x627   : > { %10346 = vmatprep.mubr.f32.mxu1 %v24876_v34 }
 0x62a   : > { %10348 = vmatmul.mubr.f32.gmra.mrb[146].mxu1 %v17726_v30  ;;  %v12876_v62 = vpop.permute.xlu0 %12875 }
 0x62b   : > { %10353 = vmatprep.mubr.f32.mxu1 %v24876_v34 }
 0x62e   : > { %10355 = vmatmul.mubr.f32.gmra.mrb[148].mxu1 %v25415_v19 }
 0x62f   : > { %10360 = vmatprep.mubr.f32.mxu1 %v24876_v34 }
 0x632   : > { %10362 = vmatmul.mubr.f32.gmra.mrb[150].mxu1 %v25417_v18 }
 0x633   : > { %10367 = vmatprep.mubr.f32.mxu1 %v24876_v34 }
 0x636   : > { %10369 = vmatmul.mubr.f32.gmra.mrb[152].mxu1 %v25674_v58 }
 0x637   : > { %10374 = vmatprep.mubr.f32.mxu1 %v24876_v34 }
 0x63a   : > { %10376 = vmatmul.mubr.f32.gmra.mrb[154].mxu1 %v25929_v52 }
 0x63b   : > { %10381 = vmatprep.mubr.f32.mxu1 %v24876_v34 }
 0x63e   : > { %10383 = vmatmul.mubr.f32.gmra.mrb[156].mxu1 %v25934_v16 }
 0x63f   : > { %10388 = vmatprep.mubr.f32.mxu1 %v24876_v34 }
 0x642   : > { %10390 = vmatmul.mubr.f32.gmra.mrb[158].mxu1 %v25813_v23 }
 0x643   : > { %10468 = vmatprep.mubr.f32.mxu1 %v24876_v34 }
 0x646   : > { %10470 = vmatmul.mubr.f32.vlgmr.msra.gmra.mrb[128].mxu1 %v26504_v50  ;;  %v26517_v50 = vld [vmem:[#allocation127_spill] sm:$0xff] }
 0x647   : > { %10475 = vmatprep.mubr.f32.mxu1 %v24876_v34  ;;  %v13002_v37 = vsel %vm10583_vm1, %v12876_v62, %v26517_v50  ;;  %v26522_v62 = vld [vmem:[#allocation138_spill] sm:$0xff] }
 0x64a   : > { %10477 = vmatmul.mubr.f32.gmra.mrb[130].mxu1 %v26507_v11  ;;  %v23566_v11 = vpop.permute.xlu1 %13335 }
 0x64b   : > { %10482 = vmatprep.mubr.f32.mxu1 %v24876_v34  ;;  %26518 = vst [vmem:[#allocation182_spill] sm:$0xff] %v23566_v11  ;;  %v26525_v11 = vld [vmem:[#allocation116_spill] sm:$0xff] }
 0x64e   : > { %10484 = vmatmul.mubr.f32.gmra.mrb[132].mxu1 %v26509_v40 }
 0x64f   : > { %10489 = vmatprep.mubr.f32.mxu1 %v24876_v34 }
 0x652   : > { %10491 = vmatmul.mubr.f32.gmra.mrb[134].mxu1 %v26510_v39 }
 0x653   : > { %10496 = vmatprep.mubr.f32.mxu1 %v24876_v34 }
 0x656   : > { %10498 = vmatmul.mubr.f32.gmra.mrb[136].mxu1 %v26511_v41  ;;  %v26520_v41 = vld [vmem:[#allocation81_spill] sm:$0xff] }
 0x657   : > { %10503 = vmatprep.mubr.f32.mxu1 %v24876_v34  ;;  %v9193_v5 = vpop.f32.mrb[96].mxu0  ;;  %v12827_v59 = vsel %vm10583_vm1, %v26521_v1, %v26520_v41  ;;  %v12828_v1 = vsel %vm10583_vm1, %v26525_v11, %v26524_v33  ;;  %v26526_v41 = vld [vmem:[#allocation193_spill] sm:$0xff]  ;;  %v26528_v33 = vld [vmem:[#allocation152_spill] sm:$0xff] }
 0x658   : > { %v12842_v15 = vmul.f32 %v12826_v22, %v9193_v5  ;;  %v9195_v63 = vpop.f32.mrb[97].mxu0  ;;  %v12829_v11 = vsel %vm10583_vm1, %v26528_v33, %v23372_v32  ;;  %v26531_v32 = vld [vmem:[#allocation126_spill] sm:$0xff] }
 0x659   : > { %v13018_v56 = vmul.f32 %v13002_v37, %v9195_v63  ;;  %v13003_v63 = vsel %vm10583_vm1, %v26522_v62, %v12944_v3 }
 0x65a   : > { %10505 = vmatmul.mubr.f32.gmra.mrb[138].mxu1 %v26512_v44  ;;  %v12858_v40 = vadd.f32 %v12842_v15, %v26519_v47  ;;  %v12884_v44 = vpop.permute.xlu0 %12883  ;;  %v26523_v15 = vld [vmem:[#allocation106_spill] sm:$0xff] }
 0x65b   : > { %10510 = vmatprep.mubr.f32.mxu1 %v24876_v34  ;;  %v9200_v39 = vpop.f32.mrb[98].mxu0 }
 0x65c   : > { %v23575_v5 = vadd.f32 %v13018_v56, %v12858_v40  ;;  %v12843_v0 = vmul.f32 %v12827_v59, %v9200_v39  ;;  %v9202_v22 = vpop.f32.mrb[99].mxu0  ;;  %v23587_v56 = vpop.permute.xlu1 %12819 }
 0x65d   : > { %v13019_v50 = vmul.f32 %v13003_v63, %v9202_v22 }
 0x65e   : > { %10512 = vmatmul.mubr.f32.gmra.mrb[140].mxu1 %v26513_v46  ;;  %v12859_v37 = vadd.f32 %v12843_v0, %v26523_v15  ;;  %v13004_v46 = vsel %vm10583_vm1, %v12884_v44, %v26526_v41  ;;  %v26527_v0 = vld [vmem:[#allocation79_spill] sm:$0xff]  ;;  %v12830_v41 = vsel %vm10583_vm1, %v26531_v32, %v23401_v54  ;;  %v26537_v32 = vld [vmem:[#allocation129_spill] sm:$0xff] }
 0x65f   : > { %10517 = vmatprep.mubr.f32.mxu1 %v24876_v34  ;;  %v9207_v47 = vpop.f32.mrb[100].mxu0 }
 0x660   : > { %v23589_v40 = vadd.f32 %v13019_v50, %v12859_v37  ;;  %v12844_v39 = vmul.f32 %v12828_v1, %v9207_v47  ;;  %v9209_v3 = vpop.f32.mrb[101].mxu0  ;;  %v26529_v37 = vld [vmem:[#allocation154_spill] sm:$0xff]  ;;  %v23607_v1 = vpop.permute.xlu1 %13099 }
 0x661   : > { %v13020_v59 = vmul.f32 %v13004_v46, %v9209_v3  ;;  %v26530_v47 = vld [vmem:[#allocation194_spill] sm:$0xff] }
 0x662   : > { %10519 = vmatmul.mubr.f32.gmra.mrb[142].mxu1 %v24981_v49  ;;  %v12860_v22 = vadd.f32 %v12844_v39, %v26527_v0  ;;  %v13005_v44 = vsel %vm10583_vm1, %v26530_v47, %v26529_v37 }
 0x663   : > { %10524 = vmatprep.mubr.f32.mxu1 %v24876_v34  ;;  %v9214_v62 = vpop.f32.mrb[102].mxu0 }
 0x664   : > { %v23601_v63 = vadd.f32 %v13020_v59, %v12860_v22  ;;  %v12845_v50 = vmul.f32 %v12829_v11, %v9214_v62  ;;  %v9216_v15 = vpop.f32.mrb[103].mxu0  ;;  %v26532_v22 = vld [vmem:[#allocation94_spill] sm:$0xff]  ;;  %v26533_v62 = vld [vmem:[#allocation108_spill] sm:$0xff]  ;;  %v23629_v37 = vpop.permute.xlu1 %12759 }
 0x665   : > { %v13021_v49 = vmul.f32 %v13005_v44, %v9216_v15  ;;  %v13006_v33 = vsel %vm10583_vm1, %v26533_v62, %v26532_v22  ;;  %v26535_v15 = vld [vmem:[#allocation185_spill] sm:$0xff] }
 0x666   : > { %10526 = vmatmul.mubr.f32.gmra.mrb[144].mxu1 %v17711_v48  ;;  %v12861_v39 = vadd.f32 %v12845_v50, %v23248_v4  ;;  %v26534_v4 = vld [vmem:[#allocation13_spill] sm:$0xff]  ;;  %v12831_v54 = vsel %vm10583_vm1, %v23473_v43, %v26535_v15 }
 0x667   : > { %10531 = vmatprep.mubr.f32.mxu1 %v24876_v34  ;;  %v9221_v3 = vpop.f32.mrb[104].mxu0 }
 0x668   : > { %v23616_v46 = vadd.f32 %v13021_v49, %v12861_v39  ;;  %v12846_v59 = vmul.f32 %v12830_v41, %v9221_v3  ;;  %v9223_v0 = vpop.f32.mrb[105].mxu0  ;;  %v26536_v39 = vld [vmem:[#allocation172_spill] sm:$0xff] }
 0x669   : > { %v13022_v48 = vmul.f32 %v13006_v33, %v9223_v0  ;;  %v26538_v0 = vld [vmem:[#allocation206_spill] sm:$0xff] }
 0x66a   : > { %10533 = vmatmul.mubr.f32.gmra.mrb[146].mxu1 %v17726_v30  ;;  %v12862_v11 = vadd.f32 %v12846_v59, %v26534_v4  ;;  %v13007_v30 = vsel %vm10583_vm1, %v26536_v39, %v23529_v55  ;;  %v12904_v59 = vpop.permute.xlu0 %12903  ;;  %v12832_v22 = vsel %vm10583_vm1, %v23478_v6, %v26538_v0  ;;  %v26539_v55 = vld [vmem:[#allocation99_spill] sm:$0xff] }
 0x66b   : > { %10538 = vmatprep.mubr.f32.mxu1 %v24876_v34  ;;  %v9228_v50 = vpop.f32.mrb[106].mxu0  ;;  %v26541_v6 = vld [vmem:[#allocation135_spill] sm:$0xff] }
 0x66c   : > { %v23631_v47 = vadd.f32 %v13022_v48, %v12862_v11  ;;  %v12847_v44 = vmul.f32 %v12831_v54, %v9228_v50  ;;  %v9230_v49 = vpop.f32.mrb[107].mxu0  ;;  %v23650_v11 = vpop.permute.xlu1 %12823  ;;  %v26540_v50 = vld [vmem:[#allocation123_spill] sm:$0xff] }
 0x66d   : > { %v13023_v3 = vmul.f32 %v13007_v30, %v9230_v49 }
 0x66e   : > { %10540 = vmatmul.mubr.f32.gmra.mrb[148].mxu1 %v25415_v19  ;;  %v12863_v41 = vadd.f32 %v12847_v44, %v26537_v32  ;;  %v13008_v19 = vsel %vm10583_vm1, %v26539_v55, %v23534_v25  ;;  %v26542_v44 = vld [vmem:[#allocation104_spill] sm:$0xff]  ;;  %v26543_v25 = vld [vmem:[#allocation195_spill] sm:$0xff] }
 0x66f   : > { %10545 = vmatprep.mubr.f32.mxu1 %v24876_v34  ;;  %v9235_v43 = vpop.f32.mrb[108].mxu0  ;;  %v12833_v49 = vsel %vm10583_vm1, %v26542_v44, %v26541_v6  ;;  %v13009_v32 = vsel %vm10583_vm1, %v12904_v59, %v26543_v25  ;;  %v26546_v55 = vld [vmem:[#allocation176_spill] sm:$0xff]  ;;  %v26548_v6 = vld [vmem:[#allocation14_spill] sm:$0xff] }
 0x670   : > { %v23644_v62 = vadd.f32 %v13023_v3, %v12863_v41  ;;  %v12848_v33 = vmul.f32 %v12832_v22, %v9235_v43  ;;  %v9237_v48 = vpop.f32.mrb[109].mxu0  ;;  %v12908_v41 = vpop.permute.xlu0 %12907  ;;  %v26544_v43 = vld [vmem:[#allocation137_spill] sm:$0xff]  ;;  %v26545_v22 = vld [vmem:[#allocation72_spill] sm:$0xff] }
 0x671   : > { %v13024_v4 = vmul.f32 %v13008_v19, %v9237_v48  ;;  %v26547_v19 = vld [vmem:[#allocation87_spill] sm:$0xff] }
 0x672   : > { %10547 = vmatmul.mubr.f32.gmra.mrb[150].mxu1 %v25417_v18  ;;  %v12864_v15 = vadd.f32 %v12848_v33, %v26540_v50  ;;  %v13010_v33 = vsel %vm10583_vm1, %v12908_v41, %v26545_v22  ;;  %v23674_v50 = vpop.permute.xlu1 %13167  ;;  %v26552_v22 = vld [vmem:[#allocation97_spill] sm:$0xff] }
 0x673   : > { %10552 = vmatprep.mubr.f32.mxu1 %v24876_v34  ;;  %v9242_v54 = vpop.f32.mrb[110].mxu0 }
 0x674   : > { %v23659_v39 = vadd.f32 %v13024_v4, %v12864_v15  ;;  %v12849_v30 = vmul.f32 %v12833_v49, %v9242_v54  ;;  %v9244_v3 = vpop.f32.mrb[111].mxu0  ;;  %v12834_v4 = vsel %vm10583_vm1, %v26547_v19, %v26546_v55  ;;  %v26549_v49 = vld [vmem:[#allocation113_spill] sm:$0xff]  ;;  %v26553_v19 = vld [vmem:[#allocation48_spill] sm:$0xff] }
 0x675   : > { %v13025_v18 = vmul.f32 %v13009_v32, %v9244_v3  ;;  %v26551_v32 = vld [vmem:[#allocation42_spill] sm:$0xff] }
 0x676   : > { %10554 = vmatmul.mubr.f32.gmra.mrb[152].mxu1 %v25674_v58  ;;  %v12865_v0 = vadd.f32 %v12849_v30, %v26544_v43  ;;  %v26550_v30 = vld [vmem:[#allocation78_spill] sm:$0xff]  ;;  %v12835_v41 = vsel %vm10583_vm1, %v26551_v32, %v23430_v57 }
 0x677   : > { %10559 = vmatprep.mubr.f32.mxu1 %v24876_v34  ;;  %v9249_v48 = vpop.f32.mrb[112].mxu0  ;;  %v13011_v3 = vsel %vm10583_vm1, %v26550_v30, %v26549_v49  ;;  %v26555_v49 = vld [vmem:[#allocation119_spill] sm:$0xff] }
 0x678   : > { %v23676_v59 = vadd.f32 %v13025_v18, %v12865_v0  ;;  %v12850_v15 = vmul.f32 %v12834_v4, %v9249_v48  ;;  %v9251_v58 = vpop.f32.mrb[113].mxu0  ;;  %v12932_v48 = vpop.permute.xlu1 %12931  ;;  %v26554_v4 = vld [vmem:[#allocation186_spill] sm:$0xff] }
 0x679   : > { %v13026_v54 = vmul.f32 %v13010_v33, %v9251_v58  ;;  %v12836_v33 = vsel %vm10583_vm1, %v26552_v22, %v23446_v42  ;;  %v13012_v57 = vsel %vm10583_vm1, %v26554_v4, %v26553_v19  ;;  %v26556_v42 = vld [vmem:[#allocation189_spill] sm:$0xff]  ;;  %v26558_v4 = vld [vmem:[#allocation134_spill] sm:$0xff] }
 0x67a   : > { %10561 = vmatmul.mubr.f32.gmra.mrb[154].mxu1 %v25929_v52  ;;  %v12866_v44 = vadd.f32 %v12850_v15, %v26548_v6 }
 0x67b   : > { %10566 = vmatprep.mubr.f32.mxu1 %v24876_v34  ;;  %v9256_v25 = vpop.f32.mrb[114].mxu0 }
 0x67c   : > { %v23689_v18 = vadd.f32 %v13026_v54, %v12866_v44  ;;  %v12851_v43 = vmul.f32 %v12835_v41, %v9256_v25  ;;  %v9258_v0 = vpop.f32.mrb[115].mxu0 }
 0x67d   : > { %v13027_v52 = vmul.f32 %v13011_v3, %v9258_v0  ;;  %v23714_v3 = vpop.permute.xlu1 %13275 }
 0x67e   : > { %10568 = vmatmul.mubr.f32.gmra.mrb[156].mxu1 %v25934_v16  ;;  %v12867_v55 = vadd.f32 %v12851_v43, %v23351_v8  ;;  %v12837_v16 = vsel %vm10583_vm1, %v23483_v29, %v26555_v49  ;;  %v12924_v43 = vpop.permute.xlu0 %12923 }
 0x67f   : > { %10573 = vmatprep.mubr.f32.mxu1 %v24876_v34  ;;  %v9263_v15 = vpop.f32.mrb[116].mxu0  ;;  %v13013_v34 = vsel %vm10583_vm1, %v26556_v42, %v23539_v21  ;;  %v13014_v29 = vsel %vm10583_vm1, %v12924_v43, %v23381_v2  ;;  %v13015_v2 = vsel %vm10583_vm1, %v23547_v24, %v23544_v10 }
 0x680   : > { %v23702_v58 = vadd.f32 %v13027_v52, %v12867_v55  ;;  %v12852_v54 = vmul.f32 %v12836_v33, %v9263_v15  ;;  %v9265_v6 = vpop.f32.mrb[117].mxu0  ;;  %v26557_v52 = vld [vmem:[#allocation145_spill] sm:$0xff] }
 0x681   : > { %v13028_v44 = vmul.f32 %v13012_v57, %v9265_v6  ;;  %v26559_v57 = vld [vmem:[#allocation86_spill] sm:$0xff] }
 0x682   : > { %10575 = vmatmul.mubr.f32.gmra.mrb[158].mxu1 %v25813_v23  ;;  %v12868_v8 = vadd.f32 %v12852_v54, %v23374_v38  ;;  %v12838_v23 = vsel %vm10583_vm1, %v23490_v60, %v26557_v52  ;;  %v12839_v15 = vsel %vm10583_vm1, %v26559_v57, %v26558_v4  ;;  %v23732_v54 = vpop.permute.xlu1 %13339 }
 0x683   : > { %v9270_v30 = vpop.f32.mrb[118].mxu0 }
 0x684   : > { %v23716_v25 = vadd.f32 %v13028_v44, %v12868_v8  ;;  %v12853_v32 = vmul.f32 %v12837_v16, %v9270_v30  ;;  %v9272_v41 = vpop.f32.mrb[119].mxu0  ;;  %v12840_v8 = vsel %vm10583_vm1, %v23496_v26, %v23587_v56 }
 0x685   : > { %v13029_v0 = vmul.f32 %v13013_v34, %v9272_v41  ;;  %v12936_v41 = vpop.permute.xlu0 %12935 }
 0x686   : > { %v12869_v38 = vadd.f32 %v12853_v32, %v23393_v17  ;;  %v13000_v30 = vpop.permute.xlu1 %12999 }
 0x687   : > { %v9277_v21 = vpop.f32.mrb[120].mxu0 }
 0x688   : > { %v23726_v22 = vadd.f32 %v13029_v0, %v12869_v38  ;;  %v12854_v33 = vmul.f32 %v12838_v23, %v9277_v21  ;;  %v9279_v55 = vpop.f32.mrb[121].mxu0  ;;  %v12841_v0 = vsel %vm10583_vm1, %v23629_v37, %v23650_v11  ;;  %v23766_v21 = vld [vmem:[%s24522_s3] sm:$0xff] }
 0x689   : > { %v13030_v19 = vmul.f32 %v13014_v29, %v9279_v55  ;;  %v13586_v37 = vand.u32 4294901760, %v23766_v21  ;;  %v23786_v55 = vld [vmem:[%s24522_s3 + $0x10] sm:$0xff] }
 0x68a   : > { %v12870_v60 = vadd.f32 %v12854_v33, %v23411_v53  ;;  %v13016_v53 = vsel %vm10583_vm1, %v12932_v48, %v23551_v61  ;;  %v13052_v33 = vpop.permute.xlu0 %13051  ;;  %v13592_v4 = vand.u32 4294901760, %v23786_v55 }
 0x68b   : > { %v9284_v17 = vpop.f32.mrb[122].mxu0 }
 0x68c   : > { %v23739_v6 = vadd.f32 %v13030_v19, %v12870_v60  ;;  %v12855_v44 = vmul.f32 %v12839_v15, %v9284_v17  ;;  %v9286_v49 = vpop.f32.mrb[123].mxu0  ;;  %v23791_v19 = vld [vmem:[%s24522_s3 + $0x18] sm:$0xff] }
 0x68d   : > { %v13031_v16 = vmul.f32 %v13015_v2, %v9286_v49  ;;  %v13595_v57 = vand.u32 4294901760, %v23791_v19  ;;  %v26560_v60 = vld [vmem:[#allocation173_spill] sm:$0xff]  ;;  %v26561_v49 = vld [vmem:[#allocation202_spill] sm:$0xff] }
 0x68e   : > { %v12871_v42 = vadd.f32 %v12855_v44, %v23427_v27  ;;  %v13017_v27 = vsel %vm10583_vm1, %v12936_v41, %v13000_v30  ;;  %v13178_v2 = vsel %vm10583_vm1, %v13052_v33, %v26560_v60  ;;  %v23816_v30 = vld [vmem:[%s24522_s3 + $0x28] sm:$0xff]  ;;  %v23847_v60 = vld [vmem:[%s24522_s3 + $0x38] sm:$0xff] }
 0x68f   : > { %v9291_v34 = vpop.f32.mrb[124].mxu0  ;;  %v13601_v41 = vand.u32 4294901760, %v23816_v30 }
 0x690   : > { %v23749_v10 = vadd.f32 %v13031_v16, %v12871_v42  ;;  %v12856_v24 = vmul.f32 %v12840_v8, %v9291_v34  ;;  %v9293_v32 = vpop.f32.mrb[125].mxu0  ;;  %v26562_v16 = vld [vmem:[#allocation111_spill] sm:$0xff]  ;;  %v23806_v42 = vpack.c.bf16 %v13595_v57, %v13592_v4  ;;  %v23811_v34 = vld [vmem:[%s24522_s3 + $0x20] sm:$0xff] }
 0x691   : > { %v13032_v43 = vmul.f32 %v13016_v53, %v9293_v32  ;;  %v13354_v8 = vsel %vm10583_vm1, %v26562_v16, %v26561_v49  ;;  %v13598_v32 = vand.u32 4294901760, %v23811_v34  ;;  %v26566_v49 = vld [vmem:[#allocation164_spill] sm:$0xff]  ;;  %v26567_v16 = vld [vmem:[#allocation163_spill] sm:$0xff] }
 0x692   : > { %v12872_v26 = vadd.f32 %v12856_v24, %v23438_v31  ;;  %v23771_v31 = vld [vmem:[%s24522_s3 + $0x8] sm:$0xff] }
 0x693   : > { %v9298_v56 = vpop.f32.mrb[126].mxu0  ;;  %v13589_v11 = vand.u32 4294901760, %v23771_v31 }
 0x694   : > { %v23758_v61 = vadd.f32 %v13032_v43, %v12872_v26  ;;  %v12857_v48 = vmul.f32 %v12841_v0, %v9298_v56  ;;  %v9300_v52 = vpop.f32.mrb[127].mxu0  ;;  %v26563_v0 = vld [vmem:[#allocation120_spill] sm:$0xff]  ;;  %v26564_v26 = vld [vmem:[#allocation205_spill] sm:$0xff] }
 0x695   : > { %v13033_v23 = vmul.f32 %v13017_v27, %v9300_v52  ;;  %v13179_v27 = vsel %vm10583_vm1, %v26564_v26, %v26563_v0 }
 0x696   : > { %v12873_v38 = vadd.f32 %v12857_v48, %v23448_v35  ;;  %v23779_v35 = vpack.c.bf16 %v13589_v11, %v13586_v37 }
 0x698   : > { %v23761_v29 = vadd.f32 %v13033_v23, %v12873_v38  ;;  %15621 = vmatprep.subr.bf16.mxu0 %v23779_v35  ;;  %v26565_v23 = vld [vmem:[#allocation171_spill] sm:$0xff]  ;;  %v23837_v38 = vpack.c.bf16 %v13601_v41, %v13598_v32 }
 0x699   : > { %15623 = vmatpush3.bf16.msra.mxu0 %v23779_v35 }
 0x69a   : > { %15625 = vmatprep.subr.bf16.mxu0 %v23806_v42 }
 0x69d   : > { %15627 = vmatpush3.bf16.msra.mxu0 %v23806_v42 }
 0x69e   : > { %15629 = vmatprep.subr.bf16.mxu0 %v23837_v38 }
 0x6a1   : > { %15631 = vmatpush3.bf16.msra.mxu0 %v23837_v38 }
 0x719   : > { %v10471_v15 = vpop.f32.mrb[128].mxu1 }
 0x71a   : > { %v13194_v17 = vmul.f32 %v13178_v2, %v10471_v15  ;;  %v10473_v44 = vpop.f32.mrb[129].mxu1  ;;  %v23842_v15 = vld [vmem:[%s24522_s3 + $0x30] sm:$0xff] }
 0x71b   : > { %v13370_v53 = vmul.f32 %v13354_v8, %v10473_v44  ;;  %v13180_v8 = vsel %vm10583_vm1, %v26567_v16, %v26566_v49  ;;  %v26571_v49 = vld [vmem:[#allocation118_spill] sm:$0xff]  ;;  %v13072_v16 = vpop.permute.xlu0 %13071 }
 0x71c   : > { %v13210_v24 = vadd.f32 %v13194_v17, %v23575_v5  ;;  %v13355_v5 = vsel %vm10583_vm1, %v23453_v13, %v26565_v23  ;;  %v13604_v13 = vand.u32 4294901760, %v23842_v15  ;;  %v24824_v17 = vand.u32 4294901760, %v23847_v60  ;;  %v26569_v23 = vld [vmem:[#allocation110_spill] sm:$0xff] }
 0x71d   : > { %v10478_v43 = vpop.f32.mrb[130].mxu1 }
 0x71e   : > { %v23827_v56 = vadd.f32 %v13370_v53, %v13210_v24  ;;  %v13195_v48 = vmul.f32 %v13179_v27, %v10478_v43  ;;  %v10480_v52 = vpop.f32.mrb[131].mxu1  ;;  %v26568_v43 = vld [vmem:[#allocation200_spill] sm:$0xff]  ;;  %v23870_v26 = vpack.c.bf16 %v24824_v17, %v13604_v13  ;;  %v26586_v17 = vld [vmem:[#allocation197_spill] sm:$0xff] }
 0x71f   : > { %v13371_v33 = vmul.f32 %v13355_v5, %v10480_v52  ;;  %v13356_v0 = vsel %vm10583_vm1, %v23458_v51, %v26568_v43  ;;  %v13181_v51 = vsel %vm10583_vm1, %v26569_v23, %v23501_v14  ;;  %v26572_v14 = vld [vmem:[#allocation140_spill] sm:$0xff]  ;;  %v26574_v23 = vld [vmem:[#allocation175_spill] sm:$0xff] }
 0x720   : > { %v13211_v2 = vadd.f32 %v13195_v48, %v23589_v40  ;;  %13418 = vrot.lane.b32.xlu0 %v23827_v56, %s17409_s17  ;;  %15633 = vmatprep.subr.bf16.mxu0 %v23870_v26  ;;  %v13182_v43 = vsel %vm10583_vm1, %v26572_v14, %v23506_v20  ;;  %v26577_v14 = vld [vmem:[#allocation57_spill] sm:$0xff] }
 0x721   : > { %v10485_v44 = vpop.f32.mrb[132].mxu1  ;;  %15635 = vmatpush3.bf16.msra.mxu0 %v23870_v26 }
 0x722   : > { %v23860_v53 = vadd.f32 %v13371_v33, %v13211_v2  ;;  %v13196_v40 = vmul.f32 %v13180_v8, %v10485_v44  ;;  %v10487_v24 = vpop.f32.mrb[133].mxu1  ;;  %v26570_v44 = vld [vmem:[#allocation71_spill] sm:$0xff] }
 0x723   : > { %v13372_v27 = vmul.f32 %v13356_v0, %v10487_v24 }
 0x724   : > { %v13212_v48 = vadd.f32 %v13196_v40, %v23601_v63  ;;  %13420 = vrot.lane.b32.xlu1 %v23860_v53, %s17409_s17  ;;  %v13357_v63 = vsel %vm10583_vm1, %v26571_v49, %v26570_v44  ;;  %v26575_v49 = vld [vmem:[#allocation196_spill] sm:$0xff] }
 0x725   : > { %v10492_v52 = vpop.f32.mrb[134].mxu1  ;;  %v13183_v20 = vsel %vm10583_vm1, %v13072_v16, %v26575_v49  ;;  %v26578_v16 = vld [vmem:[#allocation132_spill] sm:$0xff]  ;;  %v26579_v49 = vld [vmem:[#allocation155_spill] sm:$0xff] }
 0x726   : > { %v23881_v5 = vadd.f32 %v13372_v27, %v13212_v48  ;;  %v13197_v33 = vmul.f32 %v13181_v51, %v10492_v52  ;;  %v10494_v2 = vpop.f32.mrb[135].mxu1  ;;  %v26573_v52 = vld [vmem:[#allocation101_spill] sm:$0xff] }
 0x727   : > { %v13373_v8 = vmul.f32 %v13357_v63, %v10494_v2  ;;  %v13358_v51 = vsel %vm10583_vm1, %v26574_v23, %v26573_v52  ;;  %v13076_v2 = vpop.permute.xlu0 %13075 }
 0x728   : > { %v13213_v40 = vadd.f32 %v13197_v33, %v23616_v46  ;;  %13422 = vrot.lane.b32.xlu0 %v23881_v5, %s17409_s17 }
 0x729   : > { %v10499_v24 = vpop.f32.mrb[136].mxu1 }
 0x72a   : > { %v23894_v0 = vadd.f32 %v13373_v8, %v13213_v40  ;;  %v13198_v27 = vmul.f32 %v13182_v43, %v10499_v24  ;;  %v10501_v48 = vpop.f32.mrb[137].mxu1  ;;  %v26576_v24 = vld [vmem:[#allocation18_spill] sm:$0xff] }
 0x72b   : > { %v13374_v46 = vmul.f32 %v13358_v51, %v10501_v48  ;;  %v13359_v43 = vsel %vm10583_vm1, %v26577_v14, %v26576_v24  ;;  %v13096_v48 = vpop.permute.xlu0 %13095  ;;  %v13184_v51 = vsel %vm10583_vm1, %v13076_v2, %v26578_v16  ;;  %v26582_v2 = vld [vmem:[#allocation165_spill] sm:$0xff] }
 0x72c   : > { %v13214_v33 = vadd.f32 %v13198_v27, %v23631_v47  ;;  %13424 = vrot.lane.b32.xlu1 %v23894_v0, %s17409_s17  ;;  %v23912_v47 = vpop.permute.xlu1 %13279 }
 0x72d   : > { %v10506_v44 = vpop.f32.mrb[138].mxu1 }
 0x72e   : > { %v23906_v63 = vadd.f32 %v13374_v46, %v13214_v33  ;;  %v13199_v8 = vmul.f32 %v13183_v20, %v10506_v44  ;;  %v10508_v40 = vpop.f32.mrb[139].mxu1  ;;  %v26580_v20 = vld [vmem:[#allocation208_spill] sm:$0xff] }
 0x72f   : > { %v13375_v52 = vmul.f32 %v13359_v43, %v10508_v40  ;;  %v13360_v40 = vsel %vm10583_vm1, %v26580_v20, %v26579_v49  ;;  %v23926_v24 = vpop.permute.xlu0 %13103  ;;  %v26581_v43 = vld [vmem:[#allocation131_spill] sm:$0xff]  ;;  %v26583_v49 = vld [vmem:[#allocation178_spill] sm:$0xff] }
 0x730   : > { %v13215_v27 = vadd.f32 %v13199_v8, %v23644_v62  ;;  %13426 = vrot.lane.b32.xlu0 %v23906_v63, %s17409_s17 }
 0x731   : > { %v10513_v23 = vpop.f32.mrb[140].mxu1 }
 0x732   : > { %v23920_v46 = vadd.f32 %v13375_v52, %v13215_v27  ;;  %v13200_v33 = vmul.f32 %v13184_v51, %v10513_v23  ;;  %v10515_v44 = vpop.f32.mrb[141].mxu1  ;;  %v13185_v52 = vsel %vm10583_vm1, %v26582_v2, %v26581_v43  ;;  %v23935_v27 = vpop.permute.xlu1 %13107  ;;  %v26584_v43 = vld [vmem:[#allocation89_spill] sm:$0xff] }
 0x733   : > { %v13376_v62 = vmul.f32 %v13360_v40, %v10515_v44  ;;  %v23946_v20 = vpop.permute.xlu0 %13111  ;;  %v26585_v2 = vld [vmem:[#allocation109_spill] sm:$0xff] }
 0x734   : > { %v13216_v8 = vadd.f32 %v13200_v33, %v23659_v39  ;;  %13428 = vrot.lane.b32.xlu1 %v23920_v46, %s17409_s17  ;;  %v13361_v39 = vsel %vm10583_vm1, %v23463_v45, %v26583_v49  ;;  %v13362_v45 = vsel %vm10583_vm1, %v23468_v9, %v26586_v17  ;;  %v26589_v9 = vld [vmem:[#allocation141_spill] sm:$0xff] }
 0x735   : > { %v10520_v14 = vpop.f32.mrb[142].mxu1 }
 0x736   : > { %v23937_v23 = vadd.f32 %v13376_v62, %v13216_v8  ;;  %v13201_v16 = vmul.f32 %v13185_v52, %v10520_v14  ;;  %v10522_v51 = vpop.f32.mrb[143].mxu1  ;;  %v13186_v62 = vsel %vm10583_vm1, %v26585_v2, %v26584_v43  ;;  %v26588_v2 = vld [vmem:[#allocation98_spill] sm:$0xff] }
 0x737   : > { %v13377_v33 = vmul.f32 %v13361_v39, %v10522_v51  ;;  %v26587_v39 = vld [vmem:[#allocation39_spill] sm:$0xff]  ;;  %v13363_v17 = vsel %vm10583_vm1, %v26589_v9, %v26588_v2  ;;  %v26591_v2 = vld [vmem:[#allocation166_spill] sm:$0xff] }
 0x738   : > { %v13217_v44 = vadd.f32 %v13201_v16, %v23676_v59  ;;  %13430 = vrot.lane.b32.xlu0 %v23937_v23, %s17409_s17  ;;  %v23958_v16 = vpop.permute.xlu1 %13171 }
 0x739   : > { %v10527_v40 = vpop.f32.mrb[144].mxu1 }
 0x73a   : > { %v23952_v8 = vadd.f32 %v13377_v33, %v13217_v44  ;;  %v13202_v14 = vmul.f32 %v13186_v62, %v10527_v40  ;;  %v10529_v52 = vpop.f32.mrb[145].mxu1  ;;  %v13187_v33 = vsel %vm10583_vm1, %v26587_v39, %v23511_v7  ;;  %v13332_v62 = vpop.permute.xlu0 %13331 }
 0x73b   : > { %v13378_v59 = vmul.f32 %v13362_v45, %v10529_v52  ;;  %v26590_v45 = vld [vmem:[#allocation190_spill] sm:$0xff] }
 0x73c   : > { %v13218_v51 = vadd.f32 %v13202_v14, %v23689_v18  ;;  %13432 = vrot.lane.b32.xlu1 %v23952_v8, %s17409_s17  ;;  %v13188_v7 = vsel %vm10583_vm1, %v26590_v45, %v23516_v28  ;;  %v13189_v28 = vsel %vm10583_vm1, %v13096_v48, %v26591_v2  ;;  %v26593_v45 = vld [vmem:[#allocation80_spill] sm:$0xff]  ;;  %v24020_v2 = vsub.f32 %v23771_v31, %v13589_v11 }
 0x73d   : > { %v10534_v49 = vpop.f32.mrb[146].mxu1 }
 0x73e   : > { %v23967_v44 = vadd.f32 %v13378_v59, %v13218_v51  ;;  %v13203_v40 = vmul.f32 %v13187_v33, %v10534_v49  ;;  %v10536_v43 = vpop.f32.mrb[147].mxu1  ;;  %v23980_v59 = vpop.permute.xlu1 %13175  ;;  %v13364_v33 = vsel %vm10583_vm1, %v23405_v12, %v13332_v62 }
 0x73f   : > { %v13379_v18 = vmul.f32 %v13363_v17, %v10536_v43 }
 0x740   : > { %v13219_v14 = vadd.f32 %v13203_v40, %v23702_v58  ;;  %13434 = vrot.lane.b32.xlu0 %v23967_v44, %s17409_s17 }
 0x741   : > { %v10541_v52 = vpop.f32.mrb[148].mxu1 }
 0x742   : > { %v23982_v51 = vadd.f32 %v13379_v18, %v13219_v14  ;;  %v13204_v49 = vmul.f32 %v13188_v7, %v10541_v52  ;;  %v10543_v39 = vpop.f32.mrb[149].mxu1  ;;  %v13284_v17 = vpop.permute.xlu1 %13283  ;;  %v26592_v52 = vld [vmem:[#allocation182_spill] sm:$0xff] }
 0x743   : > { %v13380_v58 = vmul.f32 %v13364_v33, %v10543_v39  ;;  %v13365_v12 = vsel %vm10583_vm1, %v26593_v45, %v26592_v52  ;;  %v13366_v39 = vsel %vm10583_vm1, %v23714_v3, %v23732_v54  ;;  %v13344_v33 = vpop.permute.xlu0 %13343  ;;  %v13828_v54 = vand.u32 4294901760, %v24020_v2 }
 0x744   : > { %v13220_v40 = vadd.f32 %v13204_v49, %v23716_v25  ;;  %13436 = vrot.lane.b32.xlu1 %v23982_v51, %s17409_s17  ;;  %v26594_v49 = vld [vmem:[#allocation21_spill] sm:$0xff]  ;;  %v13367_v31 = vsel %vm10583_vm1, %v23912_v47, %v13344_v33  ;;  %v24050_v47 = vsub.f32 %v23791_v19, %v13595_v57 }
 0x745   : > { %v10548_v43 = vpop.f32.mrb[150].mxu1  ;;  %v13190_v48 = vsel %vm10583_vm1, %v23607_v1, %v26594_v49 }
 0x746   : > { %v23993_v9 = vadd.f32 %v13380_v58, %v13220_v40  ;;  %v13205_v18 = vmul.f32 %v13189_v28, %v10548_v43  ;;  %v10550_v14 = vpop.f32.mrb[151].mxu1  ;;  %v13288_v28 = vpop.permute.xlu1 %13287  ;;  %v13842_v19 = vand.u32 4294901760, %v24050_v47 }
 0x747   : > { %v13381_v62 = vmul.f32 %v13365_v12, %v10550_v14  ;;  %v13829_v12 = vsub.f32 %v24020_v2, %v13828_v54 }
 0x748   : > { %v13221_v25 = vadd.f32 %v13205_v18, %v23726_v22  ;;  %13438 = vrot.lane.b32.xlu0 %v23993_v9, %s17409_s17  ;;  %v24015_v22 = vsub.f32 %v23766_v21, %v13586_v37  ;;  %v13191_v21 = vsel %vm10583_vm1, %v23926_v24, %v23674_v50  ;;  %v24045_v50 = vsub.f32 %v23786_v55, %v13592_v4 }
 0x749   : > { %v10555_v7 = vpop.f32.mrb[152].mxu1 }
 0x74a   : > { %v24010_v58 = vadd.f32 %v13381_v62, %v13221_v25  ;;  %v13206_v40 = vmul.f32 %v13190_v48, %v10555_v7  ;;  %v10557_v43 = vpop.f32.mrb[153].mxu1  ;;  %v13821_v3 = vand.u32 4294901760, %v24015_v22  ;;  %v13830_v7 = vand.u32 4294901760, %v13829_v12  ;;  %v13352_v57 = vpop.permute.xlu1 %13351 }
 0x74b   : > { %v13382_v1 = vmul.f32 %v13366_v39, %v10557_v43  ;;  %v13192_v48 = vsel %vm10583_vm1, %v23935_v27, %v23958_v16  ;;  %v13835_v4 = vand.u32 4294901760, %v24045_v50  ;;  %v24070_v43 = vsub.f32 %v23811_v34, %v13598_v32 }
 0x74c   : > { %v13222_v18 = vadd.f32 %v13206_v40, %v23739_v6  ;;  %13440 = vrot.lane.b32.xlu1 %v24010_v58, %s17409_s17  ;;  %v13348_v6 = vpop.permute.xlu0 %13347  ;;  %v13822_v45 = vsub.f32 %v24015_v22, %v13821_v3  ;;  %v13193_v34 = vsel %vm10583_vm1, %v23946_v20, %v23980_v59  ;;  %v24103_v59 = vsub.f32 %v23842_v15, %v13604_v13 }
 0x74d   : > { %v10562_v14 = vpop.f32.mrb[154].mxu1  ;;  %v13368_v55 = vsel %vm10583_vm1, %v13284_v17, %v13348_v6  ;;  %v13836_v16 = vsub.f32 %v24045_v50, %v13835_v4  ;;  %v13843_v17 = vsub.f32 %v24050_v47, %v13842_v19  ;;  %v24834_v32 = vand.u32 4294901760, %v24070_v43 }
 0x74e   : > { %v24034_v37 = vadd.f32 %v13382_v1, %v13222_v18  ;;  %v13207_v11 = vmul.f32 %v13191_v21, %v10562_v14  ;;  %v10564_v52 = vpop.f32.mrb[155].mxu1  ;;  %v13823_v25 = vand.u32 4294901760, %v13822_v45  ;;  %v24081_v1 = vsub.f32 %v23816_v30, %v13601_v41 }
 0x74f   : > { %v13383_v62 = vmul.f32 %v13367_v31, %v10564_v52  ;;  %v13369_v21 = vsel %vm10583_vm1, %v13288_v28, %v13352_v57  ;;  %v13837_v30 = vand.u32 4294901760, %v13836_v16  ;;  %v13844_v41 = vand.u32 4294901760, %v13843_v17  ;;  %v24153_v17 = vld [vmem:[%s24521_s2] ss:$0 sm:$0xff] }
 0x750   : > { %v13223_v24 = vadd.f32 %v13207_v11, %v23749_v10  ;;  %13442 = vrot.lane.b32.xlu0 %v24034_v37, %s17409_s17  ;;  %v24065_v40 = vpack.c.bf16 %v13830_v7, %v13823_v25  ;;  %v13850_v20 = vsub.f32 %v24070_v43, %v24834_v32  ;;  %v26595_v45 = vand.u32 4294901760, %v23847_v60 }
 0x751   : > { %v10569_v49 = vpop.f32.mrb[156].mxu1  ;;  %v24105_v36 = vpack.c.bf16 %v13844_v41, %v13837_v30  ;;  %v24827_v15 = vand.u32 4294901760, %v24103_v59 }
 0x752   : > { %v24063_v10 = vadd.f32 %v13383_v62, %v13223_v24  ;;  %v13208_v39 = vmul.f32 %v13192_v48, %v10569_v49  ;;  %v10571_v33 = vpop.f32.mrb[157].mxu1  ;;  %15637 = vmatprep.subr.bf16.mxu0 %v24065_v40  ;;  %v24113_v12 = vsub.f32 %v23847_v60, %v26595_v45  ;;  %v13851_v24 = vand.u32 4294901760, %v13850_v20 }
 0x753   : > { %v13384_v27 = vmul.f32 %v13368_v55, %v10571_v33  ;;  %v13864_v49 = vsub.f32 %v24103_v59, %v24827_v15  ;;  %v24140_v33 = vpack.c.bf16 %v24050_v47, %v24045_v50  ;;  %v26602_v47 = vand.u32 4294901760, %v24103_v59 }
 0x754   : > { %v13224_v18 = vadd.f32 %v13208_v39, %v23758_v61  ;;  %13444 = vrot.lane.b32.xlu1 %v24063_v10, %s17409_s17  ;;  %v24832_v61 = vand.u32 4294901760, %v24081_v1  ;;  %v24825_v25 = vand.u32 4294901760, %v24113_v12  ;;  %v24136_v39 = vpack.c.bf16 %v24020_v2, %v24015_v22 }
 0x755   : > { %v10576_v14 = vpop.f32.mrb[158].mxu1  ;;  %v13865_v60 = vand.u32 4294901760, %v13864_v49  ;;  %v24148_v16 = vpack.c.bf16 %v24113_v12, %v24103_v59  ;;  %v15688_v22 = vpack.c.bf16 %v13842_v19, %v13835_v4  ;;  %v26603_v4 = vand.u32 4294901760, %v24113_v12 }
 0x756   : > { %v24095_v31 = vadd.f32 %v13384_v27, %v13224_v18  ;;  %v13209_v6 = vmul.f32 %v13193_v34, %v10576_v14  ;;  %v10578_v11 = vpop.f32.mrb[159].mxu1  ;;  %v13857_v28 = vsub.f32 %v24081_v1, %v24832_v61  ;;  %v24144_v27 = vpack.c.bf16 %v24081_v1, %v24070_v43 }
 0x757   : > { %v13385_v52 = vmul.f32 %v13369_v21, %v10578_v11  ;;  %v15696_v19 = vpack.c.bf16 %v26603_v4, %v26602_v47 }
 0x758   : > { %v13225_v62 = vadd.f32 %v13209_v6, %v23761_v29  ;;  %13446 = vrot.lane.b32.xlu0 %v24095_v31, %s17409_s17  ;;  %v13858_v13 = vand.u32 4294901760, %v13857_v28  ;;  %v13871_v29 = vsub.f32 %v24113_v12, %v24825_v25 }
 0x75a   : > { %v24120_v7 = vadd.f32 %v13385_v52, %v13225_v62  ;;  %v24125_v48 = vpack.c.bf16 %v13858_v13, %v13851_v24  ;;  %v13872_v55 = vand.u32 4294901760, %v13871_v29 }
 0x75c   : > { %13448 = vrot.lane.b32.xlu1 %v24120_v7, %s17409_s17  ;;  %v24132_v57 = vpack.c.bf16 %v13872_v55, %v13865_v60 }
 0x792   : > { %v13419_v18 = vpop.permute.xlu0 %13418 }
 0x793   : > { %v13466_v34 = vadd.f32 %v13419_v18, %v23827_v56 }
 0x795   : > { %v13489_v14 = vadd.f32 %v24153_v17, %v13466_v34 }
 0x796   : > { %v13421_v21 = vpop.permute.xlu1 %13420 }
 0x797   : > { %v13505_v30 = vmax.f32 %v13489_v14, 0.0  ;;  %v13467_v41 = vadd.f32 %v13421_v21, %v23860_v53 }
 0x799   : > { %v13538_v6 = vsel %vm13536_vm2, %v13505_v30, 0  ;;  %v13490_v11 = vadd.f32 %v24153_v17, %v13467_v41 }
 0x79a   : > { %v24160_v20 = vand.u32 4294901760, %v13538_v6  ;;  %v13423_v52 = vpop.permute.xlu0 %13422 }
 0x79b   : > { %v13506_v28 = vmax.f32 %v13490_v11, 0.0  ;;  %v13468_v45 = vadd.f32 %v13423_v52, %v23881_v5 }
 0x79c   : > { %v24164_v62 = vsub.f32 %v13538_v6, %v24160_v20 }
 0x79d   : > { %v13541_v56 = vsel %vm13536_vm2, %v13506_v28, 0  ;;  %v13491_v24 = vadd.f32 %v24153_v17, %v13468_v45 }
 0x79e   : > { %v24168_v13 = vand.u32 4294901760, %v13541_v56  ;;  %v13425_v53 = vpop.permute.xlu1 %13424  ;;  %v13660_v49 = vand.u32 4294901760, %v24164_v62 }
 0x79f   : > { %v13507_v29 = vmax.f32 %v13491_v24, 0.0  ;;  %v13469_v60 = vadd.f32 %v13425_v53, %v23894_v0 }
 0x7a0   : > { %v24173_v55 = vsub.f32 %v13541_v56, %v24168_v13  ;;  %v13661_v5 = vsub.f32 %v24164_v62, %v13660_v49 }
 0x7a1   : > { %v13544_v18 = vsel %vm13536_vm2, %v13507_v29, 0  ;;  %v13492_v34 = vadd.f32 %v24153_v17, %v13469_v60 }
 0x7a2   : > { %v24838_v14 = vand.u32 4294901760, %v24173_v55  ;;  %v24181_v21 = vand.u32 4294901760, %v13544_v18  ;;  %v13427_v30 = vpop.permute.xlu0 %13426  ;;  %v13662_v41 = vand.u32 4294901760, %v13661_v5  ;;  %v26596_v2 = vand.u32 4294901760, %v24173_v55 }
 0x7a3   : > { %v13508_v6 = vmax.f32 %v13492_v34, 0.0  ;;  %v13470_v0 = vadd.f32 %v13427_v30, %v23906_v63 }
 0x7a4   : > { %v13671_v11 = vsub.f32 %v24173_v55, %v24838_v14  ;;  %v24188_v52 = vsub.f32 %v13544_v18, %v24181_v21  ;;  %15012 = vmatprep.mubr.f32.mxu0 %v13662_v41 }
 0x7a5   : > { %v13547_v28 = vsel %vm13536_vm2, %v13508_v6, 0  ;;  %v13493_v45 = vadd.f32 %v24153_v17, %v13470_v0 }
 0x7a6   : > { %v13672_v56 = vand.u32 4294901760, %v13671_v11  ;;  %v24192_v24 = vand.u32 4294901760, %v13547_v28  ;;  %v13429_v53 = vpop.permute.xlu1 %13428  ;;  %v24836_v29 = vand.u32 4294901760, %v24188_v52 }
 0x7a7   : > { %v13509_v60 = vmax.f32 %v13493_v45, 0.0  ;;  %v13471_v63 = vadd.f32 %v13429_v53, %v23920_v46 }
 0x7a8   : > { %v24197_v5 = vsub.f32 %v13547_v28, %v24192_v24  ;;  %15013 = vmatmul.mubr.f32.vlgmr.msra.gmra.mrb[128].mxu0 %v13672_v56  ;;  %v13681_v18 = vsub.f32 %v24188_v52, %v24836_v29 }
 0x7a9   : > { %v13550_v34 = vsel %vm13536_vm2, %v13509_v60, 0  ;;  %v13494_v30 = vadd.f32 %v24153_v17, %v13471_v63  ;;  %15639 = vmatpush3.bf16.msra.mxu0 %v24065_v40 }
 0x7aa   : > { %v24205_v41 = vand.u32 4294901760, %v13550_v34  ;;  %v13431_v6 = vpop.permute.xlu0 %13430  ;;  %v13682_v0 = vand.u32 4294901760, %v13681_v18  ;;  %v24830_v46 = vand.u32 4294901760, %v24197_v5  ;;  %15641 = vmatprep.subr.bf16.mxu0 %v24105_v36 }
 0x7ab   : > { %v13510_v11 = vmax.f32 %v13494_v30, 0.0  ;;  %v13472_v28 = vadd.f32 %v13431_v6, %v23937_v23 }
 0x7ac   : > { %v24211_v45 = vsub.f32 %v13550_v34, %v24205_v41  ;;  %15015 = vmatprep.mubr.f32.mxu0 %v13682_v0  ;;  %v13691_v56 = vsub.f32 %v24197_v5, %v24830_v46 }
 0x7ad   : > { %v13553_v40 = vsel %vm13536_vm2, %v13510_v11, 0  ;;  %v13495_v53 = vadd.f32 %v24153_v17, %v13472_v28  ;;  %15643 = vmatpush3.bf16.msra.mxu0 %v24105_v36 }
 0x7ae   : > { %v24219_v60 = vand.u32 4294901760, %v13553_v40  ;;  %v13433_v63 = vpop.permute.xlu1 %13432  ;;  %v13692_v18 = vand.u32 4294901760, %v13691_v56  ;;  %v24828_v23 = vand.u32 4294901760, %v24211_v45  ;;  %15645 = vmatprep.subr.bf16.mxu0 %v24125_v48  ;;  %v26601_v50 = vand.u32 4294901760, %v24211_v45 }
 0x7af   : > { %v13511_v34 = vmax.f32 %v13495_v53, 0.0  ;;  %v13473_v30 = vadd.f32 %v13433_v63, %v23952_v8 }
 0x7b0   : > { %v24225_v6 = vsub.f32 %v13553_v40, %v24219_v60  ;;  %15016 = vmatmul.mubr.f32.gmra.mrb[130].mxu0 %v13692_v18  ;;  %v13701_v0 = vsub.f32 %v24211_v45, %v24828_v23 }
 0x7b1   : > { %v13556_v36 = vsel %vm13536_vm2, %v13511_v34, 0  ;;  %v13496_v11 = vadd.f32 %v24153_v17, %v13473_v30  ;;  %15647 = vmatpush3.bf16.msra.mxu0 %v24125_v48 }
 0x7b2   : > { %v24233_v28 = vand.u32 4294901760, %v13556_v36  ;;  %v13435_v56 = vpop.permute.xlu0 %13434  ;;  %v13702_v53 = vand.u32 4294901760, %v13701_v0  ;;  %v24826_v8 = vand.u32 4294901760, %v24225_v6  ;;  %15649 = vmatprep.subr.bf16.mxu0 %v24132_v57 }
 0x7b3   : > { %v13512_v40 = vmax.f32 %v13496_v11, 0.0  ;;  %v13474_v63 = vadd.f32 %v13435_v56, %v23967_v44 }
 0x7b4   : > { %v24239_v18 = vsub.f32 %v13556_v36, %v24233_v28  ;;  %15018 = vmatprep.mubr.f32.mxu0 %v13702_v53  ;;  %v13711_v34 = vsub.f32 %v24225_v6, %v24826_v8 }
 0x7b5   : > { %v13559_v48 = vsel %vm13536_vm2, %v13512_v40, 0  ;;  %v13497_v30 = vadd.f32 %v24153_v17, %v13474_v63  ;;  %15651 = vmatpush3.bf16.msra.mxu0 %v24132_v57 }
 0x7b6   : > { %v24247_v0 = vand.u32 4294901760, %v13559_v48  ;;  %v13437_v25 = vpop.permute.xlu1 %13436  ;;  %v13712_v11 = vand.u32 4294901760, %v13711_v34  ;;  %v24829_v44 = vand.u32 4294901760, %v24239_v18  ;;  %15653 = vmatprep.subr.bf16.mxu0 %v24136_v39 }
 0x7b7   : > { %v13513_v36 = vmax.f32 %v13497_v30, 0.0  ;;  %v13475_v56 = vadd.f32 %v13437_v25, %v23982_v51 }
 0x7b8   : > { %v24253_v53 = vsub.f32 %v13559_v48, %v24247_v0  ;;  %15019 = vmatmul.mubr.f32.gmra.mrb[132].mxu0 %v13712_v11  ;;  %v13721_v40 = vsub.f32 %v24239_v18, %v24829_v44 }
 0x7b9   : > { %v13562_v57 = vsel %vm13536_vm2, %v13513_v36, 0  ;;  %v13498_v63 = vadd.f32 %v24153_v17, %v13475_v56 }
 0x7ba   : > { %v24260_v34 = vand.u32 4294901760, %v13562_v57  ;;  %v13439_v8 = vpop.permute.xlu0 %13438  ;;  %v13722_v15 = vand.u32 4294901760, %v13721_v40  ;;  %v24831_v30 = vand.u32 4294901760, %v24253_v53 }
 0x7bb   : > { %v13514_v23 = vmax.f32 %v13498_v63, 0.0  ;;  %v13476_v51 = vadd.f32 %v13439_v8, %v23993_v9 }
 0x7bc   : > { %v24265_v25 = vsub.f32 %v13562_v57, %v24260_v34  ;;  %15021 = vmatprep.mubr.f32.mxu0 %v13722_v15  ;;  %v13731_v48 = vsub.f32 %v24253_v53, %v24831_v30 }
 0x7bd   : > { %v13565_v11 = vsel %vm13536_vm2, %v13514_v23, 0  ;;  %v13499_v36 = vadd.f32 %v24153_v17, %v13476_v51 }
 0x7be   : > { %v24272_v56 = vand.u32 4294901760, %v13565_v11  ;;  %v13441_v40 = vpop.permute.xlu1 %13440  ;;  %v13732_v44 = vand.u32 4294901760, %v13731_v48  ;;  %v24833_v63 = vand.u32 4294901760, %v24265_v25 }
 0x7bf   : > { %v13515_v46 = vmax.f32 %v13499_v36, 0.0  ;;  %v13477_v9 = vadd.f32 %v13441_v40, %v24010_v58 }
 0x7c0   : > { %v24277_v8 = vsub.f32 %v13565_v11, %v24272_v56  ;;  %15022 = vmatmul.mubr.f32.gmra.mrb[134].mxu0 %v13732_v44  ;;  %v13741_v15 = vsub.f32 %v24265_v25, %v24833_v63 }
 0x7c1   : > { %v13568_v23 = vsel %vm13536_vm2, %v13515_v46, 0  ;;  %v13500_v57 = vadd.f32 %v24153_v17, %v13477_v9 }
 0x7c2   : > { %v24284_v51 = vand.u32 4294901760, %v13568_v23  ;;  %v13443_v48 = vpop.permute.xlu0 %13442  ;;  %v13742_v30 = vand.u32 4294901760, %v13741_v15  ;;  %v24835_v36 = vand.u32 4294901760, %v24277_v8  ;;  %v26608_v59 = vand.u32 4294901760, %v24277_v8 }
 0x7c3   : > { %v13516_v61 = vmax.f32 %v13500_v57, 0.0  ;;  %v13478_v58 = vadd.f32 %v13443_v48, %v24034_v37 }
 0x7c4   : > { %v24289_v11 = vsub.f32 %v13568_v23, %v24284_v51  ;;  %15024 = vmatprep.mubr.f32.mxu0 %v13742_v30  ;;  %v13751_v44 = vsub.f32 %v24277_v8, %v24835_v36 }
 0x7c5   : > { %v13571_v46 = vsel %vm13536_vm2, %v13516_v61, 0  ;;  %v13501_v40 = vadd.f32 %v24153_v17, %v13478_v58 }
 0x7c6   : > { %v24296_v9 = vand.u32 4294901760, %v13571_v46  ;;  %v13445_v15 = vpop.permute.xlu1 %13444  ;;  %v13752_v63 = vand.u32 4294901760, %v13751_v44  ;;  %v24837_v57 = vand.u32 4294901760, %v24289_v11  ;;  %v26609_v12 = vand.u32 4294901760, %v24289_v11 }
 0x7c7   : > { %v13517_v32 = vmax.f32 %v13501_v40, 0.0  ;;  %v13479_v37 = vadd.f32 %v13445_v15, %v24063_v10 }
 0x7c8   : > { %v24301_v23 = vsub.f32 %v13571_v46, %v24296_v9  ;;  %15025 = vmatmul.mubr.f32.gmra.mrb[136].mxu0 %v13752_v63  ;;  %v13761_v30 = vsub.f32 %v24289_v11, %v24837_v57 }
 0x7c9   : > { %v13574_v61 = vsel %vm13536_vm2, %v13517_v32, 0  ;;  %v13502_v48 = vadd.f32 %v24153_v17, %v13479_v37 }
 0x7ca   : > { %v24308_v58 = vand.u32 4294901760, %v13574_v61  ;;  %v13447_v44 = vpop.permute.xlu0 %13446  ;;  %v13762_v36 = vand.u32 4294901760, %v13761_v30  ;;  %v24839_v40 = vand.u32 4294901760, %v24301_v23 }
 0x7cb   : > { %v13518_v29 = vmax.f32 %v13502_v48, 0.0  ;;  %v13480_v10 = vadd.f32 %v13447_v44, %v24095_v31 }
 0x7cc   : > { %v24313_v46 = vsub.f32 %v13574_v61, %v24308_v58  ;;  %15027 = vmatprep.mubr.f32.mxu0 %v13762_v36  ;;  %v13771_v63 = vsub.f32 %v24301_v23, %v24839_v40 }
 0x7cd   : > { %v13577_v32 = vsel %vm13536_vm2, %v13518_v29, 0  ;;  %v13503_v15 = vadd.f32 %v24153_v17, %v13480_v10 }
 0x7ce   : > { %v24320_v37 = vand.u32 4294901760, %v13577_v32  ;;  %v13449_v30 = vpop.permute.xlu1 %13448  ;;  %v13772_v57 = vand.u32 4294901760, %v13771_v63  ;;  %v13780_v48 = vand.u32 4294901760, %v24313_v46 }
 0x7cf   : > { %v13519_v14 = vmax.f32 %v13503_v15, 0.0  ;;  %v13481_v31 = vadd.f32 %v13449_v30, %v24120_v7 }
 0x7d0   : > { %v24325_v61 = vsub.f32 %v13577_v32, %v24320_v37  ;;  %15028 = vmatmul.mubr.f32.gmra.mrb[138].mxu0 %v13772_v57  ;;  %v13781_v36 = vsub.f32 %v24313_v46, %v13780_v48 }
 0x7d1   : > { %v13580_v29 = vsel %vm13536_vm2, %v13519_v14, 0  ;;  %v13504_v44 = vadd.f32 %v24153_v17, %v13481_v31 }
 0x7d2   : > { %v24332_v10 = vand.u32 4294901760, %v13580_v29  ;;  %v13782_v63 = vand.u32 4294901760, %v13781_v36  ;;  %v13790_v40 = vand.u32 4294901760, %v24325_v61 }
 0x7d3   : > { %v13520_v15 = vmax.f32 %v13504_v44, 0.0 }
 0x7d4   : > { %v24336_v7 = vsub.f32 %v13580_v29, %v24332_v10  ;;  %15030 = vmatprep.mubr.f32.mxu0 %v13782_v63  ;;  %v13791_v57 = vsub.f32 %v24325_v61, %v13790_v40 }
 0x7d5   : > { %v13583_v32 = vsel %vm13536_vm2, %v13520_v15, 0 }
 0x7d6   : > { %v24342_v30 = vand.u32 4294901760, %v13583_v32  ;;  %v13792_v14 = vand.u32 4294901760, %v13791_v57  ;;  %v13800_v17 = vand.u32 4294901760, %v24336_v7 }
 0x7d8   : > { %v24346_v31 = vsub.f32 %v13583_v32, %v24342_v30  ;;  %15031 = vmatmul.mubr.f32.gmra.mrb[140].mxu0 %v13792_v14  ;;  %v13801_v36 = vsub.f32 %v24336_v7, %v13800_v17 }
 0x7da   : > { %v13802_v29 = vand.u32 4294901760, %v13801_v36  ;;  %v13810_v44 = vand.u32 4294901760, %v24346_v31 }
 0x7dc   : > { %15033 = vmatprep.mubr.f32.mxu0 %v13802_v29  ;;  %v13811_v63 = vsub.f32 %v24346_v31, %v13810_v44 }
 0x7de   : > { %v13812_v15 = vand.u32 4294901760, %v13811_v63 }
 0x7e0   : > { %15034 = vmatmul.mubr.f32.gmra.mrb[142].mxu0 %v13812_v15 }
 0x7e1   : > { %15052 = vmatprep.mubr.f32.mxu0 %v24160_v20 }
 0x7e4   : > { %15053 = vmatmul.mubr.f32.vlgmr.msra.gmra.mrb[128].mxu0 %v24168_v13 }
 0x7e5   : > { %15655 = vmatpush3.bf16.msra.mxu0 %v24136_v39  ;;  %15055 = vmatprep.mubr.f32.mxu0 %v24181_v21  ;;  %v15684_v39 = vpack.c.bf16 %v13828_v54, %v13821_v3  ;;  %v26597_v3 = vand.u32 4294901760, %v24188_v52  ;;  %v26598_v54 = vand.u32 4294901760, %v24070_v43  ;;  %v26605_v43 = vand.u32 4294901760, %v24239_v18 }
 0x7e6   : > { %15657 = vmatprep.subr.bf16.mxu0 %v24140_v33 }
 0x7e8   : > { %15056 = vmatmul.mubr.f32.gmra.mrb[130].mxu0 %v24192_v24 }
 0x7e9   : > { %15058 = vmatprep.mubr.f32.mxu0 %v24205_v41  ;;  %15659 = vmatpush3.bf16.msra.mxu0 %v24140_v33  ;;  %v26599_v33 = vand.u32 4294901760, %v24081_v1  ;;  %v26606_v1 = vand.u32 4294901760, %v24253_v53 }
 0x7ea   : > { %15661 = vmatprep.subr.bf16.mxu0 %v24144_v27 }
 0x7ec   : > { %15059 = vmatmul.mubr.f32.gmra.mrb[132].mxu0 %v24219_v60 }
 0x7ed   : > { %15061 = vmatprep.mubr.f32.mxu0 %v24233_v28  ;;  %15663 = vmatpush3.bf16.msra.mxu0 %v24144_v27  ;;  %v15692_v27 = vpack.c.bf16 %v26599_v33, %v26598_v54 }
 0x7ee   : > { %15665 = vmatprep.subr.bf16.mxu0 %v24148_v16 }
 0x7f0   : > { %15062 = vmatmul.mubr.f32.gmra.mrb[134].mxu0 %v24247_v0 }
 0x7f1   : > { %15064 = vmatprep.mubr.f32.mxu0 %v24260_v34  ;;  %15667 = vmatpush3.bf16.msra.mxu0 %v24148_v16  ;;  %v26600_v16 = vand.u32 4294901760, %v24197_v5 }
 0x7f2   : > { %15669 = vmatprep.subr.bf16.mxu0 %v23779_v35 }
 0x7f4   : > { %15065 = vmatmul.mubr.f32.gmra.mrb[136].mxu0 %v24272_v56 }
 0x7f5   : > { %15067 = vmatprep.mubr.f32.mxu0 %v24284_v51 }
 0x7f8   : > { %15068 = vmatmul.mubr.f32.gmra.mrb[138].mxu0 %v24296_v9 }
 0x7f9   : > { %15070 = vmatprep.mubr.f32.mxu0 %v24308_v58 }
 0x7fc   : > { %15071 = vmatmul.mubr.f32.gmra.mrb[140].mxu0 %v24320_v37 }
 0x7fd   : > { %15073 = vmatprep.mubr.f32.mxu0 %v24332_v10 }
 0x800   : > { %15074 = vmatmul.mubr.f32.gmra.mrb[142].mxu0 %v24342_v30 }
 0x801   : > { %15092 = vmatprep.mubr.f32.mxu0 %v24164_v62  ;;  %v26604_v62 = vand.u32 4294901760, %v24225_v6 }
 0x804   : > { %15093 = vmatmul.mubr.f32.vlgmr.msra.gmra.mrb[128].mxu0 %v24173_v55  ;;  %v26610_v55 = vand.u32 4294901760, %v24301_v23 }
 0x805   : > { %15671 = vmatpush3.bf16.msra.mxu0 %v23779_v35  ;;  %15095 = vmatprep.mubr.f32.mxu0 %v24188_v52 }
 0x806   : > { %15673 = vmatprep.subr.bf16.mxu0 %v23806_v42 }
 0x808   : > { %15096 = vmatmul.mubr.f32.gmra.mrb[130].mxu0 %v24197_v5 }
 0x809   : > { %15098 = vmatprep.mubr.f32.mxu0 %v24211_v45  ;;  %15675 = vmatpush3.bf16.msra.mxu0 %v23806_v42 }
 0x80a   : > { %15677 = vmatprep.subr.bf16.mxu0 %v23837_v38 }
 0x80c   : > { %15099 = vmatmul.mubr.f32.gmra.mrb[132].mxu0 %v24225_v6 }
 0x80d   : > { %15101 = vmatprep.mubr.f32.mxu0 %v24239_v18  ;;  %15679 = vmatpush3.bf16.msra.mxu0 %v23837_v38 }
 0x80e   : > { %15681 = vmatprep.subr.bf16.mxu0 %v23870_v26 }
 0x810   : > { %15102 = vmatmul.mubr.f32.gmra.mrb[134].mxu0 %v24253_v53 }
 0x811   : > { %15104 = vmatprep.mubr.f32.mxu0 %v24265_v25  ;;  %15683 = vmatpush3.bf16.msra.mxu0 %v23870_v26 }
 0x812   : > { %15685 = vmatprep.subr.bf16.mxu0 %v15684_v39 }
 0x814   : > { %15105 = vmatmul.mubr.f32.gmra.mrb[136].mxu0 %v24277_v8 }
 0x815   : > { %15107 = vmatprep.mubr.f32.mxu0 %v24289_v11 }
 0x818   : > { %15108 = vmatmul.mubr.f32.gmra.mrb[138].mxu0 %v24301_v23 }
 0x819   : > { %15110 = vmatprep.mubr.f32.mxu0 %v24313_v46 }
 0x81c   : > { %15111 = vmatmul.mubr.f32.gmra.mrb[140].mxu0 %v24325_v61 }
 0x81d   : > { %15113 = vmatprep.mubr.f32.mxu0 %v24336_v7 }
 0x820   : > { %15114 = vmatmul.mubr.f32.gmra.mrb[142].mxu0 %v24346_v31 }
 0x821   : > { %15132 = vmatprep.mubr.f32.mxu0 %v13660_v49  ;;  %v26607_v49 = vand.u32 4294901760, %v24265_v25 }
 0x824   : > { %15133 = vmatmul.mubr.f32.vlgmr.msra.gmra.mrb[128].mxu0 %v26596_v2 }
 0x825   : > { %15687 = vmatpush3.bf16.msra.mxu0 %v15684_v39  ;;  %15135 = vmatprep.mubr.f32.mxu0 %v26597_v3 }
 0x826   : > { %15689 = vmatprep.subr.bf16.mxu0 %v15688_v22 }
 0x828   : > { %15136 = vmatmul.mubr.f32.gmra.mrb[130].mxu0 %v26600_v16 }
 0x829   : > { %15138 = vmatprep.mubr.f32.mxu0 %v26601_v50  ;;  %15691 = vmatpush3.bf16.msra.mxu0 %v15688_v22 }
 0x82a   : > { %15693 = vmatprep.subr.bf16.mxu0 %v15692_v27 }
 0x82c   : > { %15139 = vmatmul.mubr.f32.gmra.mrb[132].mxu0 %v26604_v62 }
 0x82d   : > { %15141 = vmatprep.mubr.f32.mxu0 %v26605_v43  ;;  %15695 = vmatpush3.bf16.msra.mxu0 %v15692_v27 }
 0x82e   : > { %15697 = vmatprep.subr.bf16.mxu0 %v15696_v19 }
 0x830   : > { %15142 = vmatmul.mubr.f32.gmra.mrb[134].mxu0 %v26606_v1 }
 0x831   : > { %15144 = vmatprep.mubr.f32.mxu0 %v26607_v49  ;;  %15699 = vmatpush3.bf16.msra.mxu0 %v15696_v19 }
 0x832   : > { %15701 = vmatprep.subr.bf16.mxu0 %v23779_v35 }
 0x834   : > { %15145 = vmatmul.mubr.f32.gmra.mrb[136].mxu0 %v26608_v59 }
 0x835   : > { %15147 = vmatprep.mubr.f32.mxu0 %v26609_v12 }
 0x838   : > { %15148 = vmatmul.mubr.f32.gmra.mrb[138].mxu0 %v26610_v55 }
 0x839   : > { %15150 = vmatprep.mubr.f32.mxu0 %v13780_v48 }
 0x83c   : > { %15151 = vmatmul.mubr.f32.gmra.mrb[140].mxu0 %v13790_v40 }
 0x83d   : > { %15153 = vmatprep.mubr.f32.mxu0 %v13800_v17 }
 0x840   : > { %15154 = vmatmul.mubr.f32.gmra.mrb[142].mxu0 %v13810_v44 }
 0x841   : > { %15172 = vmatprep.mubr.f32.mxu0 %v24160_v20 }
 0x844   : > { %15173 = vmatmul.mubr.f32.vlgmr.msra.gmra.mrb[128].mxu0 %v24168_v13 }
 0x845   : > { %15703 = vmatpush3.bf16.msra.mxu0 %v23779_v35  ;;  %15175 = vmatprep.mubr.f32.mxu0 %v24181_v21  ;;  %v14849_v35 = vld [vmem:[%s24523_s4] ss:$0 sm:$0xff] }
 0x846   : > { %15705 = vmatprep.subr.bf16.mxu0 %v23806_v42 }
 0x848   : > { %15176 = vmatmul.mubr.f32.gmra.mrb[130].mxu0 %v24192_v24 }
 0x849   : > { %15178 = vmatprep.mubr.f32.mxu0 %v24205_v41  ;;  %15707 = vmatpush3.bf16.msra.mxu0 %v23806_v42 }
 0x84a   : > { %15709 = vmatprep.subr.bf16.mxu0 %v23837_v38 }
 0x84c   : > { %15179 = vmatmul.mubr.f32.gmra.mrb[132].mxu0 %v24219_v60 }
 0x84d   : > { %15181 = vmatprep.mubr.f32.mxu0 %v24233_v28  ;;  %15711 = vmatpush3.bf16.msra.mxu0 %v23837_v38 }
 0x84e   : > { %15713 = vmatprep.subr.bf16.mxu0 %v23870_v26 }
 0x850   : > { %15182 = vmatmul.mubr.f32.gmra.mrb[134].mxu0 %v24247_v0 }
 0x851   : > { %15184 = vmatprep.mubr.f32.mxu0 %v24260_v34  ;;  %15715 = vmatpush3.bf16.msra.mxu0 %v23870_v26 }
 0x854   : > { %15185 = vmatmul.mubr.f32.gmra.mrb[136].mxu0 %v24272_v56 }
 0x855   : > { %15187 = vmatprep.mubr.f32.mxu0 %v24284_v51 }
 0x858   : > { %15188 = vmatmul.mubr.f32.gmra.mrb[138].mxu0 %v24296_v9 }
 0x859   : > { %15190 = vmatprep.mubr.f32.mxu0 %v24308_v58 }
 0x85c   : > { %15191 = vmatmul.mubr.f32.gmra.mrb[140].mxu0 %v24320_v37 }
 0x85d   : > { %15193 = vmatprep.mubr.f32.mxu0 %v24332_v10 }
 0x860   : > { %15194 = vmatmul.mubr.f32.gmra.mrb[142].mxu0 %v24342_v30 }
 0x861   : > { %15212 = vmatprep.mubr.f32.mxu0 %v24160_v20 }
 0x864   : > { %15213 = vmatmul.mubr.f32.vlgmr.msra.gmra.mrb[128].mxu0 %v24168_v13 }
 0x865   : > { %15215 = vmatprep.mubr.f32.mxu0 %v24181_v21 }
 0x868   : > { %15216 = vmatmul.mubr.f32.gmra.mrb[130].mxu0 %v24192_v24 }
 0x869   : > { %15218 = vmatprep.mubr.f32.mxu0 %v24205_v41 }
 0x86c   : > { %15219 = vmatmul.mubr.f32.gmra.mrb[132].mxu0 %v24219_v60 }
 0x86d   : > { %15221 = vmatprep.mubr.f32.mxu0 %v24233_v28 }
 0x870   : > { %15222 = vmatmul.mubr.f32.gmra.mrb[134].mxu0 %v24247_v0 }
 0x871   : > { %15224 = vmatprep.mubr.f32.mxu0 %v24260_v34 }
 0x874   : > { %15225 = vmatmul.mubr.f32.gmra.mrb[136].mxu0 %v24272_v56 }
 0x875   : > { %15227 = vmatprep.mubr.f32.mxu0 %v24284_v51 }
 0x878   : > { %15228 = vmatmul.mubr.f32.gmra.mrb[138].mxu0 %v24296_v9 }
 0x879   : > { %15230 = vmatprep.mubr.f32.mxu0 %v24308_v58 }
 0x87c   : > { %15231 = vmatmul.mubr.f32.gmra.mrb[140].mxu0 %v24320_v37 }
 0x87d   : > { %15233 = vmatprep.mubr.f32.mxu0 %v24332_v10 }
 0x880   : > { %15234 = vmatmul.mubr.f32.gmra.mrb[142].mxu0 %v24342_v30 }
 0x937   : > { %v15214_v42 = vpop.f32.mrb[128].mxu0 }
 0x938   : > { %v15752_v38 = vadd.f32 %v15214_v42, %v14849_v35  ;;  %v14673_v26 = vpop.f32.mrb[129].mxu0 }
 0x939   : > { %v15753_v20 = vadd.f32 %v14849_v35, %v14673_v26 }
 0x93a   : > { %14768 = vst [vmem:[%s24498_s24 + $0x8] sm:$0xff] %v15752_v38 }
 0x93b   : > { %14767 = vst [vmem:[%s24498_s24] sm:$0xff] %v15753_v20  ;;  %v15217_v13 = vpop.f32.mrb[130].mxu0 }
 0x93c   : > { %v15754_v21 = vadd.f32 %v15217_v13, %v14849_v35  ;;  %v14685_v52 = vpop.f32.mrb[131].mxu0 }
 0x93d   : > { %v15755_v24 = vadd.f32 %v14849_v35, %v14685_v52 }
 0x93e   : > { %14770 = vst [vmem:[%s24498_s24 + $0x18] sm:$0xff] %v15754_v21 }
 0x93f   : > { %14769 = vst [vmem:[%s24498_s24 + $0x10] sm:$0xff] %v15755_v24  ;;  %v15220_v5 = vpop.f32.mrb[132].mxu0 }
 0x940   : > { %v15756_v41 = vadd.f32 %v15220_v5, %v14849_v35  ;;  %v14697_v45 = vpop.f32.mrb[133].mxu0 }
 0x941   : > { %v15757_v60 = vadd.f32 %v14849_v35, %v14697_v45 }
 0x942   : > { %14772 = vst [vmem:[%s24498_s24 + $0x28] sm:$0xff] %v15756_v41 }
 0x943   : > { %14771 = vst [vmem:[%s24498_s24 + $0x20] sm:$0xff] %v15757_v60  ;;  %v15223_v6 = vpop.f32.mrb[134].mxu0 }
 0x944   : > { %v15758_v28 = vadd.f32 %v15223_v6, %v14849_v35  ;;  %v14709_v18 = vpop.f32.mrb[135].mxu0 }
 0x945   : > { %v15759_v0 = vadd.f32 %v14849_v35, %v14709_v18 }
 0x946   : > { %14774 = vst [vmem:[%s24498_s24 + $0x38] sm:$0xff] %v15758_v28 }
 0x947   : > { %14773 = vst [vmem:[%s24498_s24 + $0x30] sm:$0xff] %v15759_v0  ;;  %v15226_v53 = vpop.f32.mrb[136].mxu0 }
 0x948   : > { %v15760_v34 = vadd.f32 %v15226_v53, %v14849_v35  ;;  %v14721_v25 = vpop.f32.mrb[137].mxu0 }
 0x949   : > { %v15761_v56 = vadd.f32 %v14849_v35, %v14721_v25 }
 0x94a   : > { %14776 = vst [vmem:[%s24498_s24 + $0x48] sm:$0xff] %v15760_v34 }
 0x94b   : > { %14775 = vst [vmem:[%s24498_s24 + $0x40] sm:$0xff] %v15761_v56  ;;  %v15229_v8 = vpop.f32.mrb[138].mxu0 }
 0x94c   : > { %v15762_v51 = vadd.f32 %v15229_v8, %v14849_v35  ;;  %v14733_v11 = vpop.f32.mrb[139].mxu0 }
 0x94d   : > { %v15763_v9 = vadd.f32 %v14849_v35, %v14733_v11 }
 0x94e   : > { %14778 = vst [vmem:[%s24498_s24 + $0x58] sm:$0xff] %v15762_v51 }
 0x94f   : > { %14777 = vst [vmem:[%s24498_s24 + $0x50] sm:$0xff] %v15763_v9  ;;  %v15232_v23 = vpop.f32.mrb[140].mxu0 }
 0x950   : > { %v15764_v58 = vadd.f32 %v15232_v23, %v14849_v35  ;;  %v14745_v40 = vpop.f32.mrb[141].mxu0 }
 0x951   : > { %v15765_v46 = vadd.f32 %v14849_v35, %v14745_v40 }
 0x952   : > { %14780 = vst [vmem:[%s24498_s24 + $0x68] sm:$0xff] %v15764_v58 }
 0x953   : > { %14779 = vst [vmem:[%s24498_s24 + $0x60] sm:$0xff] %v15765_v46  ;;  %v15235_v37 = vpop.f32.mrb[142].mxu0 }
 0x954   : > { %v15766_v48 = vadd.f32 %v15235_v37, %v14849_v35  ;;  %v14757_v61 = vpop.f32.mrb[143].mxu0 }
 0x955   : > { %v15767_v10 = vadd.f32 %v14849_v35, %v14757_v61 }
 0x956   : > { %14782 = vst [vmem:[%s24498_s24 + $0x78] sm:$0xff] %v15766_v48 }
 0x957   : > { %14781 = vst [vmem:[%s24498_s24 + $0x70] sm:$0xff] %v15767_v10 }
 0x958 PF: > { %s15_s18 = sadd.s32 1, %s17374_s18  }
 0x959   : > { %p12_p4 = scmp.ge.s32.totalorder %s15_s18, 4  }
 0x95b   :  { %14 = sbr.rel (!%p12_p4) target bundleno = 1 (0x1), region = 70 }

</bundles_post_ra>
